<compile_context>
chip_gen: v6e
topology: v6e:2x2x1
jax: 0.10.0
libtpu: 0.0.40
codegen_flags: <defaults>
</compile_context>

<pallas_src>
import functools

import jax
import jax.numpy as jnp
from jax.experimental import pallas as pl
from jax.experimental.pallas import tpu as pltpu


LOCATION_CLASSES = 16          # == number of patches M in this module
PATCH_EMB = 64
GLOBAL_EMB = 64
TOTAL_EMB = LOCATION_CLASSES * PATCH_EMB + GLOBAL_EMB   # 1088
CONV_OUT = 64                  # conv1 output channels
K_PAD = 256                    # im2col feature (lane) dim padded to 2x128
RECT_PAD = 128                 # rectangle head padded 5 -> 128 lanes


# ----------------------------------------------------------------------------
# Pallas kernels
# ----------------------------------------------------------------------------
def _backbones_kernel(p_cols_ref, wconv_p_ref, wfc_p_ref, bfc_p_ref,
                      g_cols_ref, wconv_g_ref, wfc_g_ref, bfc_g_ref,
                      emb_p_ref, emb_g_ref, *, howo_p, howo_g):
    """Both backbones fused: conv1-as-matmul -> ReLU -> sum-pool -> fc.

    im2col rows arrive flattened (rows = N*Ho*Wo) and K-padded to 256, so each
    branch is a single lane-aligned (rows, 256) @ (256, 64) bf16 matmul with
    f32 accumulation.  The 1/(Ho*Wo) of the average pool is pre-folded into
    wfc, so the pool is a plain sum.  The pooling reshape keeps the lane dim
    fixed (64) and splits rows on a multiple-of-8 boundary (no relayout).
    """
    def branch(cols, wconv, wfc, bfc, howo, emb_ref):
        conv = jnp.dot(cols, wconv, preferred_element_type=jnp.float32)
        conv = jnp.maximum(conv, 0.0)                               # ReLU
        n = conv.shape[0] // howo
        pooled = conv.reshape(n, howo, conv.shape[1]).sum(axis=1)   # (n, 64)
        emb_ref[...] = (jnp.dot(pooled, wfc,
                                preferred_element_type=jnp.float32) + bfc)

    branch(p_cols_ref[...], wconv_p_ref[...], wfc_p_ref[...], bfc_p_ref[...],
           howo_p, emb_p_ref)
    branch(g_cols_ref[...], wconv_g_ref[...], wfc_g_ref[...], bfc_g_ref[...],
           howo_g, emb_g_ref)


def _heads_kernel(emb_ref, wloc_bd_ref, bloc_ref,
                  w1_ref, b1_ref, w2_ref, b2_ref, w3_ref, b3_ref,
                  loc_ref, rect_ref, *, patch_width):
    """Location head (block-diag weight -> lane-dense (B, M*16) slab) fused
    with the rectangle MLP (Linear-ReLU-Linear-ReLU-Linear, 128-lane padded)."""
    emb = emb_ref[...]                                      # (B, 1088)
    emb_p = emb[:, :patch_width]                            # (B, 1024)
    loc_ref[...] = (jnp.dot(emb_p, wloc_bd_ref[...],
                            preferred_element_type=jnp.float32) + bloc_ref[...])
    h = jnp.dot(emb, w1_ref[...], preferred_element_type=jnp.float32) + b1_ref[...]
    h = jnp.maximum(h, 0.0)
    h = jnp.dot(h, w2_ref[...], preferred_element_type=jnp.float32) + b2_ref[...]
    h = jnp.maximum(h, 0.0)
    rect_ref[...] = (jnp.dot(h, w3_ref[...],
                             preferred_element_type=jnp.float32) + b3_ref[...])


def _vmem_call(kernel, out_shapes, *args):
    """Grid-less pallas_call with every operand resident in VMEM (all tiny)."""
    return pl.pallas_call(
        kernel,
        out_shape=tuple(out_shapes),
        in_specs=[pl.BlockSpec(memory_space=pltpu.MemorySpace.VMEM)] * len(args),
        out_specs=tuple(pl.BlockSpec(memory_space=pltpu.MemorySpace.VMEM)
                        for _ in out_shapes),
        compiler_params=pltpu.CompilerParams(vmem_limit_bytes=32 * 1024 * 1024),
    )(*args)


# ----------------------------------------------------------------------------
# Plain-JAX glue (layout plumbing only)
# ----------------------------------------------------------------------------
def _out_hw(x):
    """Output spatial size of a 7x7 / stride-2 / pad-3 conv."""
    return (x + 2 * 3 - 7) // 2 + 1


def _im2col_rows(x):
    """NCHW -> lane-dense, K-padded im2col rows for a 7x7/s2/p3 conv.

    Returns ((N*Ho*Wo, K_PAD) bf16 rows, Ho*Wo).
    """
    n, c, h, w = x.shape
    ho, wo = _out_hw(h), _out_hw(w)
    xp = jnp.pad(x, ((0, 0), (0, 0), (3, 3), (3, 3)))
    taps = []
    for ky in range(7):
        for kx in range(7):
            taps.append(xp[:, :, ky:ky + 2 * ho:2, kx:kx + 2 * wo:2])
    cols = jnp.stack(taps, axis=2)                 # (N, C, 49, Ho, Wo)
    cols = cols.transpose(0, 3, 4, 1, 2)           # (N, Ho, Wo, C, 49)
    cols = cols.reshape(n, ho * wo, c * 49)
    cols = jnp.pad(cols, ((0, 0), (0, 0), (0, K_PAD - c * 49)))
    return cols.reshape(n * ho * wo, K_PAD).astype(jnp.bfloat16), ho * wo


def _add_coordinates(x):
    """(B, 3, H, W) -> (B, 5, H, W): append (y, x) in [0, 1]."""
    b, _, h, w = x.shape
    y = jnp.broadcast_to(jnp.linspace(0.0, 1.0, h).reshape(1, 1, h, 1),
                         (b, 1, h, w))
    xx = jnp.broadcast_to(jnp.linspace(0.0, 1.0, w).reshape(1, 1, 1, w),
                          (b, 1, h, w))
    return jnp.concatenate([x, y, xx], axis=1).astype(x.dtype)


# ----------------------------------------------------------------------------
# Parameters: natural init + one-time inference preparation
# ----------------------------------------------------------------------------
def init_params(key):
    ks = jax.random.split(key, 11)
    s = 0.05
    f32 = jnp.float32
    return {
        # patch backbone: conv1 (3->64, 7x7) as (3*49, 64) im2col matrix + fc
        "wconv_p": jax.random.normal(ks[0], (3 * 49, CONV_OUT), f32) * s,
        "wfc_p":   jax.random.normal(ks[1], (CONV_OUT, PATCH_EMB), f32) * s,
        "bfc_p":   jax.random.normal(ks[2], (1, PATCH_EMB), f32) * s,
        # global backbone: conv1 (5->64, 7x7) as (5*49, 64) + fc
        "wconv_g": jax.random.normal(ks[3], (5 * 49, CONV_OUT), f32) * s,
        "wfc_g":   jax.random.normal(ks[4], (CONV_OUT, GLOBAL_EMB), f32) * s,
        "bfc_g":   jax.random.normal(ks[5], (1, GLOBAL_EMB), f32) * s,
        # location net: Linear(64 -> 16)
        "wloc": jax.random.normal(ks[6], (PATCH_EMB, LOCATION_CLASSES), f32) * s,
        "bloc": jax.random.normal(ks[7], (1, LOCATION_CLASSES), f32) * s,
        # rectangle net: 1088 -> 512 -> 256 -> 5
        "w1": jax.random.normal(ks[8], (TOTAL_EMB, 512), f32) * s,
        "b1": jnp.zeros((1, 512), f32),
        "w2": jax.random.normal(ks[9], (512, 256), f32) * s,
        "b2": jnp.zeros((1, 256), f32),
        "w3": jax.random.normal(ks[10], (256, 5), f32) * s,
        "b3": jnp.zeros((1, 5), f32),
    }


def prepare_params(params, howo_p, howo_g):
    """One-time weight re-layout: K pad + bf16 conv weights, folded pool scale,
    block-diagonal location head, 128-lane-padded rectangle output layer."""
    m = LOCATION_CLASSES

    def pad_k_bf16(w):
        return jnp.pad(w, ((0, K_PAD - w.shape[0]), (0, 0))).astype(jnp.bfloat16)

    return {
        "wconv_p": pad_k_bf16(params["wconv_p"]),
        "wfc_p":   params["wfc_p"] / float(howo_p),     # fold 1/(Ho*Wo)
        "bfc_p":   params["bfc_p"],
        "wconv_g": pad_k_bf16(params["wconv_g"]),
        "wfc_g":   params["wfc_g"] / float(howo_g),
        "bfc_g":   params["bfc_g"],
        # shared location Linear as block-diag -> one lane-dense (B,1024)@(1024,256)
        "wloc_bd": jnp.kron(jnp.eye(m, dtype=jnp.float32), params["wloc"]),
        "bloc_t":  jnp.tile(params["bloc"], (1, m)),
        "w1": params["w1"], "b1": params["b1"],
        "w2": params["w2"], "b2": params["b2"],
        "w3": jnp.pad(params["w3"], ((0, 0), (0, RECT_PAD - params["w3"].shape[1]))),
        "b3": jnp.pad(params["b3"], ((0, 0), (0, RECT_PAD - params["b3"].shape[1]))),
    }


# ----------------------------------------------------------------------------
# Forward (eval semantics of JointLocationCropRectangleNet.forward)
# ----------------------------------------------------------------------------
def forward(prep, patches_tensor, global_image):
    """Returns (locations_list, rectangle_score):
      locations_list: list of M arrays, each (B, location_classes)
      rectangle_score: (B, 5)
    """
    b, m = patches_tensor.shape[:2]
    f32 = jnp.float32

    # ---- im2col (layout plumbing; lane dim padded to 256, bf16) ----
    p_flat = patches_tensor.reshape((b * m,) + patches_tensor.shape[2:])
    p_cols, howo_p = _im2col_rows(p_flat)                   # (B*M*HoWo, 256)
    g = _add_coordinates(global_image)                      # (B, 5, H, W)
    g_cols, howo_g = _im2col_rows(g)                        # (B*HoWo, 256)

    # ---- call 1: both backbones fused ----
    emb_p, emb_g = _vmem_call(
        functools.partial(_backbones_kernel, howo_p=howo_p, howo_g=howo_g),
        (jax.ShapeDtypeStruct((b * m, PATCH_EMB), f32),
         jax.ShapeDtypeStruct((b, GLOBAL_EMB), f32)),
        p_cols, prep["wconv_p"], prep["wfc_p"], prep["bfc_p"],
        g_cols, prep["wconv_g"], prep["wfc_g"], prep["bfc_g"])

    # ---- concat embeddings (patch_0 .. patch_{M-1}, global) ----
    embedding_tensor = jnp.concatenate(
        [emb_p.reshape(b, m * PATCH_EMB), emb_g], axis=1)   # (B, 1088)

    # ---- call 2: location head + rectangle MLP fused ----
    loc_slab, rect_pad = _vmem_call(
        functools.partial(_heads_kernel, patch_width=m * PATCH_EMB),
        (jax.ShapeDtypeStruct((b, m * LOCATION_CLASSES), f32),   # (B, 256)
         jax.ShapeDtypeStruct((b, RECT_PAD), f32)),              # (B, 128)
        embedding_tensor,
        prep["wloc_bd"], prep["bloc_t"],
        prep["w1"], prep["b1"], prep["w2"], prep["b2"], prep["w3"], prep["b3"])

    locations = loc_slab.reshape(b, m, LOCATION_CLASSES)    # (B, M, 16)
    locations_list = [locations[:, i] for i in range(m)]    # torch-style list
    rectangle_score = rect_pad[:, :5]                       # drop lane padding
    return locations_list, rectangle_score


# ----------------------------------------------------------------------------
if __name__ == "__main__":
    B, M, P, H, W = 2, LOCATION_CLASSES, 16, 16, 16

    key = jax.random.PRNGKey(0)
    k_patch, k_glob = jax.random.split(key)
    patches = jax.random.normal(k_patch, (B, M, 3, P, P), jnp.float32)
    global_image = jax.random.normal(k_glob, (B, 3, H, W), jnp.float32)

    params = init_params(jax.random.PRNGKey(42))
    howo_p = _out_hw(P) * _out_hw(P)
    howo_g = _out_hw(H) * _out_hw(W)
    prepared = prepare_params(params, howo_p, howo_g)

    fwd = jax.jit(functools.partial(forward, prepared))
    locations_list, rectangle_score = fwd(patches, global_image)

    jax.block_until_ready(rectangle_score)
    jax.block_until_ready(locations_list)

    assert len(locations_list) == M
    assert locations_list[0].shape == (B, LOCATION_CLASSES)
    assert rectangle_score.shape == (B, 5)
    assert bool(jnp.all(jnp.isfinite(rectangle_score)))
    assert bool(jnp.all(jnp.isfinite(jnp.stack(locations_list))))

    print("KERNEL_OK")
</pallas_src>

<mosaic_0001>
module attributes {stable_mosaic.version = 11 : i64} {
  func.func @_backbones_kernel(%arg0: memref<2048x256xbf16, #tpu.memory_space<vmem>>, %arg1: memref<256x64xbf16, #tpu.memory_space<vmem>>, %arg2: memref<64x64xf32, #tpu.memory_space<vmem>>, %arg3: memref<1x64xf32, #tpu.memory_space<vmem>>, %arg4: memref<128x256xbf16, #tpu.memory_space<vmem>>, %arg5: memref<256x64xbf16, #tpu.memory_space<vmem>>, %arg6: memref<64x64xf32, #tpu.memory_space<vmem>>, %arg7: memref<1x64xf32, #tpu.memory_space<vmem>>, %arg8: memref<32x64xf32, #tpu.memory_space<vmem>>, %arg9: memref<2x64xf32, #tpu.memory_space<vmem>>) attributes {dimension_semantics = [], scalar_prefetch = 0 : i64, scratch_operands = 0 : i64, tpu.core_type = #tpu.core_type<tc>} {
    %c0 = arith.constant 0 : index
    %c0_0 = arith.constant 0 : index
    %0 = vector.load %arg0[%c0, %c0_0] : memref<2048x256xbf16, #tpu.memory_space<vmem>>, vector<2048x256xbf16>
    %c0_1 = arith.constant 0 : index
    %c0_2 = arith.constant 0 : index
    %1 = vector.load %arg1[%c0_1, %c0_2] : memref<256x64xbf16, #tpu.memory_space<vmem>>, vector<256x64xbf16>
    %c0_3 = arith.constant 0 : index
    %c0_4 = arith.constant 0 : index
    %2 = vector.load %arg2[%c0_3, %c0_4] : memref<64x64xf32, #tpu.memory_space<vmem>>, vector<64x64xf32>
    %c0_5 = arith.constant 0 : index
    %c0_6 = arith.constant 0 : index
    %3 = vector.load %arg3[%c0_5, %c0_6] : memref<1x64xf32, #tpu.memory_space<vmem>>, vector<1x64xf32>
    %cst = arith.constant dense<0.000000e+00> : vector<2048x64xf32>
    %4 = tpu.matmul %0, %1, %cst {dimension_numbers = #tpu.dot_dimension_numbers<[1], [0], [0], [1], [0, 0, 1, 1], [], []>} : vector<2048x256xbf16>, vector<256x64xbf16>, vector<2048x64xf32> -> vector<2048x64xf32>
    %cst_7 = arith.constant 0.000000e+00 : f32
    %5 = vector.broadcast %cst_7 : f32 to vector<2048x64xf32>
    %6 = arith.maximumf %4, %5 : vector<2048x64xf32>
    %7 = vector.shape_cast %6 : vector<2048x64xf32> to vector<32x64x64xf32>
    %cst_8 = arith.constant dense<0.000000e+00> : vector<32x64xf32>
    %8 = vector.multi_reduction <add>, %7, %cst_8 [1] : vector<32x64x64xf32> to vector<32x64xf32>
    %cst_9 = arith.constant dense<0.000000e+00> : vector<32x64xf32>
    %9 = tpu.matmul %8, %2, %cst_9 {dimension_numbers = #tpu.dot_dimension_numbers<[1], [0], [0], [1], [0, 0, 1, 1], [], []>} : vector<32x64xf32>, vector<64x64xf32>, vector<32x64xf32> -> vector<32x64xf32>
    %10 = vector.broadcast %3 : vector<1x64xf32> to vector<32x64xf32>
    %11 = arith.addf %9, %10 : vector<32x64xf32>
    %c0_10 = arith.constant 0 : index
    %c0_11 = arith.constant 0 : index
    %12 = vector.load %arg8[%c0_10, %c0_11] : memref<32x64xf32, #tpu.memory_space<vmem>>, vector<32x64xf32>
    tpu.vector_store %arg8[%c0_10, %c0_11], %11 {strides = array<i32>} : memref<32x64xf32, #tpu.memory_space<vmem>>, vector<32x64xf32>,
    %c0_12 = arith.constant 0 : index
    %c0_13 = arith.constant 0 : index
    %13 = vector.load %arg4[%c0_12, %c0_13] : memref<128x256xbf16, #tpu.memory_space<vmem>>, vector<128x256xbf16>
    %c0_14 = arith.constant 0 : index
    %c0_15 = arith.constant 0 : index
    %14 = vector.load %arg5[%c0_14, %c0_15] : memref<256x64xbf16, #tpu.memory_space<vmem>>, vector<256x64xbf16>
    %c0_16 = arith.constant 0 : index
    %c0_17 = arith.constant 0 : index
    %15 = vector.load %arg6[%c0_16, %c0_17] : memref<64x64xf32, #tpu.memory_space<vmem>>, vector<64x64xf32>
    %c0_18 = arith.constant 0 : index
    %c0_19 = arith.constant 0 : index
    %16 = vector.load %arg7[%c0_18, %c0_19] : memref<1x64xf32, #tpu.memory_space<vmem>>, vector<1x64xf32>
    %cst_20 = arith.constant dense<0.000000e+00> : vector<128x64xf32>
    %17 = tpu.matmul %13, %14, %cst_20 {dimension_numbers = #tpu.dot_dimension_numbers<[1], [0], [0], [1], [0, 0, 1, 1], [], []>} : vector<128x256xbf16>, vector<256x64xbf16>, vector<128x64xf32> -> vector<128x64xf32>
    %cst_21 = arith.constant 0.000000e+00 : f32
    %18 = vector.broadcast %cst_21 : f32 to vector<128x64xf32>
    %19 = arith.maximumf %17, %18 : vector<128x64xf32>
    %20 = vector.shape_cast %19 : vector<128x64xf32> to vector<2x64x64xf32>
    %cst_22 = arith.constant dense<0.000000e+00> : vector<2x64xf32>
    %21 = vector.multi_reduction <add>, %20, %cst_22 [1] : vector<2x64x64xf32> to vector<2x64xf32>
    %cst_23 = arith.constant dense<0.000000e+00> : vector<2x64xf32>
    %22 = tpu.matmul %21, %15, %cst_23 {dimension_numbers = #tpu.dot_dimension_numbers<[1], [0], [0], [1], [0, 0, 1, 1], [], []>} : vector<2x64xf32>, vector<64x64xf32>, vector<2x64xf32> -> vector<2x64xf32>
    %23 = vector.broadcast %16 : vector<1x64xf32> to vector<2x64xf32>
    %24 = arith.addf %22, %23 : vector<2x64xf32>
    %c0_24 = arith.constant 0 : index
    %c0_25 = arith.constant 0 : index
    %25 = vector.load %arg9[%c0_24, %c0_25] : memref<2x64xf32, #tpu.memory_space<vmem>>, vector<2x64xf32>
    tpu.vector_store %arg9[%c0_24, %c0_25], %24 {strides = array<i32>} : memref<2x64xf32, #tpu.memory_space<vmem>>, vector<2x64xf32>,
    return
  }
}

module attributes {stable_mosaic.version = 11 : i64} {
  func.func @_heads_kernel(%arg0: memref<2x1088xf32, #tpu.memory_space<vmem>>, %arg1: memref<1024x256xf32, #tpu.memory_space<vmem>>, %arg2: memref<1x256xf32, #tpu.memory_space<vmem>>, %arg3: memref<1088x512xf32, #tpu.memory_space<vmem>>, %arg4: memref<1x512xf32, #tpu.memory_space<vmem>>, %arg5: memref<512x256xf32, #tpu.memory_space<vmem>>, %arg6: memref<1x256xf32, #tpu.memory_space<vmem>>, %arg7: memref<256x128xf32, #tpu.memory_space<vmem>>, %arg8: memref<1x128xf32, #tpu.memory_space<vmem>>, %arg9: memref<2x256xf32, #tpu.memory_space<vmem>>, %arg10: memref<2x128xf32, #tpu.memory_space<vmem>>) attributes {dimension_semantics = [], scalar_prefetch = 0 : i64, scratch_operands = 0 : i64, tpu.core_type = #tpu.core_type<tc>} {
    %c0 = arith.constant 0 : index
    %c0_0 = arith.constant 0 : index
    %0 = vector.load %arg0[%c0, %c0_0] : memref<2x1088xf32, #tpu.memory_space<vmem>>, vector<2x1088xf32>
    %1 = vector.extract_strided_slice %0 {offsets = [0, 0], sizes = [2, 1024], strides = [1, 1]} : vector<2x1088xf32> to vector<2x1024xf32>
    %c0_1 = arith.constant 0 : index
    %c0_2 = arith.constant 0 : index
    %2 = vector.load %arg1[%c0_1, %c0_2] : memref<1024x256xf32, #tpu.memory_space<vmem>>, vector<1024x256xf32>
    %cst = arith.constant dense<0.000000e+00> : vector<2x256xf32>
    %3 = tpu.matmul %1, %2, %cst {dimension_numbers = #tpu.dot_dimension_numbers<[1], [0], [0], [1], [0, 0, 1, 1], [], []>} : vector<2x1024xf32>, vector<1024x256xf32>, vector<2x256xf32> -> vector<2x256xf32>
    %c0_3 = arith.constant 0 : index
    %c0_4 = arith.constant 0 : index
    %4 = vector.load %arg2[%c0_3, %c0_4] : memref<1x256xf32, #tpu.memory_space<vmem>>, vector<1x256xf32>
    %5 = vector.broadcast %4 : vector<1x256xf32> to vector<2x256xf32>
    %6 = arith.addf %3, %5 : vector<2x256xf32>
    %c0_5 = arith.constant 0 : index
    %c0_6 = arith.constant 0 : index
    %7 = vector.load %arg9[%c0_5, %c0_6] : memref<2x256xf32, #tpu.memory_space<vmem>>, vector<2x256xf32>
    tpu.vector_store %arg9[%c0_5, %c0_6], %6 {strides = array<i32>} : memref<2x256xf32, #tpu.memory_space<vmem>>, vector<2x256xf32>,
    %c0_7 = arith.constant 0 : index
    %c0_8 = arith.constant 0 : index
    %8 = vector.load %arg3[%c0_7, %c0_8] : memref<1088x512xf32, #tpu.memory_space<vmem>>, vector<1088x512xf32>
    %cst_9 = arith.constant dense<0.000000e+00> : vector<2x512xf32>
    %9 = tpu.matmul %0, %8, %cst_9 {dimension_numbers = #tpu.dot_dimension_numbers<[1], [0], [0], [1], [0, 0, 1, 1], [], []>} : vector<2x1088xf32>, vector<1088x512xf32>, vector<2x512xf32> -> vector<2x512xf32>
    %c0_10 = arith.constant 0 : index
    %c0_11 = arith.constant 0 : index
    %10 = vector.load %arg4[%c0_10, %c0_11] : memref<1x512xf32, #tpu.memory_space<vmem>>, vector<1x512xf32>
    %11 = vector.broadcast %10 : vector<1x512xf32> to vector<2x512xf32>
    %12 = arith.addf %9, %11 : vector<2x512xf32>
    %cst_12 = arith.constant 0.000000e+00 : f32
    %13 = vector.broadcast %cst_12 : f32 to vector<2x512xf32>
    %14 = arith.maximumf %12, %13 : vector<2x512xf32>
    %c0_13 = arith.constant 0 : index
    %c0_14 = arith.constant 0 : index
    %15 = vector.load %arg5[%c0_13, %c0_14] : memref<512x256xf32, #tpu.memory_space<vmem>>, vector<512x256xf32>
    %cst_15 = arith.constant dense<0.000000e+00> : vector<2x256xf32>
    %16 = tpu.matmul %14, %15, %cst_15 {dimension_numbers = #tpu.dot_dimension_numbers<[1], [0], [0], [1], [0, 0, 1, 1], [], []>} : vector<2x512xf32>, vector<512x256xf32>, vector<2x256xf32> -> vector<2x256xf32>
    %c0_16 = arith.constant 0 : index
    %c0_17 = arith.constant 0 : index
    %17 = vector.load %arg6[%c0_16, %c0_17] : memref<1x256xf32, #tpu.memory_space<vmem>>, vector<1x256xf32>
    %18 = vector.broadcast %17 : vector<1x256xf32> to vector<2x256xf32>
    %19 = arith.addf %16, %18 : vector<2x256xf32>
    %cst_18 = arith.constant 0.000000e+00 : f32
    %20 = vector.broadcast %cst_18 : f32 to vector<2x256xf32>
    %21 = arith.maximumf %19, %20 : vector<2x256xf32>
    %c0_19 = arith.constant 0 : index
    %c0_20 = arith.constant 0 : index
    %22 = vector.load %arg7[%c0_19, %c0_20] : memref<256x128xf32, #tpu.memory_space<vmem>>, vector<256x128xf32>
    %cst_21 = arith.constant dense<0.000000e+00> : vector<2x128xf32>
    %23 = tpu.matmul %21, %22, %cst_21 {dimension_numbers = #tpu.dot_dimension_numbers<[1], [0], [0], [1], [0, 0, 1, 1], [], []>} : vector<2x256xf32>, vector<256x128xf32>, vector<2x128xf32> -> vector<2x128xf32>
    %c0_22 = arith.constant 0 : index
    %c0_23 = arith.constant 0 : index
    %24 = vector.load %arg8[%c0_22, %c0_23] : memref<1x128xf32, #tpu.memory_space<vmem>>, vector<1x128xf32>
    %25 = vector.broadcast %24 : vector<1x128xf32> to vector<2x128xf32>
    %26 = arith.addf %23, %25 : vector<2x128xf32>
    %c0_24 = arith.constant 0 : index
    %c0_25 = arith.constant 0 : index
    %27 = vector.load %arg10[%c0_24, %c0_25] : memref<2x128xf32, #tpu.memory_space<vmem>>, vector<2x128xf32>
    tpu.vector_store %arg10[%c0_24, %c0_25], %26 {strides = array<i32>} : memref<2x128xf32, #tpu.memory_space<vmem>>, vector<2x128xf32>,
    return
  }
}

</mosaic_0001>

<bundles_post_ra>
// kernel: forward.3
= control target key start
LH: loop header
LB: loop body
LE: loop exit
PB: predicated region body
PF: predicated region fallthrough
CT: control target
= control target key end

     0   :  { %s5466_s0 = inlined_call_operand.vmem [shape: f32[2,1088], index: 0, kind: input, shape index: {}]   ;;  %s5467_s1 = inlined_call_operand.vmem [shape: f32[1024,256], index: 1, kind: input, shape index: {}]   ;;  %s5468_s2 = inlined_call_operand.vmem [shape: f32[1,256], index: 2, kind: input, shape index: {}]   ;;  %s5469_s3 = inlined_call_operand.vmem [shape: f32[1088,512], index: 3, kind: input, shape index: {}]   ;;  %s5470_s4 = inlined_call_operand.vmem [shape: f32[1,512], index: 4, kind: input, shape index: {}]   ;;  %s5471_s5 = inlined_call_operand.vmem [shape: f32[512,256], index: 5, kind: input, shape index: {}]   ;;  %s5472_s6 = inlined_call_operand.vmem [shape: f32[1,256], index: 6, kind: input, shape index: {}]   ;;  %s5473_s7 = inlined_call_operand.vmem [shape: f32[256,128], index: 7, kind: input, shape index: {}]   ;;  %s5474_s8 = inlined_call_operand.vmem [shape: f32[1,128], index: 8, kind: input, shape index: {}]   ;;  %s5475_s9 = inlined_call_operand.vmem [shape: f32[2,256], index: 9, kind: output, shape index: {0}]   ;;  %s5476_s10 = inlined_call_operand.hbm [shape: f32[2,128], index: 10, kind: output, shape index: {1}]  }
   0x1   :  { %v69_v0 = vld [vmem:[%s5467_s1 + $0xf8] sm:$0xff]  ;;  %v68_v2 = vld [vmem:[%s5467_s1 + $0xf0] sm:$0xff]  ;;  %v67_v4 = vld [vmem:[%s5467_s1 + $0xe8] sm:$0xff] }
   0x2   :  { %v133_v1 = vld [vmem:[%s5467_s1 + $0x2f8] sm:$0xff]  ;;  %350 = vmatprep.subr.mxu0 %v69_v0  ;;  %v132_v3 = vld [vmem:[%s5467_s1 + $0x2f0] sm:$0xff]  ;;  %v131_v5 = vld [vmem:[%s5467_s1 + $0x2e8] sm:$0xff] }
   0x3   :  { %421 = vmatprep.subr.mxu1 %v133_v1  ;;  %351 = vmatpush1.msra.mxu0 %v68_v2  ;;  %v66_v6 = vld [vmem:[%s5467_s1 + $0xe0] sm:$0xff]  ;;  %v65_v8 = vld [vmem:[%s5467_s1 + $0xd8] sm:$0xff]  ;;  %v64_v10 = vld [vmem:[%s5467_s1 + $0xd0] sm:$0xff] }
   0x4   :  { %422 = vmatpush1.msra.mxu1 %v132_v3  ;;  %v130_v7 = vld [vmem:[%s5467_s1 + $0x2e0] sm:$0xff]  ;;  %352 = vmatprep.subr.mxu0 %v67_v4  ;;  %v129_v9 = vld [vmem:[%s5467_s1 + $0x2d8] sm:$0xff]  ;;  %v128_v11 = vld [vmem:[%s5467_s1 + $0x2d0] sm:$0xff] }
   0x5   :  { %423 = vmatprep.subr.mxu1 %v131_v5  ;;  %353 = vmatpush1.msra.mxu0 %v66_v6  ;;  %v63_v12 = vld [vmem:[%s5467_s1 + $0xc8] sm:$0xff]  ;;  %v62_v14 = vld [vmem:[%s5467_s1 + $0xc0] sm:$0xff]  ;;  %v61_v16 = vld [vmem:[%s5467_s1 + $0xb8] sm:$0xff] }
   0x6   :  { %424 = vmatpush1.msra.mxu1 %v130_v7  ;;  %v127_v13 = vld [vmem:[%s5467_s1 + $0x2c8] sm:$0xff]  ;;  %354 = vmatprep.subr.mxu0 %v65_v8  ;;  %v126_v15 = vld [vmem:[%s5467_s1 + $0x2c0] sm:$0xff]  ;;  %v125_v17 = vld [vmem:[%s5467_s1 + $0x2b8] sm:$0xff] }
   0x7   :  { %425 = vmatprep.subr.mxu1 %v129_v9  ;;  %355 = vmatpush1.msra.mxu0 %v64_v10  ;;  %v60_v18 = vld [vmem:[%s5467_s1 + $0xb0] sm:$0xff]  ;;  %v59_v20 = vld [vmem:[%s5467_s1 + $0xa8] sm:$0xff]  ;;  %v58_v22 = vld [vmem:[%s5467_s1 + $0xa0] sm:$0xff] }
   0x8   :  { %426 = vmatpush1.msra.mxu1 %v128_v11  ;;  %356 = vmatprep.subr.mxu0 %v63_v12  ;;  %v124_v19 = vld [vmem:[%s5467_s1 + $0x2b0] sm:$0xff]  ;;  %v123_v21 = vld [vmem:[%s5467_s1 + $0x2a8] sm:$0xff]  ;;  %v122_v23 = vld [vmem:[%s5467_s1 + $0x2a0] sm:$0xff] }
   0x9   :  { %427 = vmatprep.subr.mxu1 %v127_v13  ;;  %357 = vmatpush1.msra.mxu0 %v62_v14  ;;  %v57_v24 = vld [vmem:[%s5467_s1 + $0x98] sm:$0xff]  ;;  %v56_v26 = vld [vmem:[%s5467_s1 + $0x90] sm:$0xff]  ;;  %v55_v28 = vld [vmem:[%s5467_s1 + $0x88] sm:$0xff] }
   0xa   :  { %428 = vmatpush1.msra.mxu1 %v126_v15  ;;  %358 = vmatprep.subr.mxu0 %v61_v16  ;;  %v121_v25 = vld [vmem:[%s5467_s1 + $0x298] sm:$0xff]  ;;  %v120_v27 = vld [vmem:[%s5467_s1 + $0x290] sm:$0xff]  ;;  %v119_v29 = vld [vmem:[%s5467_s1 + $0x288] sm:$0xff] }
   0xb   :  { %429 = vmatprep.subr.mxu1 %v125_v17  ;;  %359 = vmatpush1.msra.mxu0 %v60_v18  ;;  %v54_v30 = vld [vmem:[%s5467_s1 + $0x80] sm:$0xff]  ;;  %v53_v32 = vld [vmem:[%s5467_s1 + $0x78] sm:$0xff]  ;;  %v52_v34 = vld [vmem:[%s5467_s1 + $0x70] sm:$0xff] }
   0xc   :  { %430 = vmatpush1.msra.mxu1 %v124_v19  ;;  %360 = vmatprep.subr.mxu0 %v59_v20  ;;  %v118_v31 = vld [vmem:[%s5467_s1 + $0x280] sm:$0xff]  ;;  %v117_v33 = vld [vmem:[%s5467_s1 + $0x278] sm:$0xff]  ;;  %v116_v35 = vld [vmem:[%s5467_s1 + $0x270] sm:$0xff] }
   0xd   :  { %431 = vmatprep.subr.mxu1 %v123_v21  ;;  %361 = vmatpush1.msra.mxu0 %v58_v22  ;;  %v51_v36 = vld [vmem:[%s5467_s1 + $0x68] sm:$0xff]  ;;  %v50_v38 = vld [vmem:[%s5467_s1 + $0x60] sm:$0xff]  ;;  %v49_v40 = vld [vmem:[%s5467_s1 + $0x58] sm:$0xff] }
   0xe   :  { %432 = vmatpush1.msra.mxu1 %v122_v23  ;;  %362 = vmatprep.subr.mxu0 %v57_v24  ;;  %v115_v37 = vld [vmem:[%s5467_s1 + $0x268] sm:$0xff]  ;;  %v114_v39 = vld [vmem:[%s5467_s1 + $0x260] sm:$0xff]  ;;  %v113_v41 = vld [vmem:[%s5467_s1 + $0x258] sm:$0xff] }
   0xf   :  { %433 = vmatprep.subr.mxu1 %v121_v25  ;;  %363 = vmatpush1.msra.mxu0 %v56_v26  ;;  %v48_v42 = vld [vmem:[%s5467_s1 + $0x50] sm:$0xff]  ;;  %v47_v44 = vld [vmem:[%s5467_s1 + $0x48] sm:$0xff]  ;;  %v46_v46 = vld [vmem:[%s5467_s1 + $0x40] sm:$0xff] }
  0x10   :  { %434 = vmatpush1.msra.mxu1 %v120_v27  ;;  %364 = vmatprep.subr.mxu0 %v55_v28  ;;  %v112_v43 = vld [vmem:[%s5467_s1 + $0x250] sm:$0xff]  ;;  %v111_v45 = vld [vmem:[%s5467_s1 + $0x248] sm:$0xff]  ;;  %v110_v47 = vld [vmem:[%s5467_s1 + $0x240] sm:$0xff] }
  0x11   :  { %435 = vmatprep.subr.mxu1 %v119_v29  ;;  %365 = vmatpush1.msra.mxu0 %v54_v30  ;;  %v45_v48 = vld [vmem:[%s5467_s1 + $0x38] sm:$0xff]  ;;  %v44_v50 = vld [vmem:[%s5467_s1 + $0x30] sm:$0xff]  ;;  %v43_v52 = vld [vmem:[%s5467_s1 + $0x28] sm:$0xff]  ;;  %v296_v30 = vlaneseq }
  0x12   :  { %436 = vmatpush1.msra.mxu1 %v118_v31  ;;  %366 = vmatprep.subr.mxu0 %v53_v32  ;;  %v109_v49 = vld [vmem:[%s5467_s1 + $0x238] sm:$0xff]  ;;  %v108_v51 = vld [vmem:[%s5467_s1 + $0x230] sm:$0xff]  ;;  %v107_v53 = vld [vmem:[%s5467_s1 + $0x228] sm:$0xff]  ;;  %v2417_v31 = vmov 1983009808  }
  0x13   :  { %437 = vmatprep.subr.mxu1 %v117_v33  ;;  %367 = vmatpush1.msra.mxu0 %v52_v34  ;;  %v42_v54 = vld [vmem:[%s5467_s1 + $0x20] sm:$0xff]  ;;  %v41_v56 = vld [vmem:[%s5467_s1 + $0x18] sm:$0xff]  ;;  %v40_v58 = vld [vmem:[%s5467_s1 + $0x10] sm:$0xff]  ;;  %v310_v32 = vunpack.c.l.s4 %v2417_v31 }
  0x14   :  { %438 = vmatpush1.msra.mxu1 %v116_v35  ;;  %368 = vmatprep.subr.mxu0 %v51_v36  ;;  %v106_v55 = vld [vmem:[%s5467_s1 + $0x220] sm:$0xff]  ;;  %v105_v57 = vld [vmem:[%s5467_s1 + $0x218] sm:$0xff]  ;;  %v104_v59 = vld [vmem:[%s5467_s1 + $0x210] sm:$0xff] }
  0x15   :  { %439 = vmatprep.subr.mxu1 %v115_v37  ;;  %369 = vmatpush1.msra.mxu0 %v50_v38  ;;  %v39_v60 = vld [vmem:[%s5467_s1 + $0x8] sm:$0xff]  ;;  %v38_v62 = vld [vmem:[%s5467_s1] sm:$0xff]  ;;  %v101_v0 = vld [vmem:[%s5467_s1 + $0x1f8] sm:$0xff] }
  0x16   :  { %440 = vmatpush1.msra.mxu1 %v114_v39  ;;  %370 = vmatprep.subr.mxu0 %v49_v40  ;;  %v103_v61 = vld [vmem:[%s5467_s1 + $0x208] sm:$0xff]  ;;  %v102_v63 = vld [vmem:[%s5467_s1 + $0x200] sm:$0xff]  ;;  %v165_v1 = vld [vmem:[%s5467_s1 + $0x3f8] sm:$0xff] }
  0x17   :  { %441 = vmatprep.subr.mxu1 %v113_v41  ;;  %371 = vmatpush1.msra.mxu0 %v48_v42  ;;  %v100_v2 = vld [vmem:[%s5467_s1 + $0x1f0] sm:$0xff]  ;;  %v99_v4 = vld [vmem:[%s5467_s1 + $0x1e8] sm:$0xff]  ;;  %v98_v6 = vld [vmem:[%s5467_s1 + $0x1e0] sm:$0xff]  ;;  %v2781_v41 = vshrl.u32 %v296_v30, 7  ;;  %v311_v42 = vunpack.c.0.s8 %v310_v32 }
  0x18   :  { %442 = vmatpush1.msra.mxu1 %v112_v43  ;;  %372 = vmatprep.subr.mxu0 %v47_v44  ;;  %v164_v3 = vld [vmem:[%s5467_s1 + $0x3f0] sm:$0xff]  ;;  %v163_v5 = vld [vmem:[%s5467_s1 + $0x3e8] sm:$0xff]  ;;  %v162_v7 = vld [vmem:[%s5467_s1 + $0x3e0] sm:$0xff] }
  0x19   :  { %443 = vmatprep.subr.mxu1 %v111_v45  ;;  %373 = vmatpush1.msra.mxu0 %v46_v46  ;;  %v97_v8 = vld [vmem:[%s5467_s1 + $0x1d8] sm:$0xff]  ;;  %v96_v10 = vld [vmem:[%s5467_s1 + $0x1d0] sm:$0xff]  ;;  %v95_v12 = vld [vmem:[%s5467_s1 + $0x1c8] sm:$0xff] }
  0x1a   :  { %444 = vmatpush1.msra.mxu1 %v110_v47  ;;  %374 = vmatprep.subr.mxu0 %v45_v48  ;;  %v161_v9 = vld [vmem:[%s5467_s1 + $0x3d8] sm:$0xff]  ;;  %v160_v11 = vld [vmem:[%s5467_s1 + $0x3d0] sm:$0xff]  ;;  %v159_v13 = vld [vmem:[%s5467_s1 + $0x3c8] sm:$0xff] }
  0x1b   :  { %445 = vmatprep.subr.mxu1 %v109_v49  ;;  %375 = vmatpush1.msra.mxu0 %v44_v50  ;;  %v94_v14 = vld [vmem:[%s5467_s1 + $0x1c0] sm:$0xff]  ;;  %v93_v16 = vld [vmem:[%s5467_s1 + $0x1b8] sm:$0xff]  ;;  %v92_v18 = vld [vmem:[%s5467_s1 + $0x1b0] sm:$0xff] }
  0x1c   :  { %446 = vmatpush1.msra.mxu1 %v108_v51  ;;  %376 = vmatprep.subr.mxu0 %v43_v52  ;;  %v158_v15 = vld [vmem:[%s5467_s1 + $0x3c0] sm:$0xff]  ;;  %v157_v17 = vld [vmem:[%s5467_s1 + $0x3b8] sm:$0xff]  ;;  %v156_v19 = vld [vmem:[%s5467_s1 + $0x3b0] sm:$0xff]  ;;  %v2811_v52 = vsub.s32 %v311_v42, %v2781_v41 }
  0x1d   :  { %447 = vmatprep.subr.mxu1 %v107_v53  ;;  %377 = vmatpush1.msra.mxu0 %v42_v54  ;;  %v91_v20 = vld [vmem:[%s5467_s1 + $0x1a8] sm:$0xff]  ;;  %v90_v22 = vld [vmem:[%s5467_s1 + $0x1a0] sm:$0xff]  ;;  %v89_v24 = vld [vmem:[%s5467_s1 + $0x198] sm:$0xff] }
  0x1e   :  { %448 = vmatpush1.msra.mxu1 %v106_v55  ;;  %378 = vmatprep.subr.mxu0 %v41_v56  ;;  %v155_v21 = vld [vmem:[%s5467_s1 + $0x3a8] sm:$0xff]  ;;  %v154_v23 = vld [vmem:[%s5467_s1 + $0x3a0] sm:$0xff]  ;;  %v153_v25 = vld [vmem:[%s5467_s1 + $0x398] sm:$0xff] }
  0x1f   :  { %449 = vmatprep.subr.mxu1 %v105_v57  ;;  %379 = vmatpush1.msra.mxu0 %v40_v58  ;;  %v88_v26 = vld [vmem:[%s5467_s1 + $0x190] sm:$0xff]  ;;  %v87_v28 = vld [vmem:[%s5467_s1 + $0x188] sm:$0xff]  ;;  %v86_v33 = vld [vmem:[%s5467_s1 + $0x180] sm:$0xff] }
  0x20   :  { %450 = vmatpush1.msra.mxu1 %v104_v59  ;;  %380 = vmatprep.subr.mxu0 %v39_v60  ;;  %v152_v27 = vld [vmem:[%s5467_s1 + $0x390] sm:$0xff]  ;;  %v151_v29 = vld [vmem:[%s5467_s1 + $0x388] sm:$0xff]  ;;  %v150_v34 = vld [vmem:[%s5467_s1 + $0x380] sm:$0xff] }
  0x21   :  { %451 = vmatprep.subr.mxu1 %v103_v61  ;;  %381 = vmatpush1.msra.mxu0 %v38_v62  ;;  %v85_v35 = vld [vmem:[%s5467_s1 + $0x178] sm:$0xff]  ;;  %v84_v37 = vld [vmem:[%s5467_s1 + $0x170] sm:$0xff]  ;;  %v83_v39 = vld [vmem:[%s5467_s1 + $0x168] sm:$0xff] }
  0x22   :  { %452 = vmatpush1.msra.mxu1 %v102_v63  ;;  %382 = vmatprep.subr.mxu0 %v101_v0  ;;  %v149_v36 = vld [vmem:[%s5467_s1 + $0x378] sm:$0xff]  ;;  %v148_v38 = vld [vmem:[%s5467_s1 + $0x370] sm:$0xff]  ;;  %v147_v40 = vld [vmem:[%s5467_s1 + $0x368] sm:$0xff] }
  0x23   :  { %453 = vmatprep.subr.mxu1 %v165_v1  ;;  %383 = vmatpush2.msra.mxu0 %v100_v2  ;;  %v82_v43 = vld [vmem:[%s5467_s1 + $0x160] sm:$0xff]  ;;  %v81_v45 = vld [vmem:[%s5467_s1 + $0x158] sm:$0xff]  ;;  %v80_v48 = vld [vmem:[%s5467_s1 + $0x150] sm:$0xff] }
  0x24   :  { %454 = vmatpush2.msra.mxu1 %v164_v3  ;;  %384 = vmatprep.subr.mxu0 %v99_v4  ;;  %v146_v44 = vld [vmem:[%s5467_s1 + $0x360] sm:$0xff]  ;;  %v145_v46 = vld [vmem:[%s5467_s1 + $0x358] sm:$0xff]  ;;  %v144_v49 = vld [vmem:[%s5467_s1 + $0x350] sm:$0xff] }
  0x25   :  { %455 = vmatprep.subr.mxu1 %v163_v5  ;;  %385 = vmatpush2.msra.mxu0 %v98_v6  ;;  %v35_v47 = vld [vmem:[%s5466_s0] sm:$0xff]  ;;  %v79_v50 = vld [vmem:[%s5467_s1 + $0x148] sm:$0xff]  ;;  %v77_v56 = vld [vmem:[%s5467_s1 + $0x138] sm:$0xff] }
  0x26   :  { %456 = vmatpush2.msra.mxu1 %v162_v7  ;;  %386 = vmatprep.subr.mxu0 %v97_v8  ;;  %v143_v51 = vld [vmem:[%s5467_s1 + $0x348] sm:$0xff]  ;;  %v78_v53 = vld [vmem:[%s5467_s1 + $0x140] sm:$0xff]  ;;  %v308_v55 = vcombine.high %v35_v47, %v35_v47  ;;  %v141_v57 = vld [vmem:[%s5467_s1 + $0x338] sm:$0xff]  ;;  %v2838_v62 = vrot.slane %v35_v47, %v2811_v52 }
  0x27   :  { %457 = vmatprep.subr.mxu1 %v161_v9  ;;  %387 = vmatpush2.msra.mxu0 %v96_v10  ;;  %v142_v54 = vld [vmem:[%s5467_s1 + $0x340] sm:$0xff]  ;;  %v76_v58 = vld [vmem:[%s5467_s1 + $0x130] sm:$0xff]  ;;  %v75_v60 = vld [vmem:[%s5467_s1 + $0x128] sm:$0xff] }
  0x28   :  { %458 = vmatpush2.msra.mxu1 %v160_v11  ;;  %388 = vmatprep.subr.mxu0 %v95_v12  ;;  %v140_v59 = vld [vmem:[%s5467_s1 + $0x330] sm:$0xff]  ;;  %v139_v61 = vld [vmem:[%s5467_s1 + $0x328] sm:$0xff]  ;;  %v74_v63 = vld [vmem:[%s5467_s1 + $0x120] sm:$0xff]  ;;  %v2847_v1 = vrot.slane %v308_v55, %v2811_v52  ;;  %v2869_v8 = vcombine.high %v2838_v62, %v2838_v62 }
  0x29   :  { %459 = vmatprep.subr.mxu1 %v159_v13  ;;  %389 = vmatpush2.msra.mxu0 %v94_v14  ;;  %v138_v0 = vld [vmem:[%s5467_s1 + $0x320] sm:$0xff]  ;;  %v73_v2 = vld [vmem:[%s5467_s1 + $0x118] sm:$0xff]  ;;  %v72_v4 = vld [vmem:[%s5467_s1 + $0x110] sm:$0xff] }
  0x2a   :  { %460 = vmatpush2.msra.mxu1 %v158_v15  ;;  %390 = vmatprep.subr.mxu0 %v93_v16  ;;  %v137_v3 = vld [vmem:[%s5467_s1 + $0x318] sm:$0xff]  ;;  %v136_v5 = vld [vmem:[%s5467_s1 + $0x310] sm:$0xff]  ;;  %v71_v6 = vld [vmem:[%s5467_s1 + $0x108] sm:$0xff]  ;;  %v2876_v10 = vcombine.high %v2847_v1, %v2847_v1 }
  0x2b   :  { %461 = vmatprep.subr.mxu1 %v157_v17  ;;  %391 = vmatpush2.msra.mxu0 %v92_v18  ;;  %v135_v7 = vld [vmem:[%s5467_s1 + $0x308] sm:$0xff]  ;;  %v70_v9 = vld [vmem:[%s5467_s1 + $0x100] sm:$0xff]  ;;  %v197_v12 = vld [vmem:[%s5467_s1 + $0x4f8] sm:$0xff] }
  0x2c   :  { %462 = vmatpush2.msra.mxu1 %v156_v19  ;;  %392 = vmatprep.subr.mxu0 %v91_v20  ;;  %v134_v11 = vld [vmem:[%s5467_s1 + $0x300] sm:$0xff]  ;;  %v261_v13 = vld [vmem:[%s5467_s1 + $0x6f8] sm:$0xff]  ;;  %v196_v14 = vld [vmem:[%s5467_s1 + $0x4f0] sm:$0xff] }
  0x2d   :  { %463 = vmatprep.subr.mxu1 %v155_v21  ;;  %393 = vmatpush2.msra.mxu0 %v90_v22  ;;  %v260_v15 = vld [vmem:[%s5467_s1 + $0x6f0] sm:$0xff]  ;;  %v195_v16 = vld [vmem:[%s5467_s1 + $0x4e8] sm:$0xff]  ;;  %v194_v18 = vld [vmem:[%s5467_s1 + $0x4e0] sm:$0xff] }
  0x2e   :  { %464 = vmatpush2.msra.mxu1 %v154_v23  ;;  %394 = vmatprep.subr.mxu0 %v89_v24  ;;  %v259_v17 = vld [vmem:[%s5467_s1 + $0x6e8] sm:$0xff]  ;;  %v258_v19 = vld [vmem:[%s5467_s1 + $0x6e0] sm:$0xff]  ;;  %v193_v20 = vld [vmem:[%s5467_s1 + $0x4d8] sm:$0xff] }
  0x2f   :  { %465 = vmatprep.subr.mxu1 %v153_v25  ;;  %395 = vmatpush2.msra.mxu0 %v88_v26  ;;  %v257_v21 = vld [vmem:[%s5467_s1 + $0x6d8] sm:$0xff]  ;;  %v192_v22 = vld [vmem:[%s5467_s1 + $0x4d0] sm:$0xff]  ;;  %v191_v24 = vld [vmem:[%s5467_s1 + $0x4c8] sm:$0xff] }
  0x30   :  { %466 = vmatpush2.msra.mxu1 %v152_v27  ;;  %396 = vmatprep.subr.mxu0 %v87_v28  ;;  %v256_v23 = vld [vmem:[%s5467_s1 + $0x6d0] sm:$0xff]  ;;  %v255_v25 = vld [vmem:[%s5467_s1 + $0x6c8] sm:$0xff]  ;;  %v190_v26 = vld [vmem:[%s5467_s1 + $0x4c0] sm:$0xff] }
  0x31   :  { %467 = vmatprep.subr.mxu1 %v151_v29  ;;  %397 = vmatpush2.msra.mxu0 %v86_v33  ;;  %v254_v27 = vld [vmem:[%s5467_s1 + $0x6c0] sm:$0xff]  ;;  %v189_v28 = vld [vmem:[%s5467_s1 + $0x4b8] sm:$0xff]  ;;  %v188_v30 = vld [vmem:[%s5467_s1 + $0x4b0] sm:$0xff] }
  0x32   :  { %468 = vmatpush2.msra.mxu1 %v150_v34  ;;  %398 = vmatprep.subr.mxu0 %v85_v35  ;;  %v253_v29 = vld [vmem:[%s5467_s1 + $0x6b8] sm:$0xff]  ;;  %v252_v31 = vld [vmem:[%s5467_s1 + $0x6b0] sm:$0xff]  ;;  %v187_v32 = vld [vmem:[%s5467_s1 + $0x4a8] sm:$0xff] }
  0x33   :  { %469 = vmatprep.subr.mxu1 %v149_v36  ;;  %399 = vmatpush2.msra.mxu0 %v84_v37  ;;  %v251_v33 = vld [vmem:[%s5467_s1 + $0x6a8] sm:$0xff]  ;;  %v186_v34 = vld [vmem:[%s5467_s1 + $0x4a0] sm:$0xff]  ;;  %v185_v36 = vld [vmem:[%s5467_s1 + $0x498] sm:$0xff] }
  0x34   :  { %470 = vmatpush2.msra.mxu1 %v148_v38  ;;  %400 = vmatprep.subr.mxu0 %v83_v39  ;;  %v250_v35 = vld [vmem:[%s5467_s1 + $0x6a0] sm:$0xff]  ;;  %v249_v37 = vld [vmem:[%s5467_s1 + $0x698] sm:$0xff]  ;;  %v184_v38 = vld [vmem:[%s5467_s1 + $0x490] sm:$0xff] }
  0x35   :  { %471 = vmatprep.subr.mxu1 %v147_v40  ;;  %401 = vmatpush2.msra.mxu0 %v82_v43  ;;  %v248_v39 = vld [vmem:[%s5467_s1 + $0x690] sm:$0xff]  ;;  %v183_v40 = vld [vmem:[%s5467_s1 + $0x488] sm:$0xff]  ;;  %v182_v43 = vld [vmem:[%s5467_s1 + $0x480] sm:$0xff] }
  0x36   :  { %472 = vmatpush2.msra.mxu1 %v146_v44  ;;  %402 = vmatprep.subr.mxu0 %v81_v45  ;;  %v247_v42 = vld [vmem:[%s5467_s1 + $0x688] sm:$0xff]  ;;  %v246_v44 = vld [vmem:[%s5467_s1 + $0x680] sm:$0xff]  ;;  %v181_v45 = vld [vmem:[%s5467_s1 + $0x478] sm:$0xff] }
  0x37   :  { %473 = vmatprep.subr.mxu1 %v145_v46  ;;  %403 = vmatpush2.msra.mxu0 %v80_v48  ;;  %v245_v46 = vld [vmem:[%s5467_s1 + $0x678] sm:$0xff]  ;;  %v180_v47 = vld [vmem:[%s5467_s1 + $0x470] sm:$0xff] }
  0x38   :  { %474 = vmatpush2.msra.mxu1 %v144_v49  ;;  %404 = vmatprep.subr.mxu0 %v79_v50  ;;  %v244_v48 = vld [vmem:[%s5467_s1 + $0x670] sm:$0xff]  ;;  %v179_v49 = vld [vmem:[%s5467_s1 + $0x468] sm:$0xff]  ;;  %v241_v55 = vld [vmem:[%s5467_s1 + $0x658] sm:$0xff] }
  0x39   :  { %475 = vmatprep.subr.mxu1 %v143_v51  ;;  %405 = vmatpush2.msra.mxu0 %v78_v53  ;;  %v243_v50 = vld [vmem:[%s5467_s1 + $0x668] sm:$0xff]  ;;  %v178_v51 = vld [vmem:[%s5467_s1 + $0x460] sm:$0xff] }
  0x3a   :  { %476 = vmatpush2.msra.mxu1 %v142_v54  ;;  %406 = vmatprep.subr.mxu0 %v77_v56  ;;  %v242_v53 = vld [vmem:[%s5467_s1 + $0x660] sm:$0xff]  ;;  %v177_v54 = vld [vmem:[%s5467_s1 + $0x458] sm:$0xff]  ;;  %v176_v56 = vld [vmem:[%s5467_s1 + $0x450] sm:$0xff] }
  0x3b   :  { %477 = vmatprep.subr.mxu1 %v141_v57  ;;  %407 = vmatpush2.msra.mxu0 %v76_v58  ;;  %v240_v57 = vld [vmem:[%s5467_s1 + $0x650] sm:$0xff]  ;;  %v175_v58 = vld [vmem:[%s5467_s1 + $0x448] sm:$0xff] }
  0x3c   :  { %478 = vmatpush2.msra.mxu1 %v140_v59  ;;  %408 = vmatprep.subr.mxu0 %v75_v60  ;;  %v239_v59 = vld [vmem:[%s5467_s1 + $0x648] sm:$0xff]  ;;  %v174_v60 = vld [vmem:[%s5467_s1 + $0x440] sm:$0xff] }
  0x3d   :  { %479 = vmatprep.subr.mxu1 %v139_v61  ;;  %409 = vmatpush2.msra.mxu0 %v74_v63  ;;  %v238_v61 = vld [vmem:[%s5467_s1 + $0x640] sm:$0xff]  ;;  %v173_v63 = vld [vmem:[%s5467_s1 + $0x438] sm:$0xff] }
  0x3e   :  { %480 = vmatpush2.msra.mxu1 %v138_v0  ;;  %410 = vmatprep.subr.mxu0 %v73_v2  ;;  %v237_v0 = vld [vmem:[%s5467_s1 + $0x638] sm:$0xff]  ;;  %v172_v2 = vld [vmem:[%s5467_s1 + $0x430] sm:$0xff] }
  0x3f   :  { %481 = vmatprep.subr.mxu1 %v137_v3  ;;  %411 = vmatpush2.msra.mxu0 %v72_v4  ;;  %v236_v3 = vld [vmem:[%s5467_s1 + $0x630] sm:$0xff]  ;;  %v171_v4 = vld [vmem:[%s5467_s1 + $0x428] sm:$0xff] }
  0x40   :  { %482 = vmatpush2.msra.mxu1 %v136_v5  ;;  %412 = vmatprep.subr.mxu0 %v71_v6  ;;  %v235_v5 = vld [vmem:[%s5467_s1 + $0x628] sm:$0xff]  ;;  %v170_v6 = vld [vmem:[%s5467_s1 + $0x420] sm:$0xff] }
  0x41   :  { %483 = vmatprep.subr.mxu1 %v135_v7  ;;  %413 = vmatpush2.msra.mxu0 %v70_v9  ;;  %v234_v7 = vld [vmem:[%s5467_s1 + $0x620] sm:$0xff]  ;;  %v169_v9 = vld [vmem:[%s5467_s1 + $0x418] sm:$0xff] }
  0x42   :  { %414 = vmatprep.mubr.f32.mxu0 %v2869_v8  ;;  %484 = vmatpush2.msra.mxu1 %v134_v11  ;;  %v233_v11 = vld [vmem:[%s5467_s1 + $0x618] sm:$0xff] }
  0x43   :  { %485 = vmatprep.mubr.f32.mxu1 %v2876_v10  ;;  %415 = vmatmul.mubr.f32.vlgmr.msra.gmra.mxu0 %v2838_v62 }
  0x44   :  { %486 = vmatmul.mubr.f32.vlgmr.msra.gmra.mxu1 %v2847_v1  ;;  %492 = vmatprep.subr.mxu0 %v197_v12  ;;  %v168_v12 = vld [vmem:[%s5467_s1 + $0x410] sm:$0xff] }
  0x45   :  { %563 = vmatprep.subr.mxu1 %v261_v13  ;;  %493 = vmatpush1.msra.mxu0 %v196_v14  ;;  %v232_v13 = vld [vmem:[%s5467_s1 + $0x610] sm:$0xff]  ;;  %v167_v14 = vld [vmem:[%s5467_s1 + $0x408] sm:$0xff] }
  0x46   :  { %564 = vmatpush1.msra.mxu1 %v260_v15  ;;  %494 = vmatprep.subr.mxu0 %v195_v16  ;;  %v231_v15 = vld [vmem:[%s5467_s1 + $0x608] sm:$0xff]  ;;  %v166_v16 = vld [vmem:[%s5467_s1 + $0x400] sm:$0xff] }
  0x47   :  { %565 = vmatprep.subr.mxu1 %v259_v17  ;;  %495 = vmatpush1.msra.mxu0 %v194_v18  ;;  %v230_v17 = vld [vmem:[%s5467_s1 + $0x600] sm:$0xff]  ;;  %v229_v18 = vld [vmem:[%s5467_s1 + $0x5f8] sm:$0xff] }
  0x48   :  { %566 = vmatpush1.msra.mxu1 %v258_v19  ;;  %496 = vmatprep.subr.mxu0 %v193_v20  ;;  %v293_v19 = vld [vmem:[%s5467_s1 + $0x7f8] sm:$0xff]  ;;  %v228_v20 = vld [vmem:[%s5467_s1 + $0x5f0] sm:$0xff] }
  0x49   :  { %567 = vmatprep.subr.mxu1 %v257_v21  ;;  %497 = vmatpush1.msra.mxu0 %v192_v22  ;;  %v292_v21 = vld [vmem:[%s5467_s1 + $0x7f0] sm:$0xff]  ;;  %v227_v22 = vld [vmem:[%s5467_s1 + $0x5e8] sm:$0xff] }
  0x4a   :  { %568 = vmatpush1.msra.mxu1 %v256_v23  ;;  %498 = vmatprep.subr.mxu0 %v191_v24  ;;  %v291_v23 = vld [vmem:[%s5467_s1 + $0x7e8] sm:$0xff]  ;;  %v226_v24 = vld [vmem:[%s5467_s1 + $0x5e0] sm:$0xff] }
  0x4b   :  { %569 = vmatprep.subr.mxu1 %v255_v25  ;;  %499 = vmatpush1.msra.mxu0 %v190_v26  ;;  %v290_v25 = vld [vmem:[%s5467_s1 + $0x7e0] sm:$0xff]  ;;  %v225_v26 = vld [vmem:[%s5467_s1 + $0x5d8] sm:$0xff] }
  0x4c   :  { %570 = vmatpush1.msra.mxu1 %v254_v27  ;;  %500 = vmatprep.subr.mxu0 %v189_v28  ;;  %v289_v27 = vld [vmem:[%s5467_s1 + $0x7d8] sm:$0xff]  ;;  %v224_v28 = vld [vmem:[%s5467_s1 + $0x5d0] sm:$0xff] }
  0x4d   :  { %571 = vmatprep.subr.mxu1 %v253_v29  ;;  %501 = vmatpush1.msra.mxu0 %v188_v30  ;;  %v288_v29 = vld [vmem:[%s5467_s1 + $0x7d0] sm:$0xff]  ;;  %v223_v30 = vld [vmem:[%s5467_s1 + $0x5c8] sm:$0xff] }
  0x4e   :  { %572 = vmatpush1.msra.mxu1 %v252_v31  ;;  %502 = vmatprep.subr.mxu0 %v187_v32  ;;  %v287_v31 = vld [vmem:[%s5467_s1 + $0x7c8] sm:$0xff]  ;;  %v222_v32 = vld [vmem:[%s5467_s1 + $0x5c0] sm:$0xff] }
  0x4f   :  { %573 = vmatprep.subr.mxu1 %v251_v33  ;;  %503 = vmatpush1.msra.mxu0 %v186_v34  ;;  %v286_v33 = vld [vmem:[%s5467_s1 + $0x7c0] sm:$0xff]  ;;  %v221_v34 = vld [vmem:[%s5467_s1 + $0x5b8] sm:$0xff] }
  0x50   :  { %574 = vmatpush1.msra.mxu1 %v250_v35  ;;  %504 = vmatprep.subr.mxu0 %v185_v36  ;;  %v285_v35 = vld [vmem:[%s5467_s1 + $0x7b8] sm:$0xff]  ;;  %v220_v36 = vld [vmem:[%s5467_s1 + $0x5b0] sm:$0xff] }
  0x51   :  { %575 = vmatprep.subr.mxu1 %v249_v37  ;;  %505 = vmatpush1.msra.mxu0 %v184_v38  ;;  %v284_v37 = vld [vmem:[%s5467_s1 + $0x7b0] sm:$0xff]  ;;  %v219_v38 = vld [vmem:[%s5467_s1 + $0x5a8] sm:$0xff] }
  0x52   :  { %576 = vmatpush1.msra.mxu1 %v248_v39  ;;  %506 = vmatprep.subr.mxu0 %v183_v40  ;;  %v283_v39 = vld [vmem:[%s5467_s1 + $0x7a8] sm:$0xff]  ;;  %v218_v40 = vld [vmem:[%s5467_s1 + $0x5a0] sm:$0xff] }
  0x53   :  { %577 = vmatprep.subr.mxu1 %v247_v42  ;;  %507 = vmatpush1.msra.mxu0 %v182_v43  ;;  %v282_v42 = vld [vmem:[%s5467_s1 + $0x7a0] sm:$0xff]  ;;  %v217_v43 = vld [vmem:[%s5467_s1 + $0x598] sm:$0xff] }
  0x54   :  { %578 = vmatpush1.msra.mxu1 %v246_v44  ;;  %508 = vmatprep.subr.mxu0 %v181_v45  ;;  %v281_v44 = vld [vmem:[%s5467_s1 + $0x798] sm:$0xff]  ;;  %v216_v45 = vld [vmem:[%s5467_s1 + $0x590] sm:$0xff] }
  0x55   :  { %579 = vmatprep.subr.mxu1 %v245_v46  ;;  %509 = vmatpush1.msra.mxu0 %v180_v47  ;;  %v280_v46 = vld [vmem:[%s5467_s1 + $0x790] sm:$0xff]  ;;  %v215_v47 = vld [vmem:[%s5467_s1 + $0x588] sm:$0xff] }
  0x56   :  { %580 = vmatpush1.msra.mxu1 %v244_v48  ;;  %510 = vmatprep.subr.mxu0 %v179_v49  ;;  %v279_v48 = vld [vmem:[%s5467_s1 + $0x788] sm:$0xff]  ;;  %v214_v49 = vld [vmem:[%s5467_s1 + $0x580] sm:$0xff] }
  0x57   :  { %581 = vmatprep.subr.mxu1 %v243_v50  ;;  %511 = vmatpush1.msra.mxu0 %v178_v51  ;;  %v278_v50 = vld [vmem:[%s5467_s1 + $0x780] sm:$0xff]  ;;  %v213_v51 = vld [vmem:[%s5467_s1 + $0x578] sm:$0xff] }
  0x58   :  { %582 = vmatpush1.msra.mxu1 %v242_v53  ;;  %512 = vmatprep.subr.mxu0 %v177_v54  ;;  %v277_v53 = vld [vmem:[%s5467_s1 + $0x778] sm:$0xff]  ;;  %v212_v54 = vld [vmem:[%s5467_s1 + $0x570] sm:$0xff] }
  0x59   :  { %583 = vmatprep.subr.mxu1 %v241_v55  ;;  %513 = vmatpush1.msra.mxu0 %v176_v56  ;;  %v276_v55 = vld [vmem:[%s5467_s1 + $0x770] sm:$0xff]  ;;  %v211_v56 = vld [vmem:[%s5467_s1 + $0x568] sm:$0xff] }
  0x5a   :  { %584 = vmatpush1.msra.mxu1 %v240_v57  ;;  %514 = vmatprep.subr.mxu0 %v175_v58  ;;  %v275_v57 = vld [vmem:[%s5467_s1 + $0x768] sm:$0xff]  ;;  %v210_v58 = vld [vmem:[%s5467_s1 + $0x560] sm:$0xff] }
  0x5b   :  { %585 = vmatprep.subr.mxu1 %v239_v59  ;;  %515 = vmatpush1.msra.mxu0 %v174_v60  ;;  %v274_v59 = vld [vmem:[%s5467_s1 + $0x760] sm:$0xff]  ;;  %v209_v60 = vld [vmem:[%s5467_s1 + $0x558] sm:$0xff] }
  0x5c   :  { %586 = vmatpush1.msra.mxu1 %v238_v61  ;;  %516 = vmatprep.subr.mxu0 %v173_v63  ;;  %v273_v61 = vld [vmem:[%s5467_s1 + $0x758] sm:$0xff]  ;;  %v36_v63 = vld [vmem:[%s5466_s0 + $0x8] sm:$0xff] }
  0x5d   :  { %587 = vmatprep.subr.mxu1 %v237_v0  ;;  %517 = vmatpush1.msra.mxu0 %v172_v2  ;;  %v208_v0 = vld [vmem:[%s5467_s1 + $0x550] sm:$0xff] }
  0x5e   :  { %588 = vmatpush1.msra.mxu1 %v236_v3  ;;  %518 = vmatprep.subr.mxu0 %v171_v4  ;;  %v272_v2 = vld [vmem:[%s5467_s1 + $0x750] sm:$0xff]  ;;  %v207_v3 = vld [vmem:[%s5467_s1 + $0x548] sm:$0xff] }
  0x5f   :  { %589 = vmatprep.subr.mxu1 %v235_v5  ;;  %519 = vmatpush1.msra.mxu0 %v170_v6  ;;  %v271_v4 = vld [vmem:[%s5467_s1 + $0x748] sm:$0xff]  ;;  %v206_v5 = vld [vmem:[%s5467_s1 + $0x540] sm:$0xff] }
  0x60   :  { %590 = vmatpush1.msra.mxu1 %v234_v7  ;;  %520 = vmatprep.subr.mxu0 %v169_v9  ;;  %v270_v6 = vld [vmem:[%s5467_s1 + $0x740] sm:$0xff]  ;;  %v325_v7 = vcombine.high %v36_v63, %v36_v63  ;;  %v205_v9 = vld [vmem:[%s5467_s1 + $0x538] sm:$0xff] }
  0x61   :  { %591 = vmatprep.subr.mxu1 %v233_v11  ;;  %521 = vmatpush1.msra.mxu0 %v168_v12  ;;  %v269_v11 = vld [vmem:[%s5467_s1 + $0x738] sm:$0xff]  ;;  %v204_v12 = vld [vmem:[%s5467_s1 + $0x530] sm:$0xff] }
  0x62   :  { %592 = vmatpush1.msra.mxu1 %v232_v13  ;;  %522 = vmatprep.subr.mxu0 %v167_v14  ;;  %v268_v13 = vld [vmem:[%s5467_s1 + $0x730] sm:$0xff]  ;;  %v203_v14 = vld [vmem:[%s5467_s1 + $0x528] sm:$0xff] }
  0x63   :  { %593 = vmatprep.subr.mxu1 %v231_v15  ;;  %523 = vmatpush1.msra.mxu0 %v166_v16  ;;  %v267_v15 = vld [vmem:[%s5467_s1 + $0x728] sm:$0xff]  ;;  %v3243_v16 = vrot.slane %v36_v63, %v2811_v52  ;;  %v806_v63 = vld [vmem:[%s5469_s3 + $0x500] sm:$0xff] }
  0x64   :  { %594 = vmatpush1.msra.mxu1 %v230_v17  ;;  %524 = vmatprep.subr.mxu0 %v229_v18  ;;  %v202_v17 = vld [vmem:[%s5467_s1 + $0x520] sm:$0xff] }
  0x65   :  { %595 = vmatprep.subr.mxu1 %v293_v19  ;;  %525 = vmatpush2.msra.mxu0 %v228_v20  ;;  %v266_v18 = vld [vmem:[%s5467_s1 + $0x720] sm:$0xff]  ;;  %v3252_v19 = vrot.slane %v325_v7, %v2811_v52  ;;  %v201_v20 = vld [vmem:[%s5467_s1 + $0x518] sm:$0xff]  ;;  %v264_v52 = vld [vmem:[%s5467_s1 + $0x710] sm:$0xff] }
  0x66   :  { %596 = vmatpush2.msra.mxu1 %v292_v21  ;;  %526 = vmatprep.subr.mxu0 %v227_v22  ;;  %v265_v21 = vld [vmem:[%s5467_s1 + $0x718] sm:$0xff]  ;;  %v200_v22 = vld [vmem:[%s5467_s1 + $0x510] sm:$0xff]  ;;  %v670_v7 = vld [vmem:[%s5469_s3 + $0xc0] sm:$0xff] }
  0x67   :  { %597 = vmatprep.subr.mxu1 %v291_v23  ;;  %527 = vmatpush2.msra.mxu0 %v226_v24  ;;  %v199_v23 = vld [vmem:[%s5467_s1 + $0x508] sm:$0xff] }
  0x68   :  { %598 = vmatpush2.msra.mxu1 %v290_v25  ;;  %528 = vmatprep.subr.mxu0 %v225_v26  ;;  %v263_v24 = vld [vmem:[%s5467_s1 + $0x708] sm:$0xff]  ;;  %v3274_v25 = vcombine.high %v3243_v16, %v3243_v16  ;;  %v198_v26 = vld [vmem:[%s5467_s1 + $0x500] sm:$0xff] }
  0x69   :  { %599 = vmatprep.subr.mxu1 %v289_v27  ;;  %529 = vmatpush2.msra.mxu0 %v224_v28  ;;  %v3281_v27 = vcombine.high %v3252_v19, %v3252_v19  ;;  %v262_v28 = vld [vmem:[%s5467_s1 + $0x700] sm:$0xff] }
  0x6a   :  { %600 = vmatpush2.msra.mxu1 %v288_v29  ;;  %530 = vmatprep.subr.mxu0 %v223_v30  ;;  %v707_v29 = vld [vmem:[%s5469_s3 + $0x1e8] sm:$0xff] }
  0x6b   :  { %601 = vmatprep.subr.mxu1 %v287_v31  ;;  %531 = vmatpush2.msra.mxu0 %v222_v32  ;;  %v835_v30 = vld [vmem:[%s5469_s3 + $0x5e8] sm:$0xff]  ;;  %v706_v31 = vld [vmem:[%s5469_s3 + $0x1e0] sm:$0xff] }
  0x6c   :  { %602 = vmatpush2.msra.mxu1 %v286_v33  ;;  %532 = vmatprep.subr.mxu0 %v221_v34  ;;  %v834_v32 = vld [vmem:[%s5469_s3 + $0x5e0] sm:$0xff]  ;;  %v703_v33 = vld [vmem:[%s5469_s3 + $0x1c8] sm:$0xff] }
  0x6d   :  { %603 = vmatprep.subr.mxu1 %v285_v35  ;;  %533 = vmatpush2.msra.mxu0 %v220_v36  ;;  %v831_v34 = vld [vmem:[%s5469_s3 + $0x5c8] sm:$0xff]  ;;  %v702_v35 = vld [vmem:[%s5469_s3 + $0x1c0] sm:$0xff] }
  0x6e   :  { %604 = vmatpush2.msra.mxu1 %v284_v37  ;;  %534 = vmatprep.subr.mxu0 %v219_v38  ;;  %v830_v36 = vld [vmem:[%s5469_s3 + $0x5c0] sm:$0xff]  ;;  %v699_v37 = vld [vmem:[%s5469_s3 + $0x1a8] sm:$0xff] }
  0x6f   :  { %605 = vmatprep.subr.mxu1 %v283_v39  ;;  %535 = vmatpush2.msra.mxu0 %v218_v40  ;;  %v827_v38 = vld [vmem:[%s5469_s3 + $0x5a8] sm:$0xff]  ;;  %v698_v39 = vld [vmem:[%s5469_s3 + $0x1a0] sm:$0xff] }
  0x70   :  { %606 = vmatpush2.msra.mxu1 %v282_v42  ;;  %536 = vmatprep.subr.mxu0 %v217_v43  ;;  %v826_v40 = vld [vmem:[%s5469_s3 + $0x5a0] sm:$0xff]  ;;  %v695_v42 = vld [vmem:[%s5469_s3 + $0x188] sm:$0xff] }
  0x71   :  { %607 = vmatprep.subr.mxu1 %v281_v44  ;;  %537 = vmatpush2.msra.mxu0 %v216_v45  ;;  %v823_v43 = vld [vmem:[%s5469_s3 + $0x588] sm:$0xff]  ;;  %v694_v44 = vld [vmem:[%s5469_s3 + $0x180] sm:$0xff] }
  0x72   :  { %608 = vmatpush2.msra.mxu1 %v280_v46  ;;  %538 = vmatprep.subr.mxu0 %v215_v47  ;;  %v822_v45 = vld [vmem:[%s5469_s3 + $0x580] sm:$0xff]  ;;  %v691_v46 = vld [vmem:[%s5469_s3 + $0x168] sm:$0xff] }
  0x73   :  { %609 = vmatprep.subr.mxu1 %v279_v48  ;;  %539 = vmatpush2.msra.mxu0 %v214_v49  ;;  %v819_v47 = vld [vmem:[%s5469_s3 + $0x568] sm:$0xff]  ;;  %v690_v48 = vld [vmem:[%s5469_s3 + $0x160] sm:$0xff] }
  0x74   :  { %610 = vmatpush2.msra.mxu1 %v278_v50  ;;  %540 = vmatprep.subr.mxu0 %v213_v51  ;;  %v818_v49 = vld [vmem:[%s5469_s3 + $0x560] sm:$0xff]  ;;  %v687_v50 = vld [vmem:[%s5469_s3 + $0x148] sm:$0xff] }
  0x75   :  { %611 = vmatprep.subr.mxu1 %v277_v53  ;;  %541 = vmatpush2.msra.mxu0 %v212_v54  ;;  %v815_v51 = vld [vmem:[%s5469_s3 + $0x548] sm:$0xff]  ;;  %v686_v53 = vld [vmem:[%s5469_s3 + $0x140] sm:$0xff] }
  0x76   :  { %612 = vmatpush2.msra.mxu1 %v276_v55  ;;  %542 = vmatprep.subr.mxu0 %v211_v56  ;;  %v814_v54 = vld [vmem:[%s5469_s3 + $0x540] sm:$0xff]  ;;  %v683_v55 = vld [vmem:[%s5469_s3 + $0x128] sm:$0xff] }
  0x77   :  { %613 = vmatprep.subr.mxu1 %v275_v57  ;;  %543 = vmatpush2.msra.mxu0 %v210_v58  ;;  %v811_v56 = vld [vmem:[%s5469_s3 + $0x528] sm:$0xff]  ;;  %v682_v57 = vld [vmem:[%s5469_s3 + $0x120] sm:$0xff] }
  0x78   :  { %614 = vmatpush2.msra.mxu1 %v274_v59  ;;  %544 = vmatprep.subr.mxu0 %v209_v60  ;;  %v810_v58 = vld [vmem:[%s5469_s3 + $0x520] sm:$0xff]  ;;  %v679_v59 = vld [vmem:[%s5469_s3 + $0x108] sm:$0xff] }
  0x79   :  { %615 = vmatprep.subr.mxu1 %v273_v61  ;;  %545 = vmatpush2.msra.mxu0 %v208_v0  ;;  %v807_v60 = vld [vmem:[%s5469_s3 + $0x508] sm:$0xff]  ;;  %v678_v61 = vld [vmem:[%s5469_s3 + $0x100] sm:$0xff] }
  0x7a   :  { %616 = vmatpush2.msra.mxu1 %v272_v2  ;;  %546 = vmatprep.subr.mxu0 %v207_v3  ;;  %v675_v0 = vld [vmem:[%s5469_s3 + $0xe8] sm:$0xff]  ;;  %v674_v3 = vld [vmem:[%s5469_s3 + $0xe0] sm:$0xff] }
  0x7b   :  { %617 = vmatprep.subr.mxu1 %v271_v4  ;;  %547 = vmatpush2.msra.mxu0 %v206_v5  ;;  %v803_v2 = vld [vmem:[%s5469_s3 + $0x4e8] sm:$0xff]  ;;  %v802_v4 = vld [vmem:[%s5469_s3 + $0x4e0] sm:$0xff] }
  0x7c   :  { %618 = vmatpush2.msra.mxu1 %v270_v6  ;;  %548 = vmatprep.subr.mxu0 %v205_v9  ;;  %v671_v5 = vld [vmem:[%s5469_s3 + $0xc8] sm:$0xff]  ;;  %v798_v9 = vld [vmem:[%s5469_s3 + $0x4c0] sm:$0xff] }
  0x7d   :  { %619 = vmatprep.subr.mxu1 %v269_v11  ;;  %549 = vmatpush2.msra.mxu0 %v204_v12  ;;  %v799_v6 = vld [vmem:[%s5469_s3 + $0x4c8] sm:$0xff] }
  0x7e   :  { %620 = vmatpush2.msra.mxu1 %v268_v13  ;;  %550 = vmatprep.subr.mxu0 %v203_v14  ;;  %v667_v11 = vld [vmem:[%s5469_s3 + $0xa8] sm:$0xff]  ;;  %v666_v13 = vld [vmem:[%s5469_s3 + $0xa0] sm:$0xff] }
  0x7f   :  { %621 = vmatprep.subr.mxu1 %v267_v15  ;;  %551 = vmatpush2.msra.mxu0 %v202_v17  ;;  %v795_v12 = vld [vmem:[%s5469_s3 + $0x4a8] sm:$0xff]  ;;  %v794_v14 = vld [vmem:[%s5469_s3 + $0x4a0] sm:$0xff] }
  0x80   :  { %622 = vmatpush2.msra.mxu1 %v266_v18  ;;  %552 = vmatprep.subr.mxu0 %v201_v20  ;;  %v663_v15 = vld [vmem:[%s5469_s3 + $0x88] sm:$0xff]  ;;  %v662_v18 = vld [vmem:[%s5469_s3 + $0x80] sm:$0xff] }
  0x81   :  { %623 = vmatprep.subr.mxu1 %v265_v21  ;;  %553 = vmatpush2.msra.mxu0 %v200_v22  ;;  %v791_v17 = vld [vmem:[%s5469_s3 + $0x488] sm:$0xff]  ;;  %v790_v20 = vld [vmem:[%s5469_s3 + $0x480] sm:$0xff] }
  0x82   :  { %624 = vmatpush2.msra.mxu1 %v264_v52  ;;  %554 = vmatprep.subr.mxu0 %v199_v23  ;;  %v659_v21 = vld [vmem:[%s5469_s3 + $0x68] sm:$0xff]  ;;  %v658_v52 = vld [vmem:[%s5469_s3 + $0x60] sm:$0xff] }
  0x83   :  { %625 = vmatprep.subr.mxu1 %v263_v24  ;;  %555 = vmatpush2.msra.mxu0 %v198_v26  ;;  %v787_v22 = vld [vmem:[%s5469_s3 + $0x468] sm:$0xff]  ;;  %v786_v23 = vld [vmem:[%s5469_s3 + $0x460] sm:$0xff] }
  0x84   :  { %556 = vmatprep.mubr.f32.mxu0 %v3274_v25  ;;  %626 = vmatpush2.msra.mxu1 %v262_v28  ;;  %v655_v24 = vld [vmem:[%s5469_s3 + $0x48] sm:$0xff]  ;;  %v654_v28 = vld [vmem:[%s5469_s3 + $0x40] sm:$0xff] }
  0x85   :  { %627 = vmatprep.mubr.f32.mxu1 %v3281_v27  ;;  %557 = vmatmul.mubr.f32.vlgmr.msra.gmra.mxu0 %v3243_v16  ;;  %v783_v26 = vld [vmem:[%s5469_s3 + $0x448] sm:$0xff] }
  0x86   :  { %628 = vmatmul.mubr.f32.vlgmr.msra.gmra.mxu1 %v3252_v19  ;;  %1223 = vmatprep.subr.mxu0 %v707_v29  ;;  %v782_v29 = vld [vmem:[%s5469_s3 + $0x440] sm:$0xff] }
  0x87   :  { %1294 = vmatprep.subr.mxu1 %v835_v30  ;;  %1224 = vmatpush1.msra.mxu0 %v706_v31  ;;  %v651_v30 = vld [vmem:[%s5469_s3 + $0x28] sm:$0xff] }
  0x88   :  { %1295 = vmatpush1.msra.mxu1 %v834_v32  ;;  %1225 = vmatprep.subr.mxu0 %v703_v33  ;;  %v779_v31 = vld [vmem:[%s5469_s3 + $0x428] sm:$0xff]  ;;  %v650_v32 = vld [vmem:[%s5469_s3 + $0x20] sm:$0xff] }
  0x89   :  { %1296 = vmatprep.subr.mxu1 %v831_v34  ;;  %1226 = vmatpush1.msra.mxu0 %v702_v35  ;;  %v778_v33 = vld [vmem:[%s5469_s3 + $0x420] sm:$0xff]  ;;  %v647_v34 = vld [vmem:[%s5469_s3 + $0x8] sm:$0xff] }
  0x8a   :  { %1297 = vmatpush1.msra.mxu1 %v830_v36  ;;  %1227 = vmatprep.subr.mxu0 %v699_v37  ;;  %v775_v35 = vld [vmem:[%s5469_s3 + $0x408] sm:$0xff]  ;;  %v646_v36 = vld [vmem:[%s5469_s3] sm:$0xff] }
  0x8b   :  { %1298 = vmatprep.subr.mxu1 %v827_v38  ;;  %1228 = vmatpush1.msra.mxu0 %v698_v39  ;;  %v774_v37 = vld [vmem:[%s5469_s3 + $0x400] sm:$0xff]  ;;  %v771_v38 = vld [vmem:[%s5469_s3 + $0x3e8] sm:$0xff] }
  0x8c   :  { %1299 = vmatpush1.msra.mxu1 %v826_v40  ;;  %1229 = vmatprep.subr.mxu0 %v695_v42  ;;  %v899_v39 = vld [vmem:[%s5469_s3 + $0x7e8] sm:$0xff]  ;;  %v770_v40 = vld [vmem:[%s5469_s3 + $0x3e0] sm:$0xff] }
  0x8d   :  { %1300 = vmatprep.subr.mxu1 %v823_v43  ;;  %1230 = vmatpush1.msra.mxu0 %v694_v44  ;;  %v898_v42 = vld [vmem:[%s5469_s3 + $0x7e0] sm:$0xff]  ;;  %v767_v43 = vld [vmem:[%s5469_s3 + $0x3c8] sm:$0xff] }
  0x8e   :  { %1301 = vmatpush1.msra.mxu1 %v822_v45  ;;  %1231 = vmatprep.subr.mxu0 %v691_v46  ;;  %v895_v44 = vld [vmem:[%s5469_s3 + $0x7c8] sm:$0xff]  ;;  %v766_v45 = vld [vmem:[%s5469_s3 + $0x3c0] sm:$0xff] }
  0x8f   :  { %1302 = vmatprep.subr.mxu1 %v819_v47  ;;  %1232 = vmatpush1.msra.mxu0 %v690_v48  ;;  %v894_v46 = vld [vmem:[%s5469_s3 + $0x7c0] sm:$0xff]  ;;  %v763_v47 = vld [vmem:[%s5469_s3 + $0x3a8] sm:$0xff] }
  0x90   :  { %1303 = vmatpush1.msra.mxu1 %v818_v49  ;;  %1233 = vmatprep.subr.mxu0 %v687_v50  ;;  %v891_v48 = vld [vmem:[%s5469_s3 + $0x7a8] sm:$0xff]  ;;  %v762_v49 = vld [vmem:[%s5469_s3 + $0x3a0] sm:$0xff] }
  0x91   :  { %1304 = vmatprep.subr.mxu1 %v815_v51  ;;  %1234 = vmatpush1.msra.mxu0 %v686_v53  ;;  %v890_v50 = vld [vmem:[%s5469_s3 + $0x7a0] sm:$0xff]  ;;  %v759_v51 = vld [vmem:[%s5469_s3 + $0x388] sm:$0xff] }
  0x92   :  { %1305 = vmatpush1.msra.mxu1 %v814_v54  ;;  %1235 = vmatprep.subr.mxu0 %v683_v55  ;;  %v887_v53 = vld [vmem:[%s5469_s3 + $0x788] sm:$0xff]  ;;  %v758_v54 = vld [vmem:[%s5469_s3 + $0x380] sm:$0xff] }
  0x93   :  { %1306 = vmatprep.subr.mxu1 %v811_v56  ;;  %1236 = vmatpush1.msra.mxu0 %v682_v57  ;;  %v886_v55 = vld [vmem:[%s5469_s3 + $0x780] sm:$0xff]  ;;  %v755_v56 = vld [vmem:[%s5469_s3 + $0x368] sm:$0xff] }
  0x94   :  { %1307 = vmatpush1.msra.mxu1 %v810_v58  ;;  %1237 = vmatprep.subr.mxu0 %v679_v59  ;;  %v883_v57 = vld [vmem:[%s5469_s3 + $0x768] sm:$0xff]  ;;  %v754_v58 = vld [vmem:[%s5469_s3 + $0x360] sm:$0xff] }
  0x95   :  { %1308 = vmatprep.subr.mxu1 %v807_v60  ;;  %1238 = vmatpush1.msra.mxu0 %v678_v61  ;;  %v882_v59 = vld [vmem:[%s5469_s3 + $0x760] sm:$0xff]  ;;  %v751_v60 = vld [vmem:[%s5469_s3 + $0x348] sm:$0xff] }
  0x96   :  { %1309 = vmatpush1.msra.mxu1 %v806_v63  ;;  %1239 = vmatprep.subr.mxu0 %v675_v0  ;;  %v879_v61 = vld [vmem:[%s5469_s3 + $0x748] sm:$0xff]  ;;  %v750_v63 = vld [vmem:[%s5469_s3 + $0x340] sm:$0xff] }
  0x97   :  { %1310 = vmatprep.subr.mxu1 %v803_v2  ;;  %1240 = vmatpush1.msra.mxu0 %v674_v3  ;;  %v878_v0 = vld [vmem:[%s5469_s3 + $0x740] sm:$0xff]  ;;  %v747_v2 = vld [vmem:[%s5469_s3 + $0x328] sm:$0xff] }
  0x98   :  { %1311 = vmatpush1.msra.mxu1 %v802_v4  ;;  %1241 = vmatprep.subr.mxu0 %v671_v5  ;;  %v875_v3 = vld [vmem:[%s5469_s3 + $0x728] sm:$0xff]  ;;  %v746_v4 = vld [vmem:[%s5469_s3 + $0x320] sm:$0xff] }
  0x99   :  { %1312 = vmatprep.subr.mxu1 %v799_v6  ;;  %1242 = vmatpush1.msra.mxu0 %v670_v7  ;;  %v874_v5 = vld [vmem:[%s5469_s3 + $0x720] sm:$0xff]  ;;  %v743_v6 = vld [vmem:[%s5469_s3 + $0x308] sm:$0xff] }
  0x9a   :  { %1313 = vmatpush1.msra.mxu1 %v798_v9  ;;  %1243 = vmatprep.subr.mxu0 %v667_v11  ;;  %v871_v7 = vld [vmem:[%s5469_s3 + $0x708] sm:$0xff]  ;;  %v742_v9 = vld [vmem:[%s5469_s3 + $0x300] sm:$0xff] }
  0x9b   :  { %1314 = vmatprep.subr.mxu1 %v795_v12  ;;  %1244 = vmatpush1.msra.mxu0 %v666_v13  ;;  %v870_v11 = vld [vmem:[%s5469_s3 + $0x700] sm:$0xff]  ;;  %v739_v12 = vld [vmem:[%s5469_s3 + $0x2e8] sm:$0xff] }
  0x9c   :  { %1315 = vmatpush1.msra.mxu1 %v794_v14  ;;  %1245 = vmatprep.subr.mxu0 %v663_v15  ;;  %v867_v13 = vld [vmem:[%s5469_s3 + $0x6e8] sm:$0xff]  ;;  %v738_v14 = vld [vmem:[%s5469_s3 + $0x2e0] sm:$0xff] }
  0x9d   :  { %1316 = vmatprep.subr.mxu1 %v791_v17  ;;  %1246 = vmatpush1.msra.mxu0 %v662_v18  ;;  %v866_v15 = vld [vmem:[%s5469_s3 + $0x6e0] sm:$0xff]  ;;  %v735_v17 = vld [vmem:[%s5469_s3 + $0x2c8] sm:$0xff] }
  0x9e   :  { %1317 = vmatpush1.msra.mxu1 %v790_v20  ;;  %1247 = vmatprep.subr.mxu0 %v659_v21  ;;  %v863_v18 = vld [vmem:[%s5469_s3 + $0x6c8] sm:$0xff]  ;;  %v734_v20 = vld [vmem:[%s5469_s3 + $0x2c0] sm:$0xff] }
  0x9f   :  { %1318 = vmatprep.subr.mxu1 %v787_v22  ;;  %1248 = vmatpush1.msra.mxu0 %v658_v52  ;;  %v862_v21 = vld [vmem:[%s5469_s3 + $0x6c0] sm:$0xff]  ;;  %v731_v22 = vld [vmem:[%s5469_s3 + $0x2a8] sm:$0xff] }
  0xa0   :  { %1319 = vmatpush1.msra.mxu1 %v786_v23  ;;  %1249 = vmatprep.subr.mxu0 %v655_v24  ;;  %v859_v52 = vld [vmem:[%s5469_s3 + $0x6a8] sm:$0xff]  ;;  %v730_v23 = vld [vmem:[%s5469_s3 + $0x2a0] sm:$0xff] }
  0xa1   :  { %1320 = vmatprep.subr.mxu1 %v783_v26  ;;  %1250 = vmatpush1.msra.mxu0 %v654_v28  ;;  %v858_v24 = vld [vmem:[%s5469_s3 + $0x6a0] sm:$0xff]  ;;  %v727_v26 = vld [vmem:[%s5469_s3 + $0x288] sm:$0xff] }
  0xa2   :  { %1321 = vmatpush1.msra.mxu1 %v782_v29  ;;  %1251 = vmatprep.subr.mxu0 %v651_v30  ;;  %v855_v28 = vld [vmem:[%s5469_s3 + $0x688] sm:$0xff]  ;;  %v726_v29 = vld [vmem:[%s5469_s3 + $0x280] sm:$0xff] }
  0xa3   :  { %1322 = vmatprep.subr.mxu1 %v779_v31  ;;  %1252 = vmatpush1.msra.mxu0 %v650_v32  ;;  %v854_v30 = vld [vmem:[%s5469_s3 + $0x680] sm:$0xff]  ;;  %v723_v31 = vld [vmem:[%s5469_s3 + $0x268] sm:$0xff] }
  0xa4   :  { %1323 = vmatpush1.msra.mxu1 %v778_v33  ;;  %1253 = vmatprep.subr.mxu0 %v647_v34  ;;  %v851_v32 = vld [vmem:[%s5469_s3 + $0x668] sm:$0xff]  ;;  %v722_v33 = vld [vmem:[%s5469_s3 + $0x260] sm:$0xff] }
  0xa5   :  { %1324 = vmatprep.subr.mxu1 %v775_v35  ;;  %1254 = vmatpush1.msra.mxu0 %v646_v36  ;;  %v850_v34 = vld [vmem:[%s5469_s3 + $0x660] sm:$0xff]  ;;  %v719_v35 = vld [vmem:[%s5469_s3 + $0x248] sm:$0xff] }
  0xa6   :  { %1325 = vmatpush1.msra.mxu1 %v774_v37  ;;  %1255 = vmatprep.subr.mxu0 %v771_v38  ;;  %v847_v36 = vld [vmem:[%s5469_s3 + $0x648] sm:$0xff]  ;;  %v718_v37 = vld [vmem:[%s5469_s3 + $0x240] sm:$0xff] }
  0xa7   :  { %1326 = vmatprep.subr.mxu1 %v899_v39  ;;  %1256 = vmatpush2.msra.mxu0 %v770_v40  ;;  %v846_v38 = vld [vmem:[%s5469_s3 + $0x640] sm:$0xff]  ;;  %v715_v39 = vld [vmem:[%s5469_s3 + $0x228] sm:$0xff] }
  0xa8   :  { %1327 = vmatpush2.msra.mxu1 %v898_v42  ;;  %1257 = vmatprep.subr.mxu0 %v767_v43  ;;  %v843_v40 = vld [vmem:[%s5469_s3 + $0x628] sm:$0xff]  ;;  %v714_v42 = vld [vmem:[%s5469_s3 + $0x220] sm:$0xff] }
  0xa9   :  { %1328 = vmatprep.subr.mxu1 %v895_v44  ;;  %1258 = vmatpush2.msra.mxu0 %v766_v45  ;;  %v842_v43 = vld [vmem:[%s5469_s3 + $0x620] sm:$0xff]  ;;  %v711_v44 = vld [vmem:[%s5469_s3 + $0x208] sm:$0xff] }
  0xaa   :  { %1329 = vmatpush2.msra.mxu1 %v894_v46  ;;  %1259 = vmatprep.subr.mxu0 %v763_v47  ;;  %v839_v45 = vld [vmem:[%s5469_s3 + $0x608] sm:$0xff]  ;;  %v710_v46 = vld [vmem:[%s5469_s3 + $0x200] sm:$0xff] }
  0xab   :  { %1330 = vmatprep.subr.mxu1 %v891_v48  ;;  %1260 = vmatpush2.msra.mxu0 %v762_v49  ;;  %v838_v47 = vld [vmem:[%s5469_s3 + $0x600] sm:$0xff]  ;;  %v963_v48 = vld [vmem:[%s5469_s3 + $0x9e8] sm:$0xff] }
  0xac   :  { %1331 = vmatpush2.msra.mxu1 %v890_v50  ;;  %1261 = vmatprep.subr.mxu0 %v759_v51  ;;  %v1091_v49 = vld [vmem:[%s5469_s3 + $0xde8] sm:$0xff]  ;;  %v962_v50 = vld [vmem:[%s5469_s3 + $0x9e0] sm:$0xff] }
  0xad   :  { %1332 = vmatprep.subr.mxu1 %v887_v53  ;;  %1262 = vmatpush2.msra.mxu0 %v758_v54  ;;  %v1090_v51 = vld [vmem:[%s5469_s3 + $0xde0] sm:$0xff]  ;;  %v959_v53 = vld [vmem:[%s5469_s3 + $0x9c8] sm:$0xff] }
  0xae   :  { %1333 = vmatpush2.msra.mxu1 %v886_v55  ;;  %1263 = vmatprep.subr.mxu0 %v755_v56  ;;  %v1087_v54 = vld [vmem:[%s5469_s3 + $0xdc8] sm:$0xff]  ;;  %v958_v55 = vld [vmem:[%s5469_s3 + $0x9c0] sm:$0xff] }
  0xaf   :  { %1334 = vmatprep.subr.mxu1 %v883_v57  ;;  %1264 = vmatpush2.msra.mxu0 %v754_v58  ;;  %v1086_v56 = vld [vmem:[%s5469_s3 + $0xdc0] sm:$0xff]  ;;  %v955_v57 = vld [vmem:[%s5469_s3 + $0x9a8] sm:$0xff] }
  0xb0   :  { %1335 = vmatpush2.msra.mxu1 %v882_v59  ;;  %1265 = vmatprep.subr.mxu0 %v751_v60  ;;  %v1083_v58 = vld [vmem:[%s5469_s3 + $0xda8] sm:$0xff]  ;;  %v954_v59 = vld [vmem:[%s5469_s3 + $0x9a0] sm:$0xff] }
  0xb1   :  { %1336 = vmatprep.subr.mxu1 %v879_v61  ;;  %1266 = vmatpush2.msra.mxu0 %v750_v63  ;;  %v1082_v60 = vld [vmem:[%s5469_s3 + $0xda0] sm:$0xff]  ;;  %v951_v61 = vld [vmem:[%s5469_s3 + $0x988] sm:$0xff] }
  0xb2   :  { %1337 = vmatpush2.msra.mxu1 %v878_v0  ;;  %1267 = vmatprep.subr.mxu0 %v747_v2  ;;  %v1079_v63 = vld [vmem:[%s5469_s3 + $0xd88] sm:$0xff]  ;;  %v950_v0 = vld [vmem:[%s5469_s3 + $0x980] sm:$0xff] }
  0xb3   :  { %1338 = vmatprep.subr.mxu1 %v875_v3  ;;  %1268 = vmatpush2.msra.mxu0 %v746_v4  ;;  %v1078_v2 = vld [vmem:[%s5469_s3 + $0xd80] sm:$0xff]  ;;  %v947_v3 = vld [vmem:[%s5469_s3 + $0x968] sm:$0xff] }
  0xb4   :  { %1339 = vmatpush2.msra.mxu1 %v874_v5  ;;  %1269 = vmatprep.subr.mxu0 %v743_v6  ;;  %v1075_v4 = vld [vmem:[%s5469_s3 + $0xd68] sm:$0xff]  ;;  %v946_v5 = vld [vmem:[%s5469_s3 + $0x960] sm:$0xff] }
  0xb5   :  { %1340 = vmatprep.subr.mxu1 %v871_v7  ;;  %1270 = vmatpush2.msra.mxu0 %v742_v9  ;;  %v1074_v6 = vld [vmem:[%s5469_s3 + $0xd60] sm:$0xff]  ;;  %v943_v7 = vld [vmem:[%s5469_s3 + $0x948] sm:$0xff] }
  0xb6   :  { %1341 = vmatpush2.msra.mxu1 %v870_v11  ;;  %1271 = vmatprep.subr.mxu0 %v739_v12  ;;  %v1071_v9 = vld [vmem:[%s5469_s3 + $0xd48] sm:$0xff]  ;;  %v942_v11 = vld [vmem:[%s5469_s3 + $0x940] sm:$0xff] }
  0xb7   :  { %1342 = vmatprep.subr.mxu1 %v867_v13  ;;  %1272 = vmatpush2.msra.mxu0 %v738_v14  ;;  %v1070_v12 = vld [vmem:[%s5469_s3 + $0xd40] sm:$0xff]  ;;  %v939_v13 = vld [vmem:[%s5469_s3 + $0x928] sm:$0xff] }
  0xb8   :  { %1343 = vmatpush2.msra.mxu1 %v866_v15  ;;  %1273 = vmatprep.subr.mxu0 %v735_v17  ;;  %v1067_v14 = vld [vmem:[%s5469_s3 + $0xd28] sm:$0xff]  ;;  %v938_v15 = vld [vmem:[%s5469_s3 + $0x920] sm:$0xff] }
  0xb9   :  { %1344 = vmatprep.subr.mxu1 %v863_v18  ;;  %1274 = vmatpush2.msra.mxu0 %v734_v20  ;;  %v1066_v17 = vld [vmem:[%s5469_s3 + $0xd20] sm:$0xff]  ;;  %v935_v18 = vld [vmem:[%s5469_s3 + $0x908] sm:$0xff] }
  0xba   :  { %1345 = vmatpush2.msra.mxu1 %v862_v21  ;;  %1275 = vmatprep.subr.mxu0 %v731_v22  ;;  %v1063_v20 = vld [vmem:[%s5469_s3 + $0xd08] sm:$0xff]  ;;  %v934_v21 = vld [vmem:[%s5469_s3 + $0x900] sm:$0xff] }
  0xbb   :  { %1346 = vmatprep.subr.mxu1 %v859_v52  ;;  %1276 = vmatpush2.msra.mxu0 %v730_v23  ;;  %v1062_v22 = vld [vmem:[%s5469_s3 + $0xd00] sm:$0xff]  ;;  %v931_v52 = vld [vmem:[%s5469_s3 + $0x8e8] sm:$0xff] }
  0xbc   :  { %1347 = vmatpush2.msra.mxu1 %v858_v24  ;;  %1277 = vmatprep.subr.mxu0 %v727_v26  ;;  %v1059_v23 = vld [vmem:[%s5469_s3 + $0xce8] sm:$0xff]  ;;  %v930_v24 = vld [vmem:[%s5469_s3 + $0x8e0] sm:$0xff] }
  0xbd   :  { %1348 = vmatprep.subr.mxu1 %v855_v28  ;;  %1278 = vmatpush2.msra.mxu0 %v726_v29  ;;  %v1058_v26 = vld [vmem:[%s5469_s3 + $0xce0] sm:$0xff]  ;;  %v927_v28 = vld [vmem:[%s5469_s3 + $0x8c8] sm:$0xff] }
  0xbe   :  { %1349 = vmatpush2.msra.mxu1 %v854_v30  ;;  %1279 = vmatprep.subr.mxu0 %v723_v31  ;;  %v1055_v29 = vld [vmem:[%s5469_s3 + $0xcc8] sm:$0xff]  ;;  %v926_v30 = vld [vmem:[%s5469_s3 + $0x8c0] sm:$0xff] }
  0xbf   :  { %1350 = vmatprep.subr.mxu1 %v851_v32  ;;  %1280 = vmatpush2.msra.mxu0 %v722_v33  ;;  %v1054_v31 = vld [vmem:[%s5469_s3 + $0xcc0] sm:$0xff]  ;;  %v923_v32 = vld [vmem:[%s5469_s3 + $0x8a8] sm:$0xff] }
  0xc0   :  { %1351 = vmatpush2.msra.mxu1 %v850_v34  ;;  %1281 = vmatprep.subr.mxu0 %v719_v35  ;;  %v1051_v33 = vld [vmem:[%s5469_s3 + $0xca8] sm:$0xff]  ;;  %v922_v34 = vld [vmem:[%s5469_s3 + $0x8a0] sm:$0xff] }
  0xc1   :  { %1352 = vmatprep.subr.mxu1 %v847_v36  ;;  %1282 = vmatpush2.msra.mxu0 %v718_v37  ;;  %v1050_v35 = vld [vmem:[%s5469_s3 + $0xca0] sm:$0xff]  ;;  %v919_v36 = vld [vmem:[%s5469_s3 + $0x888] sm:$0xff] }
  0xc2   :  { %1353 = vmatpush2.msra.mxu1 %v846_v38  ;;  %1283 = vmatprep.subr.mxu0 %v715_v39  ;;  %v1047_v37 = vld [vmem:[%s5469_s3 + $0xc88] sm:$0xff]  ;;  %v918_v38 = vld [vmem:[%s5469_s3 + $0x880] sm:$0xff] }
  0xc3   :  { %1354 = vmatprep.subr.mxu1 %v843_v40  ;;  %1284 = vmatpush2.msra.mxu0 %v714_v42  ;;  %v1046_v39 = vld [vmem:[%s5469_s3 + $0xc80] sm:$0xff]  ;;  %v915_v40 = vld [vmem:[%s5469_s3 + $0x868] sm:$0xff] }
  0xc4   :  { %1355 = vmatpush2.msra.mxu1 %v842_v43  ;;  %1285 = vmatprep.subr.mxu0 %v711_v44  ;;  %v1043_v42 = vld [vmem:[%s5469_s3 + $0xc68] sm:$0xff]  ;;  %v914_v43 = vld [vmem:[%s5469_s3 + $0x860] sm:$0xff] }
  0xc5   :  { %1356 = vmatprep.subr.mxu1 %v839_v45  ;;  %1286 = vmatpush2.msra.mxu0 %v710_v46  ;;  %v1042_v44 = vld [vmem:[%s5469_s3 + $0xc60] sm:$0xff]  ;;  %v911_v45 = vld [vmem:[%s5469_s3 + $0x848] sm:$0xff] }
  0xc6   :  { %1287 = vmatprep.mubr.f32.mxu0 %v2869_v8  ;;  %1357 = vmatpush2.msra.mxu1 %v838_v47  ;;  %v1039_v46 = vld [vmem:[%s5469_s3 + $0xc48] sm:$0xff]  ;;  %v910_v47 = vld [vmem:[%s5469_s3 + $0x840] sm:$0xff] }
  0xc7   :  { %1358 = vmatprep.mubr.f32.mxu1 %v2876_v10  ;;  %1288 = vmatmul.mubr.f32.vlgmr.msra.gmra.mxu0 %v2838_v62 }
  0xc8   :  { %1359 = vmatmul.mubr.f32.vlgmr.msra.gmra.mxu1 %v2847_v1  ;;  %1365 = vmatprep.subr.mxu0 %v963_v48  ;;  %v1038_v48 = vld [vmem:[%s5469_s3 + $0xc40] sm:$0xff] }
  0xc9   :  { %1436 = vmatprep.subr.mxu1 %v1091_v49  ;;  %1366 = vmatpush1.msra.mxu0 %v962_v50  ;;  %v907_v49 = vld [vmem:[%s5469_s3 + $0x828] sm:$0xff] }
  0xca   :  { %1437 = vmatpush1.msra.mxu1 %v1090_v51  ;;  %1367 = vmatprep.subr.mxu0 %v959_v53  ;;  %v1035_v50 = vld [vmem:[%s5469_s3 + $0xc28] sm:$0xff]  ;;  %v906_v51 = vld [vmem:[%s5469_s3 + $0x820] sm:$0xff] }
  0xcb   :  { %1438 = vmatprep.subr.mxu1 %v1087_v54  ;;  %1368 = vmatpush1.msra.mxu0 %v958_v55  ;;  %v1034_v53 = vld [vmem:[%s5469_s3 + $0xc20] sm:$0xff]  ;;  %v903_v54 = vld [vmem:[%s5469_s3 + $0x808] sm:$0xff] }
  0xcc   :  { %1439 = vmatpush1.msra.mxu1 %v1086_v56  ;;  %1369 = vmatprep.subr.mxu0 %v955_v57  ;;  %v1031_v55 = vld [vmem:[%s5469_s3 + $0xc08] sm:$0xff] }
  0xcd   :  { %1440 = vmatprep.subr.mxu1 %v1083_v58  ;;  %1370 = vmatpush1.msra.mxu0 %v954_v59 }
  0xce   :  { %1441 = vmatpush1.msra.mxu1 %v1082_v60  ;;  %1371 = vmatprep.subr.mxu0 %v951_v61 }
  0xcf   :  { %1442 = vmatprep.subr.mxu1 %v1079_v63  ;;  %1372 = vmatpush1.msra.mxu0 %v950_v0 }
  0xd0   :  { %1443 = vmatpush1.msra.mxu1 %v1078_v2  ;;  %1373 = vmatprep.subr.mxu0 %v947_v3 }
  0xd1   :  { %1444 = vmatprep.subr.mxu1 %v1075_v4  ;;  %1374 = vmatpush1.msra.mxu0 %v946_v5 }
  0xd2   :  { %1445 = vmatpush1.msra.mxu1 %v1074_v6  ;;  %1375 = vmatprep.subr.mxu0 %v943_v7 }
  0xd3   :  { %1446 = vmatprep.subr.mxu1 %v1071_v9  ;;  %1376 = vmatpush1.msra.mxu0 %v942_v11 }
  0xd4   :  { %1447 = vmatpush1.msra.mxu1 %v1070_v12  ;;  %1377 = vmatprep.subr.mxu0 %v939_v13 }
  0xd5   :  { %1448 = vmatprep.subr.mxu1 %v1067_v14  ;;  %1378 = vmatpush1.msra.mxu0 %v938_v15 }
  0xd6   :  { %1449 = vmatpush1.msra.mxu1 %v1066_v17  ;;  %1379 = vmatprep.subr.mxu0 %v935_v18 }
  0xd7   :  { %1450 = vmatprep.subr.mxu1 %v1063_v20  ;;  %1380 = vmatpush1.msra.mxu0 %v934_v21 }
  0xd8   :  { %1451 = vmatpush1.msra.mxu1 %v1062_v22  ;;  %1381 = vmatprep.subr.mxu0 %v931_v52 }
  0xd9   :  { %1452 = vmatprep.subr.mxu1 %v1059_v23  ;;  %1382 = vmatpush1.msra.mxu0 %v930_v24 }
  0xda   :  { %1453 = vmatpush1.msra.mxu1 %v1058_v26  ;;  %1383 = vmatprep.subr.mxu0 %v927_v28 }
  0xdb   :  { %1454 = vmatprep.subr.mxu1 %v1055_v29  ;;  %1384 = vmatpush1.msra.mxu0 %v926_v30 }
  0xdc   :  { %1455 = vmatpush1.msra.mxu1 %v1054_v31  ;;  %1385 = vmatprep.subr.mxu0 %v923_v32 }
  0xdd   :  { %1456 = vmatprep.subr.mxu1 %v1051_v33  ;;  %1386 = vmatpush1.msra.mxu0 %v922_v34 }
  0xde   :  { %1457 = vmatpush1.msra.mxu1 %v1050_v35  ;;  %1387 = vmatprep.subr.mxu0 %v919_v36 }
  0xdf   :  { %1458 = vmatprep.subr.mxu1 %v1047_v37  ;;  %1388 = vmatpush1.msra.mxu0 %v918_v38 }
  0xe0   :  { %1459 = vmatpush1.msra.mxu1 %v1046_v39  ;;  %1389 = vmatprep.subr.mxu0 %v915_v40 }
  0xe1   :  { %1460 = vmatprep.subr.mxu1 %v1043_v42  ;;  %1390 = vmatpush1.msra.mxu0 %v914_v43 }
  0xe2   :  { %1461 = vmatpush1.msra.mxu1 %v1042_v44  ;;  %1391 = vmatprep.subr.mxu0 %v911_v45 }
  0xe3   :  { %1462 = vmatprep.subr.mxu1 %v1039_v46  ;;  %1392 = vmatpush1.msra.mxu0 %v910_v47 }
  0xe4   :  { %1463 = vmatpush1.msra.mxu1 %v1038_v48 }
  0xe5   :  { %16 = vsyncpa [#allocation3], 0  ;;  %1393 = vmatprep.subr.mxu0 %v907_v49  ;;  %1464 = vmatprep.subr.mxu1 %v1035_v50  ;;  %v902_v56 = vld [vmem:[%s5469_s3 + $0x800] sm:$0xff]  ;;  %v1027_v58 = vld [vmem:[%s5469_s3 + $0xbe8] sm:$0xff]  ;;  %vm1220_vm0 = vcmask 523264   ;;  %s2419_s18 = smov [#allocation2]  }
  0xe6   :  { %v1030_v57 = vld [vmem:[%s5469_s3 + $0xc00] sm:$0xff]  ;;  %1394 = vmatpush1.msra.mxu0 %v906_v51  ;;  %1465 = vmatpush1.msra.mxu1 %v1034_v53  ;;  %v1155_v59 = vld [vmem:[%s5469_s3 + $0xfe8] sm:$0xff]  ;;  %s2339_s19 = sshll.u32 %s2419_s18, 4  ;;  %s2340_s19 = int_to_ptr.vmem [resolvable:$true] %s2339_s19 }
  0xe7   :  { %1395 = vmatprep.subr.mxu0 %v903_v54  ;;  %1466 = vmatprep.subr.mxu1 %v1031_v55  ;;  %v1026_v60 = vld [vmem:[%s5469_s3 + $0xbe0] sm:$0xff]  ;;  %v1023_v63 = vld [vmem:[%s5469_s3 + $0xbc8] sm:$0xff]  ;;  %s2395_s20 = scalar_lea.vmem %s2340_s19, 32  ;;  %p2400_p1 = scmp.lt.s32.totalorder %s2340_s19, %s2340_s19 }
  0xe8   :  { %v1154_v61 = vld [vmem:[%s5469_s3 + $0xfe0] sm:$0xff]  ;;  %1396 = vmatpush1.msra.mxu0 %v902_v56  ;;  %1467 = vmatpush1.msra.mxu1 %v1030_v57  ;;  %v1151_v0 = vld [vmem:[%s5469_s3 + $0xfc8] sm:$0xff]  ;;  %p2396_p0 = scmp.ne.s32.totalorder %s2340_s19, %s2395_s20  ;;  %p2401_p2 = scmp.lt.s32.totalorder %s2395_s20, %s2395_s20 }
  0xe9   :  { %1397 = vmatprep.subr.mxu0 %v1027_v58  ;;  %1468 = vmatprep.subr.mxu1 %v1155_v59  ;;  %v1022_v2 = vld [vmem:[%s5469_s3 + $0xbc0] sm:$0xff]  ;;  %v1019_v4 = vld [vmem:[%s5469_s3 + $0xba8] sm:$0xff] }
  0xea   :  { %v1150_v3 = vld [vmem:[%s5469_s3 + $0xfc0] sm:$0xff]  ;;  %1398 = vmatpush2.msra.mxu0 %v1026_v60  ;;  %1469 = vmatpush2.msra.mxu1 %v1154_v61  ;;  %v1147_v5 = vld [vmem:[%s5469_s3 + $0xfa8] sm:$0xff]  ;;  %p2402_p3 = por %p2401_p2, %p2400_p1 }
  0xeb   :  { %1399 = vmatprep.subr.mxu0 %v1023_v63  ;;  %1470 = vmatprep.subr.mxu1 %v1151_v0  ;;  %v1018_v6 = vld [vmem:[%s5469_s3 + $0xba0] sm:$0xff]  ;;  %v1015_v9 = vld [vmem:[%s5469_s3 + $0xb88] sm:$0xff] }
  0xec   :  { %v1146_v7 = vld [vmem:[%s5469_s3 + $0xfa0] sm:$0xff]  ;;  %1400 = vmatpush2.msra.mxu0 %v1022_v2  ;;  %1471 = vmatpush2.msra.mxu1 %v1150_v3  ;;  %v1143_v11 = vld [vmem:[%s5469_s3 + $0xf88] sm:$0xff]  ;;  %p2403_p4 = pnand %p2402_p3, %p2396_p0 }
  0xed   :  { %1401 = vmatprep.subr.mxu0 %v1019_v4  ;;  %1472 = vmatprep.subr.mxu1 %v1147_v5  ;;  %v1014_v12 = vld [vmem:[%s5469_s3 + $0xb80] sm:$0xff]  ;;  %v1011_v14 = vld [vmem:[%s5469_s3 + $0xb68] sm:$0xff] }
  0xee   :  { %v1142_v13 = vld [vmem:[%s5469_s3 + $0xf80] sm:$0xff]  ;;  %1402 = vmatpush2.msra.mxu0 %v1018_v6  ;;  %1473 = vmatpush2.msra.mxu1 %v1146_v7  ;;  %v1139_v15 = vld [vmem:[%s5469_s3 + $0xf68] sm:$0xff]  ;;  %v837_v7 = vld [vmem:[%s5469_s3 + $0x5f8] sm:$0xff] }
  0xef   :  { %1403 = vmatprep.subr.mxu0 %v1015_v9  ;;  %1474 = vmatprep.subr.mxu1 %v1143_v11  ;;  %v1010_v17 = vld [vmem:[%s5469_s3 + $0xb60] sm:$0xff]  ;;  %v1007_v20 = vld [vmem:[%s5469_s3 + $0xb48] sm:$0xff]  ;;  %v836_v11 = vld [vmem:[%s5469_s3 + $0x5f0] sm:$0xff] }
  0xf0   :  { %v1138_v18 = vld [vmem:[%s5469_s3 + $0xf60] sm:$0xff]  ;;  %1404 = vmatpush2.msra.mxu0 %v1014_v12  ;;  %1475 = vmatpush2.msra.mxu1 %v1142_v13  ;;  %v1135_v21 = vld [vmem:[%s5469_s3 + $0xf48] sm:$0xff]  ;;  %v2418_v13 = vmov 0.0  }
  0xf1   :  { %1405 = vmatprep.subr.mxu0 %v1011_v14  ;;  %1476 = vmatprep.subr.mxu1 %v1139_v15  ;;  %v1006_v22 = vld [vmem:[%s5469_s3 + $0xb40] sm:$0xff]  ;;  %v1003_v23 = vld [vmem:[%s5469_s3 + $0xb28] sm:$0xff]  ;;  %v833_v14 = vld [vmem:[%s5469_s3 + $0x5d8] sm:$0xff] }
  0xf2   :  { %v1134_v52 = vld [vmem:[%s5469_s3 + $0xf40] sm:$0xff]  ;;  %1406 = vmatpush2.msra.mxu0 %v1010_v17  ;;  %1477 = vmatpush2.msra.mxu1 %v1138_v18  ;;  %v1131_v24 = vld [vmem:[%s5469_s3 + $0xf28] sm:$0xff]  ;;  %v832_v17 = vld [vmem:[%s5469_s3 + $0x5d0] sm:$0xff] }
  0xf3   :  { %1407 = vmatprep.subr.mxu0 %v1007_v20  ;;  %1478 = vmatprep.subr.mxu1 %v1135_v21  ;;  %v1002_v26 = vld [vmem:[%s5469_s3 + $0xb20] sm:$0xff]  ;;  %v999_v29 = vld [vmem:[%s5469_s3 + $0xb08] sm:$0xff]  ;;  %v829_v20 = vld [vmem:[%s5469_s3 + $0x5b8] sm:$0xff] }
  0xf4   :  { %v1130_v28 = vld [vmem:[%s5469_s3 + $0xf20] sm:$0xff]  ;;  %1408 = vmatpush2.msra.mxu0 %v1006_v22  ;;  %1479 = vmatpush2.msra.mxu1 %v1134_v52  ;;  %v1127_v30 = vld [vmem:[%s5469_s3 + $0xf08] sm:$0xff]  ;;  %v828_v22 = vld [vmem:[%s5469_s3 + $0x5b0] sm:$0xff] }
  0xf5   :  { %1409 = vmatprep.subr.mxu0 %v1003_v23  ;;  %1480 = vmatprep.subr.mxu1 %v1131_v24  ;;  %v998_v31 = vld [vmem:[%s5469_s3 + $0xb00] sm:$0xff]  ;;  %v995_v33 = vld [vmem:[%s5469_s3 + $0xae8] sm:$0xff]  ;;  %v825_v23 = vld [vmem:[%s5469_s3 + $0x598] sm:$0xff] }
  0xf6   :  { %v1126_v32 = vld [vmem:[%s5469_s3 + $0xf00] sm:$0xff]  ;;  %1410 = vmatpush2.msra.mxu0 %v1002_v26  ;;  %1481 = vmatpush2.msra.mxu1 %v1130_v28  ;;  %v1123_v34 = vld [vmem:[%s5469_s3 + $0xee8] sm:$0xff]  ;;  %v824_v26 = vld [vmem:[%s5469_s3 + $0x590] sm:$0xff] }
  0xf7   :  { %1411 = vmatprep.subr.mxu0 %v999_v29  ;;  %1482 = vmatprep.subr.mxu1 %v1127_v30  ;;  %v994_v35 = vld [vmem:[%s5469_s3 + $0xae0] sm:$0xff]  ;;  %v991_v37 = vld [vmem:[%s5469_s3 + $0xac8] sm:$0xff]  ;;  %v821_v29 = vld [vmem:[%s5469_s3 + $0x578] sm:$0xff] }
  0xf8   :  { %v1122_v36 = vld [vmem:[%s5469_s3 + $0xee0] sm:$0xff]  ;;  %1412 = vmatpush2.msra.mxu0 %v998_v31  ;;  %1483 = vmatpush2.msra.mxu1 %v1126_v32  ;;  %v1119_v38 = vld [vmem:[%s5469_s3 + $0xec8] sm:$0xff]  ;;  %v820_v31 = vld [vmem:[%s5469_s3 + $0x570] sm:$0xff] }
  0xf9   :  { %1413 = vmatprep.subr.mxu0 %v995_v33  ;;  %1484 = vmatprep.subr.mxu1 %v1123_v34  ;;  %v990_v39 = vld [vmem:[%s5469_s3 + $0xac0] sm:$0xff]  ;;  %v987_v42 = vld [vmem:[%s5469_s3 + $0xaa8] sm:$0xff]  ;;  %v817_v33 = vld [vmem:[%s5469_s3 + $0x558] sm:$0xff] }
  0xfa   :  { %v1118_v40 = vld [vmem:[%s5469_s3 + $0xec0] sm:$0xff]  ;;  %1414 = vmatpush2.msra.mxu0 %v994_v35  ;;  %1485 = vmatpush2.msra.mxu1 %v1122_v36  ;;  %v1115_v43 = vld [vmem:[%s5469_s3 + $0xea8] sm:$0xff]  ;;  %v816_v35 = vld [vmem:[%s5469_s3 + $0x550] sm:$0xff] }
  0xfb   :  { %1415 = vmatprep.subr.mxu0 %v991_v37  ;;  %1486 = vmatprep.subr.mxu1 %v1119_v38  ;;  %v986_v44 = vld [vmem:[%s5469_s3 + $0xaa0] sm:$0xff]  ;;  %v983_v46 = vld [vmem:[%s5469_s3 + $0xa88] sm:$0xff]  ;;  %v813_v37 = vld [vmem:[%s5469_s3 + $0x538] sm:$0xff] }
  0xfc   :  { %v1114_v45 = vld [vmem:[%s5469_s3 + $0xea0] sm:$0xff]  ;;  %1416 = vmatpush2.msra.mxu0 %v990_v39  ;;  %1487 = vmatpush2.msra.mxu1 %v1118_v40  ;;  %v1111_v47 = vld [vmem:[%s5469_s3 + $0xe88] sm:$0xff]  ;;  %v812_v39 = vld [vmem:[%s5469_s3 + $0x530] sm:$0xff] }
  0xfd   :  { %1417 = vmatprep.subr.mxu0 %v987_v42  ;;  %1488 = vmatprep.subr.mxu1 %v1115_v43  ;;  %v982_v48 = vld [vmem:[%s5469_s3 + $0xa80] sm:$0xff]  ;;  %v979_v50 = vld [vmem:[%s5469_s3 + $0xa68] sm:$0xff]  ;;  %v809_v42 = vld [vmem:[%s5469_s3 + $0x518] sm:$0xff] }
  0xfe   :  { %v1110_v49 = vld [vmem:[%s5469_s3 + $0xe80] sm:$0xff]  ;;  %1418 = vmatpush2.msra.mxu0 %v986_v44  ;;  %1489 = vmatpush2.msra.mxu1 %v1114_v45  ;;  %v1107_v51 = vld [vmem:[%s5469_s3 + $0xe68] sm:$0xff]  ;;  %v2350_v43 = vld.sshfl [vmem:[%s5466_s0 + $0x10] sm:$0x3 pattern:$0x76325410] }
  0xff   :  { %1419 = vmatprep.subr.mxu0 %v983_v46  ;;  %1490 = vmatprep.subr.mxu1 %v1111_v47  ;;  %v978_v53 = vld [vmem:[%s5469_s3 + $0xa60] sm:$0xff]  ;;  %v975_v55 = vld [vmem:[%s5469_s3 + $0xa48] sm:$0xff]  ;;  %v709_v44 = vld [vmem:[%s5469_s3 + $0x1f8] sm:$0xff] }
 0x100   :  { %v1106_v54 = vld [vmem:[%s5469_s3 + $0xe60] sm:$0xff]  ;;  %1420 = vmatpush2.msra.mxu0 %v982_v48  ;;  %1491 = vmatpush2.msra.mxu1 %v1110_v49  ;;  %v1103_v56 = vld [vmem:[%s5469_s3 + $0xe48] sm:$0xff]  ;;  %v708_v45 = vld [vmem:[%s5469_s3 + $0x1f0] sm:$0xff] }
 0x101   :  { %1421 = vmatprep.subr.mxu0 %v979_v50  ;;  %1492 = vmatprep.subr.mxu1 %v1107_v51  ;;  %v974_v57 = vld [vmem:[%s5469_s3 + $0xa40] sm:$0xff]  ;;  %v971_v59 = vld [vmem:[%s5469_s3 + $0xa28] sm:$0xff]  ;;  %v808_v46 = vld [vmem:[%s5469_s3 + $0x510] sm:$0xff] }
 0x102   :  { %v1102_v58 = vld [vmem:[%s5469_s3 + $0xe40] sm:$0xff]  ;;  %1422 = vmatpush2.msra.mxu0 %v978_v53  ;;  %1493 = vmatpush2.msra.mxu1 %v1106_v54  ;;  %v1099_v60 = vld [vmem:[%s5469_s3 + $0xe28] sm:$0xff]  ;;  %v705_v47 = vld [vmem:[%s5469_s3 + $0x1d8] sm:$0xff] }
 0x103   :  { %1423 = vmatprep.subr.mxu0 %v975_v55  ;;  %1494 = vmatprep.subr.mxu1 %v1103_v56  ;;  %v970_v61 = vld [vmem:[%s5469_s3 + $0xa20] sm:$0xff]  ;;  %v967_v0 = vld [vmem:[%s5469_s3 + $0xa08] sm:$0xff]  ;;  %v805_v48 = vld [vmem:[%s5469_s3 + $0x4f8] sm:$0xff] }
 0x104   :  { %v1098_v63 = vld [vmem:[%s5469_s3 + $0xe20] sm:$0xff]  ;;  %1424 = vmatpush2.msra.mxu0 %v974_v57  ;;  %1495 = vmatpush2.msra.mxu1 %v1102_v58  ;;  %v1095_v2 = vld [vmem:[%s5469_s3 + $0xe08] sm:$0xff]  ;;  %v704_v49 = vld [vmem:[%s5469_s3 + $0x1d0] sm:$0xff] }
 0x105   :  { %1425 = vmatprep.subr.mxu0 %v971_v59  ;;  %1496 = vmatprep.subr.mxu1 %v1099_v60  ;;  %v966_v3 = vld [vmem:[%s5469_s3 + $0xa00] sm:$0xff]  ;;  %v1187_v5 = vld [vmem:[%s5469_s3 + $0x10e8] sm:$0xff]  ;;  %v804_v50 = vld [vmem:[%s5469_s3 + $0x4f0] sm:$0xff] }
 0x106   :  { %1426 = vmatpush2.msra.mxu0 %v970_v61  ;;  %1497 = vmatpush2.msra.mxu1 %v1098_v63  ;;  %v1094_v4 = vld [vmem:[%s5469_s3 + $0xe00] sm:$0xff]  ;;  %v1183_v9 = vld [vmem:[%s5469_s3 + $0x10c8] sm:$0xff]  ;;  %v701_v51 = vld [vmem:[%s5469_s3 + $0x1b8] sm:$0xff] }
 0x107   :  { %1427 = vmatprep.subr.mxu0 %v967_v0  ;;  %1498 = vmatprep.subr.mxu1 %v1095_v2  ;;  %v1186_v6 = vld [vmem:[%s5469_s3 + $0x10e0] sm:$0xff]  ;;  %v1179_v15 = vld [vmem:[%s5469_s3 + $0x10a8] sm:$0xff]  ;;  %v801_v53 = vld [vmem:[%s5469_s3 + $0x4d8] sm:$0xff] }
 0x108   :  { %1428 = vmatpush2.msra.mxu0 %v966_v3  ;;  %1429 = vmatprep.mubr.f32.mxu0 %v3274_v25  ;;  %v1182_v12 = vld [vmem:[%s5469_s3 + $0x10c0] sm:$0xff]  ;;  %v1175_v21 = vld [vmem:[%s5469_s3 + $0x1088] sm:$0xff]  ;;  %v700_v54 = vld [vmem:[%s5469_s3 + $0x1b0] sm:$0xff] }
 0x109   :  { %1499 = vmatpush2.msra.mxu1 %v1094_v4  ;;  %1500 = vmatprep.mubr.f32.mxu1 %v3281_v27  ;;  %v1178_v18 = vld [vmem:[%s5469_s3 + $0x10a0] sm:$0xff]  ;;  %v1171_v24 = vld [vmem:[%s5469_s3 + $0x1068] sm:$0xff]  ;;  %v800_v55 = vld [vmem:[%s5469_s3 + $0x4d0] sm:$0xff] }
 0x10a   :  { %1430 = vmatmul.mubr.f32.vlgmr.msra.gmra.mxu0 %v3243_v16  ;;  %1501 = vmatmul.mubr.f32.vlgmr.msra.gmra.mxu1 %v3252_v19  ;;  %v1174_v52 = vld [vmem:[%s5469_s3 + $0x1080] sm:$0xff]  ;;  %v1167_v30 = vld [vmem:[%s5469_s3 + $0x1048] sm:$0xff]  ;;  %v697_v56 = vld [vmem:[%s5469_s3 + $0x198] sm:$0xff] }
 0x10b   :  { %1523 = vmatprep.subr.mxu1 %v1187_v5  ;;  %1571 = vmatprep.mubr.f32.mxu1 %v2418_v13  ;;  %v1170_v28 = vld [vmem:[%s5469_s3 + $0x1060] sm:$0xff]  ;;  %v1163_v34 = vld [vmem:[%s5469_s3 + $0x1028] sm:$0xff]  ;;  %v797_v57 = vld [vmem:[%s5469_s3 + $0x4b8] sm:$0xff] }
 0x10c   :  { %1524 = vmatpush1.msra.mxu1 %v1186_v6  ;;  %1649 = vmatprep.subr.mxu0 %v837_v7  ;;  %v1166_v32 = vld [vmem:[%s5469_s3 + $0x1040] sm:$0xff]  ;;  %v1159_v38 = vld [vmem:[%s5469_s3 + $0x1008] sm:$0xff]  ;;  %v696_v58 = vld [vmem:[%s5469_s3 + $0x190] sm:$0xff] }
 0x10d   :  { %1525 = vmatprep.subr.mxu1 %v1183_v9  ;;  %1650 = vmatpush1.msra.mxu0 %v836_v11  ;;  %v1162_v36 = vld [vmem:[%s5469_s3 + $0x1020] sm:$0xff]  ;;  %v796_v59 = vld [vmem:[%s5469_s3 + $0x4b0] sm:$0xff]  ;;  %v693_v60 = vld [vmem:[%s5469_s3 + $0x178] sm:$0xff] }
 0x10e   :  { %1526 = vmatpush1.msra.mxu1 %v1182_v12  ;;  %1651 = vmatprep.subr.mxu0 %v833_v14  ;;  %v1158_v40 = vld [vmem:[%s5469_s3 + $0x1000] sm:$0xff]  ;;  %v793_v61 = vld [vmem:[%s5469_s3 + $0x498] sm:$0xff]  ;;  %v692_v63 = vld [vmem:[%s5469_s3 + $0x170] sm:$0xff] }
 0x10f   :  { %1527 = vmatprep.subr.mxu1 %v1179_v15  ;;  %1652 = vmatpush1.msra.mxu0 %v832_v17  ;;  %v792_v0 = vld [vmem:[%s5469_s3 + $0x490] sm:$0xff]  ;;  %v689_v2 = vld [vmem:[%s5469_s3 + $0x158] sm:$0xff] }
 0x110   :  { %1528 = vmatpush1.msra.mxu1 %v1178_v18  ;;  %1653 = vmatprep.subr.mxu0 %v829_v20  ;;  %v789_v3 = vld [vmem:[%s5469_s3 + $0x478] sm:$0xff]  ;;  %v688_v4 = vld [vmem:[%s5469_s3 + $0x150] sm:$0xff] }
 0x111   :  { %1529 = vmatprep.subr.mxu1 %v1175_v21  ;;  %1654 = vmatpush1.msra.mxu0 %v828_v22  ;;  %v788_v5 = vld [vmem:[%s5469_s3 + $0x470] sm:$0xff]  ;;  %v685_v6 = vld [vmem:[%s5469_s3 + $0x138] sm:$0xff] }
 0x112   :  { %1530 = vmatpush1.msra.mxu1 %v1174_v52  ;;  %1655 = vmatprep.subr.mxu0 %v825_v23  ;;  %v785_v7 = vld [vmem:[%s5469_s3 + $0x458] sm:$0xff]  ;;  %v684_v9 = vld [vmem:[%s5469_s3 + $0x130] sm:$0xff] }
 0x113   :  { %1531 = vmatprep.subr.mxu1 %v1171_v24  ;;  %1656 = vmatpush1.msra.mxu0 %v824_v26  ;;  %v784_v11 = vld [vmem:[%s5469_s3 + $0x450] sm:$0xff]  ;;  %v681_v12 = vld [vmem:[%s5469_s3 + $0x118] sm:$0xff] }
 0x114   :  { %1532 = vmatpush1.msra.mxu1 %v1170_v28  ;;  %1657 = vmatprep.subr.mxu0 %v821_v29  ;;  %v781_v14 = vld [vmem:[%s5469_s3 + $0x438] sm:$0xff]  ;;  %v680_v15 = vld [vmem:[%s5469_s3 + $0x110] sm:$0xff] }
 0x115   :  { %1533 = vmatprep.subr.mxu1 %v1167_v30  ;;  %1658 = vmatpush1.msra.mxu0 %v820_v31  ;;  %v780_v17 = vld [vmem:[%s5469_s3 + $0x430] sm:$0xff]  ;;  %v677_v18 = vld [vmem:[%s5469_s3 + $0xf8] sm:$0xff] }
 0x116   :  { %1534 = vmatpush1.msra.mxu1 %v1166_v32  ;;  %1659 = vmatprep.subr.mxu0 %v817_v33  ;;  %v777_v20 = vld [vmem:[%s5469_s3 + $0x418] sm:$0xff]  ;;  %v676_v21 = vld [vmem:[%s5469_s3 + $0xf0] sm:$0xff] }
 0x117   :  { %1535 = vmatprep.subr.mxu1 %v1163_v34  ;;  %1660 = vmatpush1.msra.mxu0 %v816_v35  ;;  %v776_v22 = vld [vmem:[%s5469_s3 + $0x410] sm:$0xff]  ;;  %v673_v52 = vld [vmem:[%s5469_s3 + $0xd8] sm:$0xff] }
 0x118   :  { %1536 = vmatpush1.msra.mxu1 %v1162_v36  ;;  %1661 = vmatprep.subr.mxu0 %v813_v37  ;;  %v901_v23 = vld [vmem:[%s5469_s3 + $0x7f8] sm:$0xff]  ;;  %v672_v24 = vld [vmem:[%s5469_s3 + $0xd0] sm:$0xff] }
 0x119   :  { %1537 = vmatprep.subr.mxu1 %v1159_v38  ;;  %1662 = vmatpush1.msra.mxu0 %v812_v39  ;;  %v900_v26 = vld [vmem:[%s5469_s3 + $0x7f0] sm:$0xff]  ;;  %v669_v28 = vld [vmem:[%s5469_s3 + $0xb8] sm:$0xff] }
 0x11a   :  { %1538 = vmatpush1.msra.mxu1 %v1158_v40  ;;  %1663 = vmatprep.subr.mxu0 %v809_v42  ;;  %v897_v29 = vld [vmem:[%s5469_s3 + $0x7d8] sm:$0xff]  ;;  %v668_v30 = vld [vmem:[%s5469_s3 + $0xb0] sm:$0xff] }
 0x11b   :  { %2351 = vmatmul.mubr.msk.f32.vlgmr.msra.gmra.mxu1 %vm1220_vm0, %v2350_v43  ;;  %1578 = vmatprep.subr.mxu1 %v709_v44  ;;  %v896_v31 = vld [vmem:[%s5469_s3 + $0x7d0] sm:$0xff]  ;;  %v665_v32 = vld [vmem:[%s5469_s3 + $0x98] sm:$0xff] }
 0x11c   :  { %1579 = vmatpush1.msra.mxu1 %v708_v45  ;;  %1664 = vmatpush1.msra.mxu0 %v808_v46  ;;  %v893_v33 = vld [vmem:[%s5469_s3 + $0x7b8] sm:$0xff]  ;;  %v664_v34 = vld [vmem:[%s5469_s3 + $0x90] sm:$0xff] }
 0x11d   :  { %1580 = vmatprep.subr.mxu1 %v705_v47  ;;  %1665 = vmatprep.subr.mxu0 %v805_v48  ;;  %v892_v35 = vld [vmem:[%s5469_s3 + $0x7b0] sm:$0xff]  ;;  %v661_v36 = vld [vmem:[%s5469_s3 + $0x78] sm:$0xff] }
 0x11e   :  { %1581 = vmatpush1.msra.mxu1 %v704_v49  ;;  %1666 = vmatpush1.msra.mxu0 %v804_v50  ;;  %v889_v37 = vld [vmem:[%s5469_s3 + $0x798] sm:$0xff]  ;;  %v660_v38 = vld [vmem:[%s5469_s3 + $0x70] sm:$0xff] }
 0x11f   :  { %1582 = vmatprep.subr.mxu1 %v701_v51  ;;  %1667 = vmatprep.subr.mxu0 %v801_v53  ;;  %v888_v39 = vld [vmem:[%s5469_s3 + $0x790] sm:$0xff]  ;;  %v657_v40 = vld [vmem:[%s5469_s3 + $0x58] sm:$0xff] }
 0x120   :  { %1583 = vmatpush1.msra.mxu1 %v700_v54  ;;  %1668 = vmatpush1.msra.mxu0 %v800_v55  ;;  %v885_v42 = vld [vmem:[%s5469_s3 + $0x778] sm:$0xff]  ;;  %v656_v43 = vld [vmem:[%s5469_s3 + $0x50] sm:$0xff] }
 0x121   :  { %1584 = vmatprep.subr.mxu1 %v697_v56  ;;  %1669 = vmatprep.subr.mxu0 %v797_v57  ;;  %v884_v44 = vld [vmem:[%s5469_s3 + $0x770] sm:$0xff]  ;;  %v653_v45 = vld [vmem:[%s5469_s3 + $0x38] sm:$0xff]  ;;  %v4360_v56 = vsub.s32 0, %v2781_v41 }
 0x122   :  { %1585 = vmatpush1.msra.mxu1 %v696_v58  ;;  %1670 = vmatpush1.msra.mxu0 %v796_v59  ;;  %v881_v46 = vld [vmem:[%s5469_s3 + $0x758] sm:$0xff]  ;;  %v652_v47 = vld [vmem:[%s5469_s3 + $0x30] sm:$0xff]  ;;  %v294_v59 = vld [vmem:[%s5468_s2] sm:$0x3] }
 0x123   :  { %1586 = vmatprep.subr.mxu1 %v693_v60  ;;  %1671 = vmatprep.subr.mxu0 %v793_v61  ;;  %v880_v48 = vld [vmem:[%s5469_s3 + $0x750] sm:$0xff]  ;;  %v649_v49 = vld [vmem:[%s5469_s3 + $0x18] sm:$0xff] }
 0x124   :  { %1587 = vmatpush1.msra.mxu1 %v692_v63  ;;  %1672 = vmatpush1.msra.mxu0 %v792_v0  ;;  %v877_v50 = vld [vmem:[%s5469_s3 + $0x738] sm:$0xff]  ;;  %v648_v51 = vld [vmem:[%s5469_s3 + $0x10] sm:$0xff]  ;;  %v4378_v63 = vsub.s32 1, %v2781_v41 }
 0x125   :  { %1588 = vmatprep.subr.mxu1 %v689_v2  ;;  %1673 = vmatprep.subr.mxu0 %v789_v3  ;;  %v876_v53 = vld [vmem:[%s5469_s3 + $0x730] sm:$0xff]  ;;  %v773_v54 = vld [vmem:[%s5469_s3 + $0x3f8] sm:$0xff]  ;;  %v416_v3 = vpop.f32.mrf.mxu0 }
 0x126   :  { %1589 = vmatpush1.msra.mxu1 %v688_v4  ;;  %1674 = vmatpush1.msra.mxu0 %v788_v5  ;;  %v873_v55 = vld [vmem:[%s5469_s3 + $0x718] sm:$0xff]  ;;  %v772_v57 = vld [vmem:[%s5469_s3 + $0x3f0] sm:$0xff] }
 0x127   :  { %1590 = vmatprep.subr.mxu1 %v685_v6  ;;  %1675 = vmatprep.subr.mxu0 %v785_v7  ;;  %v872_v58 = vld [vmem:[%s5469_s3 + $0x710] sm:$0xff]  ;;  %v769_v60 = vld [vmem:[%s5469_s3 + $0x3d8] sm:$0xff]  ;;  %v299_v6 = vrot.slane %v294_v59, %v4360_v56 }
 0x128   :  { %1591 = vmatpush1.msra.mxu1 %v684_v9  ;;  %1676 = vmatpush1.msra.mxu0 %v784_v11  ;;  %v869_v61 = vld [vmem:[%s5469_s3 + $0x6f8] sm:$0xff]  ;;  %v768_v0 = vld [vmem:[%s5469_s3 + $0x3d0] sm:$0xff] }
 0x129   :  { %1592 = vmatprep.subr.mxu1 %v681_v12  ;;  %1677 = vmatprep.subr.mxu0 %v781_v14  ;;  %v868_v2 = vld [vmem:[%s5469_s3 + $0x6f0] sm:$0xff]  ;;  %v765_v4 = vld [vmem:[%s5469_s3 + $0x3b8] sm:$0xff]  ;;  %v303_v14 = vrot.slane %v294_v59, %v4378_v63 }
 0x12a   :  { %1593 = vmatpush1.msra.mxu1 %v680_v15  ;;  %1678 = vmatpush1.msra.mxu0 %v780_v17  ;;  %v865_v5 = vld [vmem:[%s5469_s3 + $0x6d8] sm:$0xff]  ;;  %v764_v7 = vld [vmem:[%s5469_s3 + $0x3b0] sm:$0xff] }
 0x12b   :  { %1594 = vmatprep.subr.mxu1 %v677_v18  ;;  %1679 = vmatprep.subr.mxu0 %v777_v20  ;;  %v864_v9 = vld [vmem:[%s5469_s3 + $0x6d0] sm:$0xff]  ;;  %v761_v11 = vld [vmem:[%s5469_s3 + $0x398] sm:$0xff]  ;;  %v487_v18 = vpop.f32.mrf.mxu1  ;;  %v418_v20 = vpop.f32.mrf.mxu0 }
 0x12c   :  { %1595 = vmatpush1.msra.mxu1 %v676_v21  ;;  %1680 = vmatpush1.msra.mxu0 %v776_v22  ;;  %v861_v12 = vld [vmem:[%s5469_s3 + $0x6b8] sm:$0xff]  ;;  %v760_v15 = vld [vmem:[%s5469_s3 + $0x390] sm:$0xff] }
 0x12d   :  { %1596 = vmatprep.subr.mxu1 %v673_v52  ;;  %1681 = vmatprep.subr.mxu0 %v901_v23  ;;  %v860_v17 = vld [vmem:[%s5469_s3 + $0x6b0] sm:$0xff]  ;;  %v757_v21 = vld [vmem:[%s5469_s3 + $0x378] sm:$0xff]  ;;  %v417_v52 = vadd.f32 %v416_v3, %v299_v6 }
 0x12e   :  { %1597 = vmatpush1.msra.mxu1 %v672_v24  ;;  %1682 = vmatpush2.msra.mxu0 %v900_v26  ;;  %v857_v22 = vld [vmem:[%s5469_s3 + $0x698] sm:$0xff]  ;;  %v756_v23 = vld [vmem:[%s5469_s3 + $0x370] sm:$0xff] }
 0x12f   :  { %1598 = vmatprep.subr.mxu1 %v669_v28  ;;  %1683 = vmatprep.subr.mxu0 %v897_v29  ;;  %v856_v24 = vld [vmem:[%s5469_s3 + $0x690] sm:$0xff]  ;;  %v753_v26 = vld [vmem:[%s5469_s3 + $0x358] sm:$0xff]  ;;  %v419_v29 = vadd.f32 %v418_v20, %v303_v14 }
 0x130   :  { %1599 = vmatpush1.msra.mxu1 %v668_v30  ;;  %1684 = vmatpush2.msra.mxu0 %v896_v31  ;;  %v853_v28 = vld [vmem:[%s5469_s3 + $0x678] sm:$0xff]  ;;  %v752_v30 = vld [vmem:[%s5469_s3 + $0x350] sm:$0xff] }
 0x131   :  { %1600 = vmatprep.subr.mxu1 %v665_v32  ;;  %1685 = vmatprep.subr.mxu0 %v893_v33  ;;  %v852_v31 = vld [vmem:[%s5469_s3 + $0x670] sm:$0xff]  ;;  %v489_v32 = vpop.f32.mrf.mxu1  ;;  %v749_v33 = vld [vmem:[%s5469_s3 + $0x338] sm:$0xff] }
 0x132   :  { %1601 = vmatpush1.msra.mxu1 %v664_v34  ;;  %1686 = vmatpush2.msra.mxu0 %v892_v35  ;;  %v849_v34 = vld [vmem:[%s5469_s3 + $0x658] sm:$0xff]  ;;  %v488_v35 = vadd.f32 %v487_v18, %v417_v52  ;;  %v736_v59 = vld [vmem:[%s5469_s3 + $0x2d0] sm:$0xff] }
 0x133   :  { %1602 = vmatprep.subr.mxu1 %v661_v36  ;;  %1687 = vmatprep.subr.mxu0 %v889_v37  ;;  %v748_v36 = vld [vmem:[%s5469_s3 + $0x330] sm:$0xff]  ;;  %v1081_v14 = vld [vmem:[%s5469_s3 + $0xd98] sm:$0xff] }
 0x134   :  { %1603 = vmatpush1.msra.mxu1 %v660_v38  ;;  %1688 = vmatpush2.msra.mxu0 %v888_v39  ;;  %v848_v37 = vld [vmem:[%s5469_s3 + $0x650] sm:$0xff]  ;;  %v745_v38 = vld [vmem:[%s5469_s3 + $0x318] sm:$0xff] }
 0x135   :  { %1604 = vmatprep.subr.mxu1 %v657_v40  ;;  %1689 = vmatprep.subr.mxu0 %v885_v42  ;;  %v845_v42 = vld [vmem:[%s5469_s3 + $0x638] sm:$0xff]  ;;  %v1092_v3 = vld [vmem:[%s5469_s3 + $0xdf0] sm:$0xff] }
 0x136   :  { %1605 = vmatpush1.msra.mxu1 %v656_v43  ;;  %1690 = vmatpush2.msra.mxu0 %v884_v44  ;;  %v490_v43 = vadd.f32 %v489_v32, %v419_v29  ;;  %v744_v44 = vld [vmem:[%s5469_s3 + $0x310] sm:$0xff]  ;;  %v1077_v20 = vld [vmem:[%s5469_s3 + $0xd78] sm:$0xff] }
 0x137   :  { %1606 = vmatprep.subr.mxu1 %v653_v45  ;;  %1691 = vmatprep.subr.mxu0 %v881_v46  ;;  %v741_v46 = vld [vmem:[%s5469_s3 + $0x2f8] sm:$0xff]  ;;  %v1088_v6 = vld [vmem:[%s5469_s3 + $0xdd0] sm:$0xff] }
 0x138   :  { %1607 = vmatpush1.msra.mxu1 %v652_v47  ;;  %1692 = vmatpush2.msra.mxu0 %v880_v48  ;;  %v844_v48 = vld [vmem:[%s5469_s3 + $0x630] sm:$0xff]  ;;  %v961_v29 = vld [vmem:[%s5469_s3 + $0x9d8] sm:$0xff] }
 0x139   :  { %1608 = vmatprep.subr.mxu1 %v649_v49  ;;  %1693 = vmatprep.subr.mxu0 %v877_v50  ;;  %v740_v49 = vld [vmem:[%s5469_s3 + $0x2f0] sm:$0xff] }
 0x13a   :  { %1609 = vmatpush1.msra.mxu1 %v648_v51  ;;  %1694 = vmatpush2.msra.mxu0 %v876_v53  ;;  %v841_v51 = vld [vmem:[%s5469_s3 + $0x618] sm:$0xff]  ;;  %v716_v18 = vld [vmem:[%s5469_s3 + $0x230] sm:$0xff] }
 0x13b   :  { %1610 = vmatprep.subr.mxu1 %v773_v54  ;;  %1695 = vmatprep.subr.mxu0 %v873_v55  ;;  %v737_v54 = vld [vmem:[%s5469_s3 + $0x2d8] sm:$0xff]  ;;  %v840_v55 = vld [vmem:[%s5469_s3 + $0x610] sm:$0xff] }
 0x13c   :  { %1611 = vmatpush2.msra.mxu1 %v772_v57  ;;  %1696 = vmatpush2.msra.mxu0 %v872_v58  ;;  %v712_v52 = vld [vmem:[%s5469_s3 + $0x210] sm:$0xff] }
 0x13d   :  { %1612 = vmatprep.subr.mxu1 %v769_v60  ;;  %1697 = vmatprep.subr.mxu0 %v869_v61  ;;  %v733_v60 = vld [vmem:[%s5469_s3 + $0x2b8] sm:$0xff]  ;;  %v1068_v32 = vld [vmem:[%s5469_s3 + $0xd30] sm:$0xff] }
 0x13e   :  { %1613 = vmatpush2.msra.mxu1 %v768_v0  ;;  %1698 = vmatpush2.msra.mxu0 %v868_v2  ;;  %v1093_v0 = vld [vmem:[%s5469_s3 + $0xdf8] sm:$0xff] }
 0x13f   :  { %1614 = vmatprep.subr.mxu1 %v765_v4  ;;  %1699 = vmatprep.subr.mxu0 %v865_v5  ;;  %v729_v2 = vld [vmem:[%s5469_s3 + $0x298] sm:$0xff]  ;;  %v728_v4 = vld [vmem:[%s5469_s3 + $0x290] sm:$0xff] }
 0x140   :  { %1615 = vmatpush2.msra.mxu1 %v764_v7  ;;  %1700 = vmatpush2.msra.mxu0 %v864_v9  ;;  %v1089_v5 = vld [vmem:[%s5469_s3 + $0xdd8] sm:$0xff]  ;;  %v724_v7 = vld [vmem:[%s5469_s3 + $0x270] sm:$0xff] }
 0x141   :  { %1616 = vmatprep.subr.mxu1 %v761_v11  ;;  %1701 = vmatprep.subr.mxu0 %v861_v12  ;;  %v721_v9 = vld [vmem:[%s5469_s3 + $0x258] sm:$0xff]  ;;  %v1084_v11 = vld [vmem:[%s5469_s3 + $0xdb0] sm:$0xff] }
 0x142   :  { %1617 = vmatpush2.msra.mxu1 %v760_v15  ;;  %1702 = vmatpush2.msra.mxu0 %v860_v17  ;;  %v720_v12 = vld [vmem:[%s5469_s3 + $0x250] sm:$0xff]  ;;  %v717_v15 = vld [vmem:[%s5469_s3 + $0x238] sm:$0xff] }
 0x143   :  { %1618 = vmatprep.subr.mxu1 %v757_v21  ;;  %1703 = vmatprep.subr.mxu0 %v857_v22  ;;  %v1080_v17 = vld [vmem:[%s5469_s3 + $0xd90] sm:$0xff]  ;;  %v713_v21 = vld [vmem:[%s5469_s3 + $0x218] sm:$0xff] }
 0x144   :  { %1619 = vmatpush2.msra.mxu1 %v756_v23  ;;  %1704 = vmatpush2.msra.mxu0 %v856_v24  ;;  %v1076_v22 = vld [vmem:[%s5469_s3 + $0xd70] sm:$0xff]  ;;  %v1073_v23 = vld [vmem:[%s5469_s3 + $0xd58] sm:$0xff] }
 0x145   :  { %1620 = vmatprep.subr.mxu1 %v753_v26  ;;  %1705 = vmatprep.subr.mxu0 %v853_v28  ;;  %v558_v39 = vpop.f32.mrf.mxu0  ;;  %v965_v24 = vld [vmem:[%s5469_s3 + $0x9f8] sm:$0xff]  ;;  %v964_v26 = vld [vmem:[%s5469_s3 + $0x9f0] sm:$0xff] }
 0x146   :  { %1621 = vmatpush2.msra.mxu1 %v752_v30  ;;  %v629_v40 = vpop.f32.mrf.mxu1  ;;  %1706 = vmatpush2.msra.mxu0 %v852_v31  ;;  %v559_v45 = vadd.f32 %v558_v39, %v488_v35  ;;  %v1072_v28 = vld [vmem:[%s5469_s3 + $0xd50] sm:$0xff]  ;;  %v1069_v30 = vld [vmem:[%s5469_s3 + $0xd38] sm:$0xff] }
 0x147   :  { %1622 = vmatprep.subr.mxu1 %v749_v33  ;;  %1707 = vmatprep.subr.mxu0 %v849_v34  ;;  %v560_v47 = vpop.f32.mrf.mxu0  ;;  %v960_v31 = vld [vmem:[%s5469_s3 + $0x9d0] sm:$0xff]  ;;  %v957_v33 = vld [vmem:[%s5469_s3 + $0x9b8] sm:$0xff] }
 0x148   :  { %1623 = vmatpush2.msra.mxu1 %v748_v36  ;;  %1708 = vmatpush2.msra.mxu0 %v848_v37  ;;  %v561_v50 = vadd.f32 %v560_v47, %v490_v43  ;;  %v631_v53 = vpop.f32.mrf.mxu1  ;;  %v630_v57 = vadd.f32 %v629_v40, %v559_v45  ;;  %v1065_v34 = vld [vmem:[%s5469_s3 + $0xd18] sm:$0xff]  ;;  %v1064_v35 = vld [vmem:[%s5469_s3 + $0xd10] sm:$0xff] }
 0x149   :  { %1624 = vmatprep.subr.mxu1 %v745_v38  ;;  %1709 = vmatprep.subr.mxu0 %v845_v42  ;;  %v953_v36 = vld [vmem:[%s5469_s3 + $0x998] sm:$0xff]  ;;  %v952_v38 = vld [vmem:[%s5469_s3 + $0x990] sm:$0xff] }
 0x14a   :  { %1625 = vmatpush2.msra.mxu1 %v744_v44  ;;  %1642 = vmatprep.mubr.f32.mxu1 %v2869_v8  ;;  %v632_v58 = vadd.f32 %v631_v53, %v561_v50  ;;  %v732_v8 = vld [vmem:[%s5469_s3 + $0x2b0] sm:$0xff]  ;;  %v1061_v37 = vld [vmem:[%s5469_s3 + $0xcf8] sm:$0xff] }
 0x14b   :  { %1626 = vmatprep.subr.mxu1 %v741_v46  ;;  %1710 = vmatpush2.msra.mxu0 %v844_v48  ;;  %v1060_v39 = vld [vmem:[%s5469_s3 + $0xcf0] sm:$0xff]  ;;  %v949_v40 = vld [vmem:[%s5469_s3 + $0x978] sm:$0xff] }
 0x14c   :  { %1627 = vmatpush2.msra.mxu1 %v740_v49  ;;  %1711 = vmatprep.subr.mxu0 %v841_v51  ;;  %v636_v61 = vcombine.low %v630_v57, %v632_v58  ;;  %v1057_v42 = vld [vmem:[%s5469_s3 + $0xcd8] sm:$0xff]  ;;  %v948_v43 = vld [vmem:[%s5469_s3 + $0x970] sm:$0xff] }
 0x14d   :  { %1628 = vmatprep.subr.mxu1 %v737_v54  ;;  %1712 = vmatpush2.msra.mxu0 %v840_v55  ;;  %v1056_v44 = vld [vmem:[%s5469_s3 + $0xcd0] sm:$0xff]  ;;  %v945_v45 = vld [vmem:[%s5469_s3 + $0x958] sm:$0xff] }
 0x14e   :  { %1629 = vmatpush2.msra.mxu1 %v736_v59  ;;  %1713 = vmatprep.mubr.f32.mxu0 %v2876_v10  ;;  %2349 = vst.sshfl [vmem:[%s5475_s9] sm:$0x33 pattern:$0x76325410] %v636_v61  ;;  %v725_v10 = vld [vmem:[%s5469_s3 + $0x278] sm:$0xff]  ;;  %v944_v47 = vld [vmem:[%s5469_s3 + $0x950] sm:$0xff] }
 0x14f   :  { %1630 = vmatprep.subr.mxu1 %v733_v60  ;;  %1714 = vmatmul.mubr.f32.vlgmr.msra.gmra.mxu0 %v2847_v1  ;;  %v1085_v1 = vld [vmem:[%s5469_s3 + $0xdb8] sm:$0xff]  ;;  %v1052_v48 = vld [vmem:[%s5469_s3 + $0xcb0] sm:$0xff] }
 0x150   :  { %1631 = vmatpush2.msra.mxu1 %v732_v8  ;;  %1791 = vmatprep.subr.mxu0 %v1093_v0  ;;  %v1053_v46 = vld [vmem:[%s5469_s3 + $0xcb8] sm:$0xff]  ;;  %v940_v51 = vld [vmem:[%s5469_s3 + $0x930] sm:$0xff] }
 0x151   :  { %1632 = vmatprep.subr.mxu1 %v729_v2  ;;  %1792 = vmatpush1.msra.mxu0 %v1092_v3  ;;  %v941_v49 = vld [vmem:[%s5469_s3 + $0x938] sm:$0xff]  ;;  %v1048_v53 = vld [vmem:[%s5469_s3 + $0xc90] sm:$0xff] }
 0x152   :  { %1633 = vmatpush2.msra.mxu1 %v728_v4  ;;  %1793 = vmatprep.subr.mxu0 %v1089_v5  ;;  %v1049_v50 = vld [vmem:[%s5469_s3 + $0xc98] sm:$0xff]  ;;  %v936_v57 = vld [vmem:[%s5469_s3 + $0x910] sm:$0xff] }
 0x153   :  { %1634 = vmatprep.subr.mxu1 %v725_v10  ;;  %1794 = vmatpush1.msra.mxu0 %v1088_v6  ;;  %v937_v54 = vld [vmem:[%s5469_s3 + $0x918] sm:$0xff]  ;;  %v1044_v58 = vld [vmem:[%s5469_s3 + $0xc70] sm:$0xff] }
 0x154   :  { %1635 = vmatpush2.msra.mxu1 %v724_v7  ;;  %1795 = vmatprep.subr.mxu0 %v1085_v1  ;;  %v1045_v55 = vld [vmem:[%s5469_s3 + $0xc78] sm:$0xff]  ;;  %v932_v61 = vld [vmem:[%s5469_s3 + $0x8f0] sm:$0xff] }
 0x155   :  { %1636 = vmatprep.subr.mxu1 %v721_v9  ;;  %1796 = vmatpush1.msra.mxu0 %v1084_v11  ;;  %v933_v59 = vld [vmem:[%s5469_s3 + $0x8f8] sm:$0xff]  ;;  %v1040_v8 = vld [vmem:[%s5469_s3 + $0xc50] sm:$0xff] }
 0x156   :  { %1637 = vmatpush2.msra.mxu1 %v720_v12  ;;  %1797 = vmatprep.subr.mxu0 %v1081_v14  ;;  %v1041_v60 = vld [vmem:[%s5469_s3 + $0xc58] sm:$0xff]  ;;  %v928_v3 = vld [vmem:[%s5469_s3 + $0x8d0] sm:$0xff] }
 0x157   :  { %1638 = vmatprep.subr.mxu1 %v717_v15  ;;  %1798 = vmatpush1.msra.mxu0 %v1080_v17  ;;  %v929_v0 = vld [vmem:[%s5469_s3 + $0x8d8] sm:$0xff]  ;;  %v1036_v4 = vld [vmem:[%s5469_s3 + $0xc30] sm:$0xff] }
 0x158   :  { %1639 = vmatpush2.msra.mxu1 %v716_v18  ;;  %1799 = vmatprep.subr.mxu0 %v1077_v20  ;;  %v1037_v2 = vld [vmem:[%s5469_s3 + $0xc38] sm:$0xff]  ;;  %v924_v6 = vld [vmem:[%s5469_s3 + $0x8b0] sm:$0xff] }
 0x159   :  { %1640 = vmatprep.subr.mxu1 %v713_v21  ;;  %1800 = vmatpush1.msra.mxu0 %v1076_v22  ;;  %v925_v5 = vld [vmem:[%s5469_s3 + $0x8b8] sm:$0xff]  ;;  %v1032_v7 = vld [vmem:[%s5469_s3 + $0xc10] sm:$0xff] }
 0x15a   :  { %1641 = vmatpush2.msra.mxu1 %v712_v52  ;;  %1801 = vmatprep.subr.mxu0 %v1073_v23  ;;  %v1033_v10 = vld [vmem:[%s5469_s3 + $0xc18] sm:$0xff]  ;;  %v920_v11 = vld [vmem:[%s5469_s3 + $0x890] sm:$0xff] }
 0x15b   :  { %1643 = vmatmul.mubr.f32.vlgmr.msra.gmra.mxu1 %v2838_v62  ;;  %1720 = vmatprep.subr.mxu1 %v965_v24  ;;  %v956_v62 = vld [vmem:[%s5469_s3 + $0x9b0] sm:$0xff]  ;;  %v921_v1 = vld [vmem:[%s5469_s3 + $0x898] sm:$0xff] }
 0x15c   :  { %1721 = vmatpush1.msra.mxu1 %v964_v26  ;;  %1802 = vmatpush1.msra.mxu0 %v1072_v28  ;;  %v1157_v9 = vld [vmem:[%s5469_s3 + $0xff8] sm:$0xff]  ;;  %v1156_v12 = vld [vmem:[%s5469_s3 + $0xff0] sm:$0xff] }
 0x15d   :  { %1722 = vmatprep.subr.mxu1 %v961_v29  ;;  %1803 = vmatprep.subr.mxu0 %v1069_v30  ;;  %v917_v14 = vld [vmem:[%s5469_s3 + $0x878] sm:$0xff]  ;;  %v916_v17 = vld [vmem:[%s5469_s3 + $0x870] sm:$0xff] }
 0x15e   :  { %1723 = vmatpush1.msra.mxu1 %v960_v31  ;;  %1804 = vmatpush1.msra.mxu0 %v1068_v32  ;;  %v1153_v15 = vld [vmem:[%s5469_s3 + $0xfd8] sm:$0xff]  ;;  %v1152_v18 = vld [vmem:[%s5469_s3 + $0xfd0] sm:$0xff] }
 0x15f   :  { %1724 = vmatprep.subr.mxu1 %v957_v33  ;;  %1805 = vmatprep.subr.mxu0 %v1065_v34  ;;  %v913_v20 = vld [vmem:[%s5469_s3 + $0x858] sm:$0xff]  ;;  %v912_v22 = vld [vmem:[%s5469_s3 + $0x850] sm:$0xff] }
 0x160   :  { %1725 = vmatpush1.msra.mxu1 %v956_v62  ;;  %1806 = vmatpush1.msra.mxu0 %v1064_v35  ;;  %v1149_v21 = vld [vmem:[%s5469_s3 + $0xfb8] sm:$0xff]  ;;  %v1148_v52 = vld [vmem:[%s5469_s3 + $0xfb0] sm:$0xff] }
 0x161   :  { %1726 = vmatprep.subr.mxu1 %v953_v36  ;;  %1807 = vmatprep.subr.mxu0 %v1061_v37  ;;  %v909_v23 = vld [vmem:[%s5469_s3 + $0x838] sm:$0xff]  ;;  %v908_v26 = vld [vmem:[%s5469_s3 + $0x830] sm:$0xff] }
 0x162   :  { %1727 = vmatpush1.msra.mxu1 %v952_v38  ;;  %1808 = vmatpush1.msra.mxu0 %v1060_v39  ;;  %v1145_v24 = vld [vmem:[%s5469_s3 + $0xf98] sm:$0xff]  ;;  %v1144_v28 = vld [vmem:[%s5469_s3 + $0xf90] sm:$0xff] }
 0x163   :  { %1728 = vmatprep.subr.mxu1 %v949_v40  ;;  %1809 = vmatprep.subr.mxu0 %v1057_v42  ;;  %v905_v29 = vld [vmem:[%s5469_s3 + $0x818] sm:$0xff]  ;;  %v904_v31 = vld [vmem:[%s5469_s3 + $0x810] sm:$0xff] }
 0x164   :  { %1729 = vmatpush1.msra.mxu1 %v948_v43  ;;  %1810 = vmatpush1.msra.mxu0 %v1056_v44  ;;  %v1141_v30 = vld [vmem:[%s5469_s3 + $0xf78] sm:$0xff]  ;;  %v1140_v32 = vld [vmem:[%s5469_s3 + $0xf70] sm:$0xff] }
 0x165   :  { %1730 = vmatprep.subr.mxu1 %v945_v45  ;;  %1811 = vmatprep.subr.mxu0 %v1053_v46  ;;  %v1029_v33 = vld [vmem:[%s5469_s3 + $0xbf8] sm:$0xff]  ;;  %v1028_v62 = vld [vmem:[%s5469_s3 + $0xbf0] sm:$0xff] }
 0x166   :  { %1731 = vmatpush1.msra.mxu1 %v944_v47  ;;  %1812 = vmatpush1.msra.mxu0 %v1052_v48  ;;  %v1137_v34 = vld [vmem:[%s5469_s3 + $0xf58] sm:$0xff]  ;;  %v1136_v35 = vld [vmem:[%s5469_s3 + $0xf50] sm:$0xff] }
 0x167   :  { %1732 = vmatprep.subr.mxu1 %v941_v49  ;;  %1813 = vmatprep.subr.mxu0 %v1049_v50  ;;  %v1025_v36 = vld [vmem:[%s5469_s3 + $0xbd8] sm:$0xff]  ;;  %v1024_v38 = vld [vmem:[%s5469_s3 + $0xbd0] sm:$0xff] }
 0x168   :  { %1733 = vmatpush1.msra.mxu1 %v940_v51  ;;  %1814 = vmatpush1.msra.mxu0 %v1048_v53  ;;  %v1133_v37 = vld [vmem:[%s5469_s3 + $0xf38] sm:$0xff]  ;;  %v1132_v39 = vld [vmem:[%s5469_s3 + $0xf30] sm:$0xff] }
 0x169   :  { %1734 = vmatprep.subr.mxu1 %v937_v54  ;;  %1815 = vmatprep.subr.mxu0 %v1045_v55  ;;  %v1021_v40 = vld [vmem:[%s5469_s3 + $0xbb8] sm:$0xff]  ;;  %v1020_v43 = vld [vmem:[%s5469_s3 + $0xbb0] sm:$0xff] }
 0x16a   :  { %1735 = vmatpush1.msra.mxu1 %v936_v57  ;;  %1816 = vmatpush1.msra.mxu0 %v1044_v58  ;;  %v1129_v42 = vld [vmem:[%s5469_s3 + $0xf18] sm:$0xff]  ;;  %v1128_v44 = vld [vmem:[%s5469_s3 + $0xf10] sm:$0xff] }
 0x16b   :  { %1736 = vmatprep.subr.mxu1 %v933_v59  ;;  %1817 = vmatprep.subr.mxu0 %v1041_v60  ;;  %v1017_v45 = vld [vmem:[%s5469_s3 + $0xb98] sm:$0xff]  ;;  %v1016_v47 = vld [vmem:[%s5469_s3 + $0xb90] sm:$0xff] }
 0x16c   :  { %1737 = vmatpush1.msra.mxu1 %v932_v61  ;;  %1818 = vmatpush1.msra.mxu0 %v1040_v8  ;;  %v1125_v46 = vld [vmem:[%s5469_s3 + $0xef8] sm:$0xff]  ;;  %v1124_v48 = vld [vmem:[%s5469_s3 + $0xef0] sm:$0xff] }
 0x16d   :  { %1738 = vmatprep.subr.mxu1 %v929_v0  ;;  %1819 = vmatprep.subr.mxu0 %v1037_v2  ;;  %v1013_v49 = vld [vmem:[%s5469_s3 + $0xb78] sm:$0xff]  ;;  %v1012_v51 = vld [vmem:[%s5469_s3 + $0xb70] sm:$0xff] }
 0x16e   :  { %1739 = vmatpush1.msra.mxu1 %v928_v3  ;;  %1820 = vmatpush1.msra.mxu0 %v1036_v4  ;;  %v1121_v50 = vld [vmem:[%s5469_s3 + $0xed8] sm:$0xff]  ;;  %v1120_v53 = vld [vmem:[%s5469_s3 + $0xed0] sm:$0xff] }
 0x16f   :  { %1740 = vmatprep.subr.mxu1 %v925_v5  ;;  %1821 = vmatprep.subr.mxu0 %v1033_v10  ;;  %v1009_v54 = vld [vmem:[%s5469_s3 + $0xb58] sm:$0xff]  ;;  %v1008_v57 = vld [vmem:[%s5469_s3 + $0xb50] sm:$0xff] }
 0x170   :  { %1741 = vmatpush1.msra.mxu1 %v924_v6  ;;  %1822 = vmatpush1.msra.mxu0 %v1032_v7  ;;  %v1117_v55 = vld [vmem:[%s5469_s3 + $0xeb8] sm:$0xff]  ;;  %v1116_v58 = vld [vmem:[%s5469_s3 + $0xeb0] sm:$0xff] }
 0x171   :  { %1742 = vmatprep.subr.mxu1 %v921_v1  ;;  %1823 = vmatprep.subr.mxu0 %v1157_v9  ;;  %v1005_v59 = vld [vmem:[%s5469_s3 + $0xb38] sm:$0xff]  ;;  %v1004_v61 = vld [vmem:[%s5469_s3 + $0xb30] sm:$0xff] }
 0x172   :  { %1743 = vmatpush1.msra.mxu1 %v920_v11  ;;  %1824 = vmatpush2.msra.mxu0 %v1156_v12  ;;  %v1113_v60 = vld [vmem:[%s5469_s3 + $0xe98] sm:$0xff]  ;;  %v1112_v8 = vld [vmem:[%s5469_s3 + $0xe90] sm:$0xff] }
 0x173   :  { %1744 = vmatprep.subr.mxu1 %v917_v14  ;;  %1825 = vmatprep.subr.mxu0 %v1153_v15  ;;  %v1001_v0 = vld [vmem:[%s5469_s3 + $0xb18] sm:$0xff]  ;;  %v1000_v3 = vld [vmem:[%s5469_s3 + $0xb10] sm:$0xff] }
 0x174   :  { %1745 = vmatpush1.msra.mxu1 %v916_v17  ;;  %1826 = vmatpush2.msra.mxu0 %v1152_v18  ;;  %v1109_v2 = vld [vmem:[%s5469_s3 + $0xe78] sm:$0xff]  ;;  %v1108_v4 = vld [vmem:[%s5469_s3 + $0xe70] sm:$0xff] }
 0x175   :  { %1746 = vmatprep.subr.mxu1 %v913_v20  ;;  %1827 = vmatprep.subr.mxu0 %v1149_v21  ;;  %v997_v5 = vld [vmem:[%s5469_s3 + $0xaf8] sm:$0xff]  ;;  %v996_v6 = vld [vmem:[%s5469_s3 + $0xaf0] sm:$0xff] }
 0x176   :  { %1747 = vmatpush1.msra.mxu1 %v912_v22  ;;  %1828 = vmatpush2.msra.mxu0 %v1148_v52  ;;  %v1105_v10 = vld [vmem:[%s5469_s3 + $0xe58] sm:$0xff]  ;;  %v1104_v7 = vld [vmem:[%s5469_s3 + $0xe50] sm:$0xff] }
 0x177   :  { %1748 = vmatprep.subr.mxu1 %v909_v23  ;;  %1829 = vmatprep.subr.mxu0 %v1145_v24  ;;  %v993_v1 = vld [vmem:[%s5469_s3 + $0xad8] sm:$0xff]  ;;  %v992_v11 = vld [vmem:[%s5469_s3 + $0xad0] sm:$0xff] }
 0x178   :  { %1749 = vmatpush1.msra.mxu1 %v908_v26  ;;  %1830 = vmatpush2.msra.mxu0 %v1144_v28  ;;  %v1101_v9 = vld [vmem:[%s5469_s3 + $0xe38] sm:$0xff]  ;;  %v1100_v14 = vld [vmem:[%s5469_s3 + $0xe30] sm:$0xff]  ;;  %v1966_v28 = vld [vmem:[%s5471_s5 + $0xe8] sm:$0xff] }
 0x179   :  { %1750 = vmatprep.subr.mxu1 %v905_v29  ;;  %1831 = vmatprep.subr.mxu0 %v1141_v30  ;;  %v989_v12 = vld [vmem:[%s5469_s3 + $0xab8] sm:$0xff]  ;;  %v988_v15 = vld [vmem:[%s5469_s3 + $0xab0] sm:$0xff]  ;;  %v1965_v29 = vld [vmem:[%s5471_s5 + $0xe0] sm:$0xff] }
 0x17a   :  { %1751 = vmatpush1.msra.mxu1 %v904_v31  ;;  %1832 = vmatpush2.msra.mxu0 %v1140_v32  ;;  %v1097_v17 = vld [vmem:[%s5469_s3 + $0xe18] sm:$0xff]  ;;  %v1096_v20 = vld [vmem:[%s5469_s3 + $0xe10] sm:$0xff] }
 0x17b   :  { %1752 = vmatprep.subr.mxu1 %v1029_v33  ;;  %1833 = vmatprep.subr.mxu0 %v1137_v34  ;;  %v985_v18 = vld [vmem:[%s5469_s3 + $0xa98] sm:$0xff]  ;;  %v984_v21 = vld [vmem:[%s5469_s3 + $0xa90] sm:$0xff]  ;;  %v1962_v34 = vld [vmem:[%s5471_s5 + $0xc8] sm:$0xff] }
 0x17c   :  { %1753 = vmatpush2.msra.mxu1 %v1028_v62  ;;  %1834 = vmatpush2.msra.mxu0 %v1136_v35  ;;  %v981_v22 = vld [vmem:[%s5469_s3 + $0xa78] sm:$0xff]  ;;  %v1967_v24 = vld [vmem:[%s5471_s5 + $0xf0] sm:$0xff] }
 0x17d   :  { %1754 = vmatprep.subr.mxu1 %v1025_v36  ;;  %1835 = vmatprep.subr.mxu0 %v1133_v37  ;;  %v1968_v52 = vld [vmem:[%s5471_s5 + $0xf8] sm:$0xff]  ;;  %v976_v26 = vld [vmem:[%s5469_s3 + $0xa50] sm:$0xff]  ;;  %v1961_v37 = vld [vmem:[%s5471_s5 + $0xc0] sm:$0xff] }
 0x17e   :  { %1755 = vmatpush2.msra.mxu1 %v1024_v38  ;;  %1836 = vmatpush2.msra.mxu0 %v1132_v39  ;;  %v977_v23 = vld [vmem:[%s5469_s3 + $0xa58] sm:$0xff]  ;;  %v972_v30 = vld [vmem:[%s5469_s3 + $0xa30] sm:$0xff] }
 0x17f   :  { %1756 = vmatprep.subr.mxu1 %v1021_v40  ;;  %1837 = vmatprep.subr.mxu0 %v1129_v42  ;;  %v969_v31 = vld [vmem:[%s5469_s3 + $0xa18] sm:$0xff]  ;;  %v1963_v32 = vld [vmem:[%s5471_s5 + $0xd0] sm:$0xff] }
 0x180   :  { %1757 = vmatpush2.msra.mxu1 %v1020_v43  ;;  %1838 = vmatpush2.msra.mxu0 %v1128_v44  ;;  %v968_v33 = vld [vmem:[%s5469_s3 + $0xa10] sm:$0xff]  ;;  %v1189_v62 = vld [vmem:[%s5469_s3 + $0x10f8] sm:$0xff]  ;;  %v1958_v43 = vld [vmem:[%s5471_s5 + $0xa8] sm:$0xff] }
 0x181   :  { %1758 = vmatprep.subr.mxu1 %v1017_v45  ;;  %1839 = vmatprep.subr.mxu0 %v1125_v46  ;;  %v1188_v35 = vld [vmem:[%s5469_s3 + $0x10f0] sm:$0xff]  ;;  %v1185_v36 = vld [vmem:[%s5469_s3 + $0x10d8] sm:$0xff] }
 0x182   :  { %1759 = vmatpush2.msra.mxu1 %v1016_v47  ;;  %1840 = vmatpush2.msra.mxu0 %v1124_v48  ;;  %v1184_v38 = vld [vmem:[%s5469_s3 + $0x10d0] sm:$0xff]  ;;  %v1960_v39 = vld [vmem:[%s5471_s5 + $0xb8] sm:$0xff] }
 0x183   :  { %1760 = vmatprep.subr.mxu1 %v1013_v49  ;;  %1841 = vmatprep.subr.mxu0 %v1121_v50  ;;  %v1181_v40 = vld [vmem:[%s5469_s3 + $0x10b8] sm:$0xff]  ;;  %v1180_v42 = vld [vmem:[%s5469_s3 + $0x10b0] sm:$0xff]  ;;  %v1954_v50 = vld [vmem:[%s5471_s5 + $0x88] sm:$0xff] }
 0x184   :  { %1761 = vmatpush2.msra.mxu1 %v1012_v51  ;;  %1842 = vmatpush2.msra.mxu0 %v1120_v53  ;;  %v1177_v44 = vld [vmem:[%s5469_s3 + $0x1098] sm:$0xff]  ;;  %v1176_v45 = vld [vmem:[%s5469_s3 + $0x1090] sm:$0xff]  ;;  %v1953_v53 = vld [vmem:[%s5471_s5 + $0x80] sm:$0xff] }
 0x185   :  { %1762 = vmatprep.subr.mxu1 %v1009_v54  ;;  %1843 = vmatprep.subr.mxu0 %v1117_v55  ;;  %v1956_v46 = vld [vmem:[%s5471_s5 + $0x98] sm:$0xff]  ;;  %v1955_v48 = vld [vmem:[%s5471_s5 + $0x90] sm:$0xff] }
 0x186   :  { %1763 = vmatpush2.msra.mxu1 %v1008_v57  ;;  %1844 = vmatpush2.msra.mxu0 %v1116_v58  ;;  %v1173_v47 = vld [vmem:[%s5469_s3 + $0x1078] sm:$0xff]  ;;  %v1172_v49 = vld [vmem:[%s5469_s3 + $0x1070] sm:$0xff] }
 0x187   :  { %1764 = vmatprep.subr.mxu1 %v1005_v59  ;;  %1845 = vmatprep.subr.mxu0 %v1113_v60  ;;  %v1169_v51 = vld [vmem:[%s5469_s3 + $0x1058] sm:$0xff]  ;;  %v1168_v54 = vld [vmem:[%s5469_s3 + $0x1050] sm:$0xff]  ;;  %v1950_v60 = vld [vmem:[%s5471_s5 + $0x68] sm:$0xff] }
 0x188   :  { %1765 = vmatpush2.msra.mxu1 %v1004_v61  ;;  %1846 = vmatpush2.msra.mxu0 %v1112_v8  ;;  %v1952_v55 = vld [vmem:[%s5471_s5 + $0x78] sm:$0xff]  ;;  %v1951_v58 = vld [vmem:[%s5471_s5 + $0x70] sm:$0xff]  ;;  %v1949_v8 = vld [vmem:[%s5471_s5 + $0x60] sm:$0xff] }
 0x189   :  { %1766 = vmatprep.subr.mxu1 %v1001_v0  ;;  %1847 = vmatprep.subr.mxu0 %v1109_v2  ;;  %v1165_v57 = vld [vmem:[%s5469_s3 + $0x1038] sm:$0xff]  ;;  %v1164_v59 = vld [vmem:[%s5469_s3 + $0x1030] sm:$0xff] }
 0x18a   :  { %1767 = vmatpush2.msra.mxu1 %v1000_v3  ;;  %1848 = vmatpush2.msra.mxu0 %v1108_v4  ;;  %v1161_v61 = vld [vmem:[%s5469_s3 + $0x1018] sm:$0xff]  ;;  %v1160_v0 = vld [vmem:[%s5469_s3 + $0x1010] sm:$0xff]  ;;  %v1946_v4 = vld [vmem:[%s5471_s5 + $0x48] sm:$0xff] }
 0x18b   :  { %1768 = vmatprep.subr.mxu1 %v997_v5  ;;  %1849 = vmatprep.subr.mxu0 %v1105_v10  ;;  %v1948_v2 = vld [vmem:[%s5471_s5 + $0x58] sm:$0xff]  ;;  %v1947_v3 = vld [vmem:[%s5471_s5 + $0x50] sm:$0xff]  ;;  %v1945_v10 = vld [vmem:[%s5471_s5 + $0x40] sm:$0xff] }
 0x18c   :  { %1769 = vmatpush2.msra.mxu1 %v996_v6  ;;  %1850 = vmatpush2.msra.mxu0 %v1104_v7  ;;  %v2032_v5 = vld [vmem:[%s5471_s5 + $0x2f8] sm:$0xff]  ;;  %v2031_v6 = vld [vmem:[%s5471_s5 + $0x2f0] sm:$0xff] }
 0x18d   :  { %1770 = vmatprep.subr.mxu1 %v993_v1  ;;  %1851 = vmatprep.subr.mxu0 %v1101_v9  ;;  %v2394_v7 = vld.sshfl [vmem:[%s5466_s0 + $0x10] sm:$0x3 pattern:$0x76325410]  ;;  %v1944_v1 = vld [vmem:[%s5471_s5 + $0x38] sm:$0xff]  ;;  %v2030_v9 = vld [vmem:[%s5471_s5 + $0x2e8] sm:$0xff] }
 0x18e   :  { %1771 = vmatpush2.msra.mxu1 %v992_v11  ;;  %1784 = vmatprep.mubr.f32.mxu1 %v3274_v25  ;;  %v980_v25 = vld [vmem:[%s5469_s3 + $0xa70] sm:$0xff] }
 0x18f   :  { %1772 = vmatprep.subr.mxu1 %v989_v12  ;;  %1852 = vmatpush2.msra.mxu0 %v1100_v14  ;;  %v1943_v11 = vld [vmem:[%s5471_s5 + $0x30] sm:$0xff]  ;;  %v2029_v12 = vld [vmem:[%s5471_s5 + $0x2e0] sm:$0xff]  ;;  %v1942_v14 = vld [vmem:[%s5471_s5 + $0x28] sm:$0xff] }
 0x190   :  { %1773 = vmatpush2.msra.mxu1 %v988_v15  ;;  %1853 = vmatprep.subr.mxu0 %v1097_v17  ;;  %v2028_v15 = vld [vmem:[%s5471_s5 + $0x2d8] sm:$0xff]  ;;  %v1941_v17 = vld [vmem:[%s5471_s5 + $0x20] sm:$0xff] }
 0x191   :  { %1774 = vmatprep.subr.mxu1 %v985_v18  ;;  %1854 = vmatpush2.msra.mxu0 %v1096_v20  ;;  %v2027_v18 = vld [vmem:[%s5471_s5 + $0x2d0] sm:$0xff]  ;;  %v1940_v20 = vld [vmem:[%s5471_s5 + $0x18] sm:$0xff] }
 0x192   :  { %1775 = vmatpush2.msra.mxu1 %v984_v21  ;;  %1855 = vmatprep.mubr.f32.mxu0 %v3281_v27  ;;  %v973_v27 = vld [vmem:[%s5469_s3 + $0xa38] sm:$0xff]  ;;  %v2026_v21 = vld [vmem:[%s5471_s5 + $0x2c8] sm:$0xff] }
 0x193   :  { %1776 = vmatprep.subr.mxu1 %v981_v22  ;;  %1856 = vmatmul.mubr.f32.vlgmr.msra.gmra.mxu0 %v3252_v19  ;;  %v1964_v19 = vld [vmem:[%s5471_s5 + $0xd8] sm:$0xff]  ;;  %v1939_v22 = vld [vmem:[%s5471_s5 + $0x10] sm:$0xff] }
 0x194   :  { %1777 = vmatpush2.msra.mxu1 %v980_v25  ;;  %2077 = vmatprep.subr.mxu0 %v1968_v52  ;;  %v2025_v25 = vld [vmem:[%s5471_s5 + $0x2c0] sm:$0xff]  ;;  %v1938_v52 = vld [vmem:[%s5471_s5 + $0x8] sm:$0xff] }
 0x195   :  { %1778 = vmatprep.subr.mxu1 %v977_v23  ;;  %2078 = vmatpush1.msra.mxu0 %v1967_v24  ;;  %v2024_v23 = vld [vmem:[%s5471_s5 + $0x2b8] sm:$0xff]  ;;  %v1937_v24 = vld [vmem:[%s5471_s5] sm:$0xff] }
 0x196   :  { %1779 = vmatpush2.msra.mxu1 %v976_v26  ;;  %2079 = vmatprep.subr.mxu0 %v1966_v28  ;;  %v2023_v26 = vld [vmem:[%s5471_s5 + $0x2b0] sm:$0xff]  ;;  %v2000_v28 = vld [vmem:[%s5471_s5 + $0x1f8] sm:$0xff] }
 0x197   :  { %1780 = vmatprep.subr.mxu1 %v973_v27  ;;  %2080 = vmatpush1.msra.mxu0 %v1965_v29  ;;  %v2022_v27 = vld [vmem:[%s5471_s5 + $0x2a8] sm:$0xff]  ;;  %v1999_v29 = vld [vmem:[%s5471_s5 + $0x1f0] sm:$0xff] }
 0x198   :  { %1781 = vmatpush2.msra.mxu1 %v972_v30  ;;  %2081 = vmatprep.subr.mxu0 %v1964_v19  ;;  %v2021_v30 = vld [vmem:[%s5471_s5 + $0x2a0] sm:$0xff]  ;;  %v1998_v19 = vld [vmem:[%s5471_s5 + $0x1e8] sm:$0xff] }
 0x199   :  { %1782 = vmatprep.subr.mxu1 %v969_v31  ;;  %2082 = vmatpush1.msra.mxu0 %v1963_v32  ;;  %v2020_v31 = vld [vmem:[%s5471_s5 + $0x298] sm:$0xff]  ;;  %v1997_v32 = vld [vmem:[%s5471_s5 + $0x1e0] sm:$0xff] }
 0x19a   :  { %1783 = vmatpush2.msra.mxu1 %v968_v33  ;;  %2083 = vmatprep.subr.mxu0 %v1962_v34  ;;  %v2019_v33 = vld [vmem:[%s5471_s5 + $0x290] sm:$0xff]  ;;  %v1996_v34 = vld [vmem:[%s5471_s5 + $0x1d8] sm:$0xff] }
 0x19b   :  { %1785 = vmatmul.mubr.f32.vlgmr.msra.gmra.mxu1 %v3243_v16  ;;  %1878 = vmatprep.subr.mxu1 %v1189_v62  ;;  %v1959_v16 = vld [vmem:[%s5471_s5 + $0xb0] sm:$0xff]  ;;  %v2018_v62 = vld [vmem:[%s5471_s5 + $0x288] sm:$0xff] }
 0x19c   :  { %1879 = vmatpush1.msra.mxu1 %v1188_v35  ;;  %1926 = vmatprep.mubr.f32.mxu1 %v2418_v13  ;;  %v1957_v13 = vld [vmem:[%s5471_s5 + $0xa0] sm:$0xff]  ;;  %v1995_v35 = vld [vmem:[%s5471_s5 + $0x1d0] sm:$0xff] }
 0x19d   :  { %1880 = vmatprep.subr.mxu1 %v1185_v36  ;;  %2084 = vmatpush1.msra.mxu0 %v1961_v37  ;;  %v2017_v36 = vld [vmem:[%s5471_s5 + $0x280] sm:$0xff]  ;;  %v1994_v37 = vld [vmem:[%s5471_s5 + $0x1c8] sm:$0xff] }
 0x19e   :  { %1881 = vmatpush1.msra.mxu1 %v1184_v38  ;;  %2085 = vmatprep.subr.mxu0 %v1960_v39  ;;  %v2016_v38 = vld [vmem:[%s5471_s5 + $0x278] sm:$0xff]  ;;  %v1993_v39 = vld [vmem:[%s5471_s5 + $0x1c0] sm:$0xff] }
 0x19f   :  { %1882 = vmatprep.subr.mxu1 %v1181_v40  ;;  %2086 = vmatpush1.msra.mxu0 %v1959_v16  ;;  %v2015_v40 = vld [vmem:[%s5471_s5 + $0x270] sm:$0xff]  ;;  %v1992_v16 = vld [vmem:[%s5471_s5 + $0x1b8] sm:$0xff] }
 0x1a0   :  { %1883 = vmatpush1.msra.mxu1 %v1180_v42  ;;  %2087 = vmatprep.subr.mxu0 %v1958_v43  ;;  %v2014_v42 = vld [vmem:[%s5471_s5 + $0x268] sm:$0xff]  ;;  %v1991_v43 = vld [vmem:[%s5471_s5 + $0x1b0] sm:$0xff] }
 0x1a1   :  { %1884 = vmatprep.subr.mxu1 %v1177_v44  ;;  %2088 = vmatpush1.msra.mxu0 %v1957_v13  ;;  %v2013_v44 = vld [vmem:[%s5471_s5 + $0x260] sm:$0xff]  ;;  %v1990_v13 = vld [vmem:[%s5471_s5 + $0x1a8] sm:$0xff] }
 0x1a2   :  { %1885 = vmatpush1.msra.mxu1 %v1176_v45  ;;  %2089 = vmatprep.subr.mxu0 %v1956_v46  ;;  %v2012_v45 = vld [vmem:[%s5471_s5 + $0x258] sm:$0xff]  ;;  %v1989_v46 = vld [vmem:[%s5471_s5 + $0x1a0] sm:$0xff] }
 0x1a3   :  { %1886 = vmatprep.subr.mxu1 %v1173_v47  ;;  %2090 = vmatpush1.msra.mxu0 %v1955_v48  ;;  %v2011_v47 = vld [vmem:[%s5471_s5 + $0x250] sm:$0xff]  ;;  %v1988_v48 = vld [vmem:[%s5471_s5 + $0x198] sm:$0xff] }
 0x1a4   :  { %1887 = vmatpush1.msra.mxu1 %v1172_v49  ;;  %2091 = vmatprep.subr.mxu0 %v1954_v50  ;;  %v2010_v49 = vld [vmem:[%s5471_s5 + $0x248] sm:$0xff]  ;;  %v1987_v50 = vld [vmem:[%s5471_s5 + $0x190] sm:$0xff] }
 0x1a5   :  { %1888 = vmatprep.subr.mxu1 %v1169_v51  ;;  %2092 = vmatpush1.msra.mxu0 %v1953_v53  ;;  %v2009_v51 = vld [vmem:[%s5471_s5 + $0x240] sm:$0xff]  ;;  %v1986_v53 = vld [vmem:[%s5471_s5 + $0x188] sm:$0xff] }
 0x1a6   :  { %1889 = vmatpush1.msra.mxu1 %v1168_v54  ;;  %2093 = vmatprep.subr.mxu0 %v1952_v55  ;;  %v2008_v54 = vld [vmem:[%s5471_s5 + $0x238] sm:$0xff]  ;;  %v1985_v55 = vld [vmem:[%s5471_s5 + $0x180] sm:$0xff] }
 0x1a7   :  { %1890 = vmatprep.subr.mxu1 %v1165_v57  ;;  %2094 = vmatpush1.msra.mxu0 %v1951_v58  ;;  %v2007_v57 = vld [vmem:[%s5471_s5 + $0x230] sm:$0xff]  ;;  %v1984_v58 = vld [vmem:[%s5471_s5 + $0x178] sm:$0xff] }
 0x1a8   :  { %1891 = vmatpush1.msra.mxu1 %v1164_v59  ;;  %2095 = vmatprep.subr.mxu0 %v1950_v60  ;;  %v2006_v59 = vld [vmem:[%s5471_s5 + $0x228] sm:$0xff]  ;;  %v1983_v60 = vld [vmem:[%s5471_s5 + $0x170] sm:$0xff] }
 0x1a9   :  { %1892 = vmatprep.subr.mxu1 %v1161_v61  ;;  %2096 = vmatpush1.msra.mxu0 %v1949_v8  ;;  %v2005_v61 = vld [vmem:[%s5471_s5 + $0x220] sm:$0xff]  ;;  %v1982_v8 = vld [vmem:[%s5471_s5 + $0x168] sm:$0xff] }
 0x1aa   :  { %1893 = vmatpush1.msra.mxu1 %v1160_v0  ;;  %2097 = vmatprep.subr.mxu0 %v1948_v2  ;;  %v2004_v0 = vld [vmem:[%s5471_s5 + $0x218] sm:$0xff]  ;;  %v1981_v2 = vld [vmem:[%s5471_s5 + $0x160] sm:$0xff] }
 0x1ab   :  { %2352 = vmatmul.mubr.msk.f32.vlgmr.msra.gmra.mxu1 %vm1220_vm0, %v2394_v7  ;;  %2098 = vmatpush1.msra.mxu0 %v1947_v3  ;;  %v2003_v3 = vld [vmem:[%s5471_s5 + $0x210] sm:$0xff]  ;;  %v1978_v7 = vld [vmem:[%s5471_s5 + $0x148] sm:$0xff] }
 0x1ac   :  { %2099 = vmatprep.subr.mxu0 %v1946_v4  ;;  %2148 = vmatprep.subr.mxu1 %v2032_v5  ;;  %v1980_v4 = vld [vmem:[%s5471_s5 + $0x158] sm:$0xff]  ;;  %v2002_v5 = vld [vmem:[%s5471_s5 + $0x208] sm:$0xff] }
 0x1ad   :  { %2100 = vmatpush1.msra.mxu0 %v1945_v10  ;;  %2149 = vmatpush1.msra.mxu1 %v2031_v6  ;;  %v1979_v10 = vld [vmem:[%s5471_s5 + $0x150] sm:$0xff]  ;;  %v2001_v6 = vld [vmem:[%s5471_s5 + $0x200] sm:$0xff] }
 0x1ae   :  { %2101 = vmatprep.subr.mxu0 %v1944_v1  ;;  %2150 = vmatprep.subr.mxu1 %v2030_v9  ;;  %v2064_v1 = vld [vmem:[%s5471_s5 + $0x3f8] sm:$0xff]  ;;  %v5229_v9 = vld [vmem:[%s5470_s4] sm:$0xf] }
 0x1af   :  { %2102 = vmatpush1.msra.mxu0 %v1943_v11  ;;  %2151 = vmatpush1.msra.mxu1 %v2029_v12  ;;  %v1977_v11 = vld [vmem:[%s5471_s5 + $0x140] sm:$0xff]  ;;  %v2063_v12 = vld [vmem:[%s5471_s5 + $0x3f0] sm:$0xff] }
 0x1b0   :  { %2103 = vmatprep.subr.mxu0 %v1942_v14  ;;  %2152 = vmatprep.subr.mxu1 %v2028_v15  ;;  %v1289_v14 = vpop.f32.mrf.mxu0  ;;  %v1976_v15 = vld [vmem:[%s5471_s5 + $0x138] sm:$0xff] }
 0x1b1   :  { %2104 = vmatpush1.msra.mxu0 %v1941_v17  ;;  %2153 = vmatpush1.msra.mxu1 %v2027_v18  ;;  %v2062_v17 = vld [vmem:[%s5471_s5 + $0x3e8] sm:$0xff]  ;;  %v1975_v18 = vld [vmem:[%s5471_s5 + $0x130] sm:$0xff] }
 0x1b2   :  { %2105 = vmatprep.subr.mxu0 %v1940_v20  ;;  %2154 = vmatprep.subr.mxu1 %v2026_v21  ;;  %v2061_v20 = vld [vmem:[%s5471_s5 + $0x3e0] sm:$0xff]  ;;  %v1195_v21 = vrot.slane %v5229_v9, %v4360_v56 }
 0x1b3   :  { %2106 = vmatpush1.msra.mxu0 %v1939_v22  ;;  %2155 = vmatpush1.msra.mxu1 %v2025_v25  ;;  %v1974_v22 = vld [vmem:[%s5471_s5 + $0x128] sm:$0xff]  ;;  %v2060_v25 = vld [vmem:[%s5471_s5 + $0x3d8] sm:$0xff] }
 0x1b4   :  { %2107 = vmatprep.subr.mxu0 %v1938_v52  ;;  %2156 = vmatprep.subr.mxu1 %v2024_v23  ;;  %v1199_v52 = vrot.slane %v5229_v9, %v4378_v63  ;;  %v1973_v23 = vld [vmem:[%s5471_s5 + $0x120] sm:$0xff] }
 0x1b5   :  { %2108 = vmatpush1.msra.mxu0 %v1937_v24  ;;  %2157 = vmatpush1.msra.mxu1 %v2023_v26  ;;  %v2059_v24 = vld [vmem:[%s5471_s5 + $0x3d0] sm:$0xff]  ;;  %v1360_v26 = vpop.f32.mrf.mxu1 }
 0x1b6   :  { %2109 = vmatprep.subr.mxu0 %v2000_v28  ;;  %2158 = vmatprep.subr.mxu1 %v2022_v27  ;;  %v1291_v28 = vpop.f32.mrf.mxu0  ;;  %v1972_v27 = vld [vmem:[%s5471_s5 + $0x118] sm:$0xff] }
 0x1b7   :  { %2110 = vmatpush2.msra.mxu0 %v1999_v29  ;;  %2159 = vmatpush1.msra.mxu1 %v2021_v30  ;;  %v2058_v29 = vld [vmem:[%s5471_s5 + $0x3c8] sm:$0xff]  ;;  %v1971_v30 = vld [vmem:[%s5471_s5 + $0x110] sm:$0xff] }
 0x1b8   :  { %2111 = vmatprep.subr.mxu0 %v1998_v19  ;;  %2160 = vmatprep.subr.mxu1 %v2020_v31  ;;  %v2057_v19 = vld [vmem:[%s5471_s5 + $0x3c0] sm:$0xff]  ;;  %v1290_v31 = vadd.f32 %v1289_v14, %v1195_v21  ;;  %v2034_v14 = vld [vmem:[%s5471_s5 + $0x308] sm:$0xff]  ;;  %v2235_v21 = vld [vmem:[%s5473_s7 + $0x70] sm:$0xff] }
 0x1b9   :  { %2112 = vmatpush2.msra.mxu0 %v1997_v32  ;;  %2161 = vmatpush1.msra.mxu1 %v2019_v33  ;;  %v1970_v33 = vld [vmem:[%s5471_s5 + $0x108] sm:$0xff] }
 0x1ba   :  { %2113 = vmatprep.subr.mxu0 %v1996_v34  ;;  %2162 = vmatprep.subr.mxu1 %v2018_v62  ;;  %v1292_v34 = vadd.f32 %v1291_v28, %v1199_v52  ;;  %v1969_v62 = vld [vmem:[%s5471_s5 + $0x100] sm:$0xff]  ;;  %v2247_v28 = vld [vmem:[%s5473_s7 + $0xd0] sm:$0xff] }
 0x1bb   :  { %2114 = vmatpush2.msra.mxu0 %v1995_v35  ;;  %2163 = vmatpush1.msra.mxu1 %v2017_v36  ;;  %v1362_v35 = vpop.f32.mrf.mxu1  ;;  %v1361_v36 = vadd.f32 %v1360_v26, %v1290_v31  ;;  %v2249_v52 = vld [vmem:[%s5473_s7 + $0xe0] sm:$0xff]  ;;  %v2232_v26 = vld [vmem:[%s5473_s7 + $0x58] sm:$0xff] }
 0x1bc   :  { %2115 = vmatprep.subr.mxu0 %v1994_v37  ;;  %2164 = vmatprep.subr.mxu1 %v2016_v38  ;;  %v2229_v31 = vld [vmem:[%s5473_s7 + $0x40] sm:$0xff] }
 0x1bd   :  { %2116 = vmatpush2.msra.mxu0 %v1993_v39  ;;  %2165 = vmatpush1.msra.mxu1 %v2015_v40  ;;  %v1363_v39 = vadd.f32 %v1362_v35, %v1292_v34  ;;  %v2243_v34 = vld [vmem:[%s5473_s7 + $0xb0] sm:$0xff]  ;;  %v2242_v35 = vld [vmem:[%s5473_s7 + $0xa8] sm:$0xff] }
 0x1be   :  { %2117 = vmatprep.subr.mxu0 %v1992_v16  ;;  %2166 = vmatprep.subr.mxu1 %v2014_v42 }
 0x1bf   :  { %2118 = vmatpush2.msra.mxu0 %v1991_v43  ;;  %2167 = vmatpush1.msra.mxu1 %v2013_v44  ;;  %v2056_v43 = vld [vmem:[%s5471_s5 + $0x3b8] sm:$0xff] }
 0x1c0   :  { %2119 = vmatprep.subr.mxu0 %v1990_v13  ;;  %2168 = vmatprep.subr.mxu1 %v2012_v45  ;;  %v2055_v45 = vld [vmem:[%s5471_s5 + $0x3b0] sm:$0xff] }
 0x1c1   :  { %2120 = vmatpush2.msra.mxu0 %v1989_v46  ;;  %2169 = vmatpush1.msra.mxu1 %v2011_v47  ;;  %v2054_v47 = vld [vmem:[%s5471_s5 + $0x3a8] sm:$0xff] }
 0x1c2   :  { %2121 = vmatprep.subr.mxu0 %v1988_v48  ;;  %2170 = vmatprep.subr.mxu1 %v2010_v49 }
 0x1c3   :  { %2122 = vmatpush2.msra.mxu0 %v1987_v50  ;;  %2171 = vmatpush1.msra.mxu1 %v2009_v51  ;;  %v2053_v50 = vld [vmem:[%s5471_s5 + $0x3a0] sm:$0xff] }
 0x1c4   :  { %2123 = vmatprep.subr.mxu0 %v1986_v53  ;;  %2172 = vmatprep.subr.mxu1 %v2008_v54  ;;  %v2052_v53 = vld [vmem:[%s5471_s5 + $0x398] sm:$0xff]  ;;  %v2051_v54 = vld [vmem:[%s5471_s5 + $0x390] sm:$0xff] }
 0x1c5   :  { %2124 = vmatpush2.msra.mxu0 %v1985_v55  ;;  %2173 = vmatpush1.msra.mxu1 %v2007_v57  ;;  %v2050_v57 = vld [vmem:[%s5471_s5 + $0x388] sm:$0xff] }
 0x1c6   :  { %2125 = vmatprep.subr.mxu0 %v1984_v58  ;;  %2174 = vmatprep.subr.mxu1 %v2006_v59  ;;  %v2049_v58 = vld [vmem:[%s5471_s5 + $0x380] sm:$0xff]  ;;  %v2048_v59 = vld [vmem:[%s5471_s5 + $0x378] sm:$0xff] }
 0x1c7   :  { %2126 = vmatpush2.msra.mxu0 %v1983_v60  ;;  %2175 = vmatpush1.msra.mxu1 %v2005_v61  ;;  %v2047_v61 = vld [vmem:[%s5471_s5 + $0x370] sm:$0xff] }
 0x1c8   :  { %2127 = vmatprep.subr.mxu0 %v1982_v8  ;;  %2176 = vmatprep.subr.mxu1 %v2004_v0  ;;  %v2046_v8 = vld [vmem:[%s5471_s5 + $0x368] sm:$0xff]  ;;  %v2045_v0 = vld [vmem:[%s5471_s5 + $0x360] sm:$0xff] }
 0x1c9   :  { %2128 = vmatpush2.msra.mxu0 %v1981_v2  ;;  %2177 = vmatpush1.msra.mxu1 %v2003_v3  ;;  %v2044_v2 = vld [vmem:[%s5471_s5 + $0x358] sm:$0xff]  ;;  %v2043_v3 = vld [vmem:[%s5471_s5 + $0x350] sm:$0xff] }
 0x1ca   :  { %2129 = vmatprep.subr.mxu0 %v1980_v4  ;;  %2178 = vmatprep.subr.mxu1 %v2002_v5  ;;  %v1431_v32 = vpop.f32.mrf.mxu0  ;;  %v1502_v37 = vpop.f32.mrf.mxu1  ;;  %v2042_v4 = vld [vmem:[%s5471_s5 + $0x348] sm:$0xff]  ;;  %v2041_v5 = vld [vmem:[%s5471_s5 + $0x340] sm:$0xff] }
 0x1cb   :  { %2130 = vmatpush2.msra.mxu0 %v1979_v10  ;;  %2179 = vmatpush1.msra.mxu1 %v2001_v6  ;;  %v1432_v40 = vadd.f32 %v1431_v32, %v1361_v36  ;;  %v2040_v10 = vld [vmem:[%s5471_s5 + $0x338] sm:$0xff]  ;;  %v2039_v6 = vld [vmem:[%s5471_s5 + $0x330] sm:$0xff]  ;;  %v2226_v36 = vld [vmem:[%s5473_s7 + $0x28] sm:$0xff] }
 0x1cc   :  { %2131 = vmatprep.subr.mxu0 %v1978_v7  ;;  %2180 = vmatprep.subr.mxu1 %v2064_v1  ;;  %v1433_v38 = vpop.f32.mrf.mxu0  ;;  %v1504_v42 = vpop.f32.mrf.mxu1  ;;  %v2038_v7 = vld [vmem:[%s5471_s5 + $0x328] sm:$0xff]  ;;  %v2037_v1 = vld [vmem:[%s5471_s5 + $0x320] sm:$0xff]  ;;  %v2244_v32 = vld [vmem:[%s5473_s7 + $0xb8] sm:$0xff] }
 0x1cd   :  { %2132 = vmatpush2.msra.mxu0 %v1977_v11  ;;  %2181 = vmatpush2.msra.mxu1 %v2063_v12  ;;  %v1434_v16 = vadd.f32 %v1433_v38, %v1363_v39  ;;  %v1503_v44 = vadd.f32 %v1502_v37, %v1432_v40  ;;  %v2036_v11 = vld [vmem:[%s5471_s5 + $0x318] sm:$0xff]  ;;  %v2035_v12 = vld [vmem:[%s5471_s5 + $0x310] sm:$0xff]  ;;  %v2241_v37 = vld [vmem:[%s5473_s7 + $0xa0] sm:$0xff]  ;;  %v1202_v39 = vsub.s32 2, %v2781_v41  ;;  %v1206_v40 = vsub.s32 3, %v2781_v41 }
 0x1ce   :  { %2133 = vmatprep.subr.mxu0 %v1976_v15  ;;  %2182 = vmatprep.subr.mxu1 %v2062_v17  ;;  %v2033_v15 = vld [vmem:[%s5471_s5 + $0x300] sm:$0xff]  ;;  %v2252_v17 = vld [vmem:[%s5473_s7 + $0xf8] sm:$0xff] }
 0x1cf   :  { %2134 = vmatpush2.msra.mxu0 %v1975_v18  ;;  %2183 = vmatpush2.msra.mxu1 %v2061_v20  ;;  %v1505_v46 = vadd.f32 %v1504_v42, %v1434_v16  ;;  %v2236_v18 = vld [vmem:[%s5473_s7 + $0x78] sm:$0xff]  ;;  %v2251_v20 = vld [vmem:[%s5473_s7 + $0xf0] sm:$0xff]  ;;  %v2225_v38 = vld [vmem:[%s5473_s7 + $0x20] sm:$0xff]  ;;  %v1203_v42 = vrot.slane %v5229_v9, %v1202_v39 }
 0x1d0   :  { %2135 = vmatprep.subr.mxu0 %v1974_v22  ;;  %2184 = vmatprep.subr.mxu1 %v2060_v25  ;;  %v2250_v22 = vld [vmem:[%s5473_s7 + $0xe8] sm:$0xff] }
 0x1d1   :  { %2136 = vmatpush2.msra.mxu0 %v1973_v23  ;;  %2185 = vmatpush2.msra.mxu1 %v2059_v24  ;;  %v2234_v25 = vld [vmem:[%s5473_s7 + $0x68] sm:$0xff]  ;;  %v2233_v23 = vld [vmem:[%s5473_s7 + $0x60] sm:$0xff]  ;;  %v2248_v24 = vld [vmem:[%s5473_s7 + $0xd8] sm:$0xff] }
 0x1d2   :  { %2137 = vmatprep.subr.mxu0 %v1972_v27  ;;  %2186 = vmatprep.subr.mxu1 %v2058_v29  ;;  %v2231_v27 = vld [vmem:[%s5473_s7 + $0x50] sm:$0xff]  ;;  %v2246_v29 = vld [vmem:[%s5473_s7 + $0xc8] sm:$0xff] }
 0x1d3   :  { %2138 = vmatpush2.msra.mxu0 %v1971_v30  ;;  %2187 = vmatpush2.msra.mxu1 %v2057_v19  ;;  %v2230_v30 = vld [vmem:[%s5473_s7 + $0x48] sm:$0xff]  ;;  %v2245_v19 = vld [vmem:[%s5473_s7 + $0xc0] sm:$0xff] }
 0x1d4   :  { %2139 = vmatprep.subr.mxu0 %v1970_v33  ;;  %2188 = vmatprep.subr.mxu1 %v2056_v43  ;;  %v2228_v33 = vld [vmem:[%s5473_s7 + $0x38] sm:$0xff]  ;;  %v1207_v43 = vrot.slane %v5229_v9, %v1206_v40 }
 0x1d5   :  { %2140 = vmatpush2.msra.mxu0 %v1969_v62  ;;  %2189 = vmatpush2.msra.mxu1 %v2055_v45  ;;  %v2227_v62 = vld [vmem:[%s5473_s7 + $0x30] sm:$0xff] }
 0x1d6   :  { %2190 = vmatprep.subr.mxu1 %v2054_v47  ;;  %2354 = vmatprep.subr.mxu0 %v2252_v17 }
 0x1d7   :  { %2191 = vmatpush2.msra.mxu1 %v2053_v50 }
 0x1d8   :  { %2192 = vmatprep.subr.mxu1 %v2052_v53 }
 0x1d9   :  { %2193 = vmatpush2.msra.mxu1 %v2051_v54 }
 0x1da   :  { %2194 = vmatprep.subr.mxu1 %v2050_v57 }
 0x1db   :  { %v1573_v13 = vpop.f32.mrf.mxu1  ;;  %2195 = vmatpush2.msra.mxu1 %v2049_v58 }
 0x1dc   :  { %v1574_v48 = vadd.f32 %v1573_v13, %v1503_v44  ;;  %2196 = vmatprep.subr.mxu1 %v2048_v59 }
 0x1dd   :  { %v1575_v49 = vpop.f32.mrf.mxu1  ;;  %2197 = vmatpush2.msra.mxu1 %v2047_v61 }
 0x1de   :  { %v1576_v51 = vadd.f32 %v1575_v49, %v1505_v46  ;;  %v1933_v60 = vmax.f32 %v1574_v48, 0.0  ;;  %2198 = vmatprep.subr.mxu1 %v2046_v8 }
 0x1df   :  { %2199 = vmatpush2.msra.mxu1 %v2045_v0 }
 0x1e0   :  { %v1934_v55 = vmax.f32 %v1576_v51, 0.0  ;;  %2200 = vmatprep.subr.mxu1 %v2044_v2  ;;  %v2240_v2 = vld [vmem:[%s5473_s7 + $0x98] sm:$0xff] }
 0x1e1   :  { %2201 = vmatpush2.msra.mxu1 %v2043_v3  ;;  %v2224_v3 = vld [vmem:[%s5473_s7 + $0x18] sm:$0xff] }
 0x1e2   :  { %2141 = vmatprep.mubr.f32.mxu0 %v1934_v55  ;;  %2202 = vmatprep.subr.mxu1 %v2042_v4  ;;  %v2239_v4 = vld [vmem:[%s5473_s7 + $0x90] sm:$0xff] }
 0x1e3   :  { %2142 = vmatmul.mubr.f32.vlgmr.msra.gmra.mxu0 %v1933_v60  ;;  %2203 = vmatpush2.msra.mxu1 %v2041_v5  ;;  %v2223_v5 = vld [vmem:[%s5473_s7 + $0x10] sm:$0xff] }
 0x1e4   :  { %2204 = vmatprep.subr.mxu1 %v2040_v10  ;;  %2355 = vmatpush3.msra.mxu0 %v2236_v18  ;;  %v2238_v10 = vld [vmem:[%s5473_s7 + $0x88] sm:$0xff] }
 0x1e5   :  { %2205 = vmatpush2.msra.mxu1 %v2039_v6  ;;  %2356 = vmatprep.subr.mxu0 %v2251_v20  ;;  %v2222_v6 = vld [vmem:[%s5473_s7 + $0x8] sm:$0xff] }
 0x1e6   :  { %2206 = vmatprep.subr.mxu1 %v2038_v7  ;;  %2357 = vmatpush3.msra.mxu0 %v2235_v21  ;;  %v2237_v7 = vld [vmem:[%s5473_s7 + $0x80] sm:$0xff] }
 0x1e7   :  { %2207 = vmatpush2.msra.mxu1 %v2037_v1  ;;  %2358 = vmatprep.subr.mxu0 %v2250_v22  ;;  %v2221_v1 = vld [vmem:[%s5473_s7] sm:$0xff] }
 0x1e8   :  { %2208 = vmatprep.subr.mxu1 %v2036_v11  ;;  %2359 = vmatpush3.msra.mxu0 %v2234_v25  ;;  %v2065_v11 = vld [vmem:[%s5472_s6] sm:$0x3] }
 0x1e9   :  { %2209 = vmatpush2.msra.mxu1 %v2035_v12  ;;  %2360 = vmatprep.subr.mxu0 %v2249_v52 }
 0x1ea   :  { %2210 = vmatprep.subr.mxu1 %v2034_v14  ;;  %2361 = vmatpush3.msra.mxu0 %v2233_v23  ;;  %v2070_v14 = vrot.slane %v2065_v11, %v4360_v56 }
 0x1eb   :  { %2211 = vmatpush2.msra.mxu1 %v2033_v15  ;;  %2362 = vmatprep.subr.mxu0 %v2248_v24  ;;  %v2074_v15 = vrot.slane %v2065_v11, %v4378_v63 }
 0x1ec   :  { %2363 = vmatpush3.msra.mxu0 %v2232_v26 }
 0x1ed   :  { %2364 = vmatprep.subr.mxu0 %v2247_v28 }
 0x1ee   :  { %2365 = vmatpush3.msra.mxu0 %v2231_v27  ;;  %v2353_v27 = vld [vmem:[%s5474_s8] ss:$0 sm:$0xff] }
 0x1ef   :  { %2366 = vmatprep.subr.mxu0 %v2246_v29 }
 0x1f0   :  { %2367 = vmatpush3.msra.mxu0 %v2230_v30 }
 0x1f1   :  { %2368 = vmatprep.subr.mxu0 %v2245_v19 }
 0x1f2   :  { %2369 = vmatpush3.msra.mxu0 %v2229_v31 }
 0x1f3   :  { %2370 = vmatprep.subr.mxu0 %v2244_v32 }
 0x1f4   :  { %2371 = vmatpush3.msra.mxu0 %v2228_v33 }
 0x1f5   :  { %2372 = vmatprep.subr.mxu0 %v2243_v34 }
 0x1f6   :  { %2373 = vmatpush3.msra.mxu0 %v2227_v62 }
 0x1f7   :  { %2374 = vmatprep.subr.mxu0 %v2242_v35 }
 0x1f8   :  { %2375 = vmatpush3.msra.mxu0 %v2226_v36 }
 0x1f9   :  { %2376 = vmatprep.subr.mxu0 %v2241_v37 }
 0x1fa   :  { %2377 = vmatpush3.msra.mxu0 %v2225_v38 }
 0x1fb   :  { %2378 = vmatprep.subr.mxu0 %v2240_v2 }
 0x1fc   :  { %2379 = vmatpush3.msra.mxu0 %v2224_v3 }
 0x1fd   :  { %2380 = vmatprep.subr.mxu0 %v2239_v4 }
 0x1fe   :  { %2381 = vmatpush3.msra.mxu0 %v2223_v5 }
 0x1ff   :  { %2382 = vmatprep.subr.mxu0 %v2238_v10 }
 0x200   :  { %2383 = vmatpush3.msra.mxu0 %v2222_v6 }
 0x201   :  { %2384 = vmatprep.subr.mxu0 %v2237_v7 }
 0x202   :  { %2385 = vmatpush3.msra.mxu0 %v2221_v1 }
 0x20f   :  { %v1715_v13 = vpop.f32.mrf.mxu0 }
 0x211   :  { %v1717_v48 = vpop.f32.mrf.mxu0 }
 0x21b   :  { %v1644_v16 = vpop.f32.mrf.mxu1 }
 0x21c   :  { %v1645_v45 = vadd.f32 %v1644_v16, %v1203_v42 }
 0x21d   :  { %v1646_v44 = vpop.f32.mrf.mxu1 }
 0x21e   :  { %v1647_v47 = vadd.f32 %v1646_v44, %v1207_v43  ;;  %v1716_v49 = vadd.f32 %v1715_v13, %v1645_v45 }
 0x220   :  { %v1718_v53 = vadd.f32 %v1717_v48, %v1647_v47 }
 0x253   :  { %v1857_v51 = vpop.f32.mrf.mxu0 }
 0x255   :  { %v1859_v57 = vpop.f32.mrf.mxu0 }
 0x25b   :  { %v1786_v46 = vpop.f32.mrf.mxu1 }
 0x25c   :  { %v1787_v54 = vadd.f32 %v1786_v46, %v1716_v49 }
 0x25d   :  { %v1788_v50 = vpop.f32.mrf.mxu1 }
 0x25e   :  { %v1789_v55 = vadd.f32 %v1788_v50, %v1718_v53  ;;  %v1858_v58 = vadd.f32 %v1857_v51, %v1787_v54 }
 0x260   :  { %v1860_v59 = vadd.f32 %v1859_v57, %v1789_v55 }
 0x26b   :  { %v1928_v41 = vpop.f32.mrf.mxu1 }
 0x26c   :  { %v1929_v60 = vadd.f32 %v1928_v41, %v1858_v58 }
 0x26d   :  { %v1930_v61 = vpop.f32.mrf.mxu1 }
 0x26e   :  { %v1931_v8 = vadd.f32 %v1930_v61, %v1860_v59  ;;  %v1935_v0 = vmax.f32 %v1929_v60, 0.0 }
 0x270   :  { %v1936_v9 = vmax.f32 %v1931_v8, 0.0 }
 0x272   :  { %2212 = vmatprep.mubr.f32.mxu1 %v1936_v9 }
 0x273   :  { %2213 = vmatmul.mubr.f32.vlgmr.msra.gmra.mxu1 %v1935_v0 }
 0x2a3   :  { %v2143_v12 = vpop.f32.mrf.mxu0 }
 0x2a4   :  { %v2144_v18 = vadd.f32 %v2143_v12, %v2070_v14 }
 0x2a5   :  { %v2145_v17 = vpop.f32.mrf.mxu0 }
 0x2a6   :  { %v2146_v21 = vadd.f32 %v2145_v17, %v2074_v15 }
 0x333   :  { %v2214_v20 = vpop.f32.mrf.mxu1 }
 0x334   :  { %v2215_v22 = vadd.f32 %v2214_v20, %v2144_v18 }
 0x335   :  { %v2216_v25 = vpop.f32.mrf.mxu1 }
 0x336   :  { %v2217_v52 = vadd.f32 %v2216_v25, %v2146_v21  ;;  %v2219_v24 = vmax.f32 %v2215_v22, 0.0 }
 0x338   :  { %v2220_v23 = vmax.f32 %v2217_v52, 0.0 }
 0x33a   :  { %2324 = vmatprep.mubr.f32.mxu0 %v2220_v23 }
 0x33b   :  { %2325 = vmatmul.mubr.f32.vlgmr.msra.gmra.mxu0 %v2219_v24 }
 0x3fb   :  { %v2386_v26 = vpop.f32.mrf.mxu0 }
 0x3fd   :  { %v2387_v28 = vpop.f32.mrf.mxu0 }
 0x3fe   :  { %v2388_v56 = vadd.f32 %v2387_v28, %v2386_v26 }
 0x400   :  { %v2327_v63 = vadd.f32 %v2388_v56, %v2353_v27 }
 0x402   :  { %2330 = vst [vmem:[#allocation2] sm:$0x3] %v2327_v63 }
 0x403   :  { %2406 = shalt.err (!%p2403_p4)
}
 0x404   :  { %2342 = dma.vmem_to_hbm [thread:$0]  %s2340_s19, 32, %s5476_s10, [#allocation3]  }
 0x405   :  { %2415 = dma.done.wait [#allocation3], 32  }
 0x406   :  { %2416 = vsyncadd [#allocation3], 4294967264 }
 0x407   :  { %2348 = vsyncpa [#allocation3], 1 }

// kernel: forward.2
= control target key start
LH: loop header
LB: loop body
LE: loop exit
PB: predicated region body
PF: predicated region fallthrough
CT: control target
= control target key end

     0   :  { %v5252_v0 = vmov 0   ;;  %vm3018_vm0 = vcmask 523264   ;;  %vm3729_vm1 = vcmask 1041409   ;;  %vm3731_vm2 = vcmask 1042434   ;;  %s6745_s1 = inlined_call_operand.vmem [shape: bf16[256,64], index: 1, kind: input, shape index: {}]   ;;  %s6746_s0 = inlined_call_operand.vmem [shape: bf16[2048,256], index: 0, kind: input, shape index: {}]   ;;  %s6747_s2 = inlined_call_operand.vmem [shape: f32[64,64], index: 2, kind: input, shape index: {}]   ;;  %s6748_s5 = inlined_call_operand.vmem [shape: bf16[256,64], index: 5, kind: input, shape index: {}]   ;;  %s6749_s4 = inlined_call_operand.vmem [shape: bf16[128,256], index: 4, kind: input, shape index: {}]   ;;  %s6750_s6 = inlined_call_operand.vmem [shape: f32[64,64], index: 6, kind: input, shape index: {}]   ;;  %s6751_s3 = inlined_call_operand.vmem [shape: f32[1,64], index: 3, kind: input, shape index: {}]   ;;  %s6752_s8 = inlined_call_operand.vmem [shape: f32[32,64], index: 8, kind: output, shape index: {0}]   ;;  %s6753_s7 = inlined_call_operand.vmem [shape: f32[1,64], index: 7, kind: input, shape index: {}]   ;;  %s6754_s9 = inlined_call_operand.vmem [shape: f32[2,64], index: 9, kind: output, shape index: {1}]  }
   0x1   :  { %1705 = vmatprep.subr.bf16.mxu0 %v5252_v0  ;;  %4777 = vmatprep.subr.bf16.mxu1 %v5252_v0  ;;  %v4812_v1 = vld [vmem:[%s6745_s1 + $0x38] sm:$0xff]   ;;  %v4813_v2 = vld [vmem:[%s6745_s1 + $0x30] sm:$0xff]   ;;  %v4814_v3 = vld [vmem:[%s6745_s1 + $0x28] sm:$0xff]   ;;  %vm3733_vm3 = vcmask 1043459   ;;  %vm3735_vm4 = vcmask 1044484   ;;  %vm3737_vm5 = vcmask 1045509  }
   0x2   :  { %1706 = vmatpush1.bf16.msra.mxu0 %v4812_v1  ;;  %4793 = vmatpush1.bf16.msra.mxu1 %v4812_v1  ;;  %v4815_v4 = vld [vmem:[%s6745_s1 + $0x20] sm:$0xff]   ;;  %v4816_v5 = vld [vmem:[%s6745_s1 + $0x18] sm:$0xff]   ;;  %v4817_v7 = vld [vmem:[%s6745_s1 + $0x10] sm:$0xff]   ;;  %vm3739_vm6 = vcmask 1046534   ;;  %vm3741_vm7 = vcmask 1047559   ;;  %vm5254_vm8 = vmmov 0  }
   0x3   :  { %1707 = vmatprep.subr.bf16.mxu0 %v5252_v0  ;;  %4778 = vmatprep.subr.bf16.mxu1 %v5252_v0  ;;  %v4830_v6 = vld [vmem:[%s6746_s0 + $0x4] ss:$8 sps:$4 sm:$0xff]   ;;  %v4833_v8 = vld [vmem:[%s6746_s0 + $0x474] ss:$8 sps:$4 sm:$0xff]   ;;  %v4828_v19 = vld [vmem:[%s6746_s0] ss:$8 sps:$4 sm:$0xff]  }
   0x4   :  { %1737 = vmatprep.mubr.bf16.mxu0 %v4830_v6  ;;  %2305 = vmatprep.mubr.bf16.mxu1 %v4833_v8  ;;  %v4818_v9 = vld [vmem:[%s6745_s1 + $0x8] sm:$0xff]   ;;  %v4819_v10 = vld [vmem:[%s6745_s1] sm:$0xff]   ;;  %v4820_v11 = vld [vmem:[%s6745_s1 + $0x78] sm:$0xff]   ;;  %vm4330_vm9 = vcmask 517120  }
   0x5   :  { %v4821_v12 = vld [vmem:[%s6745_s1 + $0x70] sm:$0xff]   ;;  %v4822_v13 = vld [vmem:[%s6745_s1 + $0x68] sm:$0xff]   ;;  %v4823_v14 = vld [vmem:[%s6745_s1 + $0x60] sm:$0xff]  }
   0x6   :  { %1708 = vmatpush1.bf16.msra.mxu0 %v4813_v2  ;;  %4794 = vmatpush1.bf16.msra.mxu1 %v4813_v2  ;;  %v4824_v15 = vld [vmem:[%s6745_s1 + $0x58] sm:$0xff]   ;;  %v4825_v16 = vld [vmem:[%s6745_s1 + $0x50] sm:$0xff]   ;;  %v4826_v17 = vld [vmem:[%s6745_s1 + $0x48] sm:$0xff]  }
   0x7   :  { %1709 = vmatprep.subr.bf16.mxu0 %v5252_v0  ;;  %4779 = vmatprep.subr.bf16.mxu1 %v5252_v0  ;;  %v4827_v18 = vld [vmem:[%s6745_s1 + $0x40] sm:$0xff]   ;;  %v4831_v20 = vld [vmem:[%s6746_s0 + $0x470] ss:$8 sps:$4 sm:$0xff]   ;;  %v4834_v21 = vld [vmem:[%s6746_s0 + $0x14] ss:$8 sps:$4 sm:$0xff]  }
   0x8   :  { %v4836_v22 = vld [vmem:[%s6746_s0 + $0x484] ss:$8 sps:$4 sm:$0xff]   ;;  %v4838_v23 = vld [vmem:[%s6746_s0 + $0x10] ss:$8 sps:$4 sm:$0xff]   ;;  %v4839_v24 = vld [vmem:[%s6746_s0 + $0x480] ss:$8 sps:$4 sm:$0xff]  }
   0x9   :  { %v4840_v25 = vld [vmem:[%s6746_s0 + $0x24] ss:$8 sps:$4 sm:$0xff]   ;;  %v4842_v26 = vld [vmem:[%s6746_s0 + $0x494] ss:$8 sps:$4 sm:$0xff]   ;;  %v4844_v27 = vld [vmem:[%s6746_s0 + $0x20] ss:$8 sps:$4 sm:$0xff]  }
   0xa   :  { %1710 = vmatpush1.bf16.msra.mxu0 %v4814_v3  ;;  %4795 = vmatpush1.bf16.msra.mxu1 %v4814_v3  ;;  %v4845_v28 = vld [vmem:[%s6746_s0 + $0x490] ss:$8 sps:$4 sm:$0xff]   ;;  %v4846_v29 = vld [vmem:[%s6746_s0 + $0x34] ss:$8 sps:$4 sm:$0xff]   ;;  %v4848_v30 = vld [vmem:[%s6746_s0 + $0x4a4] ss:$8 sps:$4 sm:$0xff]  }
   0xb   :  { %1711 = vmatprep.subr.bf16.mxu0 %v5252_v0  ;;  %4780 = vmatprep.subr.bf16.mxu1 %v5252_v0  ;;  %v4850_v31 = vld [vmem:[%s6746_s0 + $0x30] ss:$8 sps:$4 sm:$0xff]   ;;  %v4851_v32 = vld [vmem:[%s6746_s0 + $0x4a0] ss:$8 sps:$4 sm:$0xff]   ;;  %v4852_v33 = vld [vmem:[%s6746_s0 + $0x44] ss:$8 sps:$4 sm:$0xff]  }
   0xc   :  { %v4854_v34 = vld [vmem:[%s6746_s0 + $0x4b4] ss:$8 sps:$4 sm:$0xff]   ;;  %v4856_v35 = vld [vmem:[%s6746_s0 + $0x40] ss:$8 sps:$4 sm:$0xff]   ;;  %v4857_v36 = vld [vmem:[%s6746_s0 + $0x4b0] ss:$8 sps:$4 sm:$0xff]  }
   0xd   :  { %v4858_v37 = vld [vmem:[%s6746_s0 + $0x54] ss:$8 sps:$4 sm:$0xff]   ;;  %v4860_v38 = vld [vmem:[%s6746_s0 + $0x4c4] ss:$8 sps:$4 sm:$0xff]   ;;  %v4862_v39 = vld [vmem:[%s6746_s0 + $0x50] ss:$8 sps:$4 sm:$0xff]  }
   0xe   :  { %1712 = vmatpush1.bf16.msra.mxu0 %v4815_v4  ;;  %4796 = vmatpush1.bf16.msra.mxu1 %v4815_v4  ;;  %v4863_v40 = vld [vmem:[%s6746_s0 + $0x4c0] ss:$8 sps:$4 sm:$0xff]   ;;  %v4864_v41 = vld [vmem:[%s6746_s0 + $0x64] ss:$8 sps:$4 sm:$0xff]   ;;  %v4866_v42 = vld [vmem:[%s6746_s0 + $0x4d4] ss:$8 sps:$4 sm:$0xff]  }
   0xf   :  { %1713 = vmatprep.subr.bf16.mxu0 %v5252_v0  ;;  %4781 = vmatprep.subr.bf16.mxu1 %v5252_v0  ;;  %v4868_v43 = vld [vmem:[%s6746_s0 + $0x60] ss:$8 sps:$4 sm:$0xff]   ;;  %v4869_v44 = vld [vmem:[%s6746_s0 + $0x4d0] ss:$8 sps:$4 sm:$0xff]   ;;  %v4870_v45 = vld [vmem:[%s6746_s0 + $0x74] ss:$8 sps:$4 sm:$0xff]  }
  0x10   :  { %v4872_v46 = vld [vmem:[%s6746_s0 + $0x4e4] ss:$8 sps:$4 sm:$0xff]   ;;  %v4874_v47 = vld [vmem:[%s6746_s0 + $0x70] ss:$8 sps:$4 sm:$0xff]   ;;  %v4875_v48 = vld [vmem:[%s6746_s0 + $0x4e0] ss:$8 sps:$4 sm:$0xff]  }
  0x11   :  { %v4876_v49 = vld [vmem:[%s6746_s0 + $0x84] ss:$8 sps:$4 sm:$0xff]   ;;  %v4878_v50 = vld [vmem:[%s6746_s0 + $0x4f4] ss:$8 sps:$4 sm:$0xff]   ;;  %v4880_v51 = vld [vmem:[%s6746_s0 + $0x80] ss:$8 sps:$4 sm:$0xff]  }
  0x12   :  { %1714 = vmatpush1.bf16.msra.mxu0 %v4816_v5  ;;  %4797 = vmatpush1.bf16.msra.mxu1 %v4816_v5  ;;  %v4881_v52 = vld [vmem:[%s6746_s0 + $0x4f0] ss:$8 sps:$4 sm:$0xff]   ;;  %v4882_v53 = vld [vmem:[%s6746_s0 + $0x94] ss:$8 sps:$4 sm:$0xff]   ;;  %v4884_v54 = vld [vmem:[%s6746_s0 + $0x504] ss:$8 sps:$4 sm:$0xff]  }
  0x13   :  { %1715 = vmatprep.subr.bf16.mxu0 %v5252_v0  ;;  %4782 = vmatprep.subr.bf16.mxu1 %v5252_v0  ;;  %v4886_v55 = vld [vmem:[%s6746_s0 + $0x90] ss:$8 sps:$4 sm:$0xff]   ;;  %v4887_v56 = vld [vmem:[%s6746_s0 + $0x500] ss:$8 sps:$4 sm:$0xff]   ;;  %v4888_v57 = vld [vmem:[%s6746_s0 + $0xa4] ss:$8 sps:$4 sm:$0xff]  }
  0x14   :  { %v4890_v58 = vld [vmem:[%s6746_s0 + $0x514] ss:$8 sps:$4 sm:$0xff]   ;;  %v4892_v59 = vld [vmem:[%s6746_s0 + $0xa0] ss:$8 sps:$4 sm:$0xff]   ;;  %v4893_v60 = vld [vmem:[%s6746_s0 + $0x510] ss:$8 sps:$4 sm:$0xff]  }
  0x15   :  { %v4894_v61 = vld [vmem:[%s6746_s0 + $0xb4] ss:$8 sps:$4 sm:$0xff]   ;;  %v4896_v62 = vld [vmem:[%s6746_s0 + $0x524] ss:$8 sps:$4 sm:$0xff]   ;;  %v4898_v63 = vld [vmem:[%s6746_s0 + $0xb0] ss:$8 sps:$4 sm:$0xff]  }
  0x16   :  { %1716 = vmatpush1.bf16.msra.mxu0 %v4817_v7  ;;  %4798 = vmatpush1.bf16.msra.mxu1 %v4817_v7  ;;  %v4900_v1 = vld [vmem:[%s6746_s0 + $0xc4] ss:$8 sps:$4 sm:$0xff]   ;;  %v4902_v2 = vld [vmem:[%s6746_s0 + $0x534] ss:$8 sps:$4 sm:$0xff]   ;;  %v4904_v3 = vld [vmem:[%s6746_s0 + $0xc0] ss:$8 sps:$4 sm:$0xff]  }
  0x17   :  { %1717 = vmatprep.subr.bf16.mxu0 %v5252_v0  ;;  %4783 = vmatprep.subr.bf16.mxu1 %v5252_v0  ;;  %v4905_v4 = vld [vmem:[%s6746_s0 + $0x530] ss:$8 sps:$4 sm:$0xff]   ;;  %v4906_v5 = vld [vmem:[%s6746_s0 + $0xd4] ss:$8 sps:$4 sm:$0xff]   ;;  %v4908_v6 = vld [vmem:[%s6746_s0 + $0x544] ss:$8 sps:$4 sm:$0xff]  }
  0x18   :  { %v4910_v7 = vld [vmem:[%s6746_s0 + $0xd0] ss:$8 sps:$4 sm:$0xff]   ;;  %v4911_v8 = vld [vmem:[%s6746_s0 + $0x540] ss:$8 sps:$4 sm:$0xff]  }
  0x1a   :  { %1718 = vmatpush1.bf16.msra.mxu0 %v4818_v9  ;;  %4799 = vmatpush1.bf16.msra.mxu1 %v4818_v9  ;;  %v4912_v9 = vld [vmem:[%s6746_s0 + $0xe4] ss:$8 sps:$4 sm:$0xff]  }
  0x1b   :  { %1719 = vmatprep.subr.bf16.mxu0 %v5252_v0  ;;  %4784 = vmatprep.subr.bf16.mxu1 %v5252_v0 }
  0x1e   :  { %1720 = vmatpush1.bf16.msra.mxu0 %v4819_v10  ;;  %4800 = vmatpush1.bf16.msra.mxu1 %v4819_v10  ;;  %v4914_v10 = vld [vmem:[%s6746_s0 + $0x554] ss:$8 sps:$4 sm:$0xff]  }
  0x1f   :  { %1721 = vmatprep.subr.bf16.mxu0 %v5252_v0  ;;  %4785 = vmatprep.subr.bf16.mxu1 %v5252_v0 }
  0x22   :  { %1722 = vmatpush2.bf16.msra.mxu0 %v4820_v11  ;;  %4801 = vmatpush2.bf16.msra.mxu1 %v4820_v11  ;;  %v4916_v11 = vld [vmem:[%s6746_s0 + $0xe0] ss:$8 sps:$4 sm:$0xff]  }
  0x23   :  { %1723 = vmatprep.subr.bf16.mxu0 %v5252_v0  ;;  %4786 = vmatprep.subr.bf16.mxu1 %v5252_v0 }
  0x26   :  { %1724 = vmatpush2.bf16.msra.mxu0 %v4821_v12  ;;  %4802 = vmatpush2.bf16.msra.mxu1 %v4821_v12  ;;  %v4917_v12 = vld [vmem:[%s6746_s0 + $0x550] ss:$8 sps:$4 sm:$0xff]  }
  0x27   :  { %1725 = vmatprep.subr.bf16.mxu0 %v5252_v0  ;;  %4787 = vmatprep.subr.bf16.mxu1 %v5252_v0 }
  0x2a   :  { %1726 = vmatpush2.bf16.msra.mxu0 %v4822_v13  ;;  %4803 = vmatpush2.bf16.msra.mxu1 %v4822_v13  ;;  %v4918_v13 = vld [vmem:[%s6746_s0 + $0xf4] ss:$8 sps:$4 sm:$0xff]  }
  0x2b   :  { %1727 = vmatprep.subr.bf16.mxu0 %v5252_v0  ;;  %4788 = vmatprep.subr.bf16.mxu1 %v5252_v0 }
  0x2e   :  { %1728 = vmatpush2.bf16.msra.mxu0 %v4823_v14  ;;  %4804 = vmatpush2.bf16.msra.mxu1 %v4823_v14  ;;  %v4920_v14 = vld [vmem:[%s6746_s0 + $0x564] ss:$8 sps:$4 sm:$0xff]  }
  0x2f   :  { %1729 = vmatprep.subr.bf16.mxu0 %v5252_v0  ;;  %4789 = vmatprep.subr.bf16.mxu1 %v5252_v0 }
  0x32   :  { %1730 = vmatpush2.bf16.msra.mxu0 %v4824_v15  ;;  %4805 = vmatpush2.bf16.msra.mxu1 %v4824_v15  ;;  %v4922_v15 = vld [vmem:[%s6746_s0 + $0xf0] ss:$8 sps:$4 sm:$0xff]  }
  0x33   :  { %1731 = vmatprep.subr.bf16.mxu0 %v5252_v0  ;;  %4790 = vmatprep.subr.bf16.mxu1 %v5252_v0 }
  0x36   :  { %1732 = vmatpush2.bf16.msra.mxu0 %v4825_v16  ;;  %4806 = vmatpush2.bf16.msra.mxu1 %v4825_v16  ;;  %v4923_v16 = vld [vmem:[%s6746_s0 + $0x560] ss:$8 sps:$4 sm:$0xff]  }
  0x37   :  { %1733 = vmatprep.subr.bf16.mxu0 %v5252_v0  ;;  %4791 = vmatprep.subr.bf16.mxu1 %v5252_v0 }
  0x3a   :  { %1734 = vmatpush2.bf16.msra.mxu0 %v4826_v17  ;;  %4807 = vmatpush2.bf16.msra.mxu1 %v4826_v17  ;;  %v4924_v17 = vld [vmem:[%s6746_s0 + $0x104] ss:$8 sps:$4 sm:$0xff]  }
  0x3b   :  { %1735 = vmatprep.subr.bf16.mxu0 %v5252_v0  ;;  %4792 = vmatprep.subr.bf16.mxu1 %v5252_v0  ;;  %v4899_v0 = vld [vmem:[%s6746_s0 + $0x520] ss:$8 sps:$4 sm:$0xff]  }
  0x3e   :  { %1736 = vmatpush2.bf16.msra.mxu0 %v4827_v18  ;;  %4808 = vmatpush2.bf16.msra.mxu1 %v4827_v18  ;;  %v4926_v18 = vld [vmem:[%s6746_s0 + $0x574] ss:$8 sps:$4 sm:$0xff]  }
  0x41   :  { %1738 = vmatmul.mubr.bf16.vlgmr.msra.gmra.mxu0 %v4828_v19  ;;  %2306 = vmatmul.mubr.bf16.vlgmr.msra.gmra.mxu1 %v4831_v20  ;;  %v4928_v19 = vld [vmem:[%s6746_s0 + $0x100] ss:$8 sps:$4 sm:$0xff]   ;;  %v4929_v20 = vld [vmem:[%s6746_s0 + $0x570] ss:$8 sps:$4 sm:$0xff]  }
  0x42   :  { %1745 = vmatprep.mubr.bf16.mxu0 %v4834_v21  ;;  %2313 = vmatprep.mubr.bf16.mxu1 %v4836_v22  ;;  %v4930_v21 = vld [vmem:[%s6746_s0 + $0x114] ss:$8 sps:$4 sm:$0xff]   ;;  %v4932_v22 = vld [vmem:[%s6746_s0 + $0x584] ss:$8 sps:$4 sm:$0xff]  }
  0x49   :  { %1746 = vmatmul.mubr.bf16.gmra.mxu0 %v4838_v23  ;;  %2314 = vmatmul.mubr.bf16.gmra.mxu1 %v4839_v24  ;;  %v4934_v23 = vld [vmem:[%s6746_s0 + $0x110] ss:$8 sps:$4 sm:$0xff]   ;;  %v4935_v24 = vld [vmem:[%s6746_s0 + $0x580] ss:$8 sps:$4 sm:$0xff]  }
  0x4a   :  { %1753 = vmatprep.mubr.bf16.mxu0 %v4840_v25  ;;  %2321 = vmatprep.mubr.bf16.mxu1 %v4842_v26  ;;  %v4936_v25 = vld [vmem:[%s6746_s0 + $0x124] ss:$8 sps:$4 sm:$0xff]   ;;  %v4938_v26 = vld [vmem:[%s6746_s0 + $0x594] ss:$8 sps:$4 sm:$0xff]  }
  0x51   :  { %1754 = vmatmul.mubr.bf16.gmra.mxu0 %v4844_v27  ;;  %2322 = vmatmul.mubr.bf16.gmra.mxu1 %v4845_v28  ;;  %v4940_v27 = vld [vmem:[%s6746_s0 + $0x120] ss:$8 sps:$4 sm:$0xff]   ;;  %v4941_v28 = vld [vmem:[%s6746_s0 + $0x590] ss:$8 sps:$4 sm:$0xff]  }
  0x52   :  { %1761 = vmatprep.mubr.bf16.mxu0 %v4846_v29  ;;  %2329 = vmatprep.mubr.bf16.mxu1 %v4848_v30  ;;  %v4942_v29 = vld [vmem:[%s6746_s0 + $0x134] ss:$8 sps:$4 sm:$0xff]   ;;  %v4944_v30 = vld [vmem:[%s6746_s0 + $0x5a4] ss:$8 sps:$4 sm:$0xff]  }
  0x59   :  { %1762 = vmatmul.mubr.bf16.gmra.mxu0 %v4850_v31  ;;  %2330 = vmatmul.mubr.bf16.gmra.mxu1 %v4851_v32  ;;  %v4946_v31 = vld [vmem:[%s6746_s0 + $0x130] ss:$8 sps:$4 sm:$0xff]   ;;  %v4947_v32 = vld [vmem:[%s6746_s0 + $0x5a0] ss:$8 sps:$4 sm:$0xff]  }
  0x5a   :  { %1769 = vmatprep.mubr.bf16.mxu0 %v4852_v33  ;;  %2337 = vmatprep.mubr.bf16.mxu1 %v4854_v34  ;;  %v4948_v33 = vld [vmem:[%s6746_s0 + $0x144] ss:$8 sps:$4 sm:$0xff]   ;;  %v4950_v34 = vld [vmem:[%s6746_s0 + $0x5b4] ss:$8 sps:$4 sm:$0xff]  }
  0x61   :  { %1770 = vmatmul.mubr.bf16.gmra.mxu0 %v4856_v35  ;;  %2338 = vmatmul.mubr.bf16.gmra.mxu1 %v4857_v36  ;;  %v4952_v35 = vld [vmem:[%s6746_s0 + $0x140] ss:$8 sps:$4 sm:$0xff]   ;;  %v4953_v36 = vld [vmem:[%s6746_s0 + $0x5b0] ss:$8 sps:$4 sm:$0xff]  }
  0x62   :  { %1777 = vmatprep.mubr.bf16.mxu0 %v4858_v37  ;;  %2345 = vmatprep.mubr.bf16.mxu1 %v4860_v38  ;;  %v4954_v37 = vld [vmem:[%s6746_s0 + $0x154] ss:$8 sps:$4 sm:$0xff]   ;;  %v4956_v38 = vld [vmem:[%s6746_s0 + $0x5c4] ss:$8 sps:$4 sm:$0xff]  }
  0x69   :  { %1778 = vmatmul.mubr.bf16.gmra.mxu0 %v4862_v39  ;;  %2346 = vmatmul.mubr.bf16.gmra.mxu1 %v4863_v40  ;;  %v4958_v39 = vld [vmem:[%s6746_s0 + $0x150] ss:$8 sps:$4 sm:$0xff]   ;;  %v4959_v40 = vld [vmem:[%s6746_s0 + $0x5c0] ss:$8 sps:$4 sm:$0xff]  }
  0x6a   :  { %1785 = vmatprep.mubr.bf16.mxu0 %v4864_v41  ;;  %2353 = vmatprep.mubr.bf16.mxu1 %v4866_v42  ;;  %v4960_v41 = vld [vmem:[%s6746_s0 + $0x164] ss:$8 sps:$4 sm:$0xff]   ;;  %v4962_v42 = vld [vmem:[%s6746_s0 + $0x5d4] ss:$8 sps:$4 sm:$0xff]  }
  0x71   :  { %1786 = vmatmul.mubr.bf16.gmra.mxu0 %v4868_v43  ;;  %2354 = vmatmul.mubr.bf16.gmra.mxu1 %v4869_v44  ;;  %v4964_v43 = vld [vmem:[%s6746_s0 + $0x160] ss:$8 sps:$4 sm:$0xff]   ;;  %v4965_v44 = vld [vmem:[%s6746_s0 + $0x5d0] ss:$8 sps:$4 sm:$0xff]  }
  0x72   :  { %1793 = vmatprep.mubr.bf16.mxu0 %v4870_v45  ;;  %2361 = vmatprep.mubr.bf16.mxu1 %v4872_v46  ;;  %v4966_v45 = vld [vmem:[%s6746_s0 + $0x174] ss:$8 sps:$4 sm:$0xff]   ;;  %v4968_v46 = vld [vmem:[%s6746_s0 + $0x5e4] ss:$8 sps:$4 sm:$0xff]  }
  0x79   :  { %1794 = vmatmul.mubr.bf16.gmra.mxu0 %v4874_v47  ;;  %2362 = vmatmul.mubr.bf16.gmra.mxu1 %v4875_v48  ;;  %v4970_v47 = vld [vmem:[%s6746_s0 + $0x170] ss:$8 sps:$4 sm:$0xff]   ;;  %v4971_v48 = vld [vmem:[%s6746_s0 + $0x5e0] ss:$8 sps:$4 sm:$0xff]  }
  0x7a   :  { %1801 = vmatprep.mubr.bf16.mxu0 %v4876_v49  ;;  %2369 = vmatprep.mubr.bf16.mxu1 %v4878_v50  ;;  %v4972_v49 = vld [vmem:[%s6746_s0 + $0x184] ss:$8 sps:$4 sm:$0xff]   ;;  %v4974_v50 = vld [vmem:[%s6746_s0 + $0x5f4] ss:$8 sps:$4 sm:$0xff]  }
  0x81   :  { %1802 = vmatmul.mubr.bf16.gmra.mxu0 %v4880_v51  ;;  %2370 = vmatmul.mubr.bf16.gmra.mxu1 %v4881_v52  ;;  %v327_v51 = vld [vmem:[%s6747_s2 + $0x38] sm:$0xff]  ;;  %v4976_v52 = vld [vmem:[%s6746_s0 + $0x180] ss:$8 sps:$4 sm:$0xff]  }
  0x82   :  { %1809 = vmatprep.mubr.bf16.mxu0 %v4882_v53  ;;  %2377 = vmatprep.mubr.bf16.mxu1 %v4884_v54  ;;  %v4977_v53 = vld [vmem:[%s6746_s0 + $0x5f0] ss:$8 sps:$4 sm:$0xff]   ;;  %v4978_v54 = vld [vmem:[%s6746_s0 + $0x194] ss:$8 sps:$4 sm:$0xff]  }
  0x83   :  { %4736 = vmatprep.subr.mxu1 %v327_v51 }
  0x84   :  { %4737 = vmatpush3.msra.mxu1 %v327_v51 }
  0x89   :  { %1810 = vmatmul.mubr.bf16.gmra.mxu0 %v4886_v55  ;;  %2378 = vmatmul.mubr.bf16.gmra.mxu1 %v4887_v56  ;;  %v4980_v55 = vld [vmem:[%s6746_s0 + $0x604] ss:$8 sps:$4 sm:$0xff]  }
  0x8a   :  { %1817 = vmatprep.mubr.bf16.mxu0 %v4888_v57  ;;  %2385 = vmatprep.mubr.bf16.mxu1 %v4890_v58 }
  0x91   :  { %1818 = vmatmul.mubr.bf16.gmra.mxu0 %v4892_v59  ;;  %2386 = vmatmul.mubr.bf16.gmra.mxu1 %v4893_v60 }
  0x92   :  { %1825 = vmatprep.mubr.bf16.mxu0 %v4894_v61  ;;  %2393 = vmatprep.mubr.bf16.mxu1 %v4896_v62 }
  0x99   :  { %1826 = vmatmul.mubr.bf16.gmra.mxu0 %v4898_v63  ;;  %2394 = vmatmul.mubr.bf16.gmra.mxu1 %v4899_v0  ;;  %v4982_v63 = vld [vmem:[%s6746_s0 + $0x190] ss:$8 sps:$4 sm:$0xff]   ;;  %v4983_v0 = vld [vmem:[%s6746_s0 + $0x600] ss:$8 sps:$4 sm:$0xff]  }
  0x9a   :  { %1833 = vmatprep.mubr.bf16.mxu0 %v4900_v1  ;;  %2401 = vmatprep.mubr.bf16.mxu1 %v4902_v2  ;;  %v4984_v2 = vld [vmem:[%s6746_s0 + $0x1a4] ss:$8 sps:$4 sm:$0xff]  }
  0xa1   :  { %1834 = vmatmul.mubr.bf16.gmra.mxu0 %v4904_v3  ;;  %2402 = vmatmul.mubr.bf16.gmra.mxu1 %v4905_v4  ;;  %v4986_v3 = vld [vmem:[%s6746_s0 + $0x614] ss:$8 sps:$4 sm:$0xff]  }
  0xa2   :  { %1841 = vmatprep.mubr.bf16.mxu0 %v4906_v5  ;;  %2409 = vmatprep.mubr.bf16.mxu1 %v4908_v6 }
  0xa9   :  { %1842 = vmatmul.mubr.bf16.gmra.mxu0 %v4910_v7  ;;  %2410 = vmatmul.mubr.bf16.gmra.mxu1 %v4911_v8 }
  0xaa   :  { %1849 = vmatprep.mubr.bf16.mxu0 %v4912_v9  ;;  %2417 = vmatprep.mubr.bf16.mxu1 %v4914_v10 }
  0xb1   :  { %1850 = vmatmul.mubr.bf16.gmra.mxu0 %v4916_v11  ;;  %2418 = vmatmul.mubr.bf16.gmra.mxu1 %v4917_v12 }
  0xb2   :  { %1857 = vmatprep.mubr.bf16.mxu0 %v4918_v13  ;;  %2425 = vmatprep.mubr.bf16.mxu1 %v4920_v14 }
  0xb9   :  { %1858 = vmatmul.mubr.bf16.gmra.mxu0 %v4922_v15  ;;  %2426 = vmatmul.mubr.bf16.gmra.mxu1 %v4923_v16 }
  0xba   :  { %1865 = vmatprep.mubr.bf16.mxu0 %v4924_v17  ;;  %2433 = vmatprep.mubr.bf16.mxu1 %v4926_v18 }
  0xc1   :  { %1866 = vmatmul.mubr.bf16.gmra.mxu0 %v4928_v19  ;;  %2434 = vmatmul.mubr.bf16.gmra.mxu1 %v4929_v20  ;;  %v4988_v19 = vld [vmem:[%s6746_s0 + $0x1a0] ss:$8 sps:$4 sm:$0xff]   ;;  %v4989_v20 = vld [vmem:[%s6746_s0 + $0x610] ss:$8 sps:$4 sm:$0xff]  }
  0xc2   :  { %1873 = vmatprep.mubr.bf16.mxu0 %v4930_v21  ;;  %2441 = vmatprep.mubr.bf16.mxu1 %v4932_v22  ;;  %v4990_v21 = vld [vmem:[%s6746_s0 + $0x1b4] ss:$8 sps:$4 sm:$0xff]  }
  0xc9   :  { %1874 = vmatmul.mubr.bf16.gmra.mxu0 %v4934_v23  ;;  %2442 = vmatmul.mubr.bf16.gmra.mxu1 %v4935_v24 }
  0xca   :  { %1881 = vmatprep.mubr.bf16.mxu0 %v4936_v25  ;;  %2449 = vmatprep.mubr.bf16.mxu1 %v4938_v26  ;;  %v4992_v25 = vld [vmem:[%s6746_s0 + $0x624] ss:$8 sps:$4 sm:$0xff]  }
  0xd1   :  { %1882 = vmatmul.mubr.bf16.gmra.mxu0 %v4940_v27  ;;  %2450 = vmatmul.mubr.bf16.gmra.mxu1 %v4941_v28 }
  0xd2   :  { %1889 = vmatprep.mubr.bf16.mxu0 %v4942_v29  ;;  %2457 = vmatprep.mubr.bf16.mxu1 %v4944_v30 }
  0xd9   :  { %1890 = vmatmul.mubr.bf16.gmra.mxu0 %v4946_v31  ;;  %2458 = vmatmul.mubr.bf16.gmra.mxu1 %v4947_v32 }
  0xda   :  { %1897 = vmatprep.mubr.bf16.mxu0 %v4948_v33  ;;  %2465 = vmatprep.mubr.bf16.mxu1 %v4950_v34 }
  0xe1   :  { %1898 = vmatmul.mubr.bf16.gmra.mxu0 %v4952_v35  ;;  %2466 = vmatmul.mubr.bf16.gmra.mxu1 %v4953_v36 }
  0xe2   :  { %1905 = vmatprep.mubr.bf16.mxu0 %v4954_v37  ;;  %2473 = vmatprep.mubr.bf16.mxu1 %v4956_v38 }
  0xe9   :  { %1906 = vmatmul.mubr.bf16.gmra.mxu0 %v4958_v39  ;;  %2474 = vmatmul.mubr.bf16.gmra.mxu1 %v4959_v40 }
  0xea   :  { %1913 = vmatprep.mubr.bf16.mxu0 %v4960_v41  ;;  %2481 = vmatprep.mubr.bf16.mxu1 %v4962_v42 }
  0xf1   :  { %1914 = vmatmul.mubr.bf16.gmra.mxu0 %v4964_v43  ;;  %2482 = vmatmul.mubr.bf16.gmra.mxu1 %v4965_v44  ;;  %v4994_v44 = vld [vmem:[%s6746_s0 + $0x1b0] ss:$8 sps:$4 sm:$0xff]  }
  0xf2   :  { %1921 = vmatprep.mubr.bf16.mxu0 %v4966_v45  ;;  %2489 = vmatprep.mubr.bf16.mxu1 %v4968_v46  ;;  %v4995_v45 = vld [vmem:[%s6746_s0 + $0x620] ss:$8 sps:$4 sm:$0xff]  }
  0xf9   :  { %1922 = vmatmul.mubr.bf16.gmra.mxu0 %v4970_v47  ;;  %2490 = vmatmul.mubr.bf16.gmra.mxu1 %v4971_v48  ;;  %v4998_v48 = vld [vmem:[%s6746_s0 + $0x1c4] ss:$8 sps:$4 sm:$0xff]  }
  0xfa   :  { %1929 = vmatprep.mubr.bf16.mxu0 %v4972_v49  ;;  %2497 = vmatprep.mubr.bf16.mxu1 %v4974_v50  ;;  %v5001_v49 = vld [vmem:[%s6746_s0 + $0x634] ss:$8 sps:$4 sm:$0xff]  }
 0x101   :  { %v1739_v56 = vpop.f32.mrf.mxu0  ;;  %1930 = vmatmul.mubr.bf16.gmra.mxu0 %v4976_v52  ;;  %v5694_v57 = vpop.f32.mrf.mxu1  ;;  %2498 = vmatmul.mubr.bf16.gmra.mxu1 %v4977_v53 }
 0x102   :  { %1937 = vmatprep.mubr.bf16.mxu0 %v4978_v54  ;;  %2505 = vmatprep.mubr.bf16.mxu1 %v4980_v55  ;;  %v2762_v60 = vmax.f32 %v1739_v56, 0.0 }
 0x103   :  { %v1741_v58 = vpop.f32.mrf.mxu0  ;;  %v2309_v59 = vpop.f32.mrf.mxu1 }
 0x104   :  { %v3019_v6 = vsel %vm3018_vm0, %v2762_v60, 0.0 }
 0x105   :  { %v1742_v61 = vpop.f32.mrf.mxu0  ;;  %v5696_v62 = vpop.f32.mrf.mxu1 }
 0x106   :  { %v2763_v1 = vmax.f32 %v1742_v61, 0.0 }
 0x107   :  { %v1744_v4 = vpop.f32.mrf.mxu0  ;;  %v2312_v5 = vpop.f32.mrf.mxu1 }
 0x108   :  { %v3020_v7 = vsel %vm3018_vm0, %v2763_v1, 0.0 }
 0x109   :  { %v3021_v8 = vadd.f32 %v3020_v7, %v3019_v6  ;;  %v1747_v9 = vpop.f32.mrf.mxu0  ;;  %1938 = vmatmul.mubr.bf16.gmra.mxu0 %v4982_v63  ;;  %v2315_v10 = vpop.f32.mrf.mxu1  ;;  %2506 = vmatmul.mubr.bf16.gmra.mxu1 %v4983_v0  ;;  %v4996_v6 = vld [vmem:[%s6746_s0 + $0x1c0] ss:$8 sps:$4 sm:$0xff]   ;;  %v4999_v7 = vld [vmem:[%s6746_s0 + $0x630] ss:$8 sps:$4 sm:$0xff]  }
 0x10a   :  { %v2764_v11 = vmax.f32 %v1747_v9, 0.0  ;;  %v2906_v12 = vmax.f32 %v2315_v10, 0.0  ;;  %1945 = vmatprep.mubr.bf16.mxu0 %v4984_v2  ;;  %2513 = vmatprep.mubr.bf16.mxu1 %v4986_v3  ;;  %v5004_v10 = vld [vmem:[%s6746_s0 + $0x1d4] ss:$8 sps:$4 sm:$0xff]  }
 0x10b   :  { %v1749_v13 = vpop.f32.mrf.mxu0  ;;  %v2317_v14 = vpop.f32.mrf.mxu1 }
 0x10c   :  { %v3022_v15 = vsel %vm3018_vm0, %v2764_v11, 0.0  ;;  %v3397_v22 = vsel %vm3018_vm0, %v2906_v12, 0.0  ;;  %v5007_v11 = vld [vmem:[%s6746_s0 + $0x644] ss:$8 sps:$4 sm:$0xff]  }
 0x10d   :  { %v3023_v16 = vadd.f32 %v3022_v15, %v3021_v8  ;;  %v1750_v17 = vpop.f32.mrf.mxu0  ;;  %v2318_v18 = vpop.f32.mrf.mxu1 }
 0x10e   :  { %v2765_v23 = vmax.f32 %v1750_v17, 0.0  ;;  %v2907_v24 = vmax.f32 %v2318_v18, 0.0 }
 0x10f   :  { %v1752_v26 = vpop.f32.mrf.mxu0  ;;  %v2320_v27 = vpop.f32.mrf.mxu1 }
 0x110   :  { %v3024_v28 = vsel %vm3018_vm0, %v2765_v23, 0.0  ;;  %v3398_v29 = vsel %vm3018_vm0, %v2907_v24, 0.0 }
 0x111   :  { %v3025_v30 = vadd.f32 %v3024_v28, %v3023_v16  ;;  %v3399_v31 = vadd.f32 %v3398_v29, %v3397_v22  ;;  %v1755_v32 = vpop.f32.mrf.mxu0  ;;  %1946 = vmatmul.mubr.bf16.gmra.mxu0 %v4988_v19  ;;  %v2323_v33 = vpop.f32.mrf.mxu1  ;;  %2514 = vmatmul.mubr.bf16.gmra.mxu1 %v4989_v20  ;;  %v5002_v28 = vld [vmem:[%s6746_s0 + $0x1d0] ss:$8 sps:$4 sm:$0xff]   ;;  %v5005_v29 = vld [vmem:[%s6746_s0 + $0x640] ss:$8 sps:$4 sm:$0xff]  }
 0x112   :  { %v2766_v34 = vmax.f32 %v1755_v32, 0.0  ;;  %v2908_v35 = vmax.f32 %v2323_v33, 0.0  ;;  %1953 = vmatprep.mubr.bf16.mxu0 %v4990_v21  ;;  %2521 = vmatprep.mubr.bf16.mxu1 %v4992_v25  ;;  %v5010_v32 = vld [vmem:[%s6746_s0 + $0x1e4] ss:$8 sps:$4 sm:$0xff]   ;;  %v5013_v33 = vld [vmem:[%s6746_s0 + $0x654] ss:$8 sps:$4 sm:$0xff]  }
 0x113   :  { %v1757_v36 = vpop.f32.mrf.mxu0  ;;  %v2325_v37 = vpop.f32.mrf.mxu1 }
 0x114   :  { %v3026_v38 = vsel %vm3018_vm0, %v2766_v34, 0.0  ;;  %v3400_v39 = vsel %vm3018_vm0, %v2908_v35, 0.0 }
 0x115   :  { %v3027_v40 = vadd.f32 %v3026_v38, %v3025_v30  ;;  %v3401_v41 = vadd.f32 %v3400_v39, %v3399_v31  ;;  %v1758_v42 = vpop.f32.mrf.mxu0  ;;  %v2326_v43 = vpop.f32.mrf.mxu1 }
 0x116   :  { %v2767_v46 = vmax.f32 %v1758_v42, 0.0  ;;  %v2909_v47 = vmax.f32 %v2326_v43, 0.0 }
 0x117   :  { %v1760_v50 = vpop.f32.mrf.mxu0  ;;  %v2328_v51 = vpop.f32.mrf.mxu1 }
 0x118   :  { %v3028_v52 = vsel %vm3018_vm0, %v2767_v46, 0.0  ;;  %v3402_v53 = vsel %vm3018_vm0, %v2909_v47, 0.0  ;;  %v5008_v51 = vld [vmem:[%s6746_s0 + $0x1e0] ss:$8 sps:$4 sm:$0xff]  }
 0x119   :  { %v3029_v54 = vadd.f32 %v3028_v52, %v3027_v40  ;;  %v3403_v55 = vadd.f32 %v3402_v53, %v3401_v41  ;;  %v1763_v56 = vpop.f32.mrf.mxu0  ;;  %1954 = vmatmul.mubr.bf16.gmra.mxu0 %v4994_v44  ;;  %v2331_v58 = vpop.f32.mrf.mxu1  ;;  %2522 = vmatmul.mubr.bf16.gmra.mxu1 %v4995_v45  ;;  %v5011_v52 = vld [vmem:[%s6746_s0 + $0x650] ss:$8 sps:$4 sm:$0xff]   ;;  %v5016_v53 = vld [vmem:[%s6746_s0 + $0x1f4] ss:$8 sps:$4 sm:$0xff]  }
 0x11a   :  { %v2768_v59 = vmax.f32 %v1763_v56, 0.0  ;;  %v2910_v60 = vmax.f32 %v2331_v58, 0.0  ;;  %1961 = vmatprep.mubr.bf16.mxu0 %v4998_v48  ;;  %2529 = vmatprep.mubr.bf16.mxu1 %v5001_v49  ;;  %v5019_v58 = vld [vmem:[%s6746_s0 + $0x664] ss:$8 sps:$4 sm:$0xff]  }
 0x11b   :  { %v1765_v61 = vpop.f32.mrf.mxu0  ;;  %v2333_v63 = vpop.f32.mrf.mxu1 }
 0x11c   :  { %v3030_v0 = vsel %vm3018_vm0, %v2768_v59, 0.0  ;;  %v3404_v1 = vsel %vm3018_vm0, %v2910_v60, 0.0 }
 0x11d   :  { %v3031_v2 = vadd.f32 %v3030_v0, %v3029_v54  ;;  %v3405_v3 = vadd.f32 %v3404_v1, %v3403_v55  ;;  %v1766_v4 = vpop.f32.mrf.mxu0  ;;  %v2334_v5 = vpop.f32.mrf.mxu1 }
 0x11e   :  { %v2769_v8 = vmax.f32 %v1766_v4, 0.0  ;;  %v2911_v9 = vmax.f32 %v2334_v5, 0.0 }
 0x11f   :  { %v1768_v12 = vpop.f32.mrf.mxu0  ;;  %v2336_v13 = vpop.f32.mrf.mxu1 }
 0x120   :  { %v3032_v14 = vsel %vm3018_vm0, %v2769_v8, 0.0  ;;  %v3406_v15 = vsel %vm3018_vm0, %v2911_v9, 0.0 }
 0x121   :  { %v5760_v16 = vadd.f32 %v3032_v14, %v3031_v2  ;;  %v3407_v17 = vadd.f32 %v3406_v15, %v3405_v3  ;;  %v1771_v18 = vpop.f32.mrf.mxu0  ;;  %1962 = vmatmul.mubr.bf16.gmra.mxu0 %v4996_v6  ;;  %v2339_v19 = vpop.f32.mrf.mxu1  ;;  %2530 = vmatmul.mubr.bf16.gmra.mxu1 %v4999_v7  ;;  %v5014_v14 = vld [vmem:[%s6746_s0 + $0x1f0] ss:$8 sps:$4 sm:$0xff]   ;;  %v5017_v15 = vld [vmem:[%s6746_s0 + $0x660] ss:$8 sps:$4 sm:$0xff]  }
 0x122   :  { %v2912_v20 = vmax.f32 %v2339_v19, 0.0  ;;  %1969 = vmatprep.mubr.bf16.mxu0 %v5004_v10  ;;  %2537 = vmatprep.mubr.bf16.mxu1 %v5007_v11  ;;  %v2770_v23 = vmax.f32 %v1771_v18, 0.0 }
 0x123   :  { %v1773_v21 = vpop.f32.mrf.mxu0  ;;  %v2341_v22 = vpop.f32.mrf.mxu1 }
 0x124   :  { %v3408_v24 = vsel %vm3018_vm0, %v2912_v20, 0.0  ;;  %v3040_v36 = vsel %vm3018_vm0, %v2770_v23, 0.0  ;;  %v5022_v20 = vld [vmem:[%s6746_s0 + $0x204] ss:$8 sps:$4 sm:$0xff]   ;;  %v5025_v21 = vld [vmem:[%s6746_s0 + $0x674] ss:$8 sps:$4 sm:$0xff]  }
 0x125   :  { %v3409_v25 = vadd.f32 %v3408_v24, %v3407_v17  ;;  %v1774_v26 = vpop.f32.mrf.mxu0  ;;  %v2342_v27 = vpop.f32.mrf.mxu1  ;;  %v326_v17 = vld [vmem:[%s6747_s2 + $0x30] sm:$0xff] }
 0x126   :  { %v2771_v30 = vmax.f32 %v1774_v26, 0.0  ;;  %v2913_v31 = vmax.f32 %v2342_v27, 0.0  ;;  %4738 = vmatprep.subr.mxu1 %v326_v17  ;;  %v3034_v26 = vrot.slane %v5760_v16, 4 }
 0x127   :  { %v1776_v34 = vpop.f32.mrf.mxu0  ;;  %v2344_v35 = vpop.f32.mrf.mxu1  ;;  %4739 = vmatpush3.msra.mxu1 %v326_v17 }
 0x128   :  { %v3041_v37 = vsel %vm3018_vm0, %v2771_v30, 0.0  ;;  %v3410_v38 = vsel %vm3018_vm0, %v2913_v31, 0.0 }
 0x129   :  { %v3042_v39 = vadd.f32 %v3041_v37, %v3040_v36  ;;  %v5778_v40 = vadd.f32 %v3410_v38, %v3409_v25  ;;  %v1779_v41 = vpop.f32.mrf.mxu0  ;;  %1970 = vmatmul.mubr.bf16.gmra.mxu0 %v5002_v28  ;;  %v2347_v42 = vpop.f32.mrf.mxu1  ;;  %2538 = vmatmul.mubr.bf16.gmra.mxu1 %v5005_v29  ;;  %v3035_v37 = vadd.f32 %v3034_v26, %v5760_v16  ;;  %v5031_v16 = vld [vmem:[%s6746_s0 + $0x684] ss:$8 sps:$4 sm:$0xff]  }
 0x12a   :  { %v2772_v43 = vmax.f32 %v1779_v41, 0.0  ;;  %v2914_v44 = vmax.f32 %v2347_v42, 0.0  ;;  %1977 = vmatprep.mubr.bf16.mxu0 %v5010_v32  ;;  %2545 = vmatprep.mubr.bf16.mxu1 %v5013_v33 }
 0x12b   :  { %v1781_v45 = vpop.f32.mrf.mxu0  ;;  %v2349_v46 = vpop.f32.mrf.mxu1 }
 0x12c   :  { %v3043_v47 = vsel %vm3018_vm0, %v2772_v43, 0.0  ;;  %v3418_v54 = vsel %vm3018_vm0, %v2914_v44, 0.0  ;;  %v5020_v43 = vld [vmem:[%s6746_s0 + $0x200] ss:$8 sps:$4 sm:$0xff]   ;;  %v5023_v44 = vld [vmem:[%s6746_s0 + $0x670] ss:$8 sps:$4 sm:$0xff]  }
 0x12d   :  { %v3044_v48 = vadd.f32 %v3043_v47, %v3042_v39  ;;  %v1782_v49 = vpop.f32.mrf.mxu0  ;;  %v2350_v50 = vpop.f32.mrf.mxu1  ;;  %v5028_v47 = vld [vmem:[%s6746_s0 + $0x214] ss:$8 sps:$4 sm:$0xff]  }
 0x12e   :  { %v2773_v55 = vmax.f32 %v1782_v49, 0.0  ;;  %v2915_v56 = vmax.f32 %v2350_v50, 0.0 }
 0x12f   :  { %v1784_v59 = vpop.f32.mrf.mxu0  ;;  %v2352_v60 = vpop.f32.mrf.mxu1 }
 0x130   :  { %v3045_v61 = vsel %vm3018_vm0, %v2773_v55, 0.0  ;;  %v3419_v63 = vsel %vm3018_vm0, %v2915_v56, 0.0 }
 0x131   :  { %v3046_v0 = vadd.f32 %v3045_v61, %v3044_v48  ;;  %v3420_v1 = vadd.f32 %v3419_v63, %v3418_v54  ;;  %v1787_v2 = vpop.f32.mrf.mxu0  ;;  %1978 = vmatmul.mubr.bf16.gmra.mxu0 %v5008_v51  ;;  %v2355_v3 = vpop.f32.mrf.mxu1  ;;  %2546 = vmatmul.mubr.bf16.gmra.mxu1 %v5011_v52  ;;  %v3036_v52 = vrot.slane %v3035_v37, 2 }
 0x132   :  { %v2774_v4 = vmax.f32 %v1787_v2, 0.0  ;;  %v2916_v5 = vmax.f32 %v2355_v3, 0.0  ;;  %1985 = vmatprep.mubr.bf16.mxu0 %v5016_v53  ;;  %2553 = vmatprep.mubr.bf16.mxu1 %v5019_v58 }
 0x133   :  { %v1789_v6 = vpop.f32.mrf.mxu0  ;;  %v2357_v7 = vpop.f32.mrf.mxu1 }
 0x134   :  { %v3047_v8 = vsel %vm3018_vm0, %v2774_v4, 0.0  ;;  %v3421_v9 = vsel %vm3018_vm0, %v2916_v5, 0.0  ;;  %v5026_v6 = vld [vmem:[%s6746_s0 + $0x210] ss:$8 sps:$4 sm:$0xff]   ;;  %v5029_v7 = vld [vmem:[%s6746_s0 + $0x680] ss:$8 sps:$4 sm:$0xff]  }
 0x135   :  { %v3048_v10 = vadd.f32 %v3047_v8, %v3046_v0  ;;  %v3422_v11 = vadd.f32 %v3421_v9, %v3420_v1  ;;  %v1790_v12 = vpop.f32.mrf.mxu0  ;;  %v2358_v13 = vpop.f32.mrf.mxu1  ;;  %v3037_v1 = vadd.f32 %v3036_v52, %v3035_v37  ;;  %v5035_v37 = vld [vmem:[%s6746_s0 + $0x690] ss:$8 sps:$4 sm:$0xff]  }
 0x136   :  { %v2775_v18 = vmax.f32 %v1790_v12, 0.0  ;;  %v2917_v19 = vmax.f32 %v2358_v13, 0.0 }
 0x137   :  { %v1792_v22 = vpop.f32.mrf.mxu0  ;;  %v2360_v23 = vpop.f32.mrf.mxu1 }
 0x138   :  { %v3049_v24 = vsel %vm3018_vm0, %v2775_v18, 0.0  ;;  %v3423_v25 = vsel %vm3018_vm0, %v2917_v19, 0.0  ;;  %v3038_v19 = vrot.slane %v3037_v1, 1 }
 0x139   :  { %v3050_v27 = vadd.f32 %v3049_v24, %v3048_v10  ;;  %v3424_v28 = vadd.f32 %v3423_v25, %v3422_v11  ;;  %v1795_v29 = vpop.f32.mrf.mxu0  ;;  %1986 = vmatmul.mubr.bf16.gmra.mxu0 %v5014_v14  ;;  %v2363_v30 = vpop.f32.mrf.mxu1  ;;  %2554 = vmatmul.mubr.bf16.gmra.mxu1 %v5017_v15  ;;  %v5034_v10 = vld [vmem:[%s6746_s0 + $0x224] ss:$8 sps:$4 sm:$0xff]   ;;  %v5037_v11 = vld [vmem:[%s6746_s0 + $0x694] ss:$8 sps:$4 sm:$0xff]  }
 0x13a   :  { %v2776_v31 = vmax.f32 %v1795_v29, 0.0  ;;  %v2918_v32 = vmax.f32 %v2363_v30, 0.0  ;;  %1993 = vmatprep.mubr.bf16.mxu0 %v5022_v20  ;;  %2561 = vmatprep.mubr.bf16.mxu1 %v5025_v21 }
 0x13b   :  { %v1797_v33 = vpop.f32.mrf.mxu0  ;;  %v2365_v34 = vpop.f32.mrf.mxu1 }
 0x13c   :  { %v3051_v35 = vsel %vm3018_vm0, %v2776_v31, 0.0  ;;  %v3425_v36 = vsel %vm3018_vm0, %v2918_v32, 0.0  ;;  %v3039_v31 = vadd.f32 %v3038_v19, %v3037_v1  ;;  %v5041_v1 = vld [vmem:[%s6746_s0 + $0x6a0] ss:$8 sps:$4 sm:$0xff]  }
 0x13d   :  { %v3052_v38 = vadd.f32 %v3051_v35, %v3050_v27  ;;  %v3426_v39 = vadd.f32 %v3425_v36, %v3424_v28  ;;  %v1798_v41 = vpop.f32.mrf.mxu0  ;;  %v2366_v42 = vpop.f32.mrf.mxu1  ;;  %v5032_v36 = vld [vmem:[%s6746_s0 + $0x220] ss:$8 sps:$4 sm:$0xff]  }
 0x13e   :  { %v2777_v45 = vmax.f32 %v1798_v41, 0.0  ;;  %v2919_v46 = vmax.f32 %v2366_v42, 0.0 }
 0x13f   :  { %v1800_v48 = vpop.f32.mrf.mxu0  ;;  %v2368_v49 = vpop.f32.mrf.mxu1 }
 0x140   :  { %v3053_v50 = vsel %vm3018_vm0, %v2777_v45, 0.0  ;;  %v3427_v51 = vsel %vm3018_vm0, %v2919_v46, 0.0 }
 0x141   :  { %v3054_v53 = vadd.f32 %v3053_v50, %v3052_v38  ;;  %v3428_v54 = vadd.f32 %v3427_v51, %v3426_v39  ;;  %v1803_v55 = vpop.f32.mrf.mxu0  ;;  %1994 = vmatmul.mubr.bf16.gmra.mxu0 %v5020_v43  ;;  %v2371_v56 = vpop.f32.mrf.mxu1  ;;  %2562 = vmatmul.mubr.bf16.gmra.mxu1 %v5023_v44  ;;  %v5040_v38 = vld [vmem:[%s6746_s0 + $0x234] ss:$8 sps:$4 sm:$0xff]   ;;  %v5043_v43 = vld [vmem:[%s6746_s0 + $0x6a4] ss:$8 sps:$4 sm:$0xff]  }
 0x142   :  { %v2920_v58 = vmax.f32 %v2371_v56, 0.0  ;;  %2001 = vmatprep.mubr.bf16.mxu0 %v5028_v47  ;;  %2569 = vmatprep.mubr.bf16.mxu1 %v5031_v16  ;;  %v2778_v63 = vmax.f32 %v1803_v55, 0.0 }
 0x143   :  { %v3055_v59 = vrot.slane %v3054_v53, 4  ;;  %v1805_v60 = vpop.f32.mrf.mxu0  ;;  %v2373_v61 = vpop.f32.mrf.mxu1 }
 0x144   :  { %v3429_v0 = vsel %vm3018_vm0, %v2920_v58, 0.0  ;;  %v3061_v15 = vsel %vm3018_vm0, %v2778_v63, 0.0 }
 0x145   :  { %v3056_v2 = vadd.f32 %v3055_v59, %v3054_v53  ;;  %v3430_v3 = vadd.f32 %v3429_v0, %v3428_v54  ;;  %v1806_v4 = vpop.f32.mrf.mxu0  ;;  %v2374_v5 = vpop.f32.mrf.mxu1  ;;  %v5038_v0 = vld [vmem:[%s6746_s0 + $0x230] ss:$8 sps:$4 sm:$0xff]  }
 0x146   :  { %v2779_v8 = vmax.f32 %v1806_v4, 0.0  ;;  %v2921_v9 = vmax.f32 %v2374_v5, 0.0  ;;  %v5046_v4 = vld [vmem:[%s6746_s0 + $0x244] ss:$8 sps:$4 sm:$0xff]   ;;  %v5049_v5 = vld [vmem:[%s6746_s0 + $0x6b4] ss:$8 sps:$4 sm:$0xff]  }
 0x147   :  { %v3057_v12 = vrot.slane %v3056_v2, 2  ;;  %v1808_v13 = vpop.f32.mrf.mxu0  ;;  %v2376_v14 = vpop.f32.mrf.mxu1 }
 0x148   :  { %v3062_v17 = vsel %vm3018_vm0, %v2779_v8, 0.0  ;;  %v3431_v18 = vsel %vm3018_vm0, %v2921_v9, 0.0 }
 0x149   :  { %v3058_v20 = vadd.f32 %v3057_v12, %v3056_v2  ;;  %v3063_v21 = vadd.f32 %v3062_v17, %v3061_v15  ;;  %v5849_v22 = vadd.f32 %v3431_v18, %v3430_v3  ;;  %v1811_v23 = vpop.f32.mrf.mxu0  ;;  %2002 = vmatmul.mubr.bf16.gmra.mxu0 %v5026_v6  ;;  %v2379_v24 = vpop.f32.mrf.mxu1  ;;  %2570 = vmatmul.mubr.bf16.gmra.mxu1 %v5029_v7 }
 0x14a   :  { %v2780_v25 = vmax.f32 %v1811_v23, 0.0  ;;  %v2922_v26 = vmax.f32 %v2379_v24, 0.0  ;;  %2009 = vmatprep.mubr.bf16.mxu0 %v5034_v10  ;;  %2577 = vmatprep.mubr.bf16.mxu1 %v5037_v11 }
 0x14b   :  { %v3059_v27 = vrot.slane %v3058_v20, 1  ;;  %v1813_v28 = vpop.f32.mrf.mxu0  ;;  %v2381_v29 = vpop.f32.mrf.mxu1 }
 0x14c   :  { %v3064_v30 = vsel %vm3018_vm0, %v2780_v25, 0.0  ;;  %v3439_v39 = vsel %vm3018_vm0, %v2922_v26, 0.0  ;;  %v5044_v26 = vld [vmem:[%s6746_s0 + $0x240] ss:$8 sps:$4 sm:$0xff]  }
 0x14d   :  { %v3060_v32 = vadd.f32 %v3059_v27, %v3058_v20  ;;  %v3065_v33 = vadd.f32 %v3064_v30, %v3063_v21  ;;  %v1814_v34 = vpop.f32.mrf.mxu0  ;;  %v2382_v35 = vpop.f32.mrf.mxu1  ;;  %v5047_v27 = vld [vmem:[%s6746_s0 + $0x6b0] ss:$8 sps:$4 sm:$0xff]   ;;  %v5052_v30 = vld [vmem:[%s6746_s0 + $0x254] ss:$8 sps:$4 sm:$0xff]  }
 0x14e   :  { %v2781_v41 = vmax.f32 %v1814_v34, 0.0  ;;  %v2923_v42 = vmax.f32 %v2382_v35, 0.0 }
 0x14f   :  { %v5866_v44 = vsel %vm3729_vm1, %v3060_v32, %v3039_v31  ;;  %v1816_v45 = vpop.f32.mrf.mxu0  ;;  %v2384_v46 = vpop.f32.mrf.mxu1  ;;  %v5055_v31 = vld [vmem:[%s6746_s0 + $0x6c4] ss:$8 sps:$4 sm:$0xff]  }
 0x150   :  { %v3066_v47 = vsel %vm3018_vm0, %v2781_v41, 0.0  ;;  %v3440_v16 = vsel %vm3018_vm0, %v2923_v42, 0.0 }
 0x151   :  { %v3067_v48 = vadd.f32 %v3066_v47, %v3065_v33  ;;  %v3441_v49 = vadd.f32 %v3440_v16, %v3439_v39  ;;  %v1819_v50 = vpop.f32.mrf.mxu0  ;;  %2010 = vmatmul.mubr.bf16.gmra.mxu0 %v5032_v36  ;;  %v2387_v51 = vpop.f32.mrf.mxu1  ;;  %2578 = vmatmul.mubr.bf16.gmra.mxu1 %v5035_v37 }
 0x152   :  { %v2782_v52 = vmax.f32 %v1819_v50, 0.0  ;;  %v2924_v53 = vmax.f32 %v2387_v51, 0.0  ;;  %2017 = vmatprep.mubr.bf16.mxu0 %v5040_v38  ;;  %2585 = vmatprep.mubr.bf16.mxu1 %v5043_v43  ;;  %v5050_v51 = vld [vmem:[%s6746_s0 + $0x250] ss:$8 sps:$4 sm:$0xff]  }
 0x153   :  { %v1821_v54 = vpop.f32.mrf.mxu0  ;;  %v2389_v55 = vpop.f32.mrf.mxu1 }
 0x154   :  { %v3068_v56 = vsel %vm3018_vm0, %v2782_v52, 0.0  ;;  %v3442_v58 = vsel %vm3018_vm0, %v2924_v53, 0.0  ;;  %v5053_v52 = vld [vmem:[%s6746_s0 + $0x6c0] ss:$8 sps:$4 sm:$0xff]   ;;  %v5058_v55 = vld [vmem:[%s6746_s0 + $0x264] ss:$8 sps:$4 sm:$0xff]  }
 0x155   :  { %v3069_v59 = vadd.f32 %v3068_v56, %v3067_v48  ;;  %v3443_v60 = vadd.f32 %v3442_v58, %v3441_v49  ;;  %v1822_v61 = vpop.f32.mrf.mxu0  ;;  %v2390_v63 = vpop.f32.mrf.mxu1  ;;  %v5061_v56 = vld [vmem:[%s6746_s0 + $0x6d4] ss:$8 sps:$4 sm:$0xff]  }
 0x156   :  { %v2783_v2 = vmax.f32 %v1822_v61, 0.0  ;;  %v2925_v3 = vmax.f32 %v2390_v63, 0.0 }
 0x157   :  { %v1824_v6 = vpop.f32.mrf.mxu0  ;;  %v2392_v7 = vpop.f32.mrf.mxu1 }
 0x158   :  { %v3070_v8 = vsel %vm3018_vm0, %v2783_v2, 0.0  ;;  %v3444_v9 = vsel %vm3018_vm0, %v2925_v3, 0.0 }
 0x159   :  { %v3071_v10 = vadd.f32 %v3070_v8, %v3069_v59  ;;  %v3445_v11 = vadd.f32 %v3444_v9, %v3443_v60  ;;  %v1827_v12 = vpop.f32.mrf.mxu0  ;;  %2018 = vmatmul.mubr.bf16.gmra.mxu0 %v5038_v0  ;;  %v2395_v13 = vpop.f32.mrf.mxu1  ;;  %2586 = vmatmul.mubr.bf16.gmra.mxu1 %v5041_v1 }
 0x15a   :  { %v2784_v14 = vmax.f32 %v1827_v12, 0.0  ;;  %v2926_v15 = vmax.f32 %v2395_v13, 0.0  ;;  %2025 = vmatprep.mubr.bf16.mxu0 %v5046_v4  ;;  %2593 = vmatprep.mubr.bf16.mxu1 %v5049_v5  ;;  %v5056_v12 = vld [vmem:[%s6746_s0 + $0x260] ss:$8 sps:$4 sm:$0xff]  }
 0x15b   :  { %v1829_v17 = vpop.f32.mrf.mxu0  ;;  %v2397_v18 = vpop.f32.mrf.mxu1 }
 0x15c   :  { %v3072_v19 = vsel %vm3018_vm0, %v2784_v14, 0.0  ;;  %v3446_v20 = vsel %vm3018_vm0, %v2926_v15, 0.0  ;;  %v5059_v18 = vld [vmem:[%s6746_s0 + $0x6d0] ss:$8 sps:$4 sm:$0xff]  }
 0x15d   :  { %v3073_v21 = vadd.f32 %v3072_v19, %v3071_v10  ;;  %v3447_v23 = vadd.f32 %v3446_v20, %v3445_v11  ;;  %v1830_v24 = vpop.f32.mrf.mxu0  ;;  %v2398_v25 = vpop.f32.mrf.mxu1  ;;  %v5064_v19 = vld [vmem:[%s6746_s0 + $0x274] ss:$8 sps:$4 sm:$0xff]   ;;  %v325_v20 = vld [vmem:[%s6747_s2 + $0x28] sm:$0xff] }
 0x15e   :  { %v2785_v28 = vmax.f32 %v1830_v24, 0.0  ;;  %v2927_v29 = vmax.f32 %v2398_v25, 0.0  ;;  %v5067_v25 = vld [vmem:[%s6746_s0 + $0x6e4] ss:$8 sps:$4 sm:$0xff]   ;;  %4740 = vmatprep.subr.mxu1 %v325_v20 }
 0x15f   :  { %v1832_v32 = vpop.f32.mrf.mxu0  ;;  %v2400_v33 = vpop.f32.mrf.mxu1  ;;  %4741 = vmatpush3.msra.mxu1 %v325_v20 }
 0x160   :  { %v3074_v34 = vsel %vm3018_vm0, %v2785_v28, 0.0  ;;  %v3448_v35 = vsel %vm3018_vm0, %v2927_v29, 0.0 }
 0x161   :  { %v3075_v36 = vadd.f32 %v3074_v34, %v3073_v21  ;;  %v3449_v37 = vadd.f32 %v3448_v35, %v3447_v23  ;;  %v1835_v38 = vpop.f32.mrf.mxu0  ;;  %2026 = vmatmul.mubr.bf16.gmra.mxu0 %v5044_v26  ;;  %v2403_v39 = vpop.f32.mrf.mxu1  ;;  %2594 = vmatmul.mubr.bf16.gmra.mxu1 %v5047_v27 }
 0x162   :  { %v2928_v41 = vmax.f32 %v2403_v39, 0.0  ;;  %2033 = vmatprep.mubr.bf16.mxu0 %v5052_v30  ;;  %2601 = vmatprep.mubr.bf16.mxu1 %v5055_v31  ;;  %v2786_v46 = vmax.f32 %v1835_v38, 0.0 }
 0x163   :  { %v3076_v42 = vrot.slane %v3075_v36, 4  ;;  %v1837_v43 = vpop.f32.mrf.mxu0  ;;  %v2405_v45 = vpop.f32.mrf.mxu1 }
 0x164   :  { %v3450_v47 = vsel %vm3018_vm0, %v2928_v41, 0.0  ;;  %v3082_v61 = vsel %vm3018_vm0, %v2786_v46, 0.0  ;;  %v5062_v46 = vld [vmem:[%s6746_s0 + $0x270] ss:$8 sps:$4 sm:$0xff]  }
 0x165   :  { %v3077_v16 = vadd.f32 %v3076_v42, %v3075_v36  ;;  %v3451_v48 = vadd.f32 %v3450_v47, %v3449_v37  ;;  %v1838_v49 = vpop.f32.mrf.mxu0  ;;  %v2406_v50 = vpop.f32.mrf.mxu1  ;;  %v5065_v47 = vld [vmem:[%s6746_s0 + $0x6e0] ss:$8 sps:$4 sm:$0xff]  }
 0x166   :  { %v2787_v53 = vmax.f32 %v1838_v49, 0.0  ;;  %v2929_v54 = vmax.f32 %v2406_v50, 0.0  ;;  %v5070_v49 = vld [vmem:[%s6746_s0 + $0x284] ss:$8 sps:$4 sm:$0xff]   ;;  %v5073_v50 = vld [vmem:[%s6746_s0 + $0x6f4] ss:$8 sps:$4 sm:$0xff]  }
 0x167   :  { %v3078_v58 = vrot.slane %v3077_v16, 2  ;;  %v1840_v59 = vpop.f32.mrf.mxu0  ;;  %v2408_v60 = vpop.f32.mrf.mxu1 }
 0x168   :  { %v3083_v63 = vsel %vm3018_vm0, %v2787_v53, 0.0  ;;  %v3452_v0 = vsel %vm3018_vm0, %v2929_v54, 0.0 }
 0x169   :  { %v3079_v1 = vadd.f32 %v3078_v58, %v3077_v16  ;;  %v3084_v2 = vadd.f32 %v3083_v63, %v3082_v61  ;;  %v5918_v3 = vadd.f32 %v3452_v0, %v3451_v48  ;;  %v1843_v4 = vpop.f32.mrf.mxu0  ;;  %2034 = vmatmul.mubr.bf16.gmra.mxu0 %v5050_v51  ;;  %v2411_v5 = vpop.f32.mrf.mxu1  ;;  %2602 = vmatmul.mubr.bf16.gmra.mxu1 %v5053_v52 }
 0x16a   :  { %v2788_v6 = vmax.f32 %v1843_v4, 0.0  ;;  %v2930_v7 = vmax.f32 %v2411_v5, 0.0  ;;  %2041 = vmatprep.mubr.bf16.mxu0 %v5058_v55  ;;  %2609 = vmatprep.mubr.bf16.mxu1 %v5061_v56 }
 0x16b   :  { %v3080_v8 = vrot.slane %v3079_v1, 1  ;;  %v1845_v9 = vpop.f32.mrf.mxu0  ;;  %v2413_v10 = vpop.f32.mrf.mxu1 }
 0x16c   :  { %v3085_v11 = vsel %vm3018_vm0, %v2788_v6, 0.0  ;;  %v3460_v21 = vsel %vm3018_vm0, %v2930_v7, 0.0  ;;  %v5071_v9 = vld [vmem:[%s6746_s0 + $0x6f0] ss:$8 sps:$4 sm:$0xff]  }
 0x16d   :  { %v3081_v13 = vadd.f32 %v3080_v8, %v3079_v1  ;;  %v3086_v14 = vadd.f32 %v3085_v11, %v3084_v2  ;;  %v1846_v15 = vpop.f32.mrf.mxu0  ;;  %v2414_v17 = vpop.f32.mrf.mxu1  ;;  %v5068_v8 = vld [vmem:[%s6746_s0 + $0x280] ss:$8 sps:$4 sm:$0xff]  }
 0x16e   :  { %v2789_v23 = vmax.f32 %v1846_v15, 0.0  ;;  %v2931_v24 = vmax.f32 %v2414_v17, 0.0 }
 0x16f   :  { %v5939_v26 = vsel %vm3731_vm2, %v3081_v13, %v5866_v44  ;;  %v1848_v27 = vpop.f32.mrf.mxu0  ;;  %v2416_v28 = vpop.f32.mrf.mxu1  ;;  %v5079_v13 = vld [vmem:[%s6746_s0 + $0x704] ss:$8 sps:$4 sm:$0xff]  }
 0x170   :  { %v3087_v29 = vsel %vm3018_vm0, %v2789_v23, 0.0  ;;  %v3461_v30 = vsel %vm3018_vm0, %v2931_v24, 0.0 }
 0x171   :  { %v3088_v31 = vadd.f32 %v3087_v29, %v3086_v14  ;;  %v3462_v32 = vadd.f32 %v3461_v30, %v3460_v21  ;;  %v1851_v33 = vpop.f32.mrf.mxu0  ;;  %2042 = vmatmul.mubr.bf16.gmra.mxu0 %v5056_v12  ;;  %v2419_v34 = vpop.f32.mrf.mxu1  ;;  %2610 = vmatmul.mubr.bf16.gmra.mxu1 %v5059_v18  ;;  %v5076_v12 = vld [vmem:[%s6746_s0 + $0x294] ss:$8 sps:$4 sm:$0xff]  }
 0x172   :  { %v2790_v35 = vmax.f32 %v1851_v33, 0.0  ;;  %v2932_v36 = vmax.f32 %v2419_v34, 0.0  ;;  %2049 = vmatprep.mubr.bf16.mxu0 %v5064_v19  ;;  %2617 = vmatprep.mubr.bf16.mxu1 %v5067_v25 }
 0x173   :  { %v1853_v37 = vpop.f32.mrf.mxu0  ;;  %v2421_v44 = vpop.f32.mrf.mxu1 }
 0x174   :  { %v3089_v38 = vsel %vm3018_vm0, %v2790_v35, 0.0  ;;  %v3463_v39 = vsel %vm3018_vm0, %v2932_v36, 0.0  ;;  %v5074_v35 = vld [vmem:[%s6746_s0 + $0x290] ss:$8 sps:$4 sm:$0xff]   ;;  %v5077_v36 = vld [vmem:[%s6746_s0 + $0x700] ss:$8 sps:$4 sm:$0xff]  }
 0x175   :  { %v3090_v41 = vadd.f32 %v3089_v38, %v3088_v31  ;;  %v3464_v42 = vadd.f32 %v3463_v39, %v3462_v32  ;;  %v1854_v43 = vpop.f32.mrf.mxu0  ;;  %v2422_v45 = vpop.f32.mrf.mxu1  ;;  %v5082_v38 = vld [vmem:[%s6746_s0 + $0x2a4] ss:$8 sps:$4 sm:$0xff]   ;;  %v5085_v39 = vld [vmem:[%s6746_s0 + $0x714] ss:$8 sps:$4 sm:$0xff]  }
 0x176   :  { %v2791_v16 = vmax.f32 %v1854_v43, 0.0  ;;  %v2933_v48 = vmax.f32 %v2422_v45, 0.0 }
 0x177   :  { %v1856_v51 = vpop.f32.mrf.mxu0  ;;  %v2424_v52 = vpop.f32.mrf.mxu1 }
 0x178   :  { %v3091_v53 = vsel %vm3018_vm0, %v2791_v16, 0.0  ;;  %v3465_v54 = vsel %vm3018_vm0, %v2933_v48, 0.0 }
 0x179   :  { %v3092_v55 = vadd.f32 %v3091_v53, %v3090_v41  ;;  %v3466_v56 = vadd.f32 %v3465_v54, %v3464_v42  ;;  %v1859_v58 = vpop.f32.mrf.mxu0  ;;  %2050 = vmatmul.mubr.bf16.gmra.mxu0 %v5062_v46  ;;  %v2427_v59 = vpop.f32.mrf.mxu1  ;;  %2618 = vmatmul.mubr.bf16.gmra.mxu1 %v5065_v47 }
 0x17a   :  { %v2792_v60 = vmax.f32 %v1859_v58, 0.0  ;;  %v2934_v61 = vmax.f32 %v2427_v59, 0.0  ;;  %2057 = vmatprep.mubr.bf16.mxu0 %v5070_v49  ;;  %2625 = vmatprep.mubr.bf16.mxu1 %v5073_v50 }
 0x17b   :  { %v1861_v63 = vpop.f32.mrf.mxu0  ;;  %v2429_v0 = vpop.f32.mrf.mxu1 }
 0x17c   :  { %v3093_v1 = vsel %vm3018_vm0, %v2792_v60, 0.0  ;;  %v3467_v2 = vsel %vm3018_vm0, %v2934_v61, 0.0  ;;  %v5080_v0 = vld [vmem:[%s6746_s0 + $0x2a0] ss:$8 sps:$4 sm:$0xff]  }
 0x17d   :  { %v3094_v4 = vadd.f32 %v3093_v1, %v3092_v55  ;;  %v3468_v5 = vadd.f32 %v3467_v2, %v3466_v56  ;;  %v1862_v6 = vpop.f32.mrf.mxu0  ;;  %v2430_v7 = vpop.f32.mrf.mxu1  ;;  %v5083_v1 = vld [vmem:[%s6746_s0 + $0x710] ss:$8 sps:$4 sm:$0xff]   ;;  %v5088_v2 = vld [vmem:[%s6746_s0 + $0x2b4] ss:$8 sps:$4 sm:$0xff]  }
 0x17e   :  { %v2793_v10 = vmax.f32 %v1862_v6, 0.0  ;;  %v2935_v11 = vmax.f32 %v2430_v7, 0.0  ;;  %v5091_v7 = vld [vmem:[%s6746_s0 + $0x724] ss:$8 sps:$4 sm:$0xff]  }
 0x17f   :  { %v1864_v14 = vpop.f32.mrf.mxu0  ;;  %v2432_v15 = vpop.f32.mrf.mxu1 }
 0x180   :  { %v3095_v17 = vsel %vm3018_vm0, %v2793_v10, 0.0  ;;  %v3469_v18 = vsel %vm3018_vm0, %v2935_v11, 0.0 }
 0x181   :  { %v3096_v19 = vadd.f32 %v3095_v17, %v3094_v4  ;;  %v3470_v20 = vadd.f32 %v3469_v18, %v3468_v5  ;;  %v1867_v21 = vpop.f32.mrf.mxu0  ;;  %2058 = vmatmul.mubr.bf16.gmra.mxu0 %v5068_v8  ;;  %v2435_v23 = vpop.f32.mrf.mxu1  ;;  %2626 = vmatmul.mubr.bf16.gmra.mxu1 %v5071_v9 }
 0x182   :  { %v2936_v24 = vmax.f32 %v2435_v23, 0.0  ;;  %2065 = vmatprep.mubr.bf16.mxu0 %v5076_v12  ;;  %2633 = vmatprep.mubr.bf16.mxu1 %v5079_v13  ;;  %v2794_v29 = vmax.f32 %v1867_v21, 0.0 }
 0x183   :  { %v3097_v25 = vrot.slane %v3096_v19, 4  ;;  %v1869_v27 = vpop.f32.mrf.mxu0  ;;  %v2437_v28 = vpop.f32.mrf.mxu1 }
 0x184   :  { %v3471_v30 = vsel %vm3018_vm0, %v2936_v24, 0.0  ;;  %v3103_v45 = vsel %vm3018_vm0, %v2794_v29, 0.0  ;;  %v5086_v29 = vld [vmem:[%s6746_s0 + $0x2b0] ss:$8 sps:$4 sm:$0xff]  }
 0x185   :  { %v3098_v31 = vadd.f32 %v3097_v25, %v3096_v19  ;;  %v3472_v32 = vadd.f32 %v3471_v30, %v3470_v20  ;;  %v1870_v33 = vpop.f32.mrf.mxu0  ;;  %v2438_v34 = vpop.f32.mrf.mxu1  ;;  %v5089_v30 = vld [vmem:[%s6746_s0 + $0x720] ss:$8 sps:$4 sm:$0xff]  }
 0x186   :  { %v2795_v37 = vmax.f32 %v1870_v33, 0.0  ;;  %v2937_v44 = vmax.f32 %v2438_v34, 0.0  ;;  %v5094_v33 = vld [vmem:[%s6746_s0 + $0x2c4] ss:$8 sps:$4 sm:$0xff]   ;;  %v5097_v34 = vld [vmem:[%s6746_s0 + $0x734] ss:$8 sps:$4 sm:$0xff]  }
 0x187   :  { %v3099_v41 = vrot.slane %v3098_v31, 2  ;;  %v1872_v42 = vpop.f32.mrf.mxu0  ;;  %v2440_v43 = vpop.f32.mrf.mxu1 }
 0x188   :  { %v3104_v46 = vsel %vm3018_vm0, %v2795_v37, 0.0  ;;  %v3473_v47 = vsel %vm3018_vm0, %v2937_v44, 0.0 }
 0x189   :  { %v3100_v16 = vadd.f32 %v3099_v41, %v3098_v31  ;;  %v3105_v48 = vadd.f32 %v3104_v46, %v3103_v45  ;;  %v5991_v49 = vadd.f32 %v3473_v47, %v3472_v32  ;;  %v1875_v50 = vpop.f32.mrf.mxu0  ;;  %2066 = vmatmul.mubr.bf16.gmra.mxu0 %v5074_v35  ;;  %v2443_v51 = vpop.f32.mrf.mxu1  ;;  %2634 = vmatmul.mubr.bf16.gmra.mxu1 %v5077_v36 }
 0x18a   :  { %v2796_v52 = vmax.f32 %v1875_v50, 0.0  ;;  %v2938_v53 = vmax.f32 %v2443_v51, 0.0  ;;  %2073 = vmatprep.mubr.bf16.mxu0 %v5082_v38  ;;  %2641 = vmatprep.mubr.bf16.mxu1 %v5085_v39 }
 0x18b   :  { %v3101_v54 = vrot.slane %v3100_v16, 1  ;;  %v1877_v55 = vpop.f32.mrf.mxu0  ;;  %v2445_v56 = vpop.f32.mrf.mxu1 }
 0x18c   :  { %v3106_v58 = vsel %vm3018_vm0, %v2796_v52, 0.0  ;;  %v3481_v4 = vsel %vm3018_vm0, %v2938_v53, 0.0  ;;  %v5095_v55 = vld [vmem:[%s6746_s0 + $0x730] ss:$8 sps:$4 sm:$0xff]   ;;  %v324_v56 = vld [vmem:[%s6747_s2 + $0x20] sm:$0xff] }
 0x18d   :  { %v3102_v59 = vadd.f32 %v3101_v54, %v3100_v16  ;;  %v3107_v60 = vadd.f32 %v3106_v58, %v3105_v48  ;;  %v1878_v61 = vpop.f32.mrf.mxu0  ;;  %v2446_v63 = vpop.f32.mrf.mxu1  ;;  %v5092_v54 = vld [vmem:[%s6746_s0 + $0x2c0] ss:$8 sps:$4 sm:$0xff]   ;;  %4742 = vmatprep.subr.mxu1 %v324_v56 }
 0x18e   :  { %v2797_v5 = vmax.f32 %v1878_v61, 0.0  ;;  %v2939_v6 = vmax.f32 %v2446_v63, 0.0  ;;  %v5103_v61 = vld [vmem:[%s6746_s0 + $0x744] ss:$8 sps:$4 sm:$0xff]   ;;  %4743 = vmatpush3.msra.mxu1 %v324_v56 }
 0x18f   :  { %v1880_v8 = vpop.f32.mrf.mxu0  ;;  %v2448_v9 = vpop.f32.mrf.mxu1  ;;  %v6009_v10 = vsel %vm3733_vm3, %v3102_v59, %v5939_v26 }
 0x190   :  { %v3108_v11 = vsel %vm3018_vm0, %v2797_v5, 0.0  ;;  %v3482_v12 = vsel %vm3018_vm0, %v2939_v6, 0.0 }
 0x191   :  { %v3109_v13 = vadd.f32 %v3108_v11, %v3107_v60  ;;  %v3483_v14 = vadd.f32 %v3482_v12, %v3481_v4  ;;  %v1883_v15 = vpop.f32.mrf.mxu0  ;;  %2074 = vmatmul.mubr.bf16.gmra.mxu0 %v5080_v0  ;;  %v2451_v17 = vpop.f32.mrf.mxu1  ;;  %2642 = vmatmul.mubr.bf16.gmra.mxu1 %v5083_v1  ;;  %v5100_v60 = vld [vmem:[%s6746_s0 + $0x2d4] ss:$8 sps:$4 sm:$0xff]  }
 0x192   :  { %v2798_v18 = vmax.f32 %v1883_v15, 0.0  ;;  %v2940_v19 = vmax.f32 %v2451_v17, 0.0  ;;  %2081 = vmatprep.mubr.bf16.mxu0 %v5088_v2  ;;  %2649 = vmatprep.mubr.bf16.mxu1 %v5091_v7 }
 0x193   :  { %v1885_v20 = vpop.f32.mrf.mxu0  ;;  %v2453_v21 = vpop.f32.mrf.mxu1 }
 0x194   :  { %v3110_v23 = vsel %vm3018_vm0, %v2798_v18, 0.0  ;;  %v3484_v26 = vsel %vm3018_vm0, %v2940_v19, 0.0  ;;  %v5098_v20 = vld [vmem:[%s6746_s0 + $0x2d0] ss:$8 sps:$4 sm:$0xff]   ;;  %v5101_v21 = vld [vmem:[%s6746_s0 + $0x740] ss:$8 sps:$4 sm:$0xff]  }
 0x195   :  { %v3111_v24 = vadd.f32 %v3110_v23, %v3109_v13  ;;  %v3485_v25 = vadd.f32 %v3484_v26, %v3483_v14  ;;  %v1886_v27 = vpop.f32.mrf.mxu0  ;;  %v2454_v28 = vpop.f32.mrf.mxu1 }
 0x196   :  { %v2799_v31 = vmax.f32 %v1886_v27, 0.0  ;;  %v2941_v32 = vmax.f32 %v2454_v28, 0.0 }
 0x197   :  { %v1888_v35 = vpop.f32.mrf.mxu0  ;;  %v2456_v36 = vpop.f32.mrf.mxu1 }
 0x198   :  { %v3112_v37 = vsel %vm3018_vm0, %v2799_v31, 0.0  ;;  %v3486_v44 = vsel %vm3018_vm0, %v2941_v32, 0.0 }
 0x199   :  { %v3113_v38 = vadd.f32 %v3112_v37, %v3111_v24  ;;  %v3487_v39 = vadd.f32 %v3486_v44, %v3485_v25  ;;  %v1891_v41 = vpop.f32.mrf.mxu0  ;;  %2082 = vmatmul.mubr.bf16.gmra.mxu0 %v5086_v29  ;;  %v2459_v42 = vpop.f32.mrf.mxu1  ;;  %2650 = vmatmul.mubr.bf16.gmra.mxu1 %v5089_v30  ;;  %v5106_v24 = vld [vmem:[%s6746_s0 + $0x2e4] ss:$8 sps:$4 sm:$0xff]   ;;  %v5109_v25 = vld [vmem:[%s6746_s0 + $0x754] ss:$8 sps:$4 sm:$0xff]  }
 0x19a   :  { %v2800_v43 = vmax.f32 %v1891_v41, 0.0  ;;  %v2942_v45 = vmax.f32 %v2459_v42, 0.0  ;;  %2089 = vmatprep.mubr.bf16.mxu0 %v5094_v33  ;;  %2657 = vmatprep.mubr.bf16.mxu1 %v5097_v34 }
 0x19b   :  { %v1893_v46 = vpop.f32.mrf.mxu0  ;;  %v2461_v47 = vpop.f32.mrf.mxu1 }
 0x19c   :  { %v3114_v16 = vsel %vm3018_vm0, %v2800_v43, 0.0  ;;  %v3488_v48 = vsel %vm3018_vm0, %v2942_v45, 0.0 }
 0x19d   :  { %v3115_v50 = vadd.f32 %v3114_v16, %v3113_v38  ;;  %v3489_v51 = vadd.f32 %v3488_v48, %v3487_v39  ;;  %v1894_v52 = vpop.f32.mrf.mxu0  ;;  %v2462_v53 = vpop.f32.mrf.mxu1  ;;  %v5104_v48 = vld [vmem:[%s6746_s0 + $0x2e0] ss:$8 sps:$4 sm:$0xff]  }
 0x19e   :  { %v2801_v58 = vmax.f32 %v1894_v52, 0.0  ;;  %v2943_v59 = vmax.f32 %v2462_v53, 0.0 }
 0x19f   :  { %v1896_v63 = vpop.f32.mrf.mxu0  ;;  %v2464_v0 = vpop.f32.mrf.mxu1 }
 0x1a0   :  { %v3116_v1 = vsel %vm3018_vm0, %v2801_v58, 0.0  ;;  %v3490_v2 = vsel %vm3018_vm0, %v2943_v59, 0.0 }
 0x1a1   :  { %v3117_v4 = vadd.f32 %v3116_v1, %v3115_v50  ;;  %v3491_v5 = vadd.f32 %v3490_v2, %v3489_v51  ;;  %v1899_v6 = vpop.f32.mrf.mxu0  ;;  %2090 = vmatmul.mubr.bf16.gmra.mxu0 %v5092_v54  ;;  %v2467_v7 = vpop.f32.mrf.mxu1  ;;  %2658 = vmatmul.mubr.bf16.gmra.mxu1 %v5095_v55  ;;  %v5107_v50 = vld [vmem:[%s6746_s0 + $0x750] ss:$8 sps:$4 sm:$0xff]   ;;  %v5112_v51 = vld [vmem:[%s6746_s0 + $0x2f4] ss:$8 sps:$4 sm:$0xff]   ;;  %v5115_v55 = vld [vmem:[%s6746_s0 + $0x764] ss:$8 sps:$4 sm:$0xff]  }
 0x1a2   :  { %v2944_v8 = vmax.f32 %v2467_v7, 0.0  ;;  %2097 = vmatprep.mubr.bf16.mxu0 %v5100_v60  ;;  %2665 = vmatprep.mubr.bf16.mxu1 %v5103_v61  ;;  %v2802_v13 = vmax.f32 %v1899_v6, 0.0 }
 0x1a3   :  { %v3118_v9 = vrot.slane %v3117_v4, 4  ;;  %v1901_v11 = vpop.f32.mrf.mxu0  ;;  %v2469_v12 = vpop.f32.mrf.mxu1 }
 0x1a4   :  { %v3492_v14 = vsel %vm3018_vm0, %v2944_v8, 0.0  ;;  %v3124_v30 = vsel %vm3018_vm0, %v2802_v13, 0.0 }
 0x1a5   :  { %v3119_v15 = vadd.f32 %v3118_v9, %v3117_v4  ;;  %v3493_v17 = vadd.f32 %v3492_v14, %v3491_v5  ;;  %v1902_v18 = vpop.f32.mrf.mxu0  ;;  %v2470_v19 = vpop.f32.mrf.mxu1  ;;  %v5110_v14 = vld [vmem:[%s6746_s0 + $0x2f0] ss:$8 sps:$4 sm:$0xff]  }
 0x1a6   :  { %v2803_v23 = vmax.f32 %v1902_v18, 0.0  ;;  %v2945_v26 = vmax.f32 %v2470_v19, 0.0  ;;  %v5118_v19 = vld [vmem:[%s6746_s0 + $0x304] ss:$8 sps:$4 sm:$0xff]  }
 0x1a7   :  { %v3120_v27 = vrot.slane %v3119_v15, 2  ;;  %v1904_v28 = vpop.f32.mrf.mxu0  ;;  %v2472_v29 = vpop.f32.mrf.mxu1 }
 0x1a8   :  { %v3125_v31 = vsel %vm3018_vm0, %v2803_v23, 0.0  ;;  %v3494_v32 = vsel %vm3018_vm0, %v2945_v26, 0.0 }
 0x1a9   :  { %v3121_v33 = vadd.f32 %v3120_v27, %v3119_v15  ;;  %v3126_v34 = vadd.f32 %v3125_v31, %v3124_v30  ;;  %v6064_v35 = vadd.f32 %v3494_v32, %v3493_v17  ;;  %v1907_v36 = vpop.f32.mrf.mxu0  ;;  %2098 = vmatmul.mubr.bf16.gmra.mxu0 %v5098_v20  ;;  %v2475_v37 = vpop.f32.mrf.mxu1  ;;  %2666 = vmatmul.mubr.bf16.gmra.mxu1 %v5101_v21  ;;  %v5113_v15 = vld [vmem:[%s6746_s0 + $0x760] ss:$8 sps:$4 sm:$0xff]   ;;  %v5121_v20 = vld [vmem:[%s6746_s0 + $0x774] ss:$8 sps:$4 sm:$0xff]  }
 0x1aa   :  { %v2804_v44 = vmax.f32 %v1907_v36, 0.0  ;;  %v2946_v38 = vmax.f32 %v2475_v37, 0.0  ;;  %2105 = vmatprep.mubr.bf16.mxu0 %v5106_v24  ;;  %2673 = vmatprep.mubr.bf16.mxu1 %v5109_v25 }
 0x1ab   :  { %v3122_v39 = vrot.slane %v3121_v33, 1  ;;  %v1909_v41 = vpop.f32.mrf.mxu0  ;;  %v2477_v42 = vpop.f32.mrf.mxu1 }
 0x1ac   :  { %v3127_v43 = vsel %vm3018_vm0, %v2804_v44, 0.0  ;;  %v3502_v52 = vsel %vm3018_vm0, %v2946_v38, 0.0  ;;  %v5116_v41 = vld [vmem:[%s6746_s0 + $0x300] ss:$8 sps:$4 sm:$0xff]   ;;  %v5119_v42 = vld [vmem:[%s6746_s0 + $0x770] ss:$8 sps:$4 sm:$0xff]  }
 0x1ad   :  { %v3123_v45 = vadd.f32 %v3122_v39, %v3121_v33  ;;  %v3128_v46 = vadd.f32 %v3127_v43, %v3126_v34  ;;  %v1910_v47 = vpop.f32.mrf.mxu0  ;;  %v2478_v16 = vpop.f32.mrf.mxu1 }
 0x1ae   :  { %v2805_v53 = vmax.f32 %v1910_v47, 0.0  ;;  %v2947_v54 = vmax.f32 %v2478_v16, 0.0  ;;  %v5127_v47 = vld [vmem:[%s6746_s0 + $0x784] ss:$8 sps:$4 sm:$0xff]  }
 0x1af   :  { %v1912_v56 = vpop.f32.mrf.mxu0  ;;  %v2480_v58 = vpop.f32.mrf.mxu1  ;;  %v6082_v59 = vsel %vm3735_vm4, %v3123_v45, %v6009_v10 }
 0x1b0   :  { %v3129_v60 = vsel %vm3018_vm0, %v2805_v53, 0.0  ;;  %v3503_v61 = vsel %vm3018_vm0, %v2947_v54, 0.0 }
 0x1b1   :  { %v3130_v63 = vadd.f32 %v3129_v60, %v3128_v46  ;;  %v3504_v0 = vadd.f32 %v3503_v61, %v3502_v52  ;;  %v1915_v1 = vpop.f32.mrf.mxu0  ;;  %2106 = vmatmul.mubr.bf16.gmra.mxu0 %v5104_v48  ;;  %v2483_v2 = vpop.f32.mrf.mxu1  ;;  %2674 = vmatmul.mubr.bf16.gmra.mxu1 %v5107_v50  ;;  %v5124_v46 = vld [vmem:[%s6746_s0 + $0x314] ss:$8 sps:$4 sm:$0xff]  }
 0x1b2   :  { %v2806_v4 = vmax.f32 %v1915_v1, 0.0  ;;  %v2948_v5 = vmax.f32 %v2483_v2, 0.0  ;;  %2113 = vmatprep.mubr.bf16.mxu0 %v5112_v51  ;;  %2681 = vmatprep.mubr.bf16.mxu1 %v5115_v55 }
 0x1b3   :  { %v1917_v6 = vpop.f32.mrf.mxu0  ;;  %v2485_v7 = vpop.f32.mrf.mxu1 }
 0x1b4   :  { %v3131_v8 = vsel %vm3018_vm0, %v2806_v4, 0.0  ;;  %v3505_v10 = vsel %vm3018_vm0, %v2948_v5, 0.0  ;;  %v5122_v5 = vld [vmem:[%s6746_s0 + $0x310] ss:$8 sps:$4 sm:$0xff]   ;;  %v5125_v6 = vld [vmem:[%s6746_s0 + $0x780] ss:$8 sps:$4 sm:$0xff]  }
 0x1b5   :  { %v3132_v9 = vadd.f32 %v3131_v8, %v3130_v63  ;;  %v3506_v11 = vadd.f32 %v3505_v10, %v3504_v0  ;;  %v1918_v12 = vpop.f32.mrf.mxu0  ;;  %v2486_v13 = vpop.f32.mrf.mxu1  ;;  %v5130_v8 = vld [vmem:[%s6746_s0 + $0x324] ss:$8 sps:$4 sm:$0xff]   ;;  %v5133_v10 = vld [vmem:[%s6746_s0 + $0x794] ss:$8 sps:$4 sm:$0xff]  }
 0x1b6   :  { %v2807_v17 = vmax.f32 %v1918_v12, 0.0  ;;  %v2949_v18 = vmax.f32 %v2486_v13, 0.0 }
 0x1b7   :  { %v1920_v21 = vpop.f32.mrf.mxu0  ;;  %v2488_v23 = vpop.f32.mrf.mxu1 }
 0x1b8   :  { %v3133_v26 = vsel %vm3018_vm0, %v2807_v17, 0.0  ;;  %v3507_v24 = vsel %vm3018_vm0, %v2949_v18, 0.0 }
 0x1b9   :  { %v3134_v25 = vadd.f32 %v3133_v26, %v3132_v9  ;;  %v3508_v27 = vadd.f32 %v3507_v24, %v3506_v11  ;;  %v1923_v28 = vpop.f32.mrf.mxu0  ;;  %2114 = vmatmul.mubr.bf16.gmra.mxu0 %v5110_v14  ;;  %v2491_v29 = vpop.f32.mrf.mxu1  ;;  %2682 = vmatmul.mubr.bf16.gmra.mxu1 %v5113_v15 }
 0x1ba   :  { %v2808_v30 = vmax.f32 %v1923_v28, 0.0  ;;  %v2950_v31 = vmax.f32 %v2491_v29, 0.0  ;;  %2121 = vmatprep.mubr.bf16.mxu0 %v5118_v19  ;;  %2689 = vmatprep.mubr.bf16.mxu1 %v5121_v20  ;;  %v5131_v28 = vld [vmem:[%s6746_s0 + $0x790] ss:$8 sps:$4 sm:$0xff]  }
 0x1bb   :  { %v1925_v32 = vpop.f32.mrf.mxu0  ;;  %v2493_v33 = vpop.f32.mrf.mxu1 }
 0x1bc   :  { %v3135_v34 = vsel %vm3018_vm0, %v2808_v30, 0.0  ;;  %v3509_v36 = vsel %vm3018_vm0, %v2950_v31, 0.0  ;;  %v5136_v31 = vld [vmem:[%s6746_s0 + $0x334] ss:$8 sps:$4 sm:$0xff]   ;;  %v5139_v32 = vld [vmem:[%s6746_s0 + $0x7a4] ss:$8 sps:$4 sm:$0xff]  }
 0x1bd   :  { %v3136_v37 = vadd.f32 %v3135_v34, %v3134_v25  ;;  %v3510_v44 = vadd.f32 %v3509_v36, %v3508_v27  ;;  %v1926_v38 = vpop.f32.mrf.mxu0  ;;  %v2494_v39 = vpop.f32.mrf.mxu1  ;;  %v5128_v27 = vld [vmem:[%s6746_s0 + $0x320] ss:$8 sps:$4 sm:$0xff]  }
 0x1be   :  { %v2809_v43 = vmax.f32 %v1926_v38, 0.0  ;;  %v2951_v45 = vmax.f32 %v2494_v39, 0.0 }
 0x1bf   :  { %v1928_v16 = vpop.f32.mrf.mxu0  ;;  %v2496_v48 = vpop.f32.mrf.mxu1 }
 0x1c0   :  { %v3137_v50 = vsel %vm3018_vm0, %v2809_v43, 0.0  ;;  %v3511_v51 = vsel %vm3018_vm0, %v2951_v45, 0.0  ;;  %v5134_v16 = vld [vmem:[%s6746_s0 + $0x330] ss:$8 sps:$4 sm:$0xff]   ;;  %v5137_v48 = vld [vmem:[%s6746_s0 + $0x7a0] ss:$8 sps:$4 sm:$0xff]  }
 0x1c1   :  { %v3138_v52 = vadd.f32 %v3137_v50, %v3136_v37  ;;  %v3512_v53 = vadd.f32 %v3511_v51, %v3510_v44  ;;  %v6118_v54 = vpop.f32.mrf.mxu0  ;;  %2122 = vmatmul.mubr.bf16.gmra.mxu0 %v5116_v41  ;;  %v2499_v55 = vpop.f32.mrf.mxu1  ;;  %2690 = vmatmul.mubr.bf16.gmra.mxu1 %v5119_v42  ;;  %v5142_v51 = vld [vmem:[%s6746_s0 + $0x344] ss:$8 sps:$4 sm:$0xff]  }
 0x1c2   :  { %v2952_v56 = vmax.f32 %v2499_v55, 0.0  ;;  %2129 = vmatprep.mubr.bf16.mxu0 %v5124_v46  ;;  %2697 = vmatprep.mubr.bf16.mxu1 %v5127_v47 }
 0x1c3   :  { %v3139_v58 = vrot.slane %v3138_v52, 4  ;;  %v1933_v60 = vpop.f32.mrf.mxu0  ;;  %v2501_v61 = vpop.f32.mrf.mxu1 }
 0x1c4   :  { %v3513_v63 = vsel %vm3018_vm0, %v2952_v56, 0.0  ;;  %v323_v56 = vld [vmem:[%s6747_s2 + $0x18] sm:$0xff] }
 0x1c5   :  { %v3140_v0 = vadd.f32 %v3139_v58, %v3138_v52  ;;  %v3514_v1 = vadd.f32 %v3513_v63, %v3512_v53  ;;  %v6121_v2 = vpop.f32.mrf.mxu0  ;;  %v2502_v4 = vpop.f32.mrf.mxu1  ;;  %v5145_v52 = vld [vmem:[%s6746_s0 + $0x7b4] ss:$8 sps:$4 sm:$0xff]   ;;  %4744 = vmatprep.subr.mxu1 %v323_v56 }
 0x1c6   :  { %v2953_v7 = vmax.f32 %v2502_v4, 0.0  ;;  %4745 = vmatpush3.msra.mxu1 %v323_v56 }
 0x1c7   :  { %v3141_v9 = vrot.slane %v3140_v0, 2  ;;  %v1936_v11 = vpop.f32.mrf.mxu0  ;;  %v2504_v12 = vpop.f32.mrf.mxu1 }
 0x1c8   :  { %v3515_v13 = vsel %vm3018_vm0, %v2953_v7, 0.0  ;;  %v5148_v12 = vld [vmem:[%s6746_s0 + $0x354] ss:$8 sps:$4 sm:$0xff]  }
 0x1c9   :  { %v3142_v14 = vadd.f32 %v3141_v9, %v3140_v0  ;;  %v6136_v15 = vadd.f32 %v3515_v13, %v3514_v1  ;;  %v6138_v17 = vpop.f32.mrf.mxu0  ;;  %2130 = vmatmul.mubr.bf16.gmra.mxu0 %v5122_v5  ;;  %v2507_v18 = vpop.f32.mrf.mxu1  ;;  %2698 = vmatmul.mubr.bf16.gmra.mxu1 %v5125_v6  ;;  %v5143_v9 = vld [vmem:[%s6746_s0 + $0x7b0] ss:$8 sps:$4 sm:$0xff]   ;;  %v5151_v13 = vld [vmem:[%s6746_s0 + $0x7c4] ss:$8 sps:$4 sm:$0xff]  }
 0x1ca   :  { %v2954_v19 = vmax.f32 %v2507_v18, 0.0  ;;  %2137 = vmatprep.mubr.bf16.mxu0 %v5130_v8  ;;  %2705 = vmatprep.mubr.bf16.mxu1 %v5133_v10  ;;  %v5140_v10 = vld [vmem:[%s6746_s0 + $0x340] ss:$8 sps:$4 sm:$0xff]  }
 0x1cb   :  { %v3143_v20 = vrot.slane %v3142_v14, 1  ;;  %v1941_v21 = vpop.f32.mrf.mxu0  ;;  %v2509_v23 = vpop.f32.mrf.mxu1 }
 0x1cc   :  { %v3523_v29 = vsel %vm3018_vm0, %v2954_v19, 0.0  ;;  %v2810_v21 = vmax.f32 %v6118_v54, 0.0  ;;  %v2812_v23 = vmax.f32 %v6138_v17, 0.0  ;;  %v5146_v54 = vld [vmem:[%s6746_s0 + $0x350] ss:$8 sps:$4 sm:$0xff]  }
 0x1cd   :  { %v3144_v26 = vadd.f32 %v3143_v20, %v3142_v14  ;;  %v6140_v24 = vpop.f32.mrf.mxu0  ;;  %v2510_v25 = vpop.f32.mrf.mxu1  ;;  %v2811_v14 = vmax.f32 %v6121_v2, 0.0 }
 0x1ce   :  { %v2955_v30 = vmax.f32 %v2510_v25, 0.0  ;;  %v2813_v2 = vmax.f32 %v6140_v24, 0.0  ;;  %v3145_v17 = vsel %vm3018_vm0, %v2810_v21, 0.0  ;;  %v5149_v24 = vld [vmem:[%s6746_s0 + $0x7c0] ss:$8 sps:$4 sm:$0xff]  }
 0x1cf   :  { %v1944_v33 = vpop.f32.mrf.mxu0  ;;  %v2512_v34 = vpop.f32.mrf.mxu1  ;;  %v6157_v36 = vsel %vm3737_vm5, %v3144_v26, %v6082_v59 }
 0x1d0   :  { %v3524_v37 = vsel %vm3018_vm0, %v2955_v30, 0.0  ;;  %v3148_v33 = vsel %vm3018_vm0, %v2812_v23, 0.0 }
 0x1d1   :  { %v3525_v44 = vadd.f32 %v3524_v37, %v3523_v29  ;;  %v6160_v38 = vpop.f32.mrf.mxu0  ;;  %2138 = vmatmul.mubr.bf16.gmra.mxu0 %v5128_v27  ;;  %v2515_v39 = vpop.f32.mrf.mxu1  ;;  %2706 = vmatmul.mubr.bf16.gmra.mxu1 %v5131_v28  ;;  %v3146_v29 = vsel %vm3018_vm0, %v2811_v14, 0.0  ;;  %v5163_v14 = vld [vmem:[%s6746_s0 + $0x7e4] ss:$8 sps:$4 sm:$0xff]  }
 0x1d2   :  { %v2956_v41 = vmax.f32 %v2515_v39, 0.0  ;;  %2145 = vmatprep.mubr.bf16.mxu0 %v5136_v31  ;;  %2713 = vmatprep.mubr.bf16.mxu1 %v5139_v32  ;;  %v2814_v34 = vmax.f32 %v6160_v38, 0.0 }
 0x1d3   :  { %v1949_v42 = vpop.f32.mrf.mxu0  ;;  %v2517_v43 = vpop.f32.mrf.mxu1 }
 0x1d4   :  { %v3526_v45 = vsel %vm3018_vm0, %v2956_v41, 0.0  ;;  %v3147_v41 = vadd.f32 %v3146_v29, %v3145_v17  ;;  %v5154_v43 = vld [vmem:[%s6746_s0 + $0x364] ss:$8 sps:$4 sm:$0xff]  }
 0x1d5   :  { %v3527_v46 = vadd.f32 %v3526_v45, %v3525_v44  ;;  %v6163_v47 = vpop.f32.mrf.mxu0  ;;  %v2518_v59 = vpop.f32.mrf.mxu1  ;;  %v5157_v45 = vld [vmem:[%s6746_s0 + $0x7d4] ss:$8 sps:$4 sm:$0xff]  }
 0x1d6   :  { %v2957_v50 = vmax.f32 %v2518_v59, 0.0  ;;  %v2815_v38 = vmax.f32 %v6163_v47, 0.0 }
 0x1d7   :  { %v1952_v53 = vpop.f32.mrf.mxu0  ;;  %v2520_v55 = vpop.f32.mrf.mxu1 }
 0x1d8   :  { %v3528_v58 = vsel %vm3018_vm0, %v2957_v50, 0.0  ;;  %v3154_v47 = vsel %vm3018_vm0, %v2815_v38, 0.0 }
 0x1d9   :  { %v3529_v60 = vadd.f32 %v3528_v58, %v3527_v46  ;;  %v6181_v61 = vpop.f32.mrf.mxu0  ;;  %2146 = vmatmul.mubr.bf16.gmra.mxu0 %v5134_v16  ;;  %v2523_v63 = vpop.f32.mrf.mxu1  ;;  %2714 = vmatmul.mubr.bf16.gmra.mxu1 %v5137_v48  ;;  %v3150_v46 = vsel %vm3018_vm0, %v2813_v2, 0.0  ;;  %v3149_v48 = vadd.f32 %v3148_v33, %v3147_v41 }
 0x1da   :  { %v2958_v0 = vmax.f32 %v2523_v63, 0.0  ;;  %2153 = vmatprep.mubr.bf16.mxu0 %v5142_v51  ;;  %2721 = vmatprep.mubr.bf16.mxu1 %v5145_v52  ;;  %v3152_v51 = vsel %vm3018_vm0, %v2814_v34, 0.0  ;;  %v2816_v52 = vmax.f32 %v6181_v61, 0.0  ;;  %v5152_v61 = vld [vmem:[%s6746_s0 + $0x360] ss:$8 sps:$4 sm:$0xff]  }
 0x1db   :  { %v1957_v1 = vpop.f32.mrf.mxu0  ;;  %v2525_v4 = vpop.f32.mrf.mxu1  ;;  %v3151_v58 = vadd.f32 %v3150_v46, %v3149_v48  ;;  %v5166_v46 = vld [vmem:[%s6746_s0 + $0x384] ss:$8 sps:$4 sm:$0xff]  }
 0x1dc   :  { %v3530_v5 = vsel %vm3018_vm0, %v2958_v0, 0.0 }
 0x1dd   :  { %v3531_v6 = vadd.f32 %v3530_v5, %v3529_v60  ;;  %v6184_v7 = vpop.f32.mrf.mxu0  ;;  %v2526_v8 = vpop.f32.mrf.mxu1  ;;  %v3153_v4 = vadd.f32 %v3152_v51, %v3151_v58  ;;  %v3156_v5 = vsel %vm3018_vm0, %v2816_v52, 0.0 }
 0x1de   :  { %v2959_v11 = vmax.f32 %v2526_v8, 0.0  ;;  %v2817_v63 = vmax.f32 %v6184_v7, 0.0 }
 0x1df   :  { %v1960_v18 = vpop.f32.mrf.mxu0  ;;  %v2528_v19 = vpop.f32.mrf.mxu1  ;;  %v3155_v7 = vadd.f32 %v3154_v47, %v3153_v4 }
 0x1e0   :  { %v3532_v20 = vsel %vm3018_vm0, %v2959_v11, 0.0  ;;  %v3158_v18 = vsel %vm3018_vm0, %v2817_v63, 0.0 }
 0x1e1   :  { %v3533_v26 = vadd.f32 %v3532_v20, %v3531_v6  ;;  %v6202_v25 = vpop.f32.mrf.mxu0  ;;  %2154 = vmatmul.mubr.bf16.gmra.mxu0 %v5140_v10  ;;  %v2531_v27 = vpop.f32.mrf.mxu1  ;;  %2722 = vmatmul.mubr.bf16.gmra.mxu1 %v5143_v9  ;;  %v5155_v10 = vld [vmem:[%s6746_s0 + $0x7d0] ss:$8 sps:$4 sm:$0xff]   ;;  %v5160_v9 = vld [vmem:[%s6746_s0 + $0x374] ss:$8 sps:$4 sm:$0xff]   ;;  %v3157_v21 = vadd.f32 %v3156_v5, %v3155_v7 }
 0x1e2   :  { %v2960_v28 = vmax.f32 %v2531_v27, 0.0  ;;  %2161 = vmatprep.mubr.bf16.mxu0 %v5148_v12  ;;  %2729 = vmatprep.mubr.bf16.mxu1 %v5151_v13  ;;  %v2818_v23 = vmax.f32 %v6202_v25, 0.0 }
 0x1e3   :  { %v1965_v30 = vpop.f32.mrf.mxu0  ;;  %v2533_v31 = vpop.f32.mrf.mxu1 }
 0x1e4   :  { %v3534_v32 = vsel %vm3018_vm0, %v2960_v28, 0.0  ;;  %v3159_v30 = vadd.f32 %v3158_v18, %v3157_v21  ;;  %v3166_v34 = vsel %vm3018_vm0, %v2818_v23, 0.0  ;;  %v5164_v18 = vld [vmem:[%s6746_s0 + $0x380] ss:$8 sps:$4 sm:$0xff]  }
 0x1e5   :  { %v3535_v37 = vadd.f32 %v3534_v32, %v3533_v26  ;;  %v1966_v44 = vpop.f32.mrf.mxu0  ;;  %v2534_v39 = vpop.f32.mrf.mxu1 }
 0x1e6   :  { %v2961_v42 = vmax.f32 %v2534_v39, 0.0  ;;  %v2819_v11 = vmax.f32 %v1966_v44, 0.0  ;;  %v3160_v38 = vrot.slane %v3159_v30, 4 }
 0x1e7   :  { %v1968_v59 = vpop.f32.mrf.mxu0  ;;  %v2536_v16 = vpop.f32.mrf.mxu1 }
 0x1e8   :  { %v3536_v50 = vsel %vm3018_vm0, %v2961_v42, 0.0  ;;  %v3167_v31 = vsel %vm3018_vm0, %v2819_v11, 0.0 }
 0x1e9   :  { %v6227_v53 = vadd.f32 %v3536_v50, %v3535_v37  ;;  %v1971_v55 = vpop.f32.mrf.mxu0  ;;  %2162 = vmatmul.mubr.bf16.gmra.mxu0 %v5146_v54  ;;  %v2539_v56 = vpop.f32.mrf.mxu1  ;;  %2730 = vmatmul.mubr.bf16.gmra.mxu1 %v5149_v24  ;;  %v3168_v39 = vadd.f32 %v3167_v31, %v3166_v34  ;;  %v5169_v50 = vld [vmem:[%s6746_s0 + $0x7f4] ss:$8 sps:$4 sm:$0xff]  }
 0x1ea   :  { %v2962_v60 = vmax.f32 %v2539_v56, 0.0  ;;  %2169 = vmatprep.mubr.bf16.mxu0 %v5154_v43  ;;  %2737 = vmatprep.mubr.bf16.mxu1 %v5157_v45  ;;  %v2820_v26 = vmax.f32 %v1971_v55, 0.0  ;;  %v5158_v43 = vld [vmem:[%s6746_s0 + $0x370] ss:$8 sps:$4 sm:$0xff]   ;;  %v5161_v45 = vld [vmem:[%s6746_s0 + $0x7e0] ss:$8 sps:$4 sm:$0xff]  }
 0x1eb   :  { %v1973_v0 = vpop.f32.mrf.mxu0  ;;  %v2541_v1 = vpop.f32.mrf.mxu1 }
 0x1ec   :  { %v3544_v12 = vsel %vm3018_vm0, %v2962_v60, 0.0  ;;  %v3169_v25 = vsel %vm3018_vm0, %v2820_v26, 0.0  ;;  %v3161_v1 = vadd.f32 %v3160_v38, %v3159_v30  ;;  %v5172_v26 = vld [vmem:[%s6746_s0 + $0x394] ss:$8 sps:$4 sm:$0xff]  }
 0x1ed   :  { %v1974_v6 = vpop.f32.mrf.mxu0  ;;  %v2542_v8 = vpop.f32.mrf.mxu1  ;;  %v3170_v51 = vadd.f32 %v3169_v25, %v3168_v39 }
 0x1ee   :  { %v2963_v13 = vmax.f32 %v2542_v8, 0.0  ;;  %v2821_v32 = vmax.f32 %v1974_v6, 0.0 }
 0x1ef   :  { %v1976_v19 = vpop.f32.mrf.mxu0  ;;  %v2544_v20 = vpop.f32.mrf.mxu1 }
 0x1f0   :  { %v3545_v27 = vsel %vm3018_vm0, %v2963_v13, 0.0  ;;  %v3171_v59 = vsel %vm3018_vm0, %v2821_v32, 0.0  ;;  %v5167_v19 = vld [vmem:[%s6746_s0 + $0x7f0] ss:$8 sps:$4 sm:$0xff]   ;;  %v3162_v20 = vrot.slane %v3161_v1, 2 }
 0x1f1   :  { %v3546_v28 = vadd.f32 %v3545_v27, %v3544_v12  ;;  %v1979_v29 = vpop.f32.mrf.mxu0  ;;  %2170 = vmatmul.mubr.bf16.gmra.mxu0 %v5152_v61  ;;  %v2547_v2 = vpop.f32.mrf.mxu1  ;;  %2738 = vmatmul.mubr.bf16.gmra.mxu1 %v5155_v10  ;;  %v3172_v60 = vadd.f32 %v3171_v59, %v3170_v51  ;;  %v3538_v27 = vrot.slane %v6227_v53, 4  ;;  %v5170_v59 = vld [vmem:[%s6746_s0 + $0x390] ss:$8 sps:$4 sm:$0xff]  }
 0x1f2   :  { %v2964_v54 = vmax.f32 %v2547_v2, 0.0  ;;  %2177 = vmatprep.mubr.bf16.mxu0 %v5160_v9  ;;  %2745 = vmatprep.mubr.bf16.mxu1 %v5163_v14  ;;  %v2822_v37 = vmax.f32 %v1979_v29, 0.0  ;;  %v3163_v34 = vadd.f32 %v3162_v20, %v3161_v1 }
 0x1f3   :  { %v1981_v17 = vpop.f32.mrf.mxu0  ;;  %v2549_v33 = vpop.f32.mrf.mxu1 }
 0x1f4   :  { %v3547_v44 = vsel %vm3018_vm0, %v2964_v54, 0.0  ;;  %v3173_v56 = vsel %vm3018_vm0, %v2822_v37, 0.0  ;;  %v3539_v37 = vadd.f32 %v3538_v27, %v6227_v53  ;;  %v5175_v53 = vld [vmem:[%s6746_s0 + $0x3a4] ss:$8 sps:$4 sm:$0xff]  }
 0x1f5   :  { %v3548_v24 = vadd.f32 %v3547_v44, %v3546_v28  ;;  %v1982_v41 = vpop.f32.mrf.mxu0  ;;  %v2550_v42 = vpop.f32.mrf.mxu1  ;;  %v3174_v6 = vadd.f32 %v3173_v56, %v3172_v60 }
 0x1f6   :  { %v2823_v16 = vmax.f32 %v1982_v41, 0.0  ;;  %v2965_v48 = vmax.f32 %v2550_v42, 0.0  ;;  %v3540_v51 = vrot.slane %v3539_v37, 2 }
 0x1f7   :  { %v1984_v52 = vpop.f32.mrf.mxu0  ;;  %v2552_v55 = vpop.f32.mrf.mxu1 }
 0x1f8   :  { %v3549_v58 = vsel %vm3018_vm0, %v2965_v48, 0.0  ;;  %v3175_v4 = vsel %vm3018_vm0, %v2823_v16, 0.0  ;;  %v3164_v16 = vrot.slane %v3163_v34, 1 }
 0x1f9   :  { %v3550_v47 = vadd.f32 %v3549_v58, %v3548_v24  ;;  %v1987_v63 = vpop.f32.mrf.mxu0  ;;  %2178 = vmatmul.mubr.bf16.gmra.mxu0 %v5158_v43  ;;  %v2555_v0 = vpop.f32.mrf.mxu1  ;;  %2746 = vmatmul.mubr.bf16.gmra.mxu1 %v5161_v45  ;;  %v3176_v11 = vadd.f32 %v3175_v4, %v3174_v6 }
 0x1fa   :  { %v2824_v61 = vmax.f32 %v1987_v63, 0.0  ;;  %v2966_v5 = vmax.f32 %v2555_v0, 0.0  ;;  %2185 = vmatprep.mubr.bf16.mxu0 %v5166_v46  ;;  %2753 = vmatprep.mubr.bf16.mxu1 %v5169_v50 }
 0x1fb   :  { %v1989_v8 = vpop.f32.mrf.mxu0  ;;  %v2557_v10 = vpop.f32.mrf.mxu1 }
 0x1fc   :  { %v3177_v9 = vsel %vm3018_vm0, %v2824_v61, 0.0  ;;  %v3551_v7 = vsel %vm3018_vm0, %v2966_v5, 0.0  ;;  %v3165_v5 = vadd.f32 %v3164_v16, %v3163_v34  ;;  %v3541_v10 = vadd.f32 %v3540_v51, %v3539_v37 }
 0x1fd   :  { %v3552_v12 = vadd.f32 %v3551_v7, %v3550_v47  ;;  %v1990_v13 = vpop.f32.mrf.mxu0  ;;  %v2558_v14 = vpop.f32.mrf.mxu1  ;;  %v3178_v28 = vadd.f32 %v3177_v9, %v3176_v11 }
 0x1fe   :  { %v2825_v21 = vmax.f32 %v1990_v13, 0.0  ;;  %v2967_v23 = vmax.f32 %v2558_v14, 0.0 }
 0x1ff   :  { %v1992_v29 = vpop.f32.mrf.mxu0  ;;  %v2560_v2 = vpop.f32.mrf.mxu1 }
 0x200   :  { %v3179_v30 = vsel %vm3018_vm0, %v2825_v21, 0.0  ;;  %v3553_v31 = vsel %vm3018_vm0, %v2967_v23, 0.0  ;;  %v5173_v21 = vld [vmem:[%s6746_s0 + $0x3a0] ss:$8 sps:$4 sm:$0xff]   ;;  %v3740_v29 = vsel %vm3739_vm6, %v3165_v5, %v6157_v36  ;;  %v5178_v2 = vld [vmem:[%s6746_s0 + $0x3b4] ss:$8 sps:$4 sm:$0xff]  }
 0x201   :  { %v3180_v32 = vadd.f32 %v3179_v30, %v3178_v28  ;;  %v3554_v54 = vadd.f32 %v3553_v31, %v3552_v12  ;;  %v1995_v17 = vpop.f32.mrf.mxu0  ;;  %2186 = vmatmul.mubr.bf16.gmra.mxu0 %v5164_v18  ;;  %v2563_v33 = vpop.f32.mrf.mxu1  ;;  %2754 = vmatmul.mubr.bf16.gmra.mxu1 %v5167_v19  ;;  %v3542_v30 = vrot.slane %v3541_v10, 1 }
 0x202   :  { %v2968_v25 = vmax.f32 %v2563_v33, 0.0  ;;  %2193 = vmatprep.mubr.bf16.mxu0 %v5172_v26  ;;  %v2826_v41 = vmax.f32 %v1995_v17, 0.0 }
 0x203   :  { %v3181_v44 = vrot.slane %v3180_v32, 4  ;;  %v1997_v39 = vpop.f32.mrf.mxu0  ;;  %v2565_v24 = vpop.f32.mrf.mxu1 }
 0x204   :  { %v3555_v42 = vsel %vm3018_vm0, %v2968_v25, 0.0  ;;  %v3187_v58 = vsel %vm3018_vm0, %v2826_v41, 0.0 }
 0x205   :  { %v3182_v43 = vadd.f32 %v3181_v44, %v3180_v32  ;;  %v3556_v45 = vadd.f32 %v3555_v42, %v3554_v54  ;;  %v1998_v46 = vpop.f32.mrf.mxu0  ;;  %v2566_v38 = vpop.f32.mrf.mxu1  ;;  %v3543_v42 = vadd.f32 %v3542_v30, %v3541_v10 }
 0x206   :  { %v2827_v48 = vmax.f32 %v1998_v46, 0.0  ;;  %v2969_v50 = vmax.f32 %v2566_v38, 0.0 }
 0x207   :  { %v3183_v52 = vrot.slane %v3182_v43, 2  ;;  %v2000_v55 = vpop.f32.mrf.mxu0  ;;  %v2568_v56 = vpop.f32.mrf.mxu1 }
 0x208   :  { %v3188_v60 = vsel %vm3018_vm0, %v2827_v48, 0.0  ;;  %v3557_v47 = vsel %vm3018_vm0, %v2969_v50, 0.0  ;;  %v322_v55 = vld [vmem:[%s6747_s2 + $0x10] sm:$0xff] }
 0x209   :  { %v3184_v63 = vadd.f32 %v3183_v52, %v3182_v43  ;;  %v3189_v0 = vadd.f32 %v3188_v60, %v3187_v58  ;;  %v3558_v1 = vadd.f32 %v3557_v47, %v3556_v45  ;;  %v2003_v4 = vpop.f32.mrf.mxu0  ;;  %2194 = vmatmul.mubr.bf16.gmra.mxu0 %v5170_v59  ;;  %v2571_v61 = vpop.f32.mrf.mxu1  ;;  %v5176_v52 = vld [vmem:[%s6746_s0 + $0x3b0] ss:$8 sps:$4 sm:$0xff]   ;;  %v5181_v60 = vld [vmem:[%s6746_s0 + $0x3c4] ss:$8 sps:$4 sm:$0xff]   ;;  %4746 = vmatprep.subr.mxu1 %v322_v55 }
 0x20a   :  { %v2828_v6 = vmax.f32 %v2003_v4, 0.0  ;;  %v2970_v8 = vmax.f32 %v2571_v61, 0.0  ;;  %2201 = vmatprep.mubr.bf16.mxu0 %v5175_v53  ;;  %4747 = vmatpush3.msra.mxu1 %v322_v55 }
 0x20b   :  { %v3185_v9 = vrot.slane %v3184_v63, 1  ;;  %v3559_v7 = vrot.slane %v3558_v1, 4  ;;  %v2005_v11 = vpop.f32.mrf.mxu0  ;;  %v2573_v12 = vpop.f32.mrf.mxu1 }
 0x20c   :  { %v3190_v13 = vsel %vm3018_vm0, %v2828_v6, 0.0  ;;  %v3565_v26 = vsel %vm3018_vm0, %v2970_v8, 0.0 }
 0x20d   :  { %v3560_v14 = vadd.f32 %v3559_v7, %v3558_v1  ;;  %v3191_v18 = vadd.f32 %v3190_v13, %v3189_v0  ;;  %v2006_v19 = vpop.f32.mrf.mxu0  ;;  %v2574_v20 = vpop.f32.mrf.mxu1  ;;  %v3186_v23 = vadd.f32 %v3185_v9, %v3184_v63 }
 0x20e   :  { %v2829_v27 = vmax.f32 %v2006_v19, 0.0  ;;  %v2971_v28 = vmax.f32 %v2574_v20, 0.0 }
 0x20f   :  { %v3561_v31 = vrot.slane %v3560_v14, 2  ;;  %v2008_v32 = vpop.f32.mrf.mxu0  ;;  %v2576_v54 = vpop.f32.mrf.mxu1  ;;  %v3742_v17 = vsel %vm3741_vm7, %v3186_v23, %v3740_v29 }
 0x210   :  { %v3192_v33 = vsel %vm3018_vm0, %v2829_v27, 0.0  ;;  %v3566_v34 = vsel %vm3018_vm0, %v2971_v28, 0.0  ;;  %4752 = vmatprep.mubr.msk.f32.mxu1 %vm3018_vm0, %v3742_v17  ;;  %v5184_v27 = vld [vmem:[%s6746_s0 + $0x3d4] ss:$8 sps:$4 sm:$0xff]  }
 0x211   :  { %v3562_v25 = vadd.f32 %v3561_v31, %v3560_v14  ;;  %v3193_v37 = vadd.f32 %v3192_v33, %v3191_v18  ;;  %v3567_v44 = vadd.f32 %v3566_v34, %v3565_v26  ;;  %v2011_v36 = vpop.f32.mrf.mxu0  ;;  %2202 = vmatmul.mubr.bf16.gmra.mxu0 %v5173_v21  ;;  %v2579_v39 = vpop.f32.mrf.mxu1  ;;  %v5179_v21 = vld [vmem:[%s6746_s0 + $0x3c0] ss:$8 sps:$4 sm:$0xff]  }
 0x212   :  { %v2830_v24 = vmax.f32 %v2011_v36, 0.0  ;;  %v2972_v41 = vmax.f32 %v2579_v39, 0.0  ;;  %2209 = vmatprep.mubr.bf16.mxu0 %v5178_v2 }
 0x213   :  { %v3563_v43 = vrot.slane %v3562_v25, 1  ;;  %v2013_v45 = vpop.f32.mrf.mxu0  ;;  %v2581_v46 = vpop.f32.mrf.mxu1 }
 0x214   :  { %v3194_v38 = vsel %vm3018_vm0, %v2830_v24, 0.0  ;;  %v3568_v59 = vsel %vm3018_vm0, %v2972_v41, 0.0  ;;  %v5182_v41 = vld [vmem:[%s6746_s0 + $0x3d0] ss:$8 sps:$4 sm:$0xff]   ;;  %v5187_v45 = vld [vmem:[%s6746_s0 + $0x3e4] ss:$8 sps:$4 sm:$0xff]  }
 0x215   :  { %v3564_v16 = vadd.f32 %v3563_v43, %v3562_v25  ;;  %v3195_v48 = vadd.f32 %v3194_v38, %v3193_v37  ;;  %v3569_v50 = vadd.f32 %v3568_v59, %v3567_v44  ;;  %v2014_v53 = vpop.f32.mrf.mxu0  ;;  %v2582_v51 = vpop.f32.mrf.mxu1 }
 0x216   :  { %v2831_v56 = vmax.f32 %v2014_v53, 0.0  ;;  %v2973_v58 = vmax.f32 %v2582_v51, 0.0 }
 0x217   :  { %v6319_v47 = vsel %vm3729_vm1, %v3564_v16, %v3543_v42  ;;  %v2016_v63 = vpop.f32.mrf.mxu0  ;;  %v2584_v0 = vpop.f32.mrf.mxu1 }
 0x218   :  { %v3196_v1 = vsel %vm3018_vm0, %v2831_v56, 0.0  ;;  %v3570_v4 = vsel %vm3018_vm0, %v2973_v58, 0.0 }
 0x219   :  { %v3197_v61 = vadd.f32 %v3196_v1, %v3195_v48  ;;  %v3571_v5 = vadd.f32 %v3570_v4, %v3569_v50  ;;  %v2019_v6 = vpop.f32.mrf.mxu0  ;;  %2210 = vmatmul.mubr.bf16.gmra.mxu0 %v5176_v52  ;;  %v2587_v8 = vpop.f32.mrf.mxu1 }
 0x21a   :  { %v2832_v10 = vmax.f32 %v2019_v6, 0.0  ;;  %v2974_v9 = vmax.f32 %v2587_v8, 0.0  ;;  %2217 = vmatprep.mubr.bf16.mxu0 %v5181_v60  ;;  %v5185_v6 = vld [vmem:[%s6746_s0 + $0x3e0] ss:$8 sps:$4 sm:$0xff]  }
 0x21b   :  { %v2021_v7 = vpop.f32.mrf.mxu0  ;;  %v2589_v11 = vpop.f32.mrf.mxu1 }
 0x21c   :  { %v3198_v12 = vsel %vm3018_vm0, %v2832_v10, 0.0  ;;  %v3572_v13 = vsel %vm3018_vm0, %v2974_v9, 0.0  ;;  %v5190_v7 = vld [vmem:[%s6746_s0 + $0x3f4] ss:$8 sps:$4 sm:$0xff]  }
 0x21d   :  { %v3199_v14 = vadd.f32 %v3198_v12, %v3197_v61  ;;  %v3573_v18 = vadd.f32 %v3572_v13, %v3571_v5  ;;  %v2022_v19 = vpop.f32.mrf.mxu0  ;;  %v2590_v20 = vpop.f32.mrf.mxu1 }
 0x21e   :  { %v2833_v23 = vmax.f32 %v2022_v19, 0.0  ;;  %v2975_v26 = vmax.f32 %v2590_v20, 0.0 }
 0x21f   :  { %v2024_v28 = vpop.f32.mrf.mxu0  ;;  %v2592_v29 = vpop.f32.mrf.mxu1 }
 0x220   :  { %v3200_v2 = vsel %vm3018_vm0, %v2833_v23, 0.0  ;;  %v3574_v30 = vsel %vm3018_vm0, %v2975_v26, 0.0 }
 0x221   :  { %v6333_v31 = vadd.f32 %v3200_v2, %v3199_v14  ;;  %v3575_v32 = vadd.f32 %v3574_v30, %v3573_v18  ;;  %v2027_v54 = vpop.f32.mrf.mxu0  ;;  %2218 = vmatmul.mubr.bf16.gmra.mxu0 %v5179_v21  ;;  %v2595_v17 = vpop.f32.mrf.mxu1 }
 0x222   :  { %v2976_v33 = vmax.f32 %v2595_v17, 0.0  ;;  %2225 = vmatprep.mubr.bf16.mxu0 %v5184_v27  ;;  %v2834_v37 = vmax.f32 %v2027_v54, 0.0 }
 0x223   :  { %v2029_v34 = vpop.f32.mrf.mxu0  ;;  %v2597_v25 = vpop.f32.mrf.mxu1 }
 0x224   :  { %v3576_v44 = vsel %vm3018_vm0, %v2976_v33, 0.0  ;;  %v3208_v59 = vsel %vm3018_vm0, %v2834_v37, 0.0 }
 0x225   :  { %v3577_v36 = vadd.f32 %v3576_v44, %v3575_v32  ;;  %v2030_v39 = vpop.f32.mrf.mxu0  ;;  %v2598_v24 = vpop.f32.mrf.mxu1  ;;  %v5188_v44 = vld [vmem:[%s6746_s0 + $0x3f0] ss:$8 sps:$4 sm:$0xff]  }
 0x226   :  { %v2835_v42 = vmax.f32 %v2030_v39, 0.0  ;;  %v2977_v43 = vmax.f32 %v2598_v24, 0.0  ;;  %v5193_v24 = vld [vmem:[%s6746_s0 + $0x404] ss:$8 sps:$4 sm:$0xff]  }
 0x227   :  { %v2032_v46 = vpop.f32.mrf.mxu0  ;;  %v2600_v38 = vpop.f32.mrf.mxu1 }
 0x228   :  { %v3209_v16 = vsel %vm3018_vm0, %v2835_v42, 0.0  ;;  %v3578_v48 = vsel %vm3018_vm0, %v2977_v43, 0.0  ;;  %v3202_v38 = vrot.slane %v6333_v31, 4 }
 0x229   :  { %v3210_v50 = vadd.f32 %v3209_v16, %v3208_v59  ;;  %v3579_v53 = vadd.f32 %v3578_v48, %v3577_v36  ;;  %v2035_v51 = vpop.f32.mrf.mxu0  ;;  %2226 = vmatmul.mubr.bf16.gmra.mxu0 %v5182_v41  ;;  %v2603_v52 = vpop.f32.mrf.mxu1 }
 0x22a   :  { %v2836_v55 = vmax.f32 %v2035_v51, 0.0  ;;  %v2978_v56 = vmax.f32 %v2603_v52, 0.0  ;;  %2233 = vmatprep.mubr.bf16.mxu0 %v5187_v45 }
 0x22b   :  { %v3580_v58 = vrot.slane %v3579_v53, 4  ;;  %v2037_v60 = vpop.f32.mrf.mxu0  ;;  %v2605_v63 = vpop.f32.mrf.mxu1 }
 0x22c   :  { %v3211_v0 = vsel %vm3018_vm0, %v2836_v55, 0.0  ;;  %v3586_v8 = vsel %vm3018_vm0, %v2978_v56, 0.0 }
 0x22d   :  { %v3581_v1 = vadd.f32 %v3580_v58, %v3579_v53  ;;  %v3212_v4 = vadd.f32 %v3211_v0, %v3210_v50  ;;  %v2038_v61 = vpop.f32.mrf.mxu0  ;;  %v2606_v5 = vpop.f32.mrf.mxu1  ;;  %v3203_v58 = vadd.f32 %v3202_v38, %v6333_v31 }
 0x22e   :  { %v2837_v10 = vmax.f32 %v2038_v61, 0.0  ;;  %v2979_v9 = vmax.f32 %v2606_v5, 0.0 }
 0x22f   :  { %v3582_v11 = vrot.slane %v3581_v1, 2  ;;  %v2040_v12 = vpop.f32.mrf.mxu0  ;;  %v2608_v13 = vpop.f32.mrf.mxu1 }
 0x230   :  { %v3213_v14 = vsel %vm3018_vm0, %v2837_v10, 0.0  ;;  %v3587_v18 = vsel %vm3018_vm0, %v2979_v9, 0.0 }
 0x231   :  { %v3583_v19 = vadd.f32 %v3582_v11, %v3581_v1  ;;  %v3214_v20 = vadd.f32 %v3213_v14, %v3212_v4  ;;  %v3588_v21 = vadd.f32 %v3587_v18, %v3586_v8  ;;  %v2043_v23 = vpop.f32.mrf.mxu0  ;;  %2234 = vmatmul.mubr.bf16.gmra.mxu0 %v5185_v6  ;;  %v2611_v26 = vpop.f32.mrf.mxu1  ;;  %v5191_v4 = vld [vmem:[%s6746_s0 + $0x400] ss:$8 sps:$4 sm:$0xff]   ;;  %v5196_v6 = vld [vmem:[%s6746_s0 + $0x414] ss:$8 sps:$4 sm:$0xff]  }
 0x232   :  { %v2838_v27 = vmax.f32 %v2043_v23, 0.0  ;;  %v2980_v28 = vmax.f32 %v2611_v26, 0.0  ;;  %2241 = vmatprep.mubr.bf16.mxu0 %v5190_v7  ;;  %v3204_v7 = vrot.slane %v3203_v58, 2 }
 0x233   :  { %v3584_v29 = vrot.slane %v3583_v19, 1  ;;  %v2045_v2 = vpop.f32.mrf.mxu0  ;;  %v2613_v30 = vpop.f32.mrf.mxu1 }
 0x234   :  { %v3215_v32 = vsel %vm3018_vm0, %v2838_v27, 0.0  ;;  %v3589_v54 = vsel %vm3018_vm0, %v2980_v28, 0.0  ;;  %v3205_v27 = vadd.f32 %v3204_v7, %v3203_v58 }
 0x235   :  { %v3585_v17 = vadd.f32 %v3584_v29, %v3583_v19  ;;  %v3216_v33 = vadd.f32 %v3215_v32, %v3214_v20  ;;  %v3590_v34 = vadd.f32 %v3589_v54, %v3588_v21  ;;  %v2046_v25 = vpop.f32.mrf.mxu0  ;;  %v2614_v37 = vpop.f32.mrf.mxu1  ;;  %v5194_v32 = vld [vmem:[%s6746_s0 + $0x410] ss:$8 sps:$4 sm:$0xff]  }
 0x236   :  { %v2839_v36 = vmax.f32 %v2046_v25, 0.0  ;;  %v2981_v39 = vmax.f32 %v2614_v37, 0.0 }
 0x237   :  { %v6365_v41 = vsel %vm3731_vm2, %v3585_v17, %v6319_v47  ;;  %v2048_v42 = vpop.f32.mrf.mxu0  ;;  %v2616_v43 = vpop.f32.mrf.mxu1 }
 0x238   :  { %v3217_v45 = vsel %vm3018_vm0, %v2839_v36, 0.0  ;;  %v3591_v46 = vsel %vm3018_vm0, %v2981_v39, 0.0 }
 0x239   :  { %v3218_v59 = vadd.f32 %v3217_v45, %v3216_v33  ;;  %v3592_v16 = vadd.f32 %v3591_v46, %v3590_v34  ;;  %v2051_v48 = vpop.f32.mrf.mxu0  ;;  %2242 = vmatmul.mubr.bf16.gmra.mxu0 %v5188_v44  ;;  %v2619_v50 = vpop.f32.mrf.mxu1  ;;  %v5199_v33 = vld [vmem:[%s6746_s0 + $0x424] ss:$8 sps:$4 sm:$0xff]  }
 0x23a   :  { %v2840_v53 = vmax.f32 %v2051_v48, 0.0  ;;  %v2982_v51 = vmax.f32 %v2619_v50, 0.0  ;;  %2249 = vmatprep.mubr.bf16.mxu0 %v5193_v24  ;;  %v3206_v24 = vrot.slane %v3205_v27, 1 }
 0x23b   :  { %v2053_v52 = vpop.f32.mrf.mxu0  ;;  %v2621_v55 = vpop.f32.mrf.mxu1 }
 0x23c   :  { %v3219_v47 = vsel %vm3018_vm0, %v2840_v53, 0.0  ;;  %v3593_v56 = vsel %vm3018_vm0, %v2982_v51, 0.0  ;;  %v3207_v55 = vadd.f32 %v3206_v24, %v3205_v27 }
 0x23d   :  { %v3220_v60 = vadd.f32 %v3219_v47, %v3218_v59  ;;  %v3594_v63 = vadd.f32 %v3593_v56, %v3592_v16  ;;  %v2054_v0 = vpop.f32.mrf.mxu0  ;;  %v2622_v1 = vpop.f32.mrf.mxu1 }
 0x23e   :  { %v2841_v61 = vmax.f32 %v2054_v0, 0.0  ;;  %v2983_v5 = vmax.f32 %v2622_v1, 0.0  ;;  %v5197_v0 = vld [vmem:[%s6746_s0 + $0x420] ss:$8 sps:$4 sm:$0xff]  }
 0x23f   :  { %v2056_v8 = vpop.f32.mrf.mxu0  ;;  %v2624_v10 = vpop.f32.mrf.mxu1 }
 0x240   :  { %v3221_v9 = vsel %vm3018_vm0, %v2841_v61, 0.0  ;;  %v3595_v31 = vsel %vm3018_vm0, %v2983_v5, 0.0  ;;  %v5202_v5 = vld [vmem:[%s6746_s0 + $0x434] ss:$8 sps:$4 sm:$0xff]  }
 0x241   :  { %v3222_v11 = vadd.f32 %v3221_v9, %v3220_v60  ;;  %v3596_v12 = vadd.f32 %v3595_v31, %v3594_v63  ;;  %v2059_v13 = vpop.f32.mrf.mxu0  ;;  %2250 = vmatmul.mubr.bf16.gmra.mxu0 %v5191_v4  ;;  %v2627_v14 = vpop.f32.mrf.mxu1 }
 0x242   :  { %v2984_v18 = vmax.f32 %v2627_v14, 0.0  ;;  %2257 = vmatprep.mubr.bf16.mxu0 %v5196_v6  ;;  %v2842_v23 = vmax.f32 %v2059_v13, 0.0 }
 0x243   :  { %v3223_v19 = vrot.slane %v3222_v11, 4  ;;  %v2061_v20 = vpop.f32.mrf.mxu0  ;;  %v2629_v21 = vpop.f32.mrf.mxu1 }
 0x244   :  { %v3597_v26 = vsel %vm3018_vm0, %v2984_v18, 0.0  ;;  %v3229_v44 = vsel %vm3018_vm0, %v2842_v23, 0.0 }
 0x245   :  { %v3224_v28 = vadd.f32 %v3223_v19, %v3222_v11  ;;  %v3598_v29 = vadd.f32 %v3597_v26, %v3596_v12  ;;  %v2062_v2 = vpop.f32.mrf.mxu0  ;;  %v2630_v30 = vpop.f32.mrf.mxu1 }
 0x246   :  { %v2843_v54 = vmax.f32 %v2062_v2, 0.0  ;;  %v2985_v17 = vmax.f32 %v2630_v30, 0.0 }
 0x247   :  { %v3225_v34 = vrot.slane %v3224_v28, 2  ;;  %v2064_v25 = vpop.f32.mrf.mxu0  ;;  %v2632_v37 = vpop.f32.mrf.mxu1 }
 0x248   :  { %v3230_v36 = vsel %vm3018_vm0, %v2843_v54, 0.0  ;;  %v3599_v39 = vsel %vm3018_vm0, %v2985_v17, 0.0  ;;  %v5200_v17 = vld [vmem:[%s6746_s0 + $0x430] ss:$8 sps:$4 sm:$0xff]   ;;  %v5205_v37 = vld [vmem:[%s6746_s0 + $0x444] ss:$8 sps:$4 sm:$0xff]  }
 0x249   :  { %v3226_v42 = vadd.f32 %v3225_v34, %v3224_v28  ;;  %v3231_v43 = vadd.f32 %v3230_v36, %v3229_v44  ;;  %v3600_v45 = vadd.f32 %v3599_v39, %v3598_v29  ;;  %v2067_v46 = vpop.f32.mrf.mxu0  ;;  %2258 = vmatmul.mubr.bf16.gmra.mxu0 %v5194_v32  ;;  %v2635_v38 = vpop.f32.mrf.mxu1 }
 0x24a   :  { %v2844_v59 = vmax.f32 %v2067_v46, 0.0  ;;  %v2986_v16 = vmax.f32 %v2635_v38, 0.0  ;;  %2265 = vmatprep.mubr.bf16.mxu0 %v5199_v33  ;;  %v321_v33 = vld [vmem:[%s6747_s2 + $0x8] sm:$0xff] }
 0x24b   :  { %v3227_v48 = vrot.slane %v3226_v42, 1  ;;  %v3601_v50 = vrot.slane %v3600_v45, 4  ;;  %v2069_v53 = vpop.f32.mrf.mxu0  ;;  %v2637_v51 = vpop.f32.mrf.mxu1  ;;  %4748 = vmatprep.subr.mxu1 %v321_v33 }
 0x24c   :  { %v3232_v52 = vsel %vm3018_vm0, %v2844_v59, 0.0  ;;  %v3607_v1 = vsel %vm3018_vm0, %v2986_v16, 0.0  ;;  %4749 = vmatpush3.msra.mxu1 %v321_v33 }
 0x24d   :  { %v3228_v47 = vadd.f32 %v3227_v48, %v3226_v42  ;;  %v3602_v56 = vadd.f32 %v3601_v50, %v3600_v45  ;;  %v3233_v58 = vadd.f32 %v3232_v52, %v3231_v43  ;;  %v2070_v60 = vpop.f32.mrf.mxu0  ;;  %v2638_v63 = vpop.f32.mrf.mxu1 }
 0x24e   :  { %v2845_v4 = vmax.f32 %v2070_v60, 0.0  ;;  %v2987_v61 = vmax.f32 %v2638_v63, 0.0  ;;  %v5208_v63 = vld [vmem:[%s6746_s0 + $0x454] ss:$8 sps:$4 sm:$0xff]  }
 0x24f   :  { %v6400_v6 = vsel %vm3729_vm1, %v3228_v47, %v3207_v55  ;;  %v3603_v8 = vrot.slane %v3602_v56, 2  ;;  %v2072_v10 = vpop.f32.mrf.mxu0  ;;  %v2640_v9 = vpop.f32.mrf.mxu1 }
 0x250   :  { %v3234_v31 = vsel %vm3018_vm0, %v2845_v4, 0.0  ;;  %v3608_v7 = vsel %vm3018_vm0, %v2987_v61, 0.0 }
 0x251   :  { %v3604_v11 = vadd.f32 %v3603_v8, %v3602_v56  ;;  %v3235_v12 = vadd.f32 %v3234_v31, %v3233_v58  ;;  %v3609_v13 = vadd.f32 %v3608_v7, %v3607_v1  ;;  %v2075_v14 = vpop.f32.mrf.mxu0  ;;  %2266 = vmatmul.mubr.bf16.gmra.mxu0 %v5197_v0  ;;  %v2643_v18 = vpop.f32.mrf.mxu1  ;;  %v5203_v56 = vld [vmem:[%s6746_s0 + $0x440] ss:$8 sps:$4 sm:$0xff]  }
 0x252   :  { %v2846_v19 = vmax.f32 %v2075_v14, 0.0  ;;  %v2988_v20 = vmax.f32 %v2643_v18, 0.0  ;;  %2273 = vmatprep.mubr.bf16.mxu0 %v5202_v5 }
 0x253   :  { %v3605_v21 = vrot.slane %v3604_v11, 1  ;;  %v2077_v23 = vpop.f32.mrf.mxu0  ;;  %v2645_v26 = vpop.f32.mrf.mxu1 }
 0x254   :  { %v3236_v27 = vsel %vm3018_vm0, %v2846_v19, 0.0  ;;  %v3610_v28 = vsel %vm3018_vm0, %v2988_v20, 0.0  ;;  %v5206_v23 = vld [vmem:[%s6746_s0 + $0x450] ss:$8 sps:$4 sm:$0xff]  }
 0x255   :  { %v3606_v29 = vadd.f32 %v3605_v21, %v3604_v11  ;;  %v3237_v2 = vadd.f32 %v3236_v27, %v3235_v12  ;;  %v3611_v30 = vadd.f32 %v3610_v28, %v3609_v13  ;;  %v2078_v32 = vpop.f32.mrf.mxu0  ;;  %v2646_v54 = vpop.f32.mrf.mxu1  ;;  %v5211_v28 = vld [vmem:[%s6746_s0 + $0x464] ss:$8 sps:$4 sm:$0xff]  }
 0x256   :  { %v2847_v34 = vmax.f32 %v2078_v32, 0.0  ;;  %v2989_v25 = vmax.f32 %v2646_v54, 0.0 }
 0x257   :  { %v6417_v44 = vsel %vm3733_vm3, %v3606_v29, %v6365_v41  ;;  %v2080_v36 = vpop.f32.mrf.mxu0  ;;  %v2648_v39 = vpop.f32.mrf.mxu1 }
 0x258   :  { %v3238_v24 = vsel %vm3018_vm0, %v2847_v34, 0.0  ;;  %v3612_v42 = vsel %vm3018_vm0, %v2989_v25, 0.0 }
 0x259   :  { %v3239_v43 = vadd.f32 %v3238_v24, %v3237_v2  ;;  %v3613_v45 = vadd.f32 %v3612_v42, %v3611_v30  ;;  %v2083_v46 = vpop.f32.mrf.mxu0  ;;  %2274 = vmatmul.mubr.bf16.gmra.mxu0 %v5200_v17  ;;  %v2651_v38 = vpop.f32.mrf.mxu1 }
 0x25a   :  { %v2848_v59 = vmax.f32 %v2083_v46, 0.0  ;;  %v2990_v16 = vmax.f32 %v2651_v38, 0.0  ;;  %2281 = vmatprep.mubr.bf16.mxu0 %v5205_v37 }
 0x25b   :  { %v2085_v48 = vpop.f32.mrf.mxu0  ;;  %v2653_v50 = vpop.f32.mrf.mxu1 }
 0x25c   :  { %v3240_v41 = vsel %vm3018_vm0, %v2848_v59, 0.0  ;;  %v3614_v53 = vsel %vm3018_vm0, %v2990_v16, 0.0 }
 0x25d   :  { %v3241_v51 = vadd.f32 %v3240_v41, %v3239_v43  ;;  %v3615_v52 = vadd.f32 %v3614_v53, %v3613_v45  ;;  %v2086_v55 = vpop.f32.mrf.mxu0  ;;  %v2654_v47 = vpop.f32.mrf.mxu1  ;;  %v5209_v53 = vld [vmem:[%s6746_s0 + $0x460] ss:$8 sps:$4 sm:$0xff]  }
 0x25e   :  { %v2849_v58 = vmax.f32 %v2086_v55, 0.0  ;;  %v2991_v60 = vmax.f32 %v2654_v47, 0.0 }
 0x25f   :  { %v2088_v0 = vpop.f32.mrf.mxu0  ;;  %v2656_v1 = vpop.f32.mrf.mxu1 }
 0x260   :  { %v3242_v4 = vsel %vm3018_vm0, %v2849_v58, 0.0  ;;  %v3616_v61 = vsel %vm3018_vm0, %v2991_v60, 0.0 }
 0x261   :  { %v3243_v5 = vadd.f32 %v3242_v4, %v3241_v51  ;;  %v3617_v8 = vadd.f32 %v3616_v61, %v3615_v52  ;;  %v2091_v10 = vpop.f32.mrf.mxu0  ;;  %2282 = vmatmul.mubr.bf16.gmra.mxu0 %v5203_v56  ;;  %v2659_v9 = vpop.f32.mrf.mxu1 }
 0x262   :  { %v2992_v31 = vmax.f32 %v2659_v9, 0.0  ;;  %2289 = vmatprep.mubr.bf16.mxu0 %v5208_v63  ;;  %v2850_v13 = vmax.f32 %v2091_v10, 0.0 }
 0x263   :  { %v3244_v7 = vrot.slane %v3243_v5, 4  ;;  %v2093_v11 = vpop.f32.mrf.mxu0  ;;  %v2661_v12 = vpop.f32.mrf.mxu1 }
 0x264   :  { %v3618_v14 = vsel %vm3018_vm0, %v2992_v31, 0.0  ;;  %v3250_v32 = vsel %vm3018_vm0, %v2850_v13, 0.0 }
 0x265   :  { %v3245_v18 = vadd.f32 %v3244_v7, %v3243_v5  ;;  %v3619_v19 = vadd.f32 %v3618_v14, %v3617_v8  ;;  %v2094_v20 = vpop.f32.mrf.mxu0  ;;  %v2662_v21 = vpop.f32.mrf.mxu1 }
 0x266   :  { %v2851_v26 = vmax.f32 %v2094_v20, 0.0  ;;  %v2993_v27 = vmax.f32 %v2662_v21, 0.0 }
 0x267   :  { %v3246_v29 = vrot.slane %v3245_v18, 2  ;;  %v2096_v2 = vpop.f32.mrf.mxu0  ;;  %v2664_v30 = vpop.f32.mrf.mxu1 }
 0x268   :  { %v3251_v54 = vsel %vm3018_vm0, %v2851_v26, 0.0  ;;  %v3620_v17 = vsel %vm3018_vm0, %v2993_v27, 0.0 }
 0x269   :  { %v3247_v33 = vadd.f32 %v3246_v29, %v3245_v18  ;;  %v3252_v34 = vadd.f32 %v3251_v54, %v3250_v32  ;;  %v3621_v25 = vadd.f32 %v3620_v17, %v3619_v19  ;;  %v2099_v37 = vpop.f32.mrf.mxu0  ;;  %2290 = vmatmul.mubr.bf16.gmra.mxu0 %v5206_v23  ;;  %v2667_v36 = vpop.f32.mrf.mxu1 }
 0x26a   :  { %v2852_v39 = vmax.f32 %v2099_v37, 0.0  ;;  %v2994_v24 = vmax.f32 %v2667_v36, 0.0  ;;  %2297 = vmatprep.mubr.bf16.mxu0 %v5211_v28 }
 0x26b   :  { %v3248_v42 = vrot.slane %v3247_v33, 1  ;;  %v3622_v43 = vrot.slane %v3621_v25, 4  ;;  %v2101_v45 = vpop.f32.mrf.mxu0  ;;  %v2669_v46 = vpop.f32.mrf.mxu1 }
 0x26c   :  { %v3253_v38 = vsel %vm3018_vm0, %v2852_v39, 0.0  ;;  %v3628_v51 = vsel %vm3018_vm0, %v2994_v24, 0.0 }
 0x26d   :  { %v3249_v59 = vadd.f32 %v3248_v42, %v3247_v33  ;;  %v3623_v16 = vadd.f32 %v3622_v43, %v3621_v25  ;;  %v3254_v48 = vadd.f32 %v3253_v38, %v3252_v34  ;;  %v2102_v50 = vpop.f32.mrf.mxu0  ;;  %v2670_v41 = vpop.f32.mrf.mxu1 }
 0x26e   :  { %v2853_v52 = vmax.f32 %v2102_v50, 0.0  ;;  %v2995_v55 = vmax.f32 %v2670_v41, 0.0 }
 0x26f   :  { %v6448_v47 = vsel %vm3731_vm2, %v3249_v59, %v6400_v6  ;;  %v3624_v56 = vrot.slane %v3623_v16, 2  ;;  %v2104_v58 = vpop.f32.mrf.mxu0  ;;  %v2672_v60 = vpop.f32.mrf.mxu1 }
 0x270   :  { %v3255_v63 = vsel %vm3018_vm0, %v2853_v52, 0.0  ;;  %v3629_v0 = vsel %vm3018_vm0, %v2995_v55, 0.0 }
 0x271   :  { %v3625_v1 = vadd.f32 %v3624_v56, %v3623_v16  ;;  %v3256_v4 = vadd.f32 %v3255_v63, %v3254_v48  ;;  %v3630_v61 = vadd.f32 %v3629_v0, %v3628_v51  ;;  %v2107_v5 = vpop.f32.mrf.mxu0  ;;  %2298 = vmatmul.mubr.bf16.gmra.mxu0 %v5209_v53  ;;  %v2675_v8 = vpop.f32.mrf.mxu1 }
 0x272   :  { %v2854_v10 = vmax.f32 %v2107_v5, 0.0  ;;  %v2996_v9 = vmax.f32 %v2675_v8, 0.0 }
 0x273   :  { %v3626_v31 = vrot.slane %v3625_v1, 1  ;;  %v2109_v7 = vpop.f32.mrf.mxu0  ;;  %v2677_v11 = vpop.f32.mrf.mxu1 }
 0x274   :  { %v3257_v6 = vsel %vm3018_vm0, %v2854_v10, 0.0  ;;  %v3631_v12 = vsel %vm3018_vm0, %v2996_v9, 0.0 }
 0x275   :  { %v3627_v13 = vadd.f32 %v3626_v31, %v3625_v1  ;;  %v3258_v14 = vadd.f32 %v3257_v6, %v3256_v4  ;;  %v3632_v18 = vadd.f32 %v3631_v12, %v3630_v61  ;;  %v2110_v19 = vpop.f32.mrf.mxu0  ;;  %v2678_v20 = vpop.f32.mrf.mxu1 }
 0x276   :  { %v2855_v21 = vmax.f32 %v2110_v19, 0.0  ;;  %v2997_v23 = vmax.f32 %v2678_v20, 0.0 }
 0x277   :  { %v2112_v26 = vpop.f32.mrf.mxu0  ;;  %v2680_v27 = vpop.f32.mrf.mxu1  ;;  %v6456_v28 = vsel %vm3735_vm4, %v3627_v13, %v6417_v44 }
 0x278   :  { %v3259_v29 = vsel %vm3018_vm0, %v2855_v21, 0.0  ;;  %v3633_v2 = vsel %vm3018_vm0, %v2997_v23, 0.0 }
 0x279   :  { %v3260_v30 = vadd.f32 %v3259_v29, %v3258_v14  ;;  %v3634_v32 = vadd.f32 %v3633_v2, %v3632_v18  ;;  %v2115_v54 = vpop.f32.mrf.mxu0  ;;  %v2683_v17 = vpop.f32.mrf.mxu1 }
 0x27a   :  { %v2856_v33 = vmax.f32 %v2115_v54, 0.0  ;;  %v2998_v34 = vmax.f32 %v2683_v17, 0.0 }
 0x27b   :  { %v2117_v25 = vpop.f32.mrf.mxu0  ;;  %v2685_v37 = vpop.f32.mrf.mxu1 }
 0x27c   :  { %v3261_v36 = vsel %vm3018_vm0, %v2856_v33, 0.0  ;;  %v3635_v39 = vsel %vm3018_vm0, %v2998_v34, 0.0  ;;  %v320_v34 = vld [vmem:[%s6747_s2] sm:$0xff] }
 0x27d   :  { %v3262_v24 = vadd.f32 %v3261_v36, %v3260_v30  ;;  %v3636_v42 = vadd.f32 %v3635_v39, %v3634_v32  ;;  %v2118_v44 = vpop.f32.mrf.mxu0  ;;  %v2686_v43 = vpop.f32.mrf.mxu1  ;;  %4750 = vmatprep.subr.mxu1 %v320_v34 }
 0x27e   :  { %v2857_v45 = vmax.f32 %v2118_v44, 0.0  ;;  %v2999_v46 = vmax.f32 %v2686_v43, 0.0  ;;  %4751 = vmatpush3.msra.mxu1 %v320_v34 }
 0x27f   :  { %v2120_v38 = vpop.f32.mrf.mxu0  ;;  %v2688_v59 = vpop.f32.mrf.mxu1 }
 0x280   :  { %v3263_v16 = vsel %vm3018_vm0, %v2857_v45, 0.0  ;;  %v3637_v48 = vsel %vm3018_vm0, %v2999_v46, 0.0 }
 0x281   :  { %v3264_v50 = vadd.f32 %v3263_v16, %v3262_v24  ;;  %v3638_v41 = vadd.f32 %v3637_v48, %v3636_v42  ;;  %v2123_v53 = vpop.f32.mrf.mxu0  ;;  %v2691_v51 = vpop.f32.mrf.mxu1 }
 0x282   :  { %v3000_v52 = vmax.f32 %v2691_v51, 0.0  ;;  %v2858_v60 = vmax.f32 %v2123_v53, 0.0 }
 0x283   :  { %v3265_v55 = vrot.slane %v3264_v50, 4  ;;  %v2125_v56 = vpop.f32.mrf.mxu0  ;;  %v2693_v58 = vpop.f32.mrf.mxu1 }
 0x284   :  { %v3639_v63 = vsel %vm3018_vm0, %v3000_v52, 0.0  ;;  %v3271_v7 = vsel %vm3018_vm0, %v2858_v60, 0.0 }
 0x285   :  { %v3266_v0 = vadd.f32 %v3265_v55, %v3264_v50  ;;  %v3640_v1 = vadd.f32 %v3639_v63, %v3638_v41  ;;  %v2126_v4 = vpop.f32.mrf.mxu0  ;;  %v2694_v61 = vpop.f32.mrf.mxu1 }
 0x286   :  { %v2859_v5 = vmax.f32 %v2126_v4, 0.0  ;;  %v3001_v8 = vmax.f32 %v2694_v61, 0.0 }
 0x287   :  { %v3267_v10 = vrot.slane %v3266_v0, 2  ;;  %v2128_v9 = vpop.f32.mrf.mxu0  ;;  %v2696_v31 = vpop.f32.mrf.mxu1 }
 0x288   :  { %v3272_v11 = vsel %vm3018_vm0, %v2859_v5, 0.0  ;;  %v3641_v6 = vsel %vm3018_vm0, %v3001_v8, 0.0 }
 0x289   :  { %v3268_v12 = vadd.f32 %v3267_v10, %v3266_v0  ;;  %v3273_v13 = vadd.f32 %v3272_v11, %v3271_v7  ;;  %v3642_v14 = vadd.f32 %v3641_v6, %v3640_v1  ;;  %v2131_v18 = vpop.f32.mrf.mxu0  ;;  %v2699_v19 = vpop.f32.mrf.mxu1 }
 0x28a   :  { %v2860_v20 = vmax.f32 %v2131_v18, 0.0  ;;  %v3002_v21 = vmax.f32 %v2699_v19, 0.0 }
 0x28b   :  { %v3269_v23 = vrot.slane %v3268_v12, 1  ;;  %v3643_v26 = vrot.slane %v3642_v14, 4  ;;  %v2133_v27 = vpop.f32.mrf.mxu0  ;;  %v2701_v29 = vpop.f32.mrf.mxu1 }
 0x28c   :  { %v3274_v2 = vsel %vm3018_vm0, %v2860_v20, 0.0  ;;  %v3649_v25 = vsel %vm3018_vm0, %v3002_v21, 0.0 }
 0x28d   :  { %v3270_v30 = vadd.f32 %v3269_v23, %v3268_v12  ;;  %v3644_v32 = vadd.f32 %v3643_v26, %v3642_v14  ;;  %v3275_v54 = vadd.f32 %v3274_v2, %v3273_v13  ;;  %v2134_v17 = vpop.f32.mrf.mxu0  ;;  %v2702_v33 = vpop.f32.mrf.mxu1 }
 0x28e   :  { %v2861_v37 = vmax.f32 %v2134_v17, 0.0  ;;  %v3003_v36 = vmax.f32 %v2702_v33, 0.0 }
 0x28f   :  { %v6475_v39 = vsel %vm3733_vm3, %v3270_v30, %v6448_v47  ;;  %v3645_v24 = vrot.slane %v3644_v32, 2  ;;  %v2136_v42 = vpop.f32.mrf.mxu0  ;;  %v2704_v44 = vpop.f32.mrf.mxu1 }
 0x290   :  { %v3276_v43 = vsel %vm3018_vm0, %v2861_v37, 0.0  ;;  %v3650_v45 = vsel %vm3018_vm0, %v3003_v36, 0.0 }
 0x291   :  { %v3646_v46 = vadd.f32 %v3645_v24, %v3644_v32  ;;  %v3277_v38 = vadd.f32 %v3276_v43, %v3275_v54  ;;  %v3651_v59 = vadd.f32 %v3650_v45, %v3649_v25  ;;  %v2139_v16 = vpop.f32.mrf.mxu0  ;;  %v2707_v48 = vpop.f32.mrf.mxu1 }
 0x292   :  { %v2862_v50 = vmax.f32 %v2139_v16, 0.0  ;;  %v3004_v41 = vmax.f32 %v2707_v48, 0.0 }
 0x293   :  { %v3647_v53 = vrot.slane %v3646_v46, 1  ;;  %v2141_v51 = vpop.f32.mrf.mxu0  ;;  %v2709_v52 = vpop.f32.mrf.mxu1 }
 0x294   :  { %v3278_v47 = vsel %vm3018_vm0, %v2862_v50, 0.0  ;;  %v3652_v55 = vsel %vm3018_vm0, %v3004_v41, 0.0 }
 0x295   :  { %v3648_v56 = vadd.f32 %v3647_v53, %v3646_v46  ;;  %v3279_v58 = vadd.f32 %v3278_v47, %v3277_v38  ;;  %v3653_v60 = vadd.f32 %v3652_v55, %v3651_v59  ;;  %v2142_v63 = vpop.f32.mrf.mxu0  ;;  %v2710_v0 = vpop.f32.mrf.mxu1 }
 0x296   :  { %v2863_v1 = vmax.f32 %v2142_v63, 0.0  ;;  %v3005_v4 = vmax.f32 %v2710_v0, 0.0 }
 0x297   :  { %v2144_v61 = vpop.f32.mrf.mxu0  ;;  %v2712_v5 = vpop.f32.mrf.mxu1  ;;  %v6483_v8 = vsel %vm3737_vm5, %v3648_v56, %v6456_v28 }
 0x298   :  { %v3280_v10 = vsel %vm3018_vm0, %v2863_v1, 0.0  ;;  %v3654_v9 = vsel %vm3018_vm0, %v3005_v4, 0.0 }
 0x299   :  { %v3281_v31 = vadd.f32 %v3280_v10, %v3279_v58  ;;  %v3655_v7 = vadd.f32 %v3654_v9, %v3653_v60  ;;  %v2147_v11 = vpop.f32.mrf.mxu0  ;;  %v2715_v6 = vpop.f32.mrf.mxu1 }
 0x29a   :  { %v2864_v12 = vmax.f32 %v2147_v11, 0.0  ;;  %v3006_v13 = vmax.f32 %v2715_v6, 0.0 }
 0x29b   :  { %v2149_v14 = vpop.f32.mrf.mxu0  ;;  %v2717_v18 = vpop.f32.mrf.mxu1 }
 0x29c   :  { %v3282_v19 = vsel %vm3018_vm0, %v2864_v12, 0.0  ;;  %v3656_v20 = vsel %vm3018_vm0, %v3006_v13, 0.0 }
 0x29d   :  { %v3283_v21 = vadd.f32 %v3282_v19, %v3281_v31  ;;  %v3657_v23 = vadd.f32 %v3656_v20, %v3655_v7  ;;  %v2150_v28 = vpop.f32.mrf.mxu0  ;;  %v2718_v26 = vpop.f32.mrf.mxu1 }
 0x29e   :  { %v2865_v27 = vmax.f32 %v2150_v28, 0.0  ;;  %v3007_v29 = vmax.f32 %v2718_v26, 0.0 }
 0x29f   :  { %v2152_v2 = vpop.f32.mrf.mxu0  ;;  %v2720_v30 = vpop.f32.mrf.mxu1 }
 0x2a0   :  { %v3284_v32 = vsel %vm3018_vm0, %v2865_v27, 0.0  ;;  %v3658_v54 = vsel %vm3018_vm0, %v3007_v29, 0.0 }
 0x2a1   :  { %v3285_v17 = vadd.f32 %v3284_v32, %v3283_v21  ;;  %v3659_v33 = vadd.f32 %v3658_v54, %v3657_v23  ;;  %v2155_v34 = vpop.f32.mrf.mxu0  ;;  %v2723_v25 = vpop.f32.mrf.mxu1 }
 0x2a2   :  { %v3008_v37 = vmax.f32 %v2723_v25, 0.0  ;;  %v2866_v44 = vmax.f32 %v2155_v34, 0.0 }
 0x2a3   :  { %v3286_v36 = vrot.slane %v3285_v17, 4  ;;  %v2157_v24 = vpop.f32.mrf.mxu0  ;;  %v2725_v42 = vpop.f32.mrf.mxu1 }
 0x2a4   :  { %v3660_v43 = vsel %vm3018_vm0, %v3008_v37, 0.0  ;;  %v3292_v51 = vsel %vm3018_vm0, %v2866_v44, 0.0 }
 0x2a5   :  { %v3287_v45 = vadd.f32 %v3286_v36, %v3285_v17  ;;  %v3661_v46 = vadd.f32 %v3660_v43, %v3659_v33  ;;  %v2158_v38 = vpop.f32.mrf.mxu0  ;;  %v2726_v59 = vpop.f32.mrf.mxu1 }
 0x2a6   :  { %v2867_v16 = vmax.f32 %v2158_v38, 0.0  ;;  %v3009_v48 = vmax.f32 %v2726_v59, 0.0 }
 0x2a7   :  { %v3288_v50 = vrot.slane %v3287_v45, 2  ;;  %v2160_v41 = vpop.f32.mrf.mxu0  ;;  %v2728_v53 = vpop.f32.mrf.mxu1 }
 0x2a8   :  { %v3293_v52 = vsel %vm3018_vm0, %v2867_v16, 0.0  ;;  %v3662_v47 = vsel %vm3018_vm0, %v3009_v48, 0.0 }
 0x2a9   :  { %v3289_v55 = vadd.f32 %v3288_v50, %v3287_v45  ;;  %v3294_v56 = vadd.f32 %v3293_v52, %v3292_v51  ;;  %v3663_v58 = vadd.f32 %v3662_v47, %v3661_v46  ;;  %v2163_v60 = vpop.f32.mrf.mxu0  ;;  %v2731_v63 = vpop.f32.mrf.mxu1  ;;  %v5212_v45 = vld [vmem:[%s6748_s5 + $0x78] sm:$0xff]  }
 0x2aa   :  { %v2868_v0 = vmax.f32 %v2163_v60, 0.0  ;;  %v3010_v1 = vmax.f32 %v2731_v63, 0.0  ;;  %4663 = vmatprep.subr.bf16.mxu1 %v5212_v45 }
 0x2ab   :  { %v3290_v4 = vrot.slane %v3289_v55, 1  ;;  %v3664_v61 = vrot.slane %v3663_v58, 4  ;;  %v2165_v5 = vpop.f32.mrf.mxu0  ;;  %v2733_v10 = vpop.f32.mrf.mxu1 }
 0x2ac   :  { %v3295_v9 = vsel %vm3018_vm0, %v2868_v0, 0.0  ;;  %v3670_v13 = vsel %vm3018_vm0, %v3010_v1, 0.0 }
 0x2ad   :  { %v3291_v31 = vadd.f32 %v3290_v4, %v3289_v55  ;;  %v3665_v7 = vadd.f32 %v3664_v61, %v3663_v58  ;;  %v3296_v11 = vadd.f32 %v3295_v9, %v3294_v56  ;;  %v2166_v6 = vpop.f32.mrf.mxu0  ;;  %v2734_v12 = vpop.f32.mrf.mxu1 }
 0x2ae   :  { %v2869_v14 = vmax.f32 %v2166_v6, 0.0  ;;  %v3011_v18 = vmax.f32 %v2734_v12, 0.0 }
 0x2af   :  { %v6499_v19 = vsel %vm3735_vm4, %v3291_v31, %v6475_v39  ;;  %v3666_v20 = vrot.slane %v3665_v7, 2  ;;  %v2168_v21 = vpop.f32.mrf.mxu0  ;;  %v2736_v23 = vpop.f32.mrf.mxu1 }
 0x2b0   :  { %v3297_v28 = vsel %vm3018_vm0, %v2869_v14, 0.0  ;;  %v3671_v26 = vsel %vm3018_vm0, %v3011_v18, 0.0 }
 0x2b1   :  { %v3667_v27 = vadd.f32 %v3666_v20, %v3665_v7  ;;  %v3298_v29 = vadd.f32 %v3297_v28, %v3296_v11  ;;  %v3672_v2 = vadd.f32 %v3671_v26, %v3670_v13  ;;  %v2171_v30 = vpop.f32.mrf.mxu0  ;;  %v2739_v32 = vpop.f32.mrf.mxu1 }
 0x2b2   :  { %v2870_v54 = vmax.f32 %v2171_v30, 0.0  ;;  %v3012_v17 = vmax.f32 %v2739_v32, 0.0 }
 0x2b3   :  { %v3668_v33 = vrot.slane %v3667_v27, 1  ;;  %v2173_v34 = vpop.f32.mrf.mxu0  ;;  %v2741_v25 = vpop.f32.mrf.mxu1 }
 0x2b4   :  { %v3299_v39 = vsel %vm3018_vm0, %v2870_v54, 0.0  ;;  %v3673_v37 = vsel %vm3018_vm0, %v3012_v17, 0.0 }
 0x2b5   :  { %v3669_v36 = vadd.f32 %v3668_v33, %v3667_v27  ;;  %v3300_v24 = vadd.f32 %v3299_v39, %v3298_v29  ;;  %v3674_v42 = vadd.f32 %v3673_v37, %v3672_v2  ;;  %v2174_v44 = vpop.f32.mrf.mxu0  ;;  %v2742_v43 = vpop.f32.mrf.mxu1 }
 0x2b6   :  { %v2871_v46 = vmax.f32 %v2174_v44, 0.0  ;;  %v3013_v38 = vmax.f32 %v2742_v43, 0.0 }
 0x2b7   :  { %v2176_v59 = vpop.f32.mrf.mxu0  ;;  %v2744_v16 = vpop.f32.mrf.mxu1  ;;  %v3762_v48 = vsel %vm3739_vm6, %v3669_v36, %v6483_v8 }
 0x2b8   :  { %v3301_v50 = vsel %vm3018_vm0, %v2871_v46, 0.0  ;;  %v3675_v41 = vsel %vm3018_vm0, %v3013_v38, 0.0 }
 0x2b9   :  { %v3302_v53 = vadd.f32 %v3301_v50, %v3300_v24  ;;  %v3676_v51 = vadd.f32 %v3675_v41, %v3674_v42  ;;  %v2179_v52 = vpop.f32.mrf.mxu0  ;;  %v2747_v47 = vpop.f32.mrf.mxu1 }
 0x2ba   :  { %v2872_v55 = vmax.f32 %v2179_v52, 0.0  ;;  %v3014_v56 = vmax.f32 %v2747_v47, 0.0 }
 0x2bb   :  { %v2181_v58 = vpop.f32.mrf.mxu0  ;;  %v2749_v60 = vpop.f32.mrf.mxu1 }
 0x2bc   :  { %v3303_v63 = vsel %vm3018_vm0, %v2872_v55, 0.0  ;;  %v3677_v0 = vsel %vm3018_vm0, %v3014_v56, 0.0 }
 0x2bd   :  { %v3304_v1 = vadd.f32 %v3303_v63, %v3302_v53  ;;  %v3678_v4 = vadd.f32 %v3677_v0, %v3676_v51  ;;  %v2182_v61 = vpop.f32.mrf.mxu0  ;;  %v2750_v8 = vpop.f32.mrf.mxu1 }
 0x2be   :  { %v2873_v5 = vmax.f32 %v2182_v61, 0.0  ;;  %v3015_v10 = vmax.f32 %v2750_v8, 0.0 }
 0x2bf   :  { %v2184_v9 = vpop.f32.mrf.mxu0  ;;  %v2752_v31 = vpop.f32.mrf.mxu1 }
 0x2c0   :  { %v3305_v7 = vsel %vm3018_vm0, %v2873_v5, 0.0  ;;  %v3679_v11 = vsel %vm3018_vm0, %v3015_v10, 0.0 }
 0x2c1   :  { %v3306_v6 = vadd.f32 %v3305_v7, %v3304_v1  ;;  %v3680_v12 = vadd.f32 %v3679_v11, %v3678_v4  ;;  %v2187_v13 = vpop.f32.mrf.mxu0  ;;  %v2755_v14 = vpop.f32.mrf.mxu1 }
 0x2c2   :  { %v3016_v18 = vmax.f32 %v2755_v14, 0.0  ;;  %v2874_v0 = vmax.f32 %v2187_v13, 0.0 }
 0x2c3   :  { %v3307_v20 = vrot.slane %v3306_v6, 4  ;;  %v2189_v21 = vpop.f32.mrf.mxu0  ;;  %v2757_v23 = vpop.f32.mrf.mxu1 }
 0x2c4   :  { %v3681_v28 = vsel %vm3018_vm0, %v3016_v18, 0.0  ;;  %v3313_v5 = vsel %vm3018_vm0, %v2874_v0, 0.0 }
 0x2c5   :  { %v3308_v26 = vadd.f32 %v3307_v20, %v3306_v6  ;;  %v3682_v27 = vadd.f32 %v3681_v28, %v3680_v12  ;;  %v2190_v29 = vpop.f32.mrf.mxu0  ;;  %v2758_v2 = vpop.f32.mrf.mxu1 }
 0x2c6   :  { %v3017_v30 = vmax.f32 %v2758_v2, 0.0  ;;  %v2875_v60 = vmax.f32 %v2190_v29, 0.0 }
 0x2c7   :  { %v3309_v32 = vrot.slane %v3308_v26, 2  ;;  %v2192_v54 = vpop.f32.mrf.mxu0  ;;  %v2760_v17 = vpop.f32.mrf.mxu1 }
 0x2c8   :  { %v3683_v33 = vsel %vm3018_vm0, %v3017_v30, 0.0  ;;  %v3314_v4 = vsel %vm3018_vm0, %v2875_v60, 0.0 }
 0x2c9   :  { %v3310_v34 = vadd.f32 %v3309_v32, %v3308_v26  ;;  %v3684_v25 = vadd.f32 %v3683_v33, %v3682_v27  ;;  %v2195_v39 = vpop.f32.mrf.mxu0 }
 0x2cb   :  { %v3311_v37 = vrot.slane %v3310_v34, 1  ;;  %v3685_v36 = vrot.slane %v3684_v25, 4  ;;  %v2197_v24 = vpop.f32.mrf.mxu0 }
 0x2cd   :  { %v3312_v42 = vadd.f32 %v3311_v37, %v3310_v34  ;;  %v3686_v44 = vadd.f32 %v3685_v36, %v3684_v25  ;;  %v2198_v43 = vpop.f32.mrf.mxu0 }
 0x2ce   :  { %v2877_v61 = vmax.f32 %v2198_v43, 0.0 }
 0x2cf   :  { %v6520_v45 = vsel %vm3737_vm5, %v3312_v42, %v6499_v19  ;;  %v3687_v46 = vrot.slane %v3686_v44, 2  ;;  %v2200_v38 = vpop.f32.mrf.mxu0  ;;  %v2876_v19 = vmax.f32 %v2195_v39, 0.0 }
 0x2d0   :  { %v3318_v7 = vsel %vm3018_vm0, %v2877_v61, 0.0 }
 0x2d1   :  { %v3688_v59 = vadd.f32 %v3687_v46, %v3686_v44  ;;  %v2203_v16 = vpop.f32.mrf.mxu0  ;;  %v3316_v10 = vsel %vm3018_vm0, %v2876_v19, 0.0 }
 0x2d2   :  { %v2878_v9 = vmax.f32 %v2203_v16, 0.0 }
 0x2d3   :  { %v3689_v50 = vrot.slane %v3688_v59, 1  ;;  %v2205_v41 = vpop.f32.mrf.mxu0 }
 0x2d4   :  { %v3320_v13 = vsel %vm3018_vm0, %v2878_v9, 0.0 }
 0x2d5   :  { %v3690_v53 = vadd.f32 %v3689_v50, %v3688_v59  ;;  %v2206_v51 = vpop.f32.mrf.mxu0 }
 0x2d6   :  { %v2879_v11 = vmax.f32 %v2206_v51, 0.0 }
 0x2d7   :  { %v2208_v52 = vpop.f32.mrf.mxu0  ;;  %v6523_v47 = vsel %vm3741_vm7, %v3690_v53, %v3762_v48  ;;  %v3315_v48 = vadd.f32 %v3314_v4, %v3313_v5 }
 0x2d8   :  { %v3322_v21 = vsel %vm3018_vm0, %v2879_v11, 0.0 }
 0x2d9   :  { %v2211_v55 = vpop.f32.mrf.mxu0  ;;  %v3317_v12 = vadd.f32 %v3316_v10, %v3315_v48 }
 0x2da   :  { %v2880_v14 = vmax.f32 %v2211_v55, 0.0 }
 0x2db   :  { %v2213_v56 = vpop.f32.mrf.mxu0  ;;  %v3319_v20 = vadd.f32 %v3318_v7, %v3317_v12 }
 0x2dc   :  { %v3324_v27 = vsel %vm3018_vm0, %v2880_v14, 0.0 }
 0x2dd   :  { %v2214_v58 = vpop.f32.mrf.mxu0  ;;  %v3321_v26 = vadd.f32 %v3320_v13, %v3319_v20 }
 0x2de   :  { %v2881_v23 = vmax.f32 %v2214_v58, 0.0 }
 0x2df   :  { %v2216_v63 = vpop.f32.mrf.mxu0  ;;  %v3323_v2 = vadd.f32 %v3322_v21, %v3321_v26 }
 0x2e0   :  { %v3326_v32 = vsel %vm3018_vm0, %v2881_v23, 0.0 }
 0x2e1   :  { %v2219_v1 = vpop.f32.mrf.mxu0  ;;  %v3325_v17 = vadd.f32 %v3324_v27, %v3323_v2 }
 0x2e2   :  { %v2882_v33 = vmax.f32 %v2219_v1, 0.0 }
 0x2e3   :  { %v2221_v8 = vpop.f32.mrf.mxu0  ;;  %v3327_v39 = vadd.f32 %v3326_v32, %v3325_v17 }
 0x2e4   :  { %v3334_v42 = vsel %vm3018_vm0, %v2882_v33, 0.0 }
 0x2e5   :  { %v2222_v31 = vpop.f32.mrf.mxu0  ;;  %v3328_v59 = vrot.slane %v3327_v39, 4 }
 0x2e6   :  { %v2883_v30 = vmax.f32 %v2222_v31, 0.0 }
 0x2e7   :  { %v2224_v6 = vpop.f32.mrf.mxu0  ;;  %v3329_v56 = vadd.f32 %v3328_v59, %v3327_v39 }
 0x2e8   :  { %v3335_v37 = vsel %vm3018_vm0, %v2883_v30, 0.0  ;;  %v5213_v30 = vld [vmem:[%s6748_s5 + $0x38] sm:$0xff]  }
 0x2e9   :  { %v2227_v18 = vpop.f32.mrf.mxu0  ;;  %v3336_v46 = vadd.f32 %v3335_v37, %v3334_v42  ;;  %v3330_v61 = vrot.slane %v3329_v56, 2 }
 0x2ea   :  { %v2884_v34 = vmax.f32 %v2227_v18, 0.0 }
 0x2eb   :  { %v2229_v28 = vpop.f32.mrf.mxu0  ;;  %v3331_v7 = vadd.f32 %v3330_v61, %v3329_v56  ;;  %v5223_v56 = vld [vmem:[%s6748_s5 + $0x10] sm:$0xff]  }
 0x2ec   :  { %v3337_v44 = vsel %vm3018_vm0, %v2884_v34, 0.0 }
 0x2ed   :  { %v2230_v29 = vpop.f32.mrf.mxu0  ;;  %v3338_v41 = vadd.f32 %v3337_v44, %v3336_v46  ;;  %v3332_v14 = vrot.slane %v3331_v7, 1  ;;  %v5220_v46 = vld [vmem:[%s6748_s5 + $0x58] sm:$0xff]  }
 0x2ee   :  { %v2885_v36 = vmax.f32 %v2230_v29, 0.0 }
 0x2ef   :  { %v2232_v54 = vpop.f32.mrf.mxu0  ;;  %v3333_v28 = vadd.f32 %v3332_v14, %v3331_v7  ;;  %v5227_v14 = vld [vmem:[%s6748_s5] sm:$0xff]  }
 0x2f0   :  { %v3339_v16 = vsel %vm3018_vm0, %v2885_v36, 0.0  ;;  %v5214_v54 = vld [vmem:[%s6748_s5 + $0x70] sm:$0xff]   ;;  %v5217_v36 = vld [vmem:[%s6748_s5 + $0x28] sm:$0xff]  }
 0x2f1   :  { %v2235_v25 = vpop.f32.mrf.mxu0  ;;  %v3340_v52 = vadd.f32 %v3339_v16, %v3338_v41  ;;  %v3748_v32 = vsel %vm3739_vm6, %v3333_v28, %v6520_v45  ;;  %v5216_v45 = vld [vmem:[%s6748_s5 + $0x68] sm:$0xff]   ;;  %v5221_v16 = vld [vmem:[%s6748_s5 + $0x18] sm:$0xff]   ;;  %v5222_v41 = vld [vmem:[%s6748_s5 + $0x50] sm:$0xff]  }
 0x2f2   :  { %v2886_v43 = vmax.f32 %v2235_v25, 0.0  ;;  %v5215_v25 = vld [vmem:[%s6748_s5 + $0x30] sm:$0xff]  }
 0x2f3   :  { %v2237_v24 = vpop.f32.mrf.mxu0 }
 0x2f4   :  { %v3341_v51 = vsel %vm3018_vm0, %v2886_v43, 0.0  ;;  %v5218_v24 = vld [vmem:[%s6748_s5 + $0x60] sm:$0xff]  }
 0x2f5   :  { %v2238_v38 = vpop.f32.mrf.mxu0  ;;  %v3342_v63 = vadd.f32 %v3341_v51, %v3340_v52  ;;  %v5219_v43 = vld [vmem:[%s6748_s5 + $0x20] sm:$0xff]  }
 0x2f6   :  { %v2887_v50 = vmax.f32 %v2238_v38, 0.0 }
 0x2f7   :  { %v2240_v53 = vpop.f32.mrf.mxu0 }
 0x2f8   :  { %v3343_v58 = vsel %vm3018_vm0, %v2887_v50, 0.0 }
 0x2f9   :  { %v2243_v55 = vpop.f32.mrf.mxu0  ;;  %v3344_v1 = vadd.f32 %v3343_v58, %v3342_v63  ;;  %v5224_v63 = vld [vmem:[%s6748_s5 + $0x48] sm:$0xff]  }
 0x2fa   :  { %v2888_v60 = vmax.f32 %v2243_v55, 0.0 }
 0x2fb   :  { %v2245_v0 = vpop.f32.mrf.mxu0 }
 0x2fc   :  { %v3345_v19 = vsel %vm3018_vm0, %v2888_v60, 0.0 }
 0x2fd   :  { %v2246_v4 = vpop.f32.mrf.mxu0  ;;  %v3346_v5 = vadd.f32 %v3345_v19, %v3344_v1 }
 0x2fe   :  { %v2889_v8 = vmax.f32 %v2246_v4, 0.0 }
 0x2ff   :  { %v2248_v10 = vpop.f32.mrf.mxu0 }
 0x300   :  { %v3347_v9 = vsel %vm3018_vm0, %v2889_v8, 0.0 }
 0x301   :  { %v3348_v31 = vadd.f32 %v3347_v9, %v3346_v5  ;;  %v2251_v48 = vpop.f32.mrf.mxu0  ;;  %v5225_v5 = vld [vmem:[%s6748_s5 + $0x8] sm:$0xff]  }
 0x302   :  { %v2890_v51 = vmax.f32 %v2251_v48, 0.0 }
 0x303   :  { %v3349_v11 = vrot.slane %v3348_v31, 4  ;;  %v2253_v6 = vpop.f32.mrf.mxu0 }
 0x304   :  { %v3355_v19 = vsel %vm3018_vm0, %v2890_v51, 0.0  ;;  %v3433_v51 = vrot.slane %v5849_v22, 4 }
 0x305   :  { %v3350_v12 = vadd.f32 %v3349_v11, %v3348_v31  ;;  %v2254_v13 = vpop.f32.mrf.mxu0  ;;  %v5226_v31 = vld [vmem:[%s6748_s5 + $0x40] sm:$0xff]  }
 0x306   :  { %v2891_v50 = vmax.f32 %v2254_v13, 0.0 }
 0x307   :  { %v3351_v18 = vrot.slane %v3350_v12, 2  ;;  %v2256_v20 = vpop.f32.mrf.mxu0 }
 0x308   :  { %v3356_v58 = vsel %vm3018_vm0, %v2891_v50, 0.0  ;;  %v2904_v50 = vmax.f32 %v5694_v57, 0.0 }
 0x309   :  { %v3352_v21 = vadd.f32 %v3351_v18, %v3350_v12  ;;  %v2259_v23 = vpop.f32.mrf.mxu0  ;;  %v3357_v61 = vadd.f32 %v3356_v58, %v3355_v19  ;;  %v3454_v58 = vrot.slane %v5918_v3, 4 }
 0x30a   :  { %v2892_v52 = vmax.f32 %v2259_v23, 0.0 }
 0x30b   :  { %v3353_v26 = vrot.slane %v3352_v21, 1  ;;  %v2261_v27 = vpop.f32.mrf.mxu0 }
 0x30c   :  { %v3358_v1 = vsel %vm3018_vm0, %v2892_v52, 0.0 }
 0x30d   :  { %v3354_v29 = vadd.f32 %v3353_v26, %v3352_v21  ;;  %v2262_v2 = vpop.f32.mrf.mxu0  ;;  %v3359_v48 = vadd.f32 %v3358_v1, %v3357_v61  ;;  %v3387_v1 = vsel %vm3018_vm0, %v2904_v50, 0.0  ;;  %v3434_v61 = vadd.f32 %v3433_v51, %v5849_v22  ;;  %v5228_v51 = vld [vmem:[%s6749_s4] ss:$8 sps:$4 sm:$0xff]  }
 0x30e   :  { %v2893_v60 = vmax.f32 %v2262_v2, 0.0 }
 0x30f   :  { %v2264_v17 = vpop.f32.mrf.mxu0  ;;  %v3749_v33 = vsel %vm3741_vm7, %v3354_v29, %v3748_v32 }
 0x310   :  { %4753 = vmatmul.mubr.msk.f32.vlgmr.msra.gmra.mxu1 %vm3018_vm0, %v3749_v33  ;;  %v3360_v10 = vsel %vm3018_vm0, %v2893_v60, 0.0 }
 0x311   :  { %v2267_v34 = vpop.f32.mrf.mxu0  ;;  %4664 = vmatpush3.bf16.msra.mxu1 %v5213_v30  ;;  %v3361_v12 = vadd.f32 %v3360_v10, %v3359_v48  ;;  %v3455_v10 = vadd.f32 %v3454_v58, %v5918_v3  ;;  %v5239_v58 = vld [vmem:[%s6749_s4 + $0x34] ss:$8 sps:$4 sm:$0xff]  }
 0x312   :  { %4665 = vmatprep.subr.bf16.mxu1 %v5214_v54  ;;  %v2894_v4 = vmax.f32 %v2267_v34, 0.0 }
 0x313   :  { %v2269_v39 = vpop.f32.mrf.mxu0 }
 0x314   :  { %v3362_v11 = vsel %vm3018_vm0, %v2894_v4, 0.0  ;;  %v3496_v4 = vrot.slane %v6064_v35, 4 }
 0x315   :  { %v2270_v37 = vpop.f32.mrf.mxu0  ;;  %4666 = vmatpush3.bf16.msra.mxu1 %v5215_v25  ;;  %v3363_v23 = vadd.f32 %v3362_v11, %v3361_v12 }
 0x316   :  { %4667 = vmatprep.subr.bf16.mxu1 %v5216_v45  ;;  %v2895_v9 = vmax.f32 %v2270_v37, 0.0  ;;  %v3497_v11 = vadd.f32 %v3496_v4, %v6064_v35  ;;  %v5246_v4 = vld [vmem:[%s6749_s4 + $0x60] ss:$8 sps:$4 sm:$0xff]  }
 0x317   :  { %v2272_v42 = vpop.f32.mrf.mxu0 }
 0x318   :  { %v3364_v18 = vsel %vm3018_vm0, %v2895_v9, 0.0 }
 0x319   :  { %v2275_v44 = vpop.f32.mrf.mxu0  ;;  %4668 = vmatpush3.bf16.msra.mxu1 %v5217_v36  ;;  %v3365_v2 = vadd.f32 %v3364_v18, %v3363_v23 }
 0x31a   :  { %4669 = vmatprep.subr.bf16.mxu1 %v5218_v24  ;;  %v2896_v6 = vmax.f32 %v2275_v44, 0.0 }
 0x31b   :  { %v2277_v38 = vpop.f32.mrf.mxu0 }
 0x31c   :  { %v3366_v26 = vsel %vm3018_vm0, %v2896_v6, 0.0  ;;  %v3435_v6 = vrot.slane %v3434_v61, 2 }
 0x31d   :  { %v2278_v59 = vpop.f32.mrf.mxu0  ;;  %4670 = vmatpush3.bf16.msra.mxu1 %v5219_v43  ;;  %v3367_v33 = vadd.f32 %v3366_v26, %v3365_v2 }
 0x31e   :  { %4671 = vmatprep.subr.bf16.mxu1 %v5220_v46  ;;  %v2897_v20 = vmax.f32 %v2278_v59, 0.0  ;;  %v3436_v23 = vadd.f32 %v3435_v6, %v3434_v61  ;;  %v5251_v61 = vld [vmem:[%s6749_s4 + $0x74] ss:$8 sps:$4 sm:$0xff]  }
 0x31f   :  { %v2280_v53 = vpop.f32.mrf.mxu0 }
 0x320   :  { %v3368_v32 = vsel %vm3018_vm0, %v2897_v20, 0.0  ;;  %v3437_v35 = vrot.slane %v3436_v23, 1 }
 0x321   :  { %v2283_v55 = vpop.f32.mrf.mxu0  ;;  %4672 = vmatpush3.bf16.msra.mxu1 %v5221_v16  ;;  %v3369_v39 = vadd.f32 %v3368_v32, %v3367_v33 }
 0x322   :  { %4673 = vmatprep.subr.bf16.mxu1 %v5222_v41  ;;  %v2898_v27 = vmax.f32 %v2283_v55, 0.0  ;;  %v3412_v41 = vrot.slane %v5778_v40, 4 }
 0x323   :  { %v2285_v0 = vpop.f32.mrf.mxu0  ;;  %v3370_v38 = vrot.slane %v3369_v39, 4 }
 0x324   :  { %v3376_v25 = vsel %vm3018_vm0, %v2898_v27, 0.0  ;;  %v3413_v57 = vadd.f32 %v3412_v41, %v5778_v40  ;;  %v5230_v41 = vld [vmem:[%s6749_s4 + $0x4] ss:$8 sps:$4 sm:$0xff]  }
 0x325   :  { %v2286_v8 = vpop.f32.mrf.mxu0  ;;  %4674 = vmatpush3.bf16.msra.mxu1 %v5223_v56  ;;  %v2905_v56 = vmax.f32 %v5696_v62, 0.0  ;;  %v3371_v0 = vadd.f32 %v3370_v38, %v3369_v39  ;;  %v3438_v39 = vadd.f32 %v3437_v35, %v3436_v23 }
 0x326   :  { %4675 = vmatprep.subr.bf16.mxu1 %v5224_v63  ;;  %v2899_v21 = vmax.f32 %v2286_v8, 0.0  ;;  %v3475_v63 = vrot.slane %v5991_v49, 4  ;;  %v3517_v8 = vrot.slane %v6136_v15, 4 }
 0x327   :  { %v2288_v7 = vpop.f32.mrf.mxu0  ;;  %v3389_v62 = vsel %vm3018_vm0, %v2905_v56, 0.0  ;;  %v5236_v56 = vld [vmem:[%s6749_s4 + $0x24] ss:$8 sps:$4 sm:$0xff]  }
 0x328   :  { %v3377_v54 = vsel %vm3018_vm0, %v2899_v21, 0.0  ;;  %v3476_v9 = vadd.f32 %v3475_v63, %v5991_v49  ;;  %v3414_v7 = vrot.slane %v3413_v57, 2  ;;  %v3518_v40 = vadd.f32 %v3517_v8, %v6136_v15  ;;  %v5242_v63 = vld [vmem:[%s6749_s4 + $0x44] ss:$8 sps:$4 sm:$0xff]   ;;  %v5249_v8 = vld [vmem:[%s6749_s4 + $0x70] ss:$8 sps:$4 sm:$0xff]  }
 0x329   :  { %v2291_v13 = vpop.f32.mrf.mxu0  ;;  %4676 = vmatpush3.bf16.msra.mxu1 %v5225_v5  ;;  %v3378_v37 = vadd.f32 %v3377_v54, %v3376_v25  ;;  %v3498_v21 = vrot.slane %v3497_v11, 2 }
 0x32a   :  { %4677 = vmatprep.subr.bf16.mxu1 %v5226_v31  ;;  %v2900_v29 = vmax.f32 %v2291_v13, 0.0  ;;  %v3372_v31 = vrot.slane %v3371_v0, 2  ;;  %v3456_v13 = vrot.slane %v3455_v10, 2  ;;  %v3477_v22 = vrot.slane %v3476_v9, 2 }
 0x32b   :  { %v2293_v28 = vpop.f32.mrf.mxu0  ;;  %v3415_v20 = vadd.f32 %v3414_v7, %v3413_v57  ;;  %v5248_v57 = vld [vmem:[%s6749_s4 + $0x64] ss:$8 sps:$4 sm:$0xff]   ;;  %v3912_v7 = vld [vmem:[%s6750_s6 + $0x18] sm:$0xff] }
 0x32c   :  { %v3379_v45 = vsel %vm3018_vm0, %v2900_v29, 0.0  ;;  %v3519_v28 = vrot.slane %v3518_v40, 2  ;;  %v3457_v26 = vadd.f32 %v3456_v13, %v3455_v10  ;;  %v3478_v49 = vadd.f32 %v3477_v22, %v3476_v9  ;;  %v3915_v10 = vld [vmem:[%s6750_s6 + $0x30] sm:$0xff]  ;;  %v3914_v9 = vld [vmem:[%s6750_s6 + $0x28] sm:$0xff] }
 0x32d   :  { %v2294_v30 = vpop.f32.mrf.mxu0  ;;  %4678 = vmatpush3.bf16.msra.mxu1 %v5227_v14  ;;  %v3380_v44 = vadd.f32 %v3379_v45, %v3378_v37  ;;  %v3373_v14 = vadd.f32 %v3372_v31, %v3371_v0  ;;  %v3416_v2 = vrot.slane %v3415_v20, 1  ;;  %v5240_v0 = vld [vmem:[%s6749_s4 + $0x40] ss:$8 sps:$4 sm:$0xff]   ;;  %v3911_v13 = vld [vmem:[%s6750_s6 + $0x10] sm:$0xff] }
 0x32e   :  { %v2901_v17 = vmax.f32 %v2294_v30, 0.0  ;;  %v3499_v30 = vadd.f32 %v3498_v21, %v3497_v11  ;;  %v3520_v32 = vadd.f32 %v3519_v28, %v3518_v40  ;;  %v3458_v15 = vrot.slane %v3457_v26, 1  ;;  %v3913_v31 = vld [vmem:[%s6750_s6 + $0x20] sm:$0xff]  ;;  %v3910_v22 = vld [vmem:[%s6750_s6 + $0x8] sm:$0xff] }
 0x32f   :  { %v2296_v34 = vpop.f32.mrf.mxu0  ;;  %v3374_v27 = vrot.slane %v3373_v14, 1  ;;  %v3417_v25 = vadd.f32 %v3416_v2, %v3415_v20 }
 0x330   :  { %v3381_v24 = vsel %vm3018_vm0, %v2901_v17, 0.0  ;;  %v3479_v17 = vrot.slane %v3478_v49, 1  ;;  %v3500_v45 = vrot.slane %v3499_v30, 1  ;;  %v3521_v37 = vrot.slane %v3520_v32, 1 }
 0x331   :  { %v2299_v36 = vpop.f32.mrf.mxu0  ;;  %v3382_v59 = vadd.f32 %v3381_v24, %v3380_v44  ;;  %v3375_v33 = vadd.f32 %v3374_v27, %v3373_v14  ;;  %v3459_v24 = vadd.f32 %v3458_v15, %v3457_v26  ;;  %v3909_v14 = vld [vmem:[%s6750_s6] sm:$0xff] }
 0x332   :  { %v2902_v42 = vmax.f32 %v2299_v36, 0.0  ;;  %v3480_v44 = vadd.f32 %v3479_v17, %v3478_v49 }
 0x333   :  { %v2301_v43 = vpop.f32.mrf.mxu0 }
 0x334   :  { %v3383_v46 = vsel %vm3018_vm0, %v2902_v42, 0.0 }
 0x335   :  { %v2302_v16 = vpop.f32.mrf.mxu0  ;;  %v3384_v52 = vadd.f32 %v3383_v46, %v3382_v59  ;;  %v3501_v46 = vadd.f32 %v3500_v45, %v3499_v30  ;;  %v3522_v59 = vadd.f32 %v3521_v37, %v3520_v32 }
 0x336   :  { %v2903_v53 = vmax.f32 %v2302_v16, 0.0 }
 0x337   :  { %v2304_v55 = vpop.f32.mrf.mxu0 }
 0x338   :  { %v3385_v60 = vsel %vm3018_vm0, %v2903_v53, 0.0  ;;  %v5231_v55 = vld [vmem:[%s6749_s4 + $0x10] ss:$8 sps:$4 sm:$0xff]  }
 0x339   :  { %v3386_v19 = vadd.f32 %v3385_v60, %v3384_v52  ;;  %v5233_v52 = vld [vmem:[%s6749_s4 + $0x14] ss:$8 sps:$4 sm:$0xff]   ;;  %v5237_v60 = vld [vmem:[%s6749_s4 + $0x30] ss:$8 sps:$4 sm:$0xff]  }
 0x33b   :  { %v3388_v5 = vadd.f32 %v3387_v1, %v3386_v19  ;;  %v5245_v19 = vld [vmem:[%s6749_s4 + $0x54] ss:$8 sps:$4 sm:$0xff]   ;;  %v5243_v1 = vld [vmem:[%s6749_s4 + $0x50] ss:$8 sps:$4 sm:$0xff]  }
 0x33d   :  { %v3390_v48 = vadd.f32 %v3389_v62, %v3388_v5  ;;  %v5253_v5 = vmov 0.0   ;;  %v3916_v62 = vld [vmem:[%s6750_s6 + $0x38] sm:$0xff] }
 0x33e   :  { %4758 = vmatprep.subr.mxu1 %v5253_v5 }
 0x33f   :  { %v3391_v12 = vrot.slane %v3390_v48, 4 }
 0x341   :  { %v3392_v18 = vadd.f32 %v3391_v12, %v3390_v48  ;;  %v4612_v48 = vld [vmem:[%s6751_s3] ss:$0 sm:$0xff] }
 0x343   :  { %v3393_v3 = vrot.slane %v3392_v18, 2 }
 0x345   :  { %v3394_v29 = vadd.f32 %v3393_v3, %v3392_v18 }
 0x347   :  { %v3395_v54 = vrot.slane %v3394_v29, 1 }
 0x349   :  { %v3396_v34 = vadd.f32 %v3395_v54, %v3394_v29 }
 0x34b   :  { %v3750_v36 = vsel %vm3729_vm1, %v3396_v34, %v3375_v33 }
 0x34c   :  { %v3751_v42 = vsel %vm3731_vm2, %v3417_v25, %v3750_v36 }
 0x34d   :  { %v3752_v43 = vsel %vm3733_vm3, %v3438_v39, %v3751_v42 }
 0x34e   :  { %v3753_v38 = vsel %vm3735_vm4, %v3459_v24, %v3752_v43 }
 0x34f   :  { %v3754_v16 = vsel %vm3737_vm5, %v3480_v44, %v3753_v38 }
 0x350   :  { %v3755_v50 = vsel %vm3739_vm6, %v3501_v46, %v3754_v16 }
 0x351   :  { %v3756_v53 = vsel %vm3741_vm7, %v3522_v59, %v3755_v50 }
 0x352   :  { %4755 = vmatprep.mubr.msk.f32.mxu1 %vm3018_vm0, %v3756_v53 }
 0x353   :  { %4756 = vmatmul.mubr.msk.f32.gmra.mxu1 %vm3018_vm0, %v6523_v47  ;;  %v5234_v47 = vld [vmem:[%s6749_s4 + $0x20] ss:$8 sps:$4 sm:$0xff]  }
 0x354   :  { %4126 = vmatprep.mubr.bf16.mxu1 %v5230_v41 }
 0x357   :  { %4127 = vmatmul.mubr.bf16.vlgmr.msra.gmra.mxu1 %v5228_v51 }
 0x358   :  { %4134 = vmatprep.mubr.bf16.mxu1 %v5233_v52  ;;  %4759 = vmatpush3.msra.mxu1 %v3916_v62 }
 0x359   :  { %4760 = vmatprep.subr.mxu1 %v5253_v5 }
 0x35a   :  { %4761 = vmatpush3.msra.mxu1 %v3915_v10 }
 0x35b   :  { %4762 = vmatprep.subr.mxu1 %v5253_v5 }
 0x35c   :  { %4763 = vmatpush3.msra.mxu1 %v3914_v9 }
 0x35d   :  { %4764 = vmatprep.subr.mxu1 %v5253_v5 }
 0x35e   :  { %4765 = vmatpush3.msra.mxu1 %v3913_v31 }
 0x35f   :  { %4135 = vmatmul.mubr.bf16.gmra.mxu1 %v5231_v55  ;;  %4766 = vmatprep.subr.mxu1 %v5253_v5 }
 0x360   :  { %4142 = vmatprep.mubr.bf16.mxu1 %v5236_v56  ;;  %4767 = vmatpush3.msra.mxu1 %v3912_v7 }
 0x361   :  { %4768 = vmatprep.subr.mxu1 %v5253_v5 }
 0x362   :  { %4769 = vmatpush3.msra.mxu1 %v3911_v13 }
 0x363   :  { %4770 = vmatprep.subr.mxu1 %v5253_v5 }
 0x364   :  { %4771 = vmatpush3.msra.mxu1 %v3910_v22 }
 0x365   :  { %4772 = vmatprep.subr.mxu1 %v5253_v5 }
 0x366   :  { %4773 = vmatpush3.msra.mxu1 %v3909_v14 }
 0x367   :  { %4143 = vmatmul.mubr.bf16.gmra.mxu1 %v5234_v47 }
 0x368   :  { %4150 = vmatprep.mubr.bf16.mxu1 %v5239_v58 }
 0x36f   :  { %4151 = vmatmul.mubr.bf16.gmra.mxu1 %v5237_v60 }
 0x370   :  { %4158 = vmatprep.mubr.bf16.mxu1 %v5242_v63 }
 0x377   :  { %4159 = vmatmul.mubr.bf16.gmra.mxu1 %v5240_v0 }
 0x378   :  { %4166 = vmatprep.mubr.bf16.mxu1 %v5245_v19 }
 0x37f   :  { %4167 = vmatmul.mubr.bf16.gmra.mxu1 %v5243_v1 }
 0x380   :  { %4174 = vmatprep.mubr.bf16.mxu1 %v5248_v57 }
 0x387   :  { %4175 = vmatmul.mubr.bf16.gmra.mxu1 %v5246_v4 }
 0x388   :  { %4182 = vmatprep.mubr.bf16.mxu1 %v5251_v61 }
 0x38f   :  { %4183 = vmatmul.mubr.bf16.gmra.mxu1 %v5249_v8 }
 0x390   :  { %4774 = vmatprep.mubr.msk.f32.mxu1 %vm5254_vm8, %v5253_v5 }
 0x3d0   :  { %v4754_v11 = vpop.f32.mrf.mxu1 }
 0x3d1   :  { %v3844_v6 = vadd.f32 %v4754_v11, %v4612_v48 }
 0x3d2   :  { %v3838_v40 = vpop.f32.mrf.mxu1 }
 0x3d3   :  { %3858 = vst.msk [vmem:[%s6752_s8 + $0x8] sm:$0xff] %vm3018_vm0, %v3844_v6  ;;  %v3839_v12 = vadd.f32 %v4612_v48, %v3838_v40 }
 0x3d5   :  { %3857 = vst.msk [vmem:[%s6752_s8] sm:$0xff] %vm3018_vm0, %v3839_v12 }
 0x413   :  { %v4757_v18 = vpop.f32.mrf.mxu1 }
 0x414   :  { %v3854_v20 = vadd.f32 %v4757_v18, %v4612_v48 }
 0x415   :  { %v3848_v21 = vpop.f32.mrf.mxu1 }
 0x416   :  { %3860 = vst.msk [vmem:[%s6752_s8 + $0x18] sm:$0xff] %vm3018_vm0, %v3854_v20  ;;  %v3849_v23 = vadd.f32 %v4612_v48, %v3848_v21 }
 0x417   :  { %v4679_v28 = vpop.f32.mrf.mxu1 }
 0x418   :  { %3859 = vst.msk [vmem:[%s6752_s8 + $0x10] sm:$0xff] %vm3018_vm0, %v3849_v23 }
 0x419   :  { %v4680_v3 = vpop.f32.mrf.mxu1 }
 0x41a   :  { %v4681_v36 = vadd.f32 %v4680_v3, %v4679_v28 }
 0x41b   :  { %v4682_v26 = vpop.f32.mrf.mxu1 }
 0x41c   :  { %v4191_v38 = vmax.f32 %v4681_v36, 0.0 }
 0x41d   :  { %v4683_v49 = vpop.f32.mrf.mxu1 }
 0x41e   :  { %v4684_v39 = vadd.f32 %v4683_v49, %v4682_v26  ;;  %v4207_v55 = vsel %vm3018_vm0, %v4191_v38, 0.0 }
 0x41f   :  { %v4685_v27 = vpop.f32.mrf.mxu1 }
 0x420   :  { %v4192_v44 = vmax.f32 %v4684_v39, 0.0 }
 0x421   :  { %v4686_v29 = vpop.f32.mrf.mxu1 }
 0x422   :  { %v4687_v24 = vadd.f32 %v4686_v29, %v4685_v27  ;;  %v4208_v41 = vsel %vm3018_vm0, %v4192_v44, 0.0 }
 0x423   :  { %v4688_v2 = vpop.f32.mrf.mxu1  ;;  %v4209_v60 = vadd.f32 %v4208_v41, %v4207_v55 }
 0x424   :  { %v4193_v59 = vmax.f32 %v4687_v24, 0.0 }
 0x425   :  { %v4689_v30 = vpop.f32.mrf.mxu1 }
 0x426   :  { %v4690_v43 = vadd.f32 %v4689_v30, %v4688_v2  ;;  %v4210_v56 = vsel %vm3018_vm0, %v4193_v59, 0.0 }
 0x427   :  { %v4691_v35 = vpop.f32.mrf.mxu1  ;;  %v4211_v4 = vadd.f32 %v4210_v56, %v4209_v60 }
 0x428   :  { %v4194_v53 = vmax.f32 %v4690_v43, 0.0 }
 0x429   :  { %v4692_v32 = vpop.f32.mrf.mxu1 }
 0x42a   :  { %v4693_v16 = vadd.f32 %v4692_v32, %v4691_v35  ;;  %v4212_v0 = vsel %vm3018_vm0, %v4194_v53, 0.0 }
 0x42b   :  { %v4694_v54 = vpop.f32.mrf.mxu1  ;;  %v4213_v9 = vadd.f32 %v4212_v0, %v4211_v4  ;;  %v4649_v4 = vld [vmem:[%s6753_s7] ss:$0 sm:$0xff] }
 0x42c   :  { %v4195_v47 = vmax.f32 %v4693_v16, 0.0 }
 0x42d   :  { %v4695_v15 = vpop.f32.mrf.mxu1 }
 0x42e   :  { %v4696_v51 = vadd.f32 %v4695_v15, %v4694_v54  ;;  %v4214_v8 = vsel %vm3018_vm0, %v4195_v47, 0.0 }
 0x42f   :  { %v4697_v17 = vpop.f32.mrf.mxu1  ;;  %v4215_v40 = vadd.f32 %v4214_v8, %v4213_v9 }
 0x430   :  { %v4196_v19 = vmax.f32 %v4696_v51, 0.0 }
 0x431   :  { %v4698_v33 = vpop.f32.mrf.mxu1 }
 0x432   :  { %v4699_v58 = vadd.f32 %v4698_v33, %v4697_v17  ;;  %v4216_v48 = vsel %vm3018_vm0, %v4196_v19, 0.0 }
 0x433   :  { %v4700_v34 = vpop.f32.mrf.mxu1  ;;  %v4217_v20 = vadd.f32 %v4216_v48, %v4215_v40 }
 0x434   :  { %v4197_v5 = vmax.f32 %v4699_v58, 0.0 }
 0x435   :  { %v4701_v25 = vpop.f32.mrf.mxu1 }
 0x436   :  { %v4702_v1 = vadd.f32 %v4701_v25, %v4700_v34  ;;  %v4218_v13 = vsel %vm3018_vm0, %v4197_v5, 0.0 }
 0x437   :  { %v4703_v45 = vpop.f32.mrf.mxu1  ;;  %v4219_v26 = vadd.f32 %v4218_v13, %v4217_v20 }
 0x438   :  { %v4198_v7 = vmax.f32 %v4702_v1, 0.0 }
 0x439   :  { %v4704_v37 = vpop.f32.mrf.mxu1 }
 0x43a   :  { %v4705_v62 = vadd.f32 %v4704_v37, %v4703_v45  ;;  %v4220_v23 = vsel %vm3018_vm0, %v4198_v7, 0.0 }
 0x43b   :  { %v4706_v42 = vpop.f32.mrf.mxu1  ;;  %v4221_v35 = vadd.f32 %v4220_v23, %v4219_v26 }
 0x43c   :  { %v4199_v22 = vmax.f32 %v4705_v62, 0.0 }
 0x43d   :  { %v4707_v46 = vpop.f32.mrf.mxu1  ;;  %v4222_v39 = vrot.slane %v4221_v35, 4 }
 0x43e   :  { %v4708_v57 = vadd.f32 %v4707_v46, %v4706_v42  ;;  %v4228_v27 = vsel %vm3018_vm0, %v4199_v22, 0.0 }
 0x43f   :  { %v4709_v50 = vpop.f32.mrf.mxu1  ;;  %v4223_v59 = vadd.f32 %v4222_v39, %v4221_v35 }
 0x440   :  { %v4200_v11 = vmax.f32 %v4708_v57, 0.0 }
 0x441   :  { %v4710_v52 = vpop.f32.mrf.mxu1  ;;  %v4224_v51 = vrot.slane %v4223_v59, 2 }
 0x442   :  { %v4711_v10 = vadd.f32 %v4710_v52, %v4709_v50  ;;  %v4229_v28 = vsel %vm3018_vm0, %v4200_v11, 0.0 }
 0x443   :  { %v4712_v63 = vpop.f32.mrf.mxu1  ;;  %v4230_v32 = vadd.f32 %v4229_v28, %v4228_v27  ;;  %v4225_v56 = vadd.f32 %v4224_v51, %v4223_v59 }
 0x444   :  { %v4201_v14 = vmax.f32 %v4711_v10, 0.0 }
 0x445   :  { %v4713_v61 = vpop.f32.mrf.mxu1  ;;  %v4226_v60 = vrot.slane %v4225_v56, 1 }
 0x446   :  { %v4714_v6 = vadd.f32 %v4713_v61, %v4712_v63  ;;  %v4231_v29 = vsel %vm3018_vm0, %v4201_v14, 0.0 }
 0x447   :  { %v4715_v31 = vpop.f32.mrf.mxu1  ;;  %v4232_v33 = vadd.f32 %v4231_v29, %v4230_v32  ;;  %v4227_v19 = vadd.f32 %v4226_v60, %v4225_v56 }
 0x448   :  { %v4202_v3 = vmax.f32 %v4714_v6, 0.0 }
 0x449   :  { %v4716_v12 = vpop.f32.mrf.mxu1 }
 0x44a   :  { %v4717_v18 = vadd.f32 %v4716_v12, %v4715_v31  ;;  %v4233_v15 = vsel %vm3018_vm0, %v4202_v3, 0.0 }
 0x44b   :  { %v4718_v21 = vpop.f32.mrf.mxu1  ;;  %v4234_v37 = vadd.f32 %v4233_v15, %v4232_v33 }
 0x44c   :  { %v4203_v2 = vmax.f32 %v4717_v18, 0.0 }
 0x44d   :  { %v4719_v49 = vpop.f32.mrf.mxu1 }
 0x44e   :  { %v4720_v30 = vadd.f32 %v4719_v49, %v4718_v21  ;;  %v4235_v25 = vsel %vm3018_vm0, %v4203_v2, 0.0 }
 0x44f   :  { %v4721_v54 = vpop.f32.mrf.mxu1  ;;  %v4236_v44 = vadd.f32 %v4235_v25, %v4234_v37 }
 0x450   :  { %v4204_v17 = vmax.f32 %v4720_v30, 0.0 }
 0x451   :  { %v4722_v34 = vpop.f32.mrf.mxu1 }
 0x452   :  { %v4723_v45 = vadd.f32 %v4722_v34, %v4721_v54  ;;  %v4237_v24 = vsel %vm3018_vm0, %v4204_v17, 0.0 }
 0x453   :  { %v4724_v36 = vpop.f32.mrf.mxu1  ;;  %v4238_v16 = vadd.f32 %v4237_v24, %v4236_v44 }
 0x454   :  { %v4205_v42 = vmax.f32 %v4723_v45, 0.0 }
 0x455   :  { %v4725_v43 = vpop.f32.mrf.mxu1 }
 0x456   :  { %v4239_v46 = vsel %vm3018_vm0, %v4205_v42, 0.0  ;;  %v4726_v38 = vadd.f32 %v4725_v43, %v4724_v36 }
 0x457   :  { %v4240_v41 = vadd.f32 %v4239_v46, %v4238_v16 }
 0x458   :  { %v4206_v50 = vmax.f32 %v4726_v38, 0.0 }
 0x45a   :  { %v4241_v53 = vsel %vm3018_vm0, %v4206_v50, 0.0 }
 0x45b   :  { %v4242_v52 = vadd.f32 %v4241_v53, %v4240_v41 }
 0x45d   :  { %v4243_v55 = vrot.slane %v4242_v52, 4 }
 0x45f   :  { %v4244_v47 = vadd.f32 %v4243_v55, %v4242_v52 }
 0x461   :  { %v4245_v58 = vrot.slane %v4244_v47, 2 }
 0x463   :  { %v4246_v63 = vadd.f32 %v4245_v58, %v4244_v47 }
 0x465   :  { %v4247_v0 = vrot.slane %v4246_v63, 1 }
 0x467   :  { %v4248_v1 = vadd.f32 %v4247_v0, %v4246_v63 }
 0x469   :  { %v4257_v57 = vsel %vm3729_vm1, %v4248_v1, %v4227_v19 }
 0x46a   :  { %4775 = vmatmul.mubr.msk.f32.vlgmr.msra.gmra.mxu1 %vm3018_vm0, %v4257_v57 }
 0x52a   :  { %v4326_v61 = vpop.f32.mrf.mxu1 }
 0x52b   :  { %v4327_v8 = vadd.f32 %v4649_v4, %v4326_v61 }
 0x52c   :  { %v4776_v5 = vpop.f32.mrf.mxu1 }
 0x52d   :  { %4331 = vst.msk [vmem:[%s6754_s9] sm:$0x3] %vm4330_vm9, %v4327_v8 }

</bundles_post_ra>
